<compile_context>
chip_gen: v7x
topology: tpu7x:2x2x1
jax: 0.10.0
libtpu: 0.0.40
codegen_flags: <defaults>
</compile_context>

<pallas_src>
import functools
import math

import numpy as np
import jax
import jax.numpy as jnp
from jax.experimental import pallas as pl
from jax.experimental.pallas import tpu as pltpu


# Tap offsets (dy, dx), tap-major order matching the packed weights.
_OFFSETS = tuple((dy, dx) for dy in (-1, 0, 1) for dx in (-1, 0, 1))
_NC_OFFSETS = tuple(o for o in _OFFSETS if o != (0, 0))     # 8 non-center taps


def _dag_plan(dag):
    """Static DAG analysis: per source node, conv / identity destinations."""
    num_nodes = len(dag) + 1
    conv_src = {j: [] for j in range(num_nodes)}
    id_src = {j: [] for j in range(num_nodes)}
    n_contrib = {d: 0 for d in range(1, num_nodes)}
    for to in range(len(dag)):
        d = to + 1
        for frm, op in enumerate(dag[to]):
            if op == 2:
                conv_src[frm].append(d)
                n_contrib[d] += 1
            elif op == 1:
                id_src[frm].append(d)
                n_contrib[d] += 1
    return conv_src, id_src, n_contrib


def _build_masks_and_poolw(H, W, HWp, NB):
    """(8, NB*HWp) f32 boundary masks (0 where a tap reads padding / another
    image / spatial pad lanes) and (1, NB*HWp) pool weights (1/HW on real
    positions, 0 on pad lanes)."""
    HW = H * W
    q = np.arange(HWp)
    hh, ww = q // W, q % W
    real = q < HW
    rows = []
    for dy, dx in _NC_OFFSETS:
        valid = real & (hh + dy >= 0) & (hh + dy < H) & (ww + dx >= 0) & (ww + dx < W)
        rows.append(valid.astype(np.float32))
    masks = np.tile(np.stack(rows), (1, NB))                         # (8, NB*HWp)
    pw = np.tile(real.astype(np.float32) / HW, NB)[None, :]          # (1, NB*HWp)
    return masks, pw


# ----------------------------------------------------------------------------
# Fused kernel: stem + DAG + avgpool + readout for NB batch images per step.
# ----------------------------------------------------------------------------

def _fused_cnn_kernel(x_ref, bmask_ref, pw_ref, *args,
                      dag, W, HWp, NB, width, cin_pad):
    """args = (stem_w, stem_b, [grp_w, grp_b]*, ro_w, ro_b, o_ref,
               nodes_scratch, patch_x_scratch, patch_scratch).

    Layouts (per grid step, LANES = NB*HWp):
      x_ref      : (1, cin_pad, LANES)      f32
      bmask_ref  : (8, max_c, LANES)        f32   (pre-broadcast boundary masks)
      pw_ref     : (1, LANES)               f32   (avg-pool weights)
      stem_w     : (width, 9*cin_pad)       bf16
      grp_w      : (k*width, 9*width)       bf16  (conv edges sharing a source)
      biases     : (rows, 1)                f32
      ro_w       : (width, out_dim)         f32
      ro_b       : (1, out_dim)             f32
      o_ref      : (1, NB, out_dim)         f32
    """
    conv_src, id_src, n_contrib = _dag_plan(dag)
    num_nodes = len(dag) + 1
    n_groups = len([j for j in range(num_nodes - 1) if conv_src[j]])

    stem_w_ref, stem_b_ref = args[0], args[1]
    grp_refs = args[2:2 + 2 * n_groups]
    ro_w_ref = args[2 + 2 * n_groups]
    ro_b_ref = args[3 + 2 * n_groups]
    o_ref = args[4 + 2 * n_groups]
    nodes_ref, patch_x_ref, patch_ref = args[5 + 2 * n_groups:]

    LANES = NB * HWp

    def build_patch(a, patch, C):
        """a: (C, LANES) f32 -> 9-tap im2col patch written into bf16 scratch.

        Roll on the XLU, boundary mask in f32 on the VPU, per-tap bf16 cast +
        store: at most one f32 tap is live at a time (no big f32 concat)."""
        nc = 0
        for t, (dy, dx) in enumerate(_OFFSETS):
            s = dy * W + dx                                  # flat spatial offset
            if s == 0:
                v = a                                        # center tap
            else:
                # tap[:, p] = a[:, p + s]; out-of-image reads are masked to 0.
                v = pltpu.roll(a, shift=(-s) % LANES, axis=1)
                v = v * bmask_ref[nc, 0:C, :]                # hoisted broadcast mask
                nc += 1
            patch[t * C:(t + 1) * C, :] = v.astype(jnp.bfloat16)

    def conv_group(patch, w_ref, b_ref):
        out = jnp.dot(w_ref[...], patch[...],
                      preferred_element_type=jnp.float32)    # (rows, LANES) f32
        return jnp.maximum(out + b_ref[...], 0.0)

    # ---- Stem (node 0) ----
    build_patch(x_ref[0], patch_x_ref, cin_pad)
    nodes_ref[0] = conv_group(patch_x_ref, stem_w_ref, stem_b_ref)

    # Destinations with no incoming non-zero edge are all-zero feature maps.
    for d in range(1, num_nodes):
        if n_contrib[d] == 0:
            nodes_ref[d] = jnp.zeros((width, LANES), jnp.float32)

    # ---- DAG, grouped by source node: patch built once per source, all conv
    #      edges sharing a source done as ONE stacked MXU matmul. ----
    seen = {d: 0 for d in range(1, num_nodes)}
    g = 0
    for j in range(num_nodes - 1):
        if conv_src[j]:
            build_patch(nodes_ref[j], patch_ref, width)
            y = conv_group(patch_ref, grp_refs[2 * g], grp_refs[2 * g + 1])
            g += 1
            for idx, d in enumerate(conv_src[j]):
                chunk = y[idx * width:(idx + 1) * width, :]
                if seen[d] == 0:
                    nodes_ref[d] = chunk
                else:
                    nodes_ref[d] += chunk
                seen[d] += 1
        for d in id_src[j]:
            if seen[d] == 0:
                nodes_ref[d] = nodes_ref[j]
            else:
                nodes_ref[d] += nodes_ref[j]
            seen[d] += 1

    # ---- Head: masked per-image avg-pool + linear (lane-dense output) ----
    weighted = nodes_ref[num_nodes - 1] * pw_ref[...]        # (width, LANES) f32
    cols = [jnp.sum(weighted[:, b * HWp:(b + 1) * HWp], axis=1, keepdims=True)
            for b in range(NB)]
    pooled = cols[0] if NB == 1 else jnp.concatenate(cols, axis=1)   # (width, NB)
    logits = jax.lax.dot_general(                            # pooled^T @ W_ro
        pooled, ro_w_ref[...],
        dimension_numbers=(((0,), (0,)), ((), ())),
        preferred_element_type=jnp.float32) + ro_b_ref[...]  # (NB, out_dim)
    o_ref[0] = logits.astype(o_ref.dtype)


# ----------------------------------------------------------------------------
# Wrapper
# ----------------------------------------------------------------------------

def cnn_forward(params, x_nchw, dag, *, batch_block=None):
    """Equivalent of CNN.forward(x) (return_all=False). x_nchw: (N, Cin, H, W).

    batch_block: images folded along the lane axis per grid step.  Default
    targets ~1024 lanes; on v7x pass N//2 (>=2 grid steps) so both TCs work."""
    N, Cin, H, W = x_nchw.shape
    HW = H * W
    HWp = -(-HW // 128) * 128                     # pad spatial to a lane multiple
    width = params["stem_b"].shape[0]
    out_dim = params["readout_b"].shape[0]
    assert width % 8 == 0, "width must be a multiple of 8 (16 preferred for bf16)"

    cin_pad = max(16, -(-Cin // 16) * 16)         # bf16 sublane-tile aligned
    max_c = max(width, cin_pad)

    if batch_block is None:
        target = max(1, 1024 // HWp)
        batch_block = 1
        for nb in range(1, min(N, target) + 1):
            if N % nb == 0:
                batch_block = nb
    NB = batch_block
    assert N % NB == 0, "batch_block must divide the batch size"
    G = N // NB
    LANES = NB * HWp

    # (N, Cin, H, W) -> (G, cin_pad, NB*HWp): channels on sublanes, the NB
    # images of a group contiguous along lanes (each occupying HWp lanes).
    x = x_nchw.reshape(N, Cin, HW).astype(jnp.float32)
    x = jnp.pad(x, ((0, 0), (0, cin_pad - Cin), (0, HWp - HW)))
    x = x.reshape(G, NB, cin_pad, HWp).transpose(0, 2, 1, 3).reshape(G, cin_pad, LANES)

    masks_np, pw_np = _build_masks_and_poolw(H, W, HWp, NB)
    # Hoisted mask broadcast: ship masks already broadcast over channels.
    bmask = jnp.asarray(
        np.ascontiguousarray(np.broadcast_to(masks_np[:, None, :], (8, max_c, LANES))),
        dtype=jnp.float32)
    pw = jnp.asarray(pw_np, dtype=jnp.float32)

    def pack_w(w_hwio, cin_to):
        # (kh, kw, Cin, Cout) -> (Cout, 9*cin_to) bf16, tap-major (ky, kx, ci).
        kh, kw, cin, cout = w_hwio.shape
        if cin_to != cin:
            w_hwio = jnp.pad(w_hwio, ((0, 0), (0, 0), (0, cin_to - cin), (0, 0)))
        w = jnp.transpose(w_hwio, (3, 0, 1, 2)).reshape(cout, kh * kw * cin_to)
        return w.astype(jnp.bfloat16)

    conv_src, _, _ = _dag_plan(dag)
    num_nodes = len(dag) + 1

    inputs = [x, bmask, pw,
              pack_w(params["stem_w"], cin_pad),
              params["stem_b"].reshape(width, 1).astype(jnp.float32)]
    in_specs = [
        pl.BlockSpec((1, cin_pad, LANES), lambda g: (g, 0, 0)),
        pl.BlockSpec((8, max_c, LANES), lambda g: (0, 0, 0)),
        pl.BlockSpec((1, LANES), lambda g: (0, 0)),
        pl.BlockSpec((width, 9 * cin_pad), lambda g: (0, 0)),
        pl.BlockSpec((width, 1), lambda g: (0, 0)),
    ]
    n_conv_edges = 0
    for j in range(num_nodes - 1):
        dests = conv_src[j]
        if not dests:
            continue
        k = len(dests)
        # Stack all conv edges that read source node j along Cout.
        w_stack = jnp.concatenate(
            [pack_w(params["dag_w"][(d - 1, j)], width) for d in dests], axis=0)
        b_stack = jnp.concatenate(
            [params["dag_b"][(d - 1, j)].reshape(width, 1) for d in dests],
            axis=0).astype(jnp.float32)
        inputs += [w_stack, b_stack]
        in_specs += [pl.BlockSpec((k * width, 9 * width), lambda g: (0, 0)),
                     pl.BlockSpec((k * width, 1), lambda g: (0, 0))]
        n_conv_edges += k
    inputs.append(params["readout_w"].astype(jnp.float32))            # (width, out_dim)
    inputs.append(params["readout_b"].reshape(1, out_dim).astype(jnp.float32))
    in_specs.append(pl.BlockSpec((width, out_dim), lambda g: (0, 0)))
    in_specs.append(pl.BlockSpec((1, out_dim), lambda g: (0, 0)))

    flops = 2 * N * HWp * (9 * cin_pad * width + n_conv_edges * 9 * width * width)
    flops += 2 * N * width * out_dim + N * width * HWp
    bytes_accessed = sum(int(np.prod(a.shape)) * a.dtype.itemsize for a in inputs)
    bytes_accessed += N * out_dim * 4

    kernel = functools.partial(_fused_cnn_kernel, dag=dag, W=W, HWp=HWp, NB=NB,
                               width=width, cin_pad=cin_pad)
    out = pl.pallas_call(
        kernel,
        out_shape=jax.ShapeDtypeStruct((G, NB, out_dim), jnp.float32),
        grid_spec=pltpu.PrefetchScalarGridSpec(
            num_scalar_prefetch=0,
            grid=(G,),
            in_specs=in_specs,
            out_specs=pl.BlockSpec((1, NB, out_dim), lambda g: (g, 0, 0)),
            scratch_shapes=[
                pltpu.VMEM((num_nodes, width, LANES), jnp.float32),   # node activations
                pltpu.VMEM((9 * cin_pad, LANES), jnp.bfloat16),       # stem im2col patch
                pltpu.VMEM((9 * width, LANES), jnp.bfloat16),         # DAG im2col patch
            ]),
        compiler_params=pltpu.CompilerParams(
            dimension_semantics=("parallel",)),
        cost_estimate=pl.CostEstimate(flops=flops, transcendentals=0,
                                      bytes_accessed=bytes_accessed),
    )(*inputs)
    return out.reshape(N, out_dim)


# ----------------------------------------------------------------------------
# Parameters
# ----------------------------------------------------------------------------

def init_params(key, dag, in_dim, width, out_dim, kernel_size=3):
    """Deterministic Kaiming-style (fan_out) init.
    # TODO(synk): critic_init_ / get_in_out_degree are not defined in the
    # reference source; degree-scaled init is replaced by plain fan_out init.
    """
    def conv_init(k, cin, cout):
        std = math.sqrt(2.0 / (cout * kernel_size * kernel_size))
        return std * jax.random.normal(
            k, (kernel_size, kernel_size, cin, cout), jnp.float32)

    keys = iter(jax.random.split(key, 64))
    params = {
        "stem_w": conv_init(next(keys), in_dim, width),
        "stem_b": jnp.zeros((width,), jnp.float32),
        "dag_w": {},
        "dag_b": {},
    }
    for _to in range(len(dag)):
        for _from, op in enumerate(dag[_to]):
            if op == 2:
                params["dag_w"][(_to, _from)] = conv_init(next(keys), width, width)
                params["dag_b"][(_to, _from)] = jnp.zeros((width,), jnp.float32)
    lin_std = math.sqrt(2.0 / out_dim)
    params["readout_w"] = lin_std * jax.random.normal(
        next(keys), (width, out_dim), jnp.float32)
    params["readout_b"] = jnp.zeros((out_dim,), jnp.float32)
    return params


# ----------------------------------------------------------------------------
# Pure-JAX reference (numerical sanity check)
# ----------------------------------------------------------------------------

def _conv3x3_ref(x, w, b):
    y = jax.lax.conv_general_dilated(
        x, w, window_strides=(1, 1), padding="SAME",
        dimension_numbers=("NHWC", "HWIO", "NHWC"),
        precision=jax.lax.Precision.HIGHEST)
    return jnp.maximum(y + b, 0.0)


def cnn_forward_ref(params, x_nchw, dag):
    x = jnp.transpose(x_nchw, (0, 2, 3, 1)).astype(jnp.float32)
    x = _conv3x3_ref(x, params["stem_w"], params["stem_b"])
    nodes = [x]
    for _to in range(len(dag)):
        acc = None
        for _from, op in enumerate(dag[_to]):
            if op == 2:
                y = _conv3x3_ref(nodes[_from],
                                 params["dag_w"][(_to, _from)],
                                 params["dag_b"][(_to, _from)])
            elif op == 1:
                y = nodes[_from]
            else:
                y = None
            if y is not None:
                acc = y if acc is None else acc + y
        nodes.append(acc if acc is not None else jnp.zeros_like(nodes[0]))
    pooled = jnp.mean(nodes[-1], axis=(1, 2))
    return pooled @ params["readout_w"] + params["readout_b"]


# ----------------------------------------------------------------------------
# Main
# ----------------------------------------------------------------------------

if __name__ == "__main__":
    # Small shapes consistent with the module: NCHW input (batch=2, in_dim=4, 16x16).
    batch, in_dim, hw = 2, 4, 16
    width, out_dim = 32, 10
    dag = [[2], [1, 2], [0, 1, 2]]     # exercises Block / Identity / Zero ops

    key = jax.random.PRNGKey(0)
    k_x, k_p = jax.random.split(key)
    x = jax.random.normal(k_x, (batch, in_dim, hw, hw), jnp.float32)
    params = init_params(k_p, dag, in_dim, width, out_dim)

    out = jax.jit(functools.partial(cnn_forward, dag=dag))(params, x)
    out = jax.block_until_ready(out)

    ref = jax.block_until_ready(cnn_forward_ref(params, x, dag))

    assert out.shape == (batch, out_dim), out.shape
    assert bool(jnp.all(jnp.isfinite(out)))
    # bf16 MXU operands, f32 accumulation -> a couple of percent tolerance.
    assert bool(jnp.allclose(out, ref, rtol=2e-2, atol=2e-2)), (out, ref)

    print("KERNEL_OK")
</pallas_src>

<mosaic_0001>
module attributes {stable_mosaic.version = 11 : i64} {
  func.func @_fused_cnn_kernel(%arg0: i32, %arg1: memref<1x16x512xf32, #tpu.memory_space<vmem>>, %arg2: memref<8x32x512xf32, #tpu.memory_space<vmem>>, %arg3: memref<1x512xf32, #tpu.memory_space<vmem>>, %arg4: memref<32x144xbf16, #tpu.memory_space<vmem>>, %arg5: memref<32x1xf32, #tpu.memory_space<vmem>>, %arg6: memref<32x288xbf16, #tpu.memory_space<vmem>>, %arg7: memref<32x1xf32, #tpu.memory_space<vmem>>, %arg8: memref<32x288xbf16, #tpu.memory_space<vmem>>, %arg9: memref<32x1xf32, #tpu.memory_space<vmem>>, %arg10: memref<32x288xbf16, #tpu.memory_space<vmem>>, %arg11: memref<32x1xf32, #tpu.memory_space<vmem>>, %arg12: memref<32x10xf32, #tpu.memory_space<vmem>>, %arg13: memref<1x10xf32, #tpu.memory_space<vmem>>, %arg14: memref<1x2x10xf32, #tpu.memory_space<vmem>>, %arg15: memref<4x32x512xf32, #tpu.memory_space<vmem>>, %arg16: memref<144x512xbf16, #tpu.memory_space<vmem>>, %arg17: memref<288x512xbf16, #tpu.memory_space<vmem>>) attributes {dimension_semantics = [#tpu.dimension_semantics<parallel>], iteration_bounds = array<i64: 1>, scalar_prefetch = 0 : i64, scratch_operands = 3 : i64, tpu.core_type = #tpu.core_type<tc>, window_params = [{transform_indices = @transform_0, window_bounds = array<i64: 1, 16, 512>}, {pipeline_mode = #tpu.pipeline_mode<synchronous>, transform_indices = @transform_1, window_bounds = array<i64: 8, 32, 512>}, {pipeline_mode = #tpu.pipeline_mode<synchronous>, transform_indices = @transform_2, window_bounds = array<i64: 1, 512>}, {pipeline_mode = #tpu.pipeline_mode<synchronous>, transform_indices = @transform_3, window_bounds = array<i64: 32, 144>}, {pipeline_mode = #tpu.pipeline_mode<synchronous>, transform_indices = @transform_4, window_bounds = array<i64: 32, 1>}, {pipeline_mode = #tpu.pipeline_mode<synchronous>, transform_indices = @transform_5, window_bounds = array<i64: 32, 288>}, {pipeline_mode = #tpu.pipeline_mode<synchronous>, transform_indices = @transform_6, window_bounds = array<i64: 32, 1>}, {pipeline_mode = #tpu.pipeline_mode<synchronous>, transform_indices = @transform_7, window_bounds = array<i64: 32, 288>}, {pipeline_mode = #tpu.pipeline_mode<synchronous>, transform_indices = @transform_8, window_bounds = array<i64: 32, 1>}, {pipeline_mode = #tpu.pipeline_mode<synchronous>, transform_indices = @transform_9, window_bounds = array<i64: 32, 288>}, {pipeline_mode = #tpu.pipeline_mode<synchronous>, transform_indices = @transform_10, window_bounds = array<i64: 32, 1>}, {pipeline_mode = #tpu.pipeline_mode<synchronous>, transform_indices = @transform_11, window_bounds = array<i64: 32, 10>}, {pipeline_mode = #tpu.pipeline_mode<synchronous>, transform_indices = @transform_12, window_bounds = array<i64: 1, 10>}, {transform_indices = @transform_13, window_bounds = array<i64: 1, 2, 10>}]} {
    %c0 = arith.constant 0 : index
    %c0_0 = arith.constant 0 : index
    %c0_1 = arith.constant 0 : index
    %0 = vector.load %arg1[%c0, %c0_0, %c0_1] : memref<1x16x512xf32, #tpu.memory_space<vmem>>, vector<1x16x512xf32>
    %1 = vector.shape_cast %0 : vector<1x16x512xf32> to vector<16x512xf32>
    %c17_i32 = arith.constant 17 : i32
    %2 = tpu.dynamic_rotate %1 by %c17_i32 dim 1 : vector<16x512xf32>, i32 -> vector<16x512xf32>
    %c0_2 = arith.constant 0 : index
    %c0_3 = arith.constant 0 : index
    %c0_4 = arith.constant 0 : index
    %3 = vector.load %arg2[%c0_2, %c0_3, %c0_4] : memref<8x32x512xf32, #tpu.memory_space<vmem>>, vector<1x16x512xf32>
    %4 = vector.shape_cast %3 : vector<1x16x512xf32> to vector<16x512xf32>
    %5 = arith.mulf %2, %4 : vector<16x512xf32>
    %6 = arith.truncf %5 : vector<16x512xf32> to vector<16x512xbf16>
    %c0_5 = arith.constant 0 : index
    %c0_6 = arith.constant 0 : index
    %7 = vector.load %arg16[%c0_5, %c0_6] : memref<144x512xbf16, #tpu.memory_space<vmem>>, vector<16x512xbf16>
    tpu.vector_store %arg16[%c0_5, %c0_6], %6 {strides = array<i32>} : memref<144x512xbf16, #tpu.memory_space<vmem>>, vector<16x512xbf16>,
    %c16_i32 = arith.constant 16 : i32
    %8 = tpu.dynamic_rotate %1 by %c16_i32 dim 1 : vector<16x512xf32>, i32 -> vector<16x512xf32>
    %c1 = arith.constant 1 : index
    %c0_7 = arith.constant 0 : index
    %c0_8 = arith.constant 0 : index
    %9 = vector.load %arg2[%c1, %c0_7, %c0_8] : memref<8x32x512xf32, #tpu.memory_space<vmem>>, vector<1x16x512xf32>
    %10 = vector.shape_cast %9 : vector<1x16x512xf32> to vector<16x512xf32>
    %11 = arith.mulf %8, %10 : vector<16x512xf32>
    %12 = arith.truncf %11 : vector<16x512xf32> to vector<16x512xbf16>
    %c16 = arith.constant 16 : index
    %c0_9 = arith.constant 0 : index
    %13 = vector.load %arg16[%c16, %c0_9] : memref<144x512xbf16, #tpu.memory_space<vmem>>, vector<16x512xbf16>
    tpu.vector_store %arg16[%c16, %c0_9], %12 {strides = array<i32>} : memref<144x512xbf16, #tpu.memory_space<vmem>>, vector<16x512xbf16>,
    %c15_i32 = arith.constant 15 : i32
    %14 = tpu.dynamic_rotate %1 by %c15_i32 dim 1 : vector<16x512xf32>, i32 -> vector<16x512xf32>
    %c2 = arith.constant 2 : index
    %c0_10 = arith.constant 0 : index
    %c0_11 = arith.constant 0 : index
    %15 = vector.load %arg2[%c2, %c0_10, %c0_11] : memref<8x32x512xf32, #tpu.memory_space<vmem>>, vector<1x16x512xf32>
    %16 = vector.shape_cast %15 : vector<1x16x512xf32> to vector<16x512xf32>
    %17 = arith.mulf %14, %16 : vector<16x512xf32>
    %18 = arith.truncf %17 : vector<16x512xf32> to vector<16x512xbf16>
    %c32 = arith.constant 32 : index
    %c0_12 = arith.constant 0 : index
    %19 = vector.load %arg16[%c32, %c0_12] : memref<144x512xbf16, #tpu.memory_space<vmem>>, vector<16x512xbf16>
    tpu.vector_store %arg16[%c32, %c0_12], %18 {strides = array<i32>} : memref<144x512xbf16, #tpu.memory_space<vmem>>, vector<16x512xbf16>,
    %c1_i32 = arith.constant 1 : i32
    %20 = tpu.dynamic_rotate %1 by %c1_i32 dim 1 : vector<16x512xf32>, i32 -> vector<16x512xf32>
    %c3 = arith.constant 3 : index
    %c0_13 = arith.constant 0 : index
    %c0_14 = arith.constant 0 : index
    %21 = vector.load %arg2[%c3, %c0_13, %c0_14] : memref<8x32x512xf32, #tpu.memory_space<vmem>>, vector<1x16x512xf32>
    %22 = vector.shape_cast %21 : vector<1x16x512xf32> to vector<16x512xf32>
    %23 = arith.mulf %20, %22 : vector<16x512xf32>
    %24 = arith.truncf %23 : vector<16x512xf32> to vector<16x512xbf16>
    %c48 = arith.constant 48 : index
    %c0_15 = arith.constant 0 : index
    %25 = vector.load %arg16[%c48, %c0_15] : memref<144x512xbf16, #tpu.memory_space<vmem>>, vector<16x512xbf16>
    tpu.vector_store %arg16[%c48, %c0_15], %24 {strides = array<i32>} : memref<144x512xbf16, #tpu.memory_space<vmem>>, vector<16x512xbf16>,
    %26 = arith.truncf %1 : vector<16x512xf32> to vector<16x512xbf16>
    %c64 = arith.constant 64 : index
    %c0_16 = arith.constant 0 : index
    %27 = vector.load %arg16[%c64, %c0_16] : memref<144x512xbf16, #tpu.memory_space<vmem>>, vector<16x512xbf16>
    tpu.vector_store %arg16[%c64, %c0_16], %26 {strides = array<i32>} : memref<144x512xbf16, #tpu.memory_space<vmem>>, vector<16x512xbf16>,
    %c511_i32 = arith.constant 511 : i32
    %28 = tpu.dynamic_rotate %1 by %c511_i32 dim 1 : vector<16x512xf32>, i32 -> vector<16x512xf32>
    %c4 = arith.constant 4 : index
    %c0_17 = arith.constant 0 : index
    %c0_18 = arith.constant 0 : index
    %29 = vector.load %arg2[%c4, %c0_17, %c0_18] : memref<8x32x512xf32, #tpu.memory_space<vmem>>, vector<1x16x512xf32>
    %30 = vector.shape_cast %29 : vector<1x16x512xf32> to vector<16x512xf32>
    %31 = arith.mulf %28, %30 : vector<16x512xf32>
    %32 = arith.truncf %31 : vector<16x512xf32> to vector<16x512xbf16>
    %c80 = arith.constant 80 : index
    %c0_19 = arith.constant 0 : index
    %33 = vector.load %arg16[%c80, %c0_19] : memref<144x512xbf16, #tpu.memory_space<vmem>>, vector<16x512xbf16>
    tpu.vector_store %arg16[%c80, %c0_19], %32 {strides = array<i32>} : memref<144x512xbf16, #tpu.memory_space<vmem>>, vector<16x512xbf16>,
    %c497_i32 = arith.constant 497 : i32
    %34 = tpu.dynamic_rotate %1 by %c497_i32 dim 1 : vector<16x512xf32>, i32 -> vector<16x512xf32>
    %c5 = arith.constant 5 : index
    %c0_20 = arith.constant 0 : index
    %c0_21 = arith.constant 0 : index
    %35 = vector.load %arg2[%c5, %c0_20, %c0_21] : memref<8x32x512xf32, #tpu.memory_space<vmem>>, vector<1x16x512xf32>
    %36 = vector.shape_cast %35 : vector<1x16x512xf32> to vector<16x512xf32>
    %37 = arith.mulf %34, %36 : vector<16x512xf32>
    %38 = arith.truncf %37 : vector<16x512xf32> to vector<16x512xbf16>
    %c96 = arith.constant 96 : index
    %c0_22 = arith.constant 0 : index
    %39 = vector.load %arg16[%c96, %c0_22] : memref<144x512xbf16, #tpu.memory_space<vmem>>, vector<16x512xbf16>
    tpu.vector_store %arg16[%c96, %c0_22], %38 {strides = array<i32>} : memref<144x512xbf16, #tpu.memory_space<vmem>>, vector<16x512xbf16>,
    %c496_i32 = arith.constant 496 : i32
    %40 = tpu.dynamic_rotate %1 by %c496_i32 dim 1 : vector<16x512xf32>, i32 -> vector<16x512xf32>
    %c6 = arith.constant 6 : index
    %c0_23 = arith.constant 0 : index
    %c0_24 = arith.constant 0 : index
    %41 = vector.load %arg2[%c6, %c0_23, %c0_24] : memref<8x32x512xf32, #tpu.memory_space<vmem>>, vector<1x16x512xf32>
    %42 = vector.shape_cast %41 : vector<1x16x512xf32> to vector<16x512xf32>
    %43 = arith.mulf %40, %42 : vector<16x512xf32>
    %44 = arith.truncf %43 : vector<16x512xf32> to vector<16x512xbf16>
    %c112 = arith.constant 112 : index
    %c0_25 = arith.constant 0 : index
    %45 = vector.load %arg16[%c112, %c0_25] : memref<144x512xbf16, #tpu.memory_space<vmem>>, vector<16x512xbf16>
    tpu.vector_store %arg16[%c112, %c0_25], %44 {strides = array<i32>} : memref<144x512xbf16, #tpu.memory_space<vmem>>, vector<16x512xbf16>,
    %c495_i32 = arith.constant 495 : i32
    %46 = tpu.dynamic_rotate %1 by %c495_i32 dim 1 : vector<16x512xf32>, i32 -> vector<16x512xf32>
    %c7 = arith.constant 7 : index
    %c0_26 = arith.constant 0 : index
    %c0_27 = arith.constant 0 : index
    %47 = vector.load %arg2[%c7, %c0_26, %c0_27] : memref<8x32x512xf32, #tpu.memory_space<vmem>>, vector<1x16x512xf32>
    %48 = vector.shape_cast %47 : vector<1x16x512xf32> to vector<16x512xf32>
    %49 = arith.mulf %46, %48 : vector<16x512xf32>
    %50 = arith.truncf %49 : vector<16x512xf32> to vector<16x512xbf16>
    %c128 = arith.constant 128 : index
    %c0_28 = arith.constant 0 : index
    %51 = vector.load %arg16[%c128, %c0_28] : memref<144x512xbf16, #tpu.memory_space<vmem>>, vector<16x512xbf16>
    tpu.vector_store %arg16[%c128, %c0_28], %50 {strides = array<i32>} : memref<144x512xbf16, #tpu.memory_space<vmem>>, vector<16x512xbf16>,
    %c0_29 = arith.constant 0 : index
    %c0_30 = arith.constant 0 : index
    %52 = vector.load %arg4[%c0_29, %c0_30] : memref<32x144xbf16, #tpu.memory_space<vmem>>, vector<32x144xbf16>
    %c0_31 = arith.constant 0 : index
    %c0_32 = arith.constant 0 : index
    %53 = vector.load %arg16[%c0_31, %c0_32] : memref<144x512xbf16, #tpu.memory_space<vmem>>, vector<144x512xbf16>
    %cst = arith.constant dense<0.000000e+00> : vector<32x512xf32>
    %54 = tpu.matmul %52, %53, %cst {dimension_numbers = #tpu.dot_dimension_numbers<[1], [0], [0], [1], [0, 0, 1, 1], [], []>} : vector<32x144xbf16>, vector<144x512xbf16>, vector<32x512xf32> -> vector<32x512xf32>
    %c0_33 = arith.constant 0 : index
    %c0_34 = arith.constant 0 : index
    %55 = vector.load %arg5[%c0_33, %c0_34] : memref<32x1xf32, #tpu.memory_space<vmem>>, vector<32x1xf32>
    %56 = vector.broadcast %55 : vector<32x1xf32> to vector<32x512xf32>
    %57 = arith.addf %54, %56 : vector<32x512xf32>
    %cst_35 = arith.constant 0.000000e+00 : f32
    %58 = vector.broadcast %cst_35 : f32 to vector<32x512xf32>
    %59 = arith.maximumf %57, %58 : vector<32x512xf32>
    %c0_36 = arith.constant 0 : index
    %c0_37 = arith.constant 0 : index
    %c0_38 = arith.constant 0 : index
    %60 = vector.load %arg15[%c0_36, %c0_37, %c0_38] : memref<4x32x512xf32, #tpu.memory_space<vmem>>, vector<1x32x512xf32>
    %61 = vector.shape_cast %60 : vector<1x32x512xf32> to vector<32x512xf32>
    %62 = vector.shape_cast %59 : vector<32x512xf32> to vector<1x32x512xf32>
    tpu.vector_store %arg15[%c0_36, %c0_37, %c0_38], %62 {strides = array<i32>} : memref<4x32x512xf32, #tpu.memory_space<vmem>>, vector<1x32x512xf32>,
    %c0_39 = arith.constant 0 : index
    %c0_40 = arith.constant 0 : index
    %c0_41 = arith.constant 0 : index
    %63 = vector.load %arg15[%c0_39, %c0_40, %c0_41] : memref<4x32x512xf32, #tpu.memory_space<vmem>>, vector<1x32x512xf32>
    %64 = vector.shape_cast %63 : vector<1x32x512xf32> to vector<32x512xf32>
    %c17_i32_42 = arith.constant 17 : i32
    %65 = tpu.dynamic_rotate %64 by %c17_i32_42 dim 1 : vector<32x512xf32>, i32 -> vector<32x512xf32>
    %c0_43 = arith.constant 0 : index
    %c0_44 = arith.constant 0 : index
    %c0_45 = arith.constant 0 : index
    %66 = vector.load %arg2[%c0_43, %c0_44, %c0_45] : memref<8x32x512xf32, #tpu.memory_space<vmem>>, vector<1x32x512xf32>
    %67 = vector.shape_cast %66 : vector<1x32x512xf32> to vector<32x512xf32>
    %68 = arith.mulf %65, %67 : vector<32x512xf32>
    %69 = arith.truncf %68 : vector<32x512xf32> to vector<32x512xbf16>
    %c0_46 = arith.constant 0 : index
    %c0_47 = arith.constant 0 : index
    %70 = vector.load %arg17[%c0_46, %c0_47] : memref<288x512xbf16, #tpu.memory_space<vmem>>, vector<32x512xbf16>
    tpu.vector_store %arg17[%c0_46, %c0_47], %69 {strides = array<i32>} : memref<288x512xbf16, #tpu.memory_space<vmem>>, vector<32x512xbf16>,
    %c16_i32_48 = arith.constant 16 : i32
    %71 = tpu.dynamic_rotate %64 by %c16_i32_48 dim 1 : vector<32x512xf32>, i32 -> vector<32x512xf32>
    %c1_49 = arith.constant 1 : index
    %c0_50 = arith.constant 0 : index
    %c0_51 = arith.constant 0 : index
    %72 = vector.load %arg2[%c1_49, %c0_50, %c0_51] : memref<8x32x512xf32, #tpu.memory_space<vmem>>, vector<1x32x512xf32>
    %73 = vector.shape_cast %72 : vector<1x32x512xf32> to vector<32x512xf32>
    %74 = arith.mulf %71, %73 : vector<32x512xf32>
    %75 = arith.truncf %74 : vector<32x512xf32> to vector<32x512xbf16>
    %c32_52 = arith.constant 32 : index
    %c0_53 = arith.constant 0 : index
    %76 = vector.load %arg17[%c32_52, %c0_53] : memref<288x512xbf16, #tpu.memory_space<vmem>>, vector<32x512xbf16>
    tpu.vector_store %arg17[%c32_52, %c0_53], %75 {strides = array<i32>} : memref<288x512xbf16, #tpu.memory_space<vmem>>, vector<32x512xbf16>,
    %c15_i32_54 = arith.constant 15 : i32
    %77 = tpu.dynamic_rotate %64 by %c15_i32_54 dim 1 : vector<32x512xf32>, i32 -> vector<32x512xf32>
    %c2_55 = arith.constant 2 : index
    %c0_56 = arith.constant 0 : index
    %c0_57 = arith.constant 0 : index
    %78 = vector.load %arg2[%c2_55, %c0_56, %c0_57] : memref<8x32x512xf32, #tpu.memory_space<vmem>>, vector<1x32x512xf32>
    %79 = vector.shape_cast %78 : vector<1x32x512xf32> to vector<32x512xf32>
    %80 = arith.mulf %77, %79 : vector<32x512xf32>
    %81 = arith.truncf %80 : vector<32x512xf32> to vector<32x512xbf16>
    %c64_58 = arith.constant 64 : index
    %c0_59 = arith.constant 0 : index
    %82 = vector.load %arg17[%c64_58, %c0_59] : memref<288x512xbf16, #tpu.memory_space<vmem>>, vector<32x512xbf16>
    tpu.vector_store %arg17[%c64_58, %c0_59], %81 {strides = array<i32>} : memref<288x512xbf16, #tpu.memory_space<vmem>>, vector<32x512xbf16>,
    %c1_i32_60 = arith.constant 1 : i32
    %83 = tpu.dynamic_rotate %64 by %c1_i32_60 dim 1 : vector<32x512xf32>, i32 -> vector<32x512xf32>
    %c3_61 = arith.constant 3 : index
    %c0_62 = arith.constant 0 : index
    %c0_63 = arith.constant 0 : index
    %84 = vector.load %arg2[%c3_61, %c0_62, %c0_63] : memref<8x32x512xf32, #tpu.memory_space<vmem>>, vector<1x32x512xf32>
    %85 = vector.shape_cast %84 : vector<1x32x512xf32> to vector<32x512xf32>
    %86 = arith.mulf %83, %85 : vector<32x512xf32>
    %87 = arith.truncf %86 : vector<32x512xf32> to vector<32x512xbf16>
    %c96_64 = arith.constant 96 : index
    %c0_65 = arith.constant 0 : index
    %88 = vector.load %arg17[%c96_64, %c0_65] : memref<288x512xbf16, #tpu.memory_space<vmem>>, vector<32x512xbf16>
    tpu.vector_store %arg17[%c96_64, %c0_65], %87 {strides = array<i32>} : memref<288x512xbf16, #tpu.memory_space<vmem>>, vector<32x512xbf16>,
    %89 = arith.truncf %64 : vector<32x512xf32> to vector<32x512xbf16>
    %c128_66 = arith.constant 128 : index
    %c0_67 = arith.constant 0 : index
    %90 = vector.load %arg17[%c128_66, %c0_67] : memref<288x512xbf16, #tpu.memory_space<vmem>>, vector<32x512xbf16>
    tpu.vector_store %arg17[%c128_66, %c0_67], %89 {strides = array<i32>} : memref<288x512xbf16, #tpu.memory_space<vmem>>, vector<32x512xbf16>,
    %c511_i32_68 = arith.constant 511 : i32
    %91 = tpu.dynamic_rotate %64 by %c511_i32_68 dim 1 : vector<32x512xf32>, i32 -> vector<32x512xf32>
    %c4_69 = arith.constant 4 : index
    %c0_70 = arith.constant 0 : index
    %c0_71 = arith.constant 0 : index
    %92 = vector.load %arg2[%c4_69, %c0_70, %c0_71] : memref<8x32x512xf32, #tpu.memory_space<vmem>>, vector<1x32x512xf32>
    %93 = vector.shape_cast %92 : vector<1x32x512xf32> to vector<32x512xf32>
    %94 = arith.mulf %91, %93 : vector<32x512xf32>
    %95 = arith.truncf %94 : vector<32x512xf32> to vector<32x512xbf16>
    %c160 = arith.constant 160 : index
    %c0_72 = arith.constant 0 : index
    %96 = vector.load %arg17[%c160, %c0_72] : memref<288x512xbf16, #tpu.memory_space<vmem>>, vector<32x512xbf16>
    tpu.vector_store %arg17[%c160, %c0_72], %95 {strides = array<i32>} : memref<288x512xbf16, #tpu.memory_space<vmem>>, vector<32x512xbf16>,
    %c497_i32_73 = arith.constant 497 : i32
    %97 = tpu.dynamic_rotate %64 by %c497_i32_73 dim 1 : vector<32x512xf32>, i32 -> vector<32x512xf32>
    %c5_74 = arith.constant 5 : index
    %c0_75 = arith.constant 0 : index
    %c0_76 = arith.constant 0 : index
    %98 = vector.load %arg2[%c5_74, %c0_75, %c0_76] : memref<8x32x512xf32, #tpu.memory_space<vmem>>, vector<1x32x512xf32>
    %99 = vector.shape_cast %98 : vector<1x32x512xf32> to vector<32x512xf32>
    %100 = arith.mulf %97, %99 : vector<32x512xf32>
    %101 = arith.truncf %100 : vector<32x512xf32> to vector<32x512xbf16>
    %c192 = arith.constant 192 : index
    %c0_77 = arith.constant 0 : index
    %102 = vector.load %arg17[%c192, %c0_77] : memref<288x512xbf16, #tpu.memory_space<vmem>>, vector<32x512xbf16>
    tpu.vector_store %arg17[%c192, %c0_77], %101 {strides = array<i32>} : memref<288x512xbf16, #tpu.memory_space<vmem>>, vector<32x512xbf16>,
    %c496_i32_78 = arith.constant 496 : i32
    %103 = tpu.dynamic_rotate %64 by %c496_i32_78 dim 1 : vector<32x512xf32>, i32 -> vector<32x512xf32>
    %c6_79 = arith.constant 6 : index
    %c0_80 = arith.constant 0 : index
    %c0_81 = arith.constant 0 : index
    %104 = vector.load %arg2[%c6_79, %c0_80, %c0_81] : memref<8x32x512xf32, #tpu.memory_space<vmem>>, vector<1x32x512xf32>
    %105 = vector.shape_cast %104 : vector<1x32x512xf32> to vector<32x512xf32>
    %106 = arith.mulf %103, %105 : vector<32x512xf32>
    %107 = arith.truncf %106 : vector<32x512xf32> to vector<32x512xbf16>
    %c224 = arith.constant 224 : index
    %c0_82 = arith.constant 0 : index
    %108 = vector.load %arg17[%c224, %c0_82] : memref<288x512xbf16, #tpu.memory_space<vmem>>, vector<32x512xbf16>
    tpu.vector_store %arg17[%c224, %c0_82], %107 {strides = array<i32>} : memref<288x512xbf16, #tpu.memory_space<vmem>>, vector<32x512xbf16>,
    %c495_i32_83 = arith.constant 495 : i32
    %109 = tpu.dynamic_rotate %64 by %c495_i32_83 dim 1 : vector<32x512xf32>, i32 -> vector<32x512xf32>
    %c7_84 = arith.constant 7 : index
    %c0_85 = arith.constant 0 : index
    %c0_86 = arith.constant 0 : index
    %110 = vector.load %arg2[%c7_84, %c0_85, %c0_86] : memref<8x32x512xf32, #tpu.memory_space<vmem>>, vector<1x32x512xf32>
    %111 = vector.shape_cast %110 : vector<1x32x512xf32> to vector<32x512xf32>
    %112 = arith.mulf %109, %111 : vector<32x512xf32>
    %113 = arith.truncf %112 : vector<32x512xf32> to vector<32x512xbf16>
    %c256 = arith.constant 256 : index
    %c0_87 = arith.constant 0 : index
    %114 = vector.load %arg17[%c256, %c0_87] : memref<288x512xbf16, #tpu.memory_space<vmem>>, vector<32x512xbf16>
    tpu.vector_store %arg17[%c256, %c0_87], %113 {strides = array<i32>} : memref<288x512xbf16, #tpu.memory_space<vmem>>, vector<32x512xbf16>,
    %c0_88 = arith.constant 0 : index
    %c0_89 = arith.constant 0 : index
    %115 = vector.load %arg6[%c0_88, %c0_89] : memref<32x288xbf16, #tpu.memory_space<vmem>>, vector<32x288xbf16>
    %c0_90 = arith.constant 0 : index
    %c0_91 = arith.constant 0 : index
    %116 = vector.load %arg17[%c0_90, %c0_91] : memref<288x512xbf16, #tpu.memory_space<vmem>>, vector<288x512xbf16>
    %cst_92 = arith.constant dense<0.000000e+00> : vector<32x512xf32>
    %117 = tpu.matmul %115, %116, %cst_92 {dimension_numbers = #tpu.dot_dimension_numbers<[1], [0], [0], [1], [0, 0, 1, 1], [], []>} : vector<32x288xbf16>, vector<288x512xbf16>, vector<32x512xf32> -> vector<32x512xf32>
    %c0_93 = arith.constant 0 : index
    %c0_94 = arith.constant 0 : index
    %118 = vector.load %arg7[%c0_93, %c0_94] : memref<32x1xf32, #tpu.memory_space<vmem>>, vector<32x1xf32>
    %119 = vector.broadcast %118 : vector<32x1xf32> to vector<32x512xf32>
    %120 = arith.addf %117, %119 : vector<32x512xf32>
    %cst_95 = arith.constant 0.000000e+00 : f32
    %121 = vector.broadcast %cst_95 : f32 to vector<32x512xf32>
    %122 = arith.maximumf %120, %121 : vector<32x512xf32>
    %c1_96 = arith.constant 1 : index
    %c0_97 = arith.constant 0 : index
    %c0_98 = arith.constant 0 : index
    %123 = vector.load %arg15[%c1_96, %c0_97, %c0_98] : memref<4x32x512xf32, #tpu.memory_space<vmem>>, vector<1x32x512xf32>
    %124 = vector.shape_cast %123 : vector<1x32x512xf32> to vector<32x512xf32>
    %125 = vector.shape_cast %122 : vector<32x512xf32> to vector<1x32x512xf32>
    tpu.vector_store %arg15[%c1_96, %c0_97, %c0_98], %125 {strides = array<i32>} : memref<4x32x512xf32, #tpu.memory_space<vmem>>, vector<1x32x512xf32>,
    %c0_99 = arith.constant 0 : index
    %c0_100 = arith.constant 0 : index
    %c0_101 = arith.constant 0 : index
    %126 = vector.load %arg15[%c0_99, %c0_100, %c0_101] : memref<4x32x512xf32, #tpu.memory_space<vmem>>, vector<1x32x512xf32>
    %127 = vector.shape_cast %126 : vector<1x32x512xf32> to vector<32x512xf32>
    %c2_102 = arith.constant 2 : index
    %c0_103 = arith.constant 0 : index
    %c0_104 = arith.constant 0 : index
    %128 = vector.load %arg15[%c2_102, %c0_103, %c0_104] : memref<4x32x512xf32, #tpu.memory_space<vmem>>, vector<1x32x512xf32>
    %129 = vector.shape_cast %128 : vector<1x32x512xf32> to vector<32x512xf32>
    %130 = vector.shape_cast %127 : vector<32x512xf32> to vector<1x32x512xf32>
    tpu.vector_store %arg15[%c2_102, %c0_103, %c0_104], %130 {strides = array<i32>} : memref<4x32x512xf32, #tpu.memory_space<vmem>>, vector<1x32x512xf32>,
    %c1_105 = arith.constant 1 : index
    %c0_106 = arith.constant 0 : index
    %c0_107 = arith.constant 0 : index
    %131 = vector.load %arg15[%c1_105, %c0_106, %c0_107] : memref<4x32x512xf32, #tpu.memory_space<vmem>>, vector<1x32x512xf32>
    %132 = vector.shape_cast %131 : vector<1x32x512xf32> to vector<32x512xf32>
    %c17_i32_108 = arith.constant 17 : i32
    %133 = tpu.dynamic_rotate %132 by %c17_i32_108 dim 1 : vector<32x512xf32>, i32 -> vector<32x512xf32>
    %c0_109 = arith.constant 0 : index
    %c0_110 = arith.constant 0 : index
    %c0_111 = arith.constant 0 : index
    %134 = vector.load %arg2[%c0_109, %c0_110, %c0_111] : memref<8x32x512xf32, #tpu.memory_space<vmem>>, vector<1x32x512xf32>
    %135 = vector.shape_cast %134 : vector<1x32x512xf32> to vector<32x512xf32>
    %136 = arith.mulf %133, %135 : vector<32x512xf32>
    %137 = arith.truncf %136 : vector<32x512xf32> to vector<32x512xbf16>
    %c0_112 = arith.constant 0 : index
    %c0_113 = arith.constant 0 : index
    %138 = vector.load %arg17[%c0_112, %c0_113] : memref<288x512xbf16, #tpu.memory_space<vmem>>, vector<32x512xbf16>
    tpu.vector_store %arg17[%c0_112, %c0_113], %137 {strides = array<i32>} : memref<288x512xbf16, #tpu.memory_space<vmem>>, vector<32x512xbf16>,
    %c16_i32_114 = arith.constant 16 : i32
    %139 = tpu.dynamic_rotate %132 by %c16_i32_114 dim 1 : vector<32x512xf32>, i32 -> vector<32x512xf32>
    %c1_115 = arith.constant 1 : index
    %c0_116 = arith.constant 0 : index
    %c0_117 = arith.constant 0 : index
    %140 = vector.load %arg2[%c1_115, %c0_116, %c0_117] : memref<8x32x512xf32, #tpu.memory_space<vmem>>, vector<1x32x512xf32>
    %141 = vector.shape_cast %140 : vector<1x32x512xf32> to vector<32x512xf32>
    %142 = arith.mulf %139, %141 : vector<32x512xf32>
    %143 = arith.truncf %142 : vector<32x512xf32> to vector<32x512xbf16>
    %c32_118 = arith.constant 32 : index
    %c0_119 = arith.constant 0 : index
    %144 = vector.load %arg17[%c32_118, %c0_119] : memref<288x512xbf16, #tpu.memory_space<vmem>>, vector<32x512xbf16>
    tpu.vector_store %arg17[%c32_118, %c0_119], %143 {strides = array<i32>} : memref<288x512xbf16, #tpu.memory_space<vmem>>, vector<32x512xbf16>,
    %c15_i32_120 = arith.constant 15 : i32
    %145 = tpu.dynamic_rotate %132 by %c15_i32_120 dim 1 : vector<32x512xf32>, i32 -> vector<32x512xf32>
    %c2_121 = arith.constant 2 : index
    %c0_122 = arith.constant 0 : index
    %c0_123 = arith.constant 0 : index
    %146 = vector.load %arg2[%c2_121, %c0_122, %c0_123] : memref<8x32x512xf32, #tpu.memory_space<vmem>>, vector<1x32x512xf32>
    %147 = vector.shape_cast %146 : vector<1x32x512xf32> to vector<32x512xf32>
    %148 = arith.mulf %145, %147 : vector<32x512xf32>
    %149 = arith.truncf %148 : vector<32x512xf32> to vector<32x512xbf16>
    %c64_124 = arith.constant 64 : index
    %c0_125 = arith.constant 0 : index
    %150 = vector.load %arg17[%c64_124, %c0_125] : memref<288x512xbf16, #tpu.memory_space<vmem>>, vector<32x512xbf16>
    tpu.vector_store %arg17[%c64_124, %c0_125], %149 {strides = array<i32>} : memref<288x512xbf16, #tpu.memory_space<vmem>>, vector<32x512xbf16>,
    %c1_i32_126 = arith.constant 1 : i32
    %151 = tpu.dynamic_rotate %132 by %c1_i32_126 dim 1 : vector<32x512xf32>, i32 -> vector<32x512xf32>
    %c3_127 = arith.constant 3 : index
    %c0_128 = arith.constant 0 : index
    %c0_129 = arith.constant 0 : index
    %152 = vector.load %arg2[%c3_127, %c0_128, %c0_129] : memref<8x32x512xf32, #tpu.memory_space<vmem>>, vector<1x32x512xf32>
    %153 = vector.shape_cast %152 : vector<1x32x512xf32> to vector<32x512xf32>
    %154 = arith.mulf %151, %153 : vector<32x512xf32>
    %155 = arith.truncf %154 : vector<32x512xf32> to vector<32x512xbf16>
    %c96_130 = arith.constant 96 : index
    %c0_131 = arith.constant 0 : index
    %156 = vector.load %arg17[%c96_130, %c0_131] : memref<288x512xbf16, #tpu.memory_space<vmem>>, vector<32x512xbf16>
    tpu.vector_store %arg17[%c96_130, %c0_131], %155 {strides = array<i32>} : memref<288x512xbf16, #tpu.memory_space<vmem>>, vector<32x512xbf16>,
    %157 = arith.truncf %132 : vector<32x512xf32> to vector<32x512xbf16>
    %c128_132 = arith.constant 128 : index
    %c0_133 = arith.constant 0 : index
    %158 = vector.load %arg17[%c128_132, %c0_133] : memref<288x512xbf16, #tpu.memory_space<vmem>>, vector<32x512xbf16>
    tpu.vector_store %arg17[%c128_132, %c0_133], %157 {strides = array<i32>} : memref<288x512xbf16, #tpu.memory_space<vmem>>, vector<32x512xbf16>,
    %c511_i32_134 = arith.constant 511 : i32
    %159 = tpu.dynamic_rotate %132 by %c511_i32_134 dim 1 : vector<32x512xf32>, i32 -> vector<32x512xf32>
    %c4_135 = arith.constant 4 : index
    %c0_136 = arith.constant 0 : index
    %c0_137 = arith.constant 0 : index
    %160 = vector.load %arg2[%c4_135, %c0_136, %c0_137] : memref<8x32x512xf32, #tpu.memory_space<vmem>>, vector<1x32x512xf32>
    %161 = vector.shape_cast %160 : vector<1x32x512xf32> to vector<32x512xf32>
    %162 = arith.mulf %159, %161 : vector<32x512xf32>
    %163 = arith.truncf %162 : vector<32x512xf32> to vector<32x512xbf16>
    %c160_138 = arith.constant 160 : index
    %c0_139 = arith.constant 0 : index
    %164 = vector.load %arg17[%c160_138, %c0_139] : memref<288x512xbf16, #tpu.memory_space<vmem>>, vector<32x512xbf16>
    tpu.vector_store %arg17[%c160_138, %c0_139], %163 {strides = array<i32>} : memref<288x512xbf16, #tpu.memory_space<vmem>>, vector<32x512xbf16>,
    %c497_i32_140 = arith.constant 497 : i32
    %165 = tpu.dynamic_rotate %132 by %c497_i32_140 dim 1 : vector<32x512xf32>, i32 -> vector<32x512xf32>
    %c5_141 = arith.constant 5 : index
    %c0_142 = arith.constant 0 : index
    %c0_143 = arith.constant 0 : index
    %166 = vector.load %arg2[%c5_141, %c0_142, %c0_143] : memref<8x32x512xf32, #tpu.memory_space<vmem>>, vector<1x32x512xf32>
    %167 = vector.shape_cast %166 : vector<1x32x512xf32> to vector<32x512xf32>
    %168 = arith.mulf %165, %167 : vector<32x512xf32>
    %169 = arith.truncf %168 : vector<32x512xf32> to vector<32x512xbf16>
    %c192_144 = arith.constant 192 : index
    %c0_145 = arith.constant 0 : index
    %170 = vector.load %arg17[%c192_144, %c0_145] : memref<288x512xbf16, #tpu.memory_space<vmem>>, vector<32x512xbf16>
    tpu.vector_store %arg17[%c192_144, %c0_145], %169 {strides = array<i32>} : memref<288x512xbf16, #tpu.memory_space<vmem>>, vector<32x512xbf16>,
    %c496_i32_146 = arith.constant 496 : i32
    %171 = tpu.dynamic_rotate %132 by %c496_i32_146 dim 1 : vector<32x512xf32>, i32 -> vector<32x512xf32>
    %c6_147 = arith.constant 6 : index
    %c0_148 = arith.constant 0 : index
    %c0_149 = arith.constant 0 : index
    %172 = vector.load %arg2[%c6_147, %c0_148, %c0_149] : memref<8x32x512xf32, #tpu.memory_space<vmem>>, vector<1x32x512xf32>
    %173 = vector.shape_cast %172 : vector<1x32x512xf32> to vector<32x512xf32>
    %174 = arith.mulf %171, %173 : vector<32x512xf32>
    %175 = arith.truncf %174 : vector<32x512xf32> to vector<32x512xbf16>
    %c224_150 = arith.constant 224 : index
    %c0_151 = arith.constant 0 : index
    %176 = vector.load %arg17[%c224_150, %c0_151] : memref<288x512xbf16, #tpu.memory_space<vmem>>, vector<32x512xbf16>
    tpu.vector_store %arg17[%c224_150, %c0_151], %175 {strides = array<i32>} : memref<288x512xbf16, #tpu.memory_space<vmem>>, vector<32x512xbf16>,
    %c495_i32_152 = arith.constant 495 : i32
    %177 = tpu.dynamic_rotate %132 by %c495_i32_152 dim 1 : vector<32x512xf32>, i32 -> vector<32x512xf32>
    %c7_153 = arith.constant 7 : index
    %c0_154 = arith.constant 0 : index
    %c0_155 = arith.constant 0 : index
    %178 = vector.load %arg2[%c7_153, %c0_154, %c0_155] : memref<8x32x512xf32, #tpu.memory_space<vmem>>, vector<1x32x512xf32>
    %179 = vector.shape_cast %178 : vector<1x32x512xf32> to vector<32x512xf32>
    %180 = arith.mulf %177, %179 : vector<32x512xf32>
    %181 = arith.truncf %180 : vector<32x512xf32> to vector<32x512xbf16>
    %c256_156 = arith.constant 256 : index
    %c0_157 = arith.constant 0 : index
    %182 = vector.load %arg17[%c256_156, %c0_157] : memref<288x512xbf16, #tpu.memory_space<vmem>>, vector<32x512xbf16>
    tpu.vector_store %arg17[%c256_156, %c0_157], %181 {strides = array<i32>} : memref<288x512xbf16, #tpu.memory_space<vmem>>, vector<32x512xbf16>,
    %c0_158 = arith.constant 0 : index
    %c0_159 = arith.constant 0 : index
    %183 = vector.load %arg8[%c0_158, %c0_159] : memref<32x288xbf16, #tpu.memory_space<vmem>>, vector<32x288xbf16>
    %c0_160 = arith.constant 0 : index
    %c0_161 = arith.constant 0 : index
    %184 = vector.load %arg17[%c0_160, %c0_161] : memref<288x512xbf16, #tpu.memory_space<vmem>>, vector<288x512xbf16>
    %cst_162 = arith.constant dense<0.000000e+00> : vector<32x512xf32>
    %185 = tpu.matmul %183, %184, %cst_162 {dimension_numbers = #tpu.dot_dimension_numbers<[1], [0], [0], [1], [0, 0, 1, 1], [], []>} : vector<32x288xbf16>, vector<288x512xbf16>, vector<32x512xf32> -> vector<32x512xf32>
    %c0_163 = arith.constant 0 : index
    %c0_164 = arith.constant 0 : index
    %186 = vector.load %arg9[%c0_163, %c0_164] : memref<32x1xf32, #tpu.memory_space<vmem>>, vector<32x1xf32>
    %187 = vector.broadcast %186 : vector<32x1xf32> to vector<32x512xf32>
    %188 = arith.addf %185, %187 : vector<32x512xf32>
    %cst_165 = arith.constant 0.000000e+00 : f32
    %189 = vector.broadcast %cst_165 : f32 to vector<32x512xf32>
    %190 = arith.maximumf %188, %189 : vector<32x512xf32>
    %c2_166 = arith.constant 2 : index
    %c0_167 = arith.constant 0 : index
    %c0_168 = arith.constant 0 : index
    %191 = vector.load %arg15[%c2_166, %c0_167, %c0_168] : memref<4x32x512xf32, #tpu.memory_space<vmem>>, vector<1x32x512xf32>
    %192 = vector.shape_cast %191 : vector<1x32x512xf32> to vector<32x512xf32>
    %193 = arith.addf %192, %190 : vector<32x512xf32>
    %c2_169 = arith.constant 2 : index
    %c0_170 = arith.constant 0 : index
    %c0_171 = arith.constant 0 : index
    %194 = vector.load %arg15[%c2_169, %c0_170, %c0_171] : memref<4x32x512xf32, #tpu.memory_space<vmem>>, vector<1x32x512xf32>
    %195 = vector.shape_cast %194 : vector<1x32x512xf32> to vector<32x512xf32>
    %196 = vector.shape_cast %193 : vector<32x512xf32> to vector<1x32x512xf32>
    tpu.vector_store %arg15[%c2_169, %c0_170, %c0_171], %196 {strides = array<i32>} : memref<4x32x512xf32, #tpu.memory_space<vmem>>, vector<1x32x512xf32>,
    %c1_172 = arith.constant 1 : index
    %c0_173 = arith.constant 0 : index
    %c0_174 = arith.constant 0 : index
    %197 = vector.load %arg15[%c1_172, %c0_173, %c0_174] : memref<4x32x512xf32, #tpu.memory_space<vmem>>, vector<1x32x512xf32>
    %198 = vector.shape_cast %197 : vector<1x32x512xf32> to vector<32x512xf32>
    %c3_175 = arith.constant 3 : index
    %c0_176 = arith.constant 0 : index
    %c0_177 = arith.constant 0 : index
    %199 = vector.load %arg15[%c3_175, %c0_176, %c0_177] : memref<4x32x512xf32, #tpu.memory_space<vmem>>, vector<1x32x512xf32>
    %200 = vector.shape_cast %199 : vector<1x32x512xf32> to vector<32x512xf32>
    %201 = vector.shape_cast %198 : vector<32x512xf32> to vector<1x32x512xf32>
    tpu.vector_store %arg15[%c3_175, %c0_176, %c0_177], %201 {strides = array<i32>} : memref<4x32x512xf32, #tpu.memory_space<vmem>>, vector<1x32x512xf32>,
    %c2_178 = arith.constant 2 : index
    %c0_179 = arith.constant 0 : index
    %c0_180 = arith.constant 0 : index
    %202 = vector.load %arg15[%c2_178, %c0_179, %c0_180] : memref<4x32x512xf32, #tpu.memory_space<vmem>>, vector<1x32x512xf32>
    %203 = vector.shape_cast %202 : vector<1x32x512xf32> to vector<32x512xf32>
    %c17_i32_181 = arith.constant 17 : i32
    %204 = tpu.dynamic_rotate %203 by %c17_i32_181 dim 1 : vector<32x512xf32>, i32 -> vector<32x512xf32>
    %c0_182 = arith.constant 0 : index
    %c0_183 = arith.constant 0 : index
    %c0_184 = arith.constant 0 : index
    %205 = vector.load %arg2[%c0_182, %c0_183, %c0_184] : memref<8x32x512xf32, #tpu.memory_space<vmem>>, vector<1x32x512xf32>
    %206 = vector.shape_cast %205 : vector<1x32x512xf32> to vector<32x512xf32>
    %207 = arith.mulf %204, %206 : vector<32x512xf32>
    %208 = arith.truncf %207 : vector<32x512xf32> to vector<32x512xbf16>
    %c0_185 = arith.constant 0 : index
    %c0_186 = arith.constant 0 : index
    %209 = vector.load %arg17[%c0_185, %c0_186] : memref<288x512xbf16, #tpu.memory_space<vmem>>, vector<32x512xbf16>
    tpu.vector_store %arg17[%c0_185, %c0_186], %208 {strides = array<i32>} : memref<288x512xbf16, #tpu.memory_space<vmem>>, vector<32x512xbf16>,
    %c16_i32_187 = arith.constant 16 : i32
    %210 = tpu.dynamic_rotate %203 by %c16_i32_187 dim 1 : vector<32x512xf32>, i32 -> vector<32x512xf32>
    %c1_188 = arith.constant 1 : index
    %c0_189 = arith.constant 0 : index
    %c0_190 = arith.constant 0 : index
    %211 = vector.load %arg2[%c1_188, %c0_189, %c0_190] : memref<8x32x512xf32, #tpu.memory_space<vmem>>, vector<1x32x512xf32>
    %212 = vector.shape_cast %211 : vector<1x32x512xf32> to vector<32x512xf32>
    %213 = arith.mulf %210, %212 : vector<32x512xf32>
    %214 = arith.truncf %213 : vector<32x512xf32> to vector<32x512xbf16>
    %c32_191 = arith.constant 32 : index
    %c0_192 = arith.constant 0 : index
    %215 = vector.load %arg17[%c32_191, %c0_192] : memref<288x512xbf16, #tpu.memory_space<vmem>>, vector<32x512xbf16>
    tpu.vector_store %arg17[%c32_191, %c0_192], %214 {strides = array<i32>} : memref<288x512xbf16, #tpu.memory_space<vmem>>, vector<32x512xbf16>,
    %c15_i32_193 = arith.constant 15 : i32
    %216 = tpu.dynamic_rotate %203 by %c15_i32_193 dim 1 : vector<32x512xf32>, i32 -> vector<32x512xf32>
    %c2_194 = arith.constant 2 : index
    %c0_195 = arith.constant 0 : index
    %c0_196 = arith.constant 0 : index
    %217 = vector.load %arg2[%c2_194, %c0_195, %c0_196] : memref<8x32x512xf32, #tpu.memory_space<vmem>>, vector<1x32x512xf32>
    %218 = vector.shape_cast %217 : vector<1x32x512xf32> to vector<32x512xf32>
    %219 = arith.mulf %216, %218 : vector<32x512xf32>
    %220 = arith.truncf %219 : vector<32x512xf32> to vector<32x512xbf16>
    %c64_197 = arith.constant 64 : index
    %c0_198 = arith.constant 0 : index
    %221 = vector.load %arg17[%c64_197, %c0_198] : memref<288x512xbf16, #tpu.memory_space<vmem>>, vector<32x512xbf16>
    tpu.vector_store %arg17[%c64_197, %c0_198], %220 {strides = array<i32>} : memref<288x512xbf16, #tpu.memory_space<vmem>>, vector<32x512xbf16>,
    %c1_i32_199 = arith.constant 1 : i32
    %222 = tpu.dynamic_rotate %203 by %c1_i32_199 dim 1 : vector<32x512xf32>, i32 -> vector<32x512xf32>
    %c3_200 = arith.constant 3 : index
    %c0_201 = arith.constant 0 : index
    %c0_202 = arith.constant 0 : index
    %223 = vector.load %arg2[%c3_200, %c0_201, %c0_202] : memref<8x32x512xf32, #tpu.memory_space<vmem>>, vector<1x32x512xf32>
    %224 = vector.shape_cast %223 : vector<1x32x512xf32> to vector<32x512xf32>
    %225 = arith.mulf %222, %224 : vector<32x512xf32>
    %226 = arith.truncf %225 : vector<32x512xf32> to vector<32x512xbf16>
    %c96_203 = arith.constant 96 : index
    %c0_204 = arith.constant 0 : index
    %227 = vector.load %arg17[%c96_203, %c0_204] : memref<288x512xbf16, #tpu.memory_space<vmem>>, vector<32x512xbf16>
    tpu.vector_store %arg17[%c96_203, %c0_204], %226 {strides = array<i32>} : memref<288x512xbf16, #tpu.memory_space<vmem>>, vector<32x512xbf16>,
    %228 = arith.truncf %203 : vector<32x512xf32> to vector<32x512xbf16>
    %c128_205 = arith.constant 128 : index
    %c0_206 = arith.constant 0 : index
    %229 = vector.load %arg17[%c128_205, %c0_206] : memref<288x512xbf16, #tpu.memory_space<vmem>>, vector<32x512xbf16>
    tpu.vector_store %arg17[%c128_205, %c0_206], %228 {strides = array<i32>} : memref<288x512xbf16, #tpu.memory_space<vmem>>, vector<32x512xbf16>,
    %c511_i32_207 = arith.constant 511 : i32
    %230 = tpu.dynamic_rotate %203 by %c511_i32_207 dim 1 : vector<32x512xf32>, i32 -> vector<32x512xf32>
    %c4_208 = arith.constant 4 : index
    %c0_209 = arith.constant 0 : index
    %c0_210 = arith.constant 0 : index
    %231 = vector.load %arg2[%c4_208, %c0_209, %c0_210] : memref<8x32x512xf32, #tpu.memory_space<vmem>>, vector<1x32x512xf32>
    %232 = vector.shape_cast %231 : vector<1x32x512xf32> to vector<32x512xf32>
    %233 = arith.mulf %230, %232 : vector<32x512xf32>
    %234 = arith.truncf %233 : vector<32x512xf32> to vector<32x512xbf16>
    %c160_211 = arith.constant 160 : index
    %c0_212 = arith.constant 0 : index
    %235 = vector.load %arg17[%c160_211, %c0_212] : memref<288x512xbf16, #tpu.memory_space<vmem>>, vector<32x512xbf16>
    tpu.vector_store %arg17[%c160_211, %c0_212], %234 {strides = array<i32>} : memref<288x512xbf16, #tpu.memory_space<vmem>>, vector<32x512xbf16>,
    %c497_i32_213 = arith.constant 497 : i32
    %236 = tpu.dynamic_rotate %203 by %c497_i32_213 dim 1 : vector<32x512xf32>, i32 -> vector<32x512xf32>
    %c5_214 = arith.constant 5 : index
    %c0_215 = arith.constant 0 : index
    %c0_216 = arith.constant 0 : index
    %237 = vector.load %arg2[%c5_214, %c0_215, %c0_216] : memref<8x32x512xf32, #tpu.memory_space<vmem>>, vector<1x32x512xf32>
    %238 = vector.shape_cast %237 : vector<1x32x512xf32> to vector<32x512xf32>
    %239 = arith.mulf %236, %238 : vector<32x512xf32>
    %240 = arith.truncf %239 : vector<32x512xf32> to vector<32x512xbf16>
    %c192_217 = arith.constant 192 : index
    %c0_218 = arith.constant 0 : index
    %241 = vector.load %arg17[%c192_217, %c0_218] : memref<288x512xbf16, #tpu.memory_space<vmem>>, vector<32x512xbf16>
    tpu.vector_store %arg17[%c192_217, %c0_218], %240 {strides = array<i32>} : memref<288x512xbf16, #tpu.memory_space<vmem>>, vector<32x512xbf16>,
    %c496_i32_219 = arith.constant 496 : i32
    %242 = tpu.dynamic_rotate %203 by %c496_i32_219 dim 1 : vector<32x512xf32>, i32 -> vector<32x512xf32>
    %c6_220 = arith.constant 6 : index
    %c0_221 = arith.constant 0 : index
    %c0_222 = arith.constant 0 : index
    %243 = vector.load %arg2[%c6_220, %c0_221, %c0_222] : memref<8x32x512xf32, #tpu.memory_space<vmem>>, vector<1x32x512xf32>
    %244 = vector.shape_cast %243 : vector<1x32x512xf32> to vector<32x512xf32>
    %245 = arith.mulf %242, %244 : vector<32x512xf32>
    %246 = arith.truncf %245 : vector<32x512xf32> to vector<32x512xbf16>
    %c224_223 = arith.constant 224 : index
    %c0_224 = arith.constant 0 : index
    %247 = vector.load %arg17[%c224_223, %c0_224] : memref<288x512xbf16, #tpu.memory_space<vmem>>, vector<32x512xbf16>
    tpu.vector_store %arg17[%c224_223, %c0_224], %246 {strides = array<i32>} : memref<288x512xbf16, #tpu.memory_space<vmem>>, vector<32x512xbf16>,
    %c495_i32_225 = arith.constant 495 : i32
    %248 = tpu.dynamic_rotate %203 by %c495_i32_225 dim 1 : vector<32x512xf32>, i32 -> vector<32x512xf32>
    %c7_226 = arith.constant 7 : index
    %c0_227 = arith.constant 0 : index
    %c0_228 = arith.constant 0 : index
    %249 = vector.load %arg2[%c7_226, %c0_227, %c0_228] : memref<8x32x512xf32, #tpu.memory_space<vmem>>, vector<1x32x512xf32>
    %250 = vector.shape_cast %249 : vector<1x32x512xf32> to vector<32x512xf32>
    %251 = arith.mulf %248, %250 : vector<32x512xf32>
    %252 = arith.truncf %251 : vector<32x512xf32> to vector<32x512xbf16>
    %c256_229 = arith.constant 256 : index
    %c0_230 = arith.constant 0 : index
    %253 = vector.load %arg17[%c256_229, %c0_230] : memref<288x512xbf16, #tpu.memory_space<vmem>>, vector<32x512xbf16>
    tpu.vector_store %arg17[%c256_229, %c0_230], %252 {strides = array<i32>} : memref<288x512xbf16, #tpu.memory_space<vmem>>, vector<32x512xbf16>,
    %c0_231 = arith.constant 0 : index
    %c0_232 = arith.constant 0 : index
    %254 = vector.load %arg10[%c0_231, %c0_232] : memref<32x288xbf16, #tpu.memory_space<vmem>>, vector<32x288xbf16>
    %c0_233 = arith.constant 0 : index
    %c0_234 = arith.constant 0 : index
    %255 = vector.load %arg17[%c0_233, %c0_234] : memref<288x512xbf16, #tpu.memory_space<vmem>>, vector<288x512xbf16>
    %cst_235 = arith.constant dense<0.000000e+00> : vector<32x512xf32>
    %256 = tpu.matmul %254, %255, %cst_235 {dimension_numbers = #tpu.dot_dimension_numbers<[1], [0], [0], [1], [0, 0, 1, 1], [], []>} : vector<32x288xbf16>, vector<288x512xbf16>, vector<32x512xf32> -> vector<32x512xf32>
    %c0_236 = arith.constant 0 : index
    %c0_237 = arith.constant 0 : index
    %257 = vector.load %arg11[%c0_236, %c0_237] : memref<32x1xf32, #tpu.memory_space<vmem>>, vector<32x1xf32>
    %258 = vector.broadcast %257 : vector<32x1xf32> to vector<32x512xf32>
    %259 = arith.addf %256, %258 : vector<32x512xf32>
    %cst_238 = arith.constant 0.000000e+00 : f32
    %260 = vector.broadcast %cst_238 : f32 to vector<32x512xf32>
    %261 = arith.maximumf %259, %260 : vector<32x512xf32>
    %c3_239 = arith.constant 3 : index
    %c0_240 = arith.constant 0 : index
    %c0_241 = arith.constant 0 : index
    %262 = vector.load %arg15[%c3_239, %c0_240, %c0_241] : memref<4x32x512xf32, #tpu.memory_space<vmem>>, vector<1x32x512xf32>
    %263 = vector.shape_cast %262 : vector<1x32x512xf32> to vector<32x512xf32>
    %264 = arith.addf %263, %261 : vector<32x512xf32>
    %c3_242 = arith.constant 3 : index
    %c0_243 = arith.constant 0 : index
    %c0_244 = arith.constant 0 : index
    %265 = vector.load %arg15[%c3_242, %c0_243, %c0_244] : memref<4x32x512xf32, #tpu.memory_space<vmem>>, vector<1x32x512xf32>
    %266 = vector.shape_cast %265 : vector<1x32x512xf32> to vector<32x512xf32>
    %267 = vector.shape_cast %264 : vector<32x512xf32> to vector<1x32x512xf32>
    tpu.vector_store %arg15[%c3_242, %c0_243, %c0_244], %267 {strides = array<i32>} : memref<4x32x512xf32, #tpu.memory_space<vmem>>, vector<1x32x512xf32>,
    %c3_245 = arith.constant 3 : index
    %c0_246 = arith.constant 0 : index
    %c0_247 = arith.constant 0 : index
    %268 = vector.load %arg15[%c3_245, %c0_246, %c0_247] : memref<4x32x512xf32, #tpu.memory_space<vmem>>, vector<1x32x512xf32>
    %269 = vector.shape_cast %268 : vector<1x32x512xf32> to vector<32x512xf32>
    %c0_248 = arith.constant 0 : index
    %c0_249 = arith.constant 0 : index
    %270 = vector.load %arg3[%c0_248, %c0_249] : memref<1x512xf32, #tpu.memory_space<vmem>>, vector<1x512xf32>
    %271 = vector.broadcast %270 : vector<1x512xf32> to vector<32x512xf32>
    %272 = arith.mulf %269, %271 : vector<32x512xf32>
    %273 = vector.extract_strided_slice %272 {offsets = [0, 0], sizes = [32, 256], strides = [1, 1]} : vector<32x512xf32> to vector<32x256xf32>
    %cst_250 = arith.constant dense<0.000000e+00> : vector<32xf32>
    %274 = vector.multi_reduction <add>, %273, %cst_250 [1] : vector<32x256xf32> to vector<32xf32>
    %275 = vector.shape_cast %274 : vector<32xf32> to vector<32x1xf32>
    %276 = vector.extract_strided_slice %272 {offsets = [0, 256], sizes = [32, 256], strides = [1, 1]} : vector<32x512xf32> to vector<32x256xf32>
    %cst_251 = arith.constant dense<0.000000e+00> : vector<32xf32>
    %277 = vector.multi_reduction <add>, %276, %cst_251 [1] : vector<32x256xf32> to vector<32xf32>
    %278 = vector.shape_cast %277 : vector<32xf32> to vector<32x1xf32>
    %279 = tpu.concatenate %275, %278 in 1 : vector<32x1xf32>, vector<32x1xf32> -> vector<32x2xf32>
    %c0_252 = arith.constant 0 : index
    %c0_253 = arith.constant 0 : index
    %280 = vector.load %arg12[%c0_252, %c0_253] : memref<32x10xf32, #tpu.memory_space<vmem>>, vector<32x10xf32>
    %cst_254 = arith.constant dense<0.000000e+00> : vector<2x10xf32>
    %281 = tpu.matmul %279, %280, %cst_254 {dimension_numbers = #tpu.dot_dimension_numbers<[0], [0], [1], [1], [0, 1, 1, 1], [], []>} : vector<32x2xf32>, vector<32x10xf32>, vector<2x10xf32> -> vector<2x10xf32>
    %c0_255 = arith.constant 0 : index
    %c0_256 = arith.constant 0 : index
    %282 = vector.load %arg13[%c0_255, %c0_256] : memref<1x10xf32, #tpu.memory_space<vmem>>, vector<1x10xf32>
    %283 = vector.broadcast %282 : vector<1x10xf32> to vector<2x10xf32>
    %284 = arith.addf %281, %283 : vector<2x10xf32>
    %c0_257 = arith.constant 0 : index
    %c0_258 = arith.constant 0 : index
    %c0_259 = arith.constant 0 : index
    %285 = vector.load %arg14[%c0_257, %c0_258, %c0_259] : memref<1x2x10xf32, #tpu.memory_space<vmem>>, vector<1x2x10xf32>
    %286 = vector.shape_cast %285 : vector<1x2x10xf32> to vector<2x10xf32>
    %287 = vector.shape_cast %284 : vector<2x10xf32> to vector<1x2x10xf32>
    tpu.vector_store %arg14[%c0_257, %c0_258, %c0_259], %287 {strides = array<i32>} : memref<1x2x10xf32, #tpu.memory_space<vmem>>, vector<1x2x10xf32>,
    return
  }
  func.func @transform_0(%arg0: i32) -> (i32, i32, i32) {
    %c0_i32 = arith.constant 0 : i32
    %c0_i32_0 = arith.constant 0 : i32
    %c0_i32_1 = arith.constant 0 : i32
    return %arg0, %c0_i32, %c0_i32_0 : i32, i32, i32
  }
  func.func @transform_1(%arg0: i32) -> (i32, i32, i32) {
    %c0_i32 = arith.constant 0 : i32
    %c0_i32_0 = arith.constant 0 : i32
    %c0_i32_1 = arith.constant 0 : i32
    %c0_i32_2 = arith.constant 0 : i32
    return %c0_i32, %c0_i32_0, %c0_i32_1 : i32, i32, i32
  }
  func.func @transform_2(%arg0: i32) -> (i32, i32) {
    %c0_i32 = arith.constant 0 : i32
    %c0_i32_0 = arith.constant 0 : i32
    %c0_i32_1 = arith.constant 0 : i32
    return %c0_i32, %c0_i32_0 : i32, i32
  }
  func.func @transform_3(%arg0: i32) -> (i32, i32) {
    %c0_i32 = arith.constant 0 : i32
    %c0_i32_0 = arith.constant 0 : i32
    %c0_i32_1 = arith.constant 0 : i32
    return %c0_i32, %c0_i32_0 : i32, i32
  }
  func.func @transform_4(%arg0: i32) -> (i32, i32) {
    %c0_i32 = arith.constant 0 : i32
    %c0_i32_0 = arith.constant 0 : i32
    %c0_i32_1 = arith.constant 0 : i32
    return %c0_i32, %c0_i32_0 : i32, i32
  }
  func.func @transform_5(%arg0: i32) -> (i32, i32) {
    %c0_i32 = arith.constant 0 : i32
    %c0_i32_0 = arith.constant 0 : i32
    %c0_i32_1 = arith.constant 0 : i32
    return %c0_i32, %c0_i32_0 : i32, i32
  }
  func.func @transform_6(%arg0: i32) -> (i32, i32) {
    %c0_i32 = arith.constant 0 : i32
    %c0_i32_0 = arith.constant 0 : i32
    %c0_i32_1 = arith.constant 0 : i32
    return %c0_i32, %c0_i32_0 : i32, i32
  }
  func.func @transform_7(%arg0: i32) -> (i32, i32) {
    %c0_i32 = arith.constant 0 : i32
    %c0_i32_0 = arith.constant 0 : i32
    %c0_i32_1 = arith.constant 0 : i32
    return %c0_i32, %c0_i32_0 : i32, i32
  }
  func.func @transform_8(%arg0: i32) -> (i32, i32) {
    %c0_i32 = arith.constant 0 : i32
    %c0_i32_0 = arith.constant 0 : i32
    %c0_i32_1 = arith.constant 0 : i32
    return %c0_i32, %c0_i32_0 : i32, i32
  }
  func.func @transform_9(%arg0: i32) -> (i32, i32) {
    %c0_i32 = arith.constant 0 : i32
    %c0_i32_0 = arith.constant 0 : i32
    %c0_i32_1 = arith.constant 0 : i32
    return %c0_i32, %c0_i32_0 : i32, i32
  }
  func.func @transform_10(%arg0: i32) -> (i32, i32) {
    %c0_i32 = arith.constant 0 : i32
    %c0_i32_0 = arith.constant 0 : i32
    %c0_i32_1 = arith.constant 0 : i32
    return %c0_i32, %c0_i32_0 : i32, i32
  }
  func.func @transform_11(%arg0: i32) -> (i32, i32) {
    %c0_i32 = arith.constant 0 : i32
    %c0_i32_0 = arith.constant 0 : i32
    %c0_i32_1 = arith.constant 0 : i32
    return %c0_i32, %c0_i32_0 : i32, i32
  }
  func.func @transform_12(%arg0: i32) -> (i32, i32) {
    %c0_i32 = arith.constant 0 : i32
    %c0_i32_0 = arith.constant 0 : i32
    %c0_i32_1 = arith.constant 0 : i32
    return %c0_i32, %c0_i32_0 : i32, i32
  }
  func.func @transform_13(%arg0: i32) -> (i32, i32, i32) {
    %c0_i32 = arith.constant 0 : i32
    %c0_i32_0 = arith.constant 0 : i32
    %c0_i32_1 = arith.constant 0 : i32
    return %arg0, %c0_i32, %c0_i32_0 : i32, i32, i32
  }
}

</mosaic_0001>

<bundles_post_ra>
// kernel: cnn_forward.1
= control target key start
LH: loop header
LB: loop body
LE: loop exit
PB: predicated region body
PF: predicated region fallthrough
CT: control target
= control target key end

     0   :  { %s5238_s29 = smov 17   ;;  %s5239_s25 = smov 16   ;;  %s10630_s0 = inlined_call_operand.vmem [shape: f32[1,16,512], index: 0, kind: input, shape index: {}]   ;;  %s10631_s1 = inlined_call_operand.vmem [shape: f32[8,32,512], index: 1, kind: input, shape index: {}]   ;;  %s10632_s2 = inlined_call_operand.vmem [shape: f32[1,512], index: 2, kind: input, shape index: {}]   ;;  %s10633_s3 = inlined_call_operand.vmem [shape: bf16[32,144], index: 3, kind: input, shape index: {}]   ;;  %s10634_s4 = inlined_call_operand.vmem [shape: f32[32,1], index: 4, kind: input, shape index: {}]   ;;  %s10635_s5 = inlined_call_operand.vmem [shape: bf16[32,288], index: 5, kind: input, shape index: {}]   ;;  %s10636_s6 = inlined_call_operand.vmem [shape: f32[32,1], index: 6, kind: input, shape index: {}]   ;;  %s10637_s7 = inlined_call_operand.vmem [shape: bf16[32,288], index: 7, kind: input, shape index: {}]   ;;  %s10638_s8 = inlined_call_operand.vmem [shape: f32[32,1], index: 8, kind: input, shape index: {}]   ;;  %s10639_s9 = inlined_call_operand.vmem [shape: bf16[32,288], index: 9, kind: input, shape index: {}]   ;;  %s10640_s10 = inlined_call_operand.vmem [shape: f32[32,1], index: 10, kind: input, shape index: {}]   ;;  %s10641_s11 = inlined_call_operand.vmem [shape: f32[32,10], index: 11, kind: input, shape index: {}]   ;;  %s10642_s12 = inlined_call_operand.vmem [shape: f32[1,10], index: 12, kind: input, shape index: {}]   ;;  %s10643_s13 = inlined_call_operand.hbm [shape: f32[1,2,10], index: 13, kind: output, shape index: {}]  }
   0x1   :  { %v5324_v0 = vld [vmem:[%s10630_s0 + $0x8] sm:$0xff]  ;;  %v5329_v1 = vld [vmem:[%s10630_s0] sm:$0xff]  ;;  %v5352_v4 = vld [vmem:[%s10630_s0 + $0x30] sm:$0xff] }
   0x2   :  { %58 = vrot.lane.b32.xlu1 %v5324_v0, %s5238_s29  ;;  %54 = vrot.lane.b32.xlu0 %v5329_v1, %s5238_s29  ;;  %v5338_v2 = vld [vmem:[%s10630_s0 + $0x28] sm:$0xff]  ;;  %v5343_v3 = vld [vmem:[%s10630_s0 + $0x20] sm:$0xff] }
   0x3   :  { %v5357_v5 = vld [vmem:[%s10630_s0 + $0x10] sm:$0xff]  ;;  %v5366_v6 = vld [vmem:[%s10630_s0 + $0x38] sm:$0xff] }
   0x4   :  { %v5371_v7 = vld [vmem:[%s10630_s0 + $0x18] sm:$0xff] }
   0x6   :  { %60 = vrot.lane.b32.xlu1 %v5338_v2, %s5238_s29  ;;  %56 = vrot.lane.b32.xlu0 %v5343_v3, %s5238_s29 }
   0xa   :  { %64 = vrot.lane.b32.xlu1 %v5352_v4, %s5238_s29  ;;  %62 = vrot.lane.b32.xlu0 %v5357_v5, %s5238_s29 }
   0xe   :  { %68 = vrot.lane.b32.xlu1 %v5366_v6, %s5238_s29  ;;  %66 = vrot.lane.b32.xlu0 %v5371_v7, %s5238_s29 }
  0x12   :  { %107 = vrot.lane.b32.xlu1 %v5343_v3, %s5239_s25  ;;  %105 = vrot.lane.b32.xlu0 %v5329_v1, %s5239_s25 }
  0x13   :  { %18 = vsyncpa [#allocation6], 0  ;;  %s5240_s0 = smov 15   ;;  %s5241_s26 = smov 1   ;;  %v10644_v8 = vlaneseq  ;;  %v5156_v10 = vld [vmem:[%s10633_s3 + $0x4] ss:$8 sps:$4 sm:$0xff]  }
  0x14   :  { %s5242_s27 = smov 127   ;;  %s5243_s28 = smov 113   ;;  %vm545_vm0 = vcmask 130048   ;;  %v82_v14 = vld [vmem:[%s10631_s1 + $0x8] sm:$0xff]  ;;  %v83_v26 = vld [vmem:[%s10631_s1 + $0x10] sm:$0xff]  ;;  %v81_v28 = vld [vmem:[%s10631_s1] sm:$0xff] }
  0x15   :  { %s5244_s30 = smov 112   ;;  %v5474_v9 = vand.u32 127, %v10644_v8  ;;  %s5245_s14 = smov 111   ;;  %4649 = vmatprep.mubr.msk.bf16.mxu0 %vm545_vm0, %v5156_v10  ;;  %4651 = vmatprep.mubr.msk.bf16.mxu1 %vm545_vm0, %v5156_v10  ;;  %v86_v15 = vld [vmem:[%s10631_s1 + $0x28] sm:$0xff]  ;;  %v87_v27 = vld [vmem:[%s10631_s1 + $0x30] sm:$0xff]  ;;  %v85_v29 = vld [vmem:[%s10631_s1 + $0x20] sm:$0xff] }
  0x16   :  { %111 = vrot.lane.b32.xlu1 %v5338_v2, %s5239_s25  ;;  %109 = vrot.lane.b32.xlu0 %v5324_v0, %s5239_s25  ;;  %v84_v30 = vld [vmem:[%s10631_s1 + $0x18] sm:$0xff]  ;;  %v504_v44 = vld [vmem:[%s10634_s4 + $0x8] sm:$0xff]  ;;  %v10645_v50 = vmov 0   ;;  %vm1624_vm9 = vcmask 261120   ;;  %vm5248_vm10 = vmmov 0   ;;  %vm4452_vm11 = vcmask 7168  }
  0x17   :  { %vm72_vm1 = vcmp.lt.s32.totalorder %v5474_v9, 17  ;;  %v88_v31 = vld [vmem:[%s10631_s1 + $0x38] sm:$0xff]  ;;  %v503_v45 = vld [vmem:[%s10634_s4] sm:$0xff]  ;;  %5153 = vset.pattern.permute.xlu1 %v10645_v50  ;;  %5152 = vset.pattern.permute.xlu0 %v10645_v50  ;;  %vm121_vm2 = vcmp.lt.s32.totalorder %v5474_v9, 16  ;;  %v505_v52 = vld [vmem:[%s10634_s4 + $0x10] sm:$0xff]  ;;  %vm171_vm3 = vcmp.lt.s32.totalorder %v5474_v9, 15 }
  0x18   :  { %v506_v53 = vld [vmem:[%s10634_s4 + $0x18] sm:$0xff]  ;;  %v4594_v54 = vld [vmem:[%s10631_s1 + $0xa8] sm:$0xff]  ;;  %vm221_vm4 = vcmp.lt.s32.totalorder %v5474_v9, 1  ;;  %vm279_vm5 = vcmp.lt.s32.totalorder %v5474_v9, 127  ;;  %vm329_vm6 = vcmp.lt.s32.totalorder %v5474_v9, 113  ;;  %vm379_vm7 = vcmp.lt.s32.totalorder %v5474_v9, 112 }
  0x19   :  { %v4590_v55 = vld [vmem:[%s10631_s1 + $0x88] sm:$0xff]  ;;  %vm429_vm8 = vcmp.lt.s32.totalorder %v5474_v9, 111  ;;  %s5250_s16 = smov [#allocation5]   ;;  %vm4573_vm12 = vcmask 74752  }
  0x1a   :  { %115 = vrot.lane.b32.xlu1 %v5352_v4, %s5239_s25  ;;  %113 = vrot.lane.b32.xlu0 %v5357_v5, %s5239_s25  ;;  %v5183_v9 = vld [vmem:[%s10639_s9 + $0x20] ss:$12 sps:$4 sm:$0xff]  }
  0x1e   :  { %119 = vrot.lane.b32.xlu1 %v5366_v6, %s5239_s25  ;;  %117 = vrot.lane.b32.xlu0 %v5371_v7, %s5239_s25 }
  0x22   :  { %157 = vrot.lane.b32.xlu1 %v5343_v3, %s5240_s0  ;;  %155 = vrot.lane.b32.xlu0 %v5329_v1, %s5240_s0 }
  0x26   :  { %161 = vrot.lane.b32.xlu1 %v5338_v2, %s5240_s0  ;;  %159 = vrot.lane.b32.xlu0 %v5324_v0, %s5240_s0 }
  0x2a   :  { %165 = vrot.lane.b32.xlu1 %v5352_v4, %s5240_s0  ;;  %163 = vrot.lane.b32.xlu0 %v5357_v5, %s5240_s0 }
  0x2e   :  { %169 = vrot.lane.b32.xlu1 %v5366_v6, %s5240_s0  ;;  %167 = vrot.lane.b32.xlu0 %v5371_v7, %s5240_s0 }
  0x32   :  { %207 = vrot.lane.b32.xlu1 %v5343_v3, %s5241_s26  ;;  %205 = vrot.lane.b32.xlu0 %v5329_v1, %s5241_s26 }
  0x36   :  { %211 = vrot.lane.b32.xlu1 %v5338_v2, %s5241_s26  ;;  %209 = vrot.lane.b32.xlu0 %v5324_v0, %s5241_s26 }
  0x3a   :  { %215 = vrot.lane.b32.xlu1 %v5352_v4, %s5241_s26  ;;  %213 = vrot.lane.b32.xlu0 %v5357_v5, %s5241_s26 }
  0x3e   :  { %219 = vrot.lane.b32.xlu1 %v5366_v6, %s5241_s26  ;;  %217 = vrot.lane.b32.xlu0 %v5371_v7, %s5241_s26 }
  0x42   :  { %265 = vrot.lane.b32.xlu1 %v5343_v3, %s5242_s27  ;;  %263 = vrot.lane.b32.xlu0 %v5329_v1, %s5242_s27 }
  0x46   :  { %269 = vrot.lane.b32.xlu1 %v5338_v2, %s5242_s27  ;;  %267 = vrot.lane.b32.xlu0 %v5324_v0, %s5242_s27 }
  0x4a   :  { %273 = vrot.lane.b32.xlu1 %v5352_v4, %s5242_s27  ;;  %271 = vrot.lane.b32.xlu0 %v5357_v5, %s5242_s27 }
  0x4e   :  { %277 = vrot.lane.b32.xlu1 %v5366_v6, %s5242_s27  ;;  %275 = vrot.lane.b32.xlu0 %v5371_v7, %s5242_s27 }
  0x52   :  { %315 = vrot.lane.b32.xlu1 %v5343_v3, %s5243_s28  ;;  %313 = vrot.lane.b32.xlu0 %v5329_v1, %s5243_s28 }
  0x56   :  { %319 = vrot.lane.b32.xlu1 %v5338_v2, %s5243_s28  ;;  %317 = vrot.lane.b32.xlu0 %v5324_v0, %s5243_s28 }
  0x5a   :  { %323 = vrot.lane.b32.xlu1 %v5352_v4, %s5243_s28  ;;  %321 = vrot.lane.b32.xlu0 %v5357_v5, %s5243_s28 }
  0x5e   :  { %327 = vrot.lane.b32.xlu1 %v5366_v6, %s5243_s28  ;;  %325 = vrot.lane.b32.xlu0 %v5371_v7, %s5243_s28 }
  0x62   :  { %365 = vrot.lane.b32.xlu1 %v5343_v3, %s5244_s30  ;;  %363 = vrot.lane.b32.xlu0 %v5329_v1, %s5244_s30 }
  0x66   :  { %369 = vrot.lane.b32.xlu1 %v5338_v2, %s5244_s30  ;;  %367 = vrot.lane.b32.xlu0 %v5324_v0, %s5244_s30 }
  0x6a   :  { %373 = vrot.lane.b32.xlu1 %v5352_v4, %s5244_s30  ;;  %371 = vrot.lane.b32.xlu0 %v5357_v5, %s5244_s30 }
  0x6e   :  { %377 = vrot.lane.b32.xlu1 %v5366_v6, %s5244_s30  ;;  %375 = vrot.lane.b32.xlu0 %v5371_v7, %s5244_s30 }
  0x72   :  { %415 = vrot.lane.b32.xlu1 %v5343_v3, %s5245_s14  ;;  %413 = vrot.lane.b32.xlu0 %v5329_v1, %s5245_s14 }
  0x74   :  { %v59_v11 = vpop.permute.xlu1 %58  ;;  %v55_v12 = vpop.permute.xlu0 %54 }
  0x75   :  { %v77_v13 = vsel %vm72_vm1, %v55_v12, %v59_v11 }
  0x76   :  { %419 = vrot.lane.b32.xlu1 %v5338_v2, %s5245_s14  ;;  %417 = vrot.lane.b32.xlu0 %v5324_v0, %s5245_s14  ;;  %v90_v19 = vmul.f32 %v82_v14, %v77_v13  ;;  %v4591_v13 = vld [vmem:[%s10631_s1 + $0x90] sm:$0xff] }
  0x78   :  { %v61_v16 = vpop.permute.xlu1 %60  ;;  %v57_v17 = vpop.permute.xlu0 %56 }
  0x79   :  { %v78_v18 = vsel %vm72_vm1, %v57_v17, %v61_v16 }
  0x7a   :  { %423 = vrot.lane.b32.xlu1 %v5352_v4, %s5245_s14  ;;  %421 = vrot.lane.b32.xlu0 %v5357_v5, %s5245_s14  ;;  %v94_v20 = vmul.f32 %v86_v15, %v78_v18  ;;  %v4593_v15 = vld [vmem:[%s10631_s1 + $0xa0] sm:$0xff]  ;;  %v4592_v18 = vld [vmem:[%s10631_s1 + $0x98] sm:$0xff] }
  0x7c   :  { %v65_v21 = vpop.permute.xlu1 %64  ;;  %v63_v22 = vpop.permute.xlu0 %62  ;;  %v98_v23 = vpack.c.bf16 %v94_v20, %v90_v19 }
  0x7d   :  { %v76_v24 = vsel %vm72_vm1, %v61_v16, %v65_v21  ;;  %v75_v25 = vsel %vm72_vm1, %v59_v11, %v63_v22  ;;  %v4595_v11 = vld [vmem:[%s10631_s1 + $0xb0] sm:$0xff]  ;;  %v4596_v16 = vld [vmem:[%s10631_s1 + $0xb8] sm:$0xff] }
  0x7e   :  { %427 = vrot.lane.b32.xlu1 %v5366_v6, %s5245_s14  ;;  %425 = vrot.lane.b32.xlu0 %v5371_v7, %s5245_s14  ;;  %v91_v34 = vmul.f32 %v83_v26, %v75_v25  ;;  %v95_v35 = vmul.f32 %v87_v27, %v76_v24 }
  0x7f   :  { %552 = vmatprep.subr.bf16.mxu0 %v98_v23 }
  0x80   :  { %v69_v32 = vpop.permute.xlu1 %68  ;;  %v67_v33 = vpop.permute.xlu0 %66  ;;  %v99_v51 = vpack.c.bf16 %v95_v35, %v91_v34 }
  0x81   :  { %v80_v36 = vsel %vm72_vm1, %v69_v32, %v57_v17  ;;  %v79_v37 = vsel %vm72_vm1, %v67_v33, %v55_v12  ;;  %v73_v38 = vsel %vm72_vm1, %v63_v22, %v67_v33  ;;  %v74_v39 = vsel %vm72_vm1, %v65_v21, %v69_v32  ;;  %v4589_v17 = vld [vmem:[%s10631_s1 + $0x80] sm:$0xff] }
  0x82   :  { %v89_v40 = vmul.f32 %v81_v28, %v79_v37  ;;  %v93_v41 = vmul.f32 %v85_v29, %v80_v36  ;;  %v92_v42 = vmul.f32 %v84_v30, %v73_v38  ;;  %v96_v43 = vmul.f32 %v88_v31, %v74_v39  ;;  %514 = vperm.xlu1 %5153, %v504_v44   ;;  %v4602_v36 = vld [vmem:[%s10631_s1 + $0x128] sm:$0xff] }
  0x83   :  { %509 = vperm.xlu0 %5152, %v503_v45   ;;  %v4598_v37 = vld [vmem:[%s10631_s1 + $0x108] sm:$0xff] }
  0x84   :  { %v108_v46 = vpop.permute.xlu1 %107  ;;  %v106_v47 = vpop.permute.xlu0 %105  ;;  %v97_v48 = vpack.c.bf16 %v93_v41, %v89_v40  ;;  %v100_v49 = vpack.c.bf16 %v96_v43, %v92_v42 }
  0x86   :  { %553 = vmatpush1.bf16.msra.mxu0 %v97_v48  ;;  %605 = vmatprep.subr.bf16.mxu1 %v100_v49  ;;  %v4599_v49 = vld [vmem:[%s10631_s1 + $0x110] sm:$0xff] }
  0x87   :  { %606 = vmatpush1.bf16.msra.mxu1 %v99_v51  ;;  %519 = vperm.xlu1 %5153, %v505_v52   ;;  %v4601_v52 = vld [vmem:[%s10631_s1 + $0x120] sm:$0xff] }
  0x88   :  { %v112_v56 = vpop.permute.xlu1 %111  ;;  %v110_v57 = vpop.permute.xlu0 %109  ;;  %524 = vperm.xlu0 %5152, %v506_v53   ;;  %v4604_v53 = vld [vmem:[%s10631_s1 + $0x138] sm:$0xff] }
  0x89   :  { %v127_v58 = vsel %vm121_vm2, %v108_v46, %v112_v56  ;;  %v126_v59 = vsel %vm121_vm2, %v106_v47, %v110_v57 }
  0x8a   :  { %v144_v60 = vmul.f32 %v4594_v54, %v127_v58  ;;  %v140_v61 = vmul.f32 %v4590_v55, %v126_v59  ;;  %v4597_v54 = vld [vmem:[%s10631_s1 + $0x100] sm:$0xff]  ;;  %v4600_v55 = vld [vmem:[%s10631_s1 + $0x118] sm:$0xff] }
  0x8c   :  { %v116_v62 = vpop.permute.xlu1 %115  ;;  %v114_v63 = vpop.permute.xlu0 %113  ;;  %v148_v10 = vpack.c.bf16 %v144_v60, %v140_v61 }
  0x8d   :  { %v125_v12 = vsel %vm121_vm2, %v112_v56, %v116_v62  ;;  %v124_v14 = vsel %vm121_vm2, %v110_v57, %v114_v63 }
  0x8e   :  { %554 = vmatprep.subr.bf16.mxu0 %v148_v10  ;;  %v145_v19 = vmul.f32 %v4595_v11, %v125_v12  ;;  %v141_v20 = vmul.f32 %v4591_v13, %v124_v14 }
  0x90   :  { %v120_v21 = vpop.permute.xlu1 %119  ;;  %v118_v22 = vpop.permute.xlu0 %117  ;;  %v149_v35 = vpack.c.bf16 %v145_v19, %v141_v20  ;;  %v4610_v19 = vld [vmem:[%s10631_s1 + $0x1a8] sm:$0xff] }
  0x91   :  { %v123_v23 = vsel %vm121_vm2, %v116_v62, %v120_v21  ;;  %v129_v24 = vsel %vm121_vm2, %v120_v21, %v108_v46  ;;  %v122_v25 = vsel %vm121_vm2, %v114_v63, %v118_v22  ;;  %v128_v26 = vsel %vm121_vm2, %v118_v22, %v106_v47  ;;  %v4603_v47 = vld [vmem:[%s10631_s1 + $0x130] sm:$0xff]  ;;  %v4606_v20 = vld [vmem:[%s10631_s1 + $0x188] sm:$0xff] }
  0x92   :  { %v143_v27 = vmul.f32 %v4593_v15, %v129_v24  ;;  %v146_v28 = vmul.f32 %v4596_v16, %v123_v23  ;;  %v139_v29 = vmul.f32 %v4589_v17, %v128_v26  ;;  %v142_v30 = vmul.f32 %v4592_v18, %v122_v25 }
  0x94   :  { %v158_v31 = vpop.permute.xlu1 %157  ;;  %v156_v32 = vpop.permute.xlu0 %155  ;;  %v147_v33 = vpack.c.bf16 %v143_v27, %v139_v29  ;;  %v150_v34 = vpack.c.bf16 %v146_v28, %v142_v30  ;;  %v4611_v30 = vld [vmem:[%s10631_s1 + $0x1b0] sm:$0xff] }
  0x96   :  { %555 = vmatpush1.bf16.msra.mxu0 %v147_v33  ;;  %607 = vmatprep.subr.bf16.mxu1 %v150_v34  ;;  %v4609_v34 = vld [vmem:[%s10631_s1 + $0x1a0] sm:$0xff] }
  0x97   :  { %608 = vmatpush1.bf16.msra.mxu1 %v149_v35  ;;  %v4612_v35 = vld [vmem:[%s10631_s1 + $0x1b8] sm:$0xff] }
  0x98   :  { %v162_v38 = vpop.permute.xlu1 %161  ;;  %v160_v39 = vpop.permute.xlu0 %159 }
  0x99   :  { %v177_v40 = vsel %vm171_vm3, %v158_v31, %v162_v38  ;;  %v176_v41 = vsel %vm171_vm3, %v156_v32, %v160_v39 }
  0x9a   :  { %v194_v42 = vmul.f32 %v4602_v36, %v177_v40  ;;  %v190_v43 = vmul.f32 %v4598_v37, %v176_v41  ;;  %v4605_v36 = vld [vmem:[%s10631_s1 + $0x180] sm:$0xff]  ;;  %v4608_v37 = vld [vmem:[%s10631_s1 + $0x198] sm:$0xff] }
  0x9c   :  { %v166_v44 = vpop.permute.xlu1 %165  ;;  %v164_v45 = vpop.permute.xlu0 %163  ;;  %v198_v46 = vpack.c.bf16 %v194_v42, %v190_v43 }
  0x9d   :  { %v175_v48 = vsel %vm171_vm3, %v162_v38, %v166_v44  ;;  %v174_v51 = vsel %vm171_vm3, %v160_v39, %v164_v45 }
  0x9e   :  { %556 = vmatprep.subr.bf16.mxu0 %v198_v46  ;;  %v195_v56 = vmul.f32 %v4603_v47, %v175_v48  ;;  %v191_v57 = vmul.f32 %v4599_v49, %v174_v51  ;;  %v256_v51 = vpack.c.bf16 %v5338_v2, %v5324_v0  ;;  %v257_v0 = vpack.c.bf16 %v5352_v4, %v5357_v5  ;;  %v4614_v4 = vld [vmem:[%s10631_s1 + $0x208] sm:$0xff] }
  0xa0   :  { %v170_v58 = vpop.permute.xlu1 %169  ;;  %v168_v59 = vpop.permute.xlu0 %167  ;;  %v199_v18 = vpack.c.bf16 %v195_v56, %v191_v57  ;;  %v258_v56 = vpack.c.bf16 %v5366_v6, %v5371_v7  ;;  %v4617_v6 = vld [vmem:[%s10631_s1 + $0x220] sm:$0xff] }
  0xa1   :  { %v173_v60 = vsel %vm171_vm3, %v166_v44, %v170_v58  ;;  %v179_v61 = vsel %vm171_vm3, %v170_v58, %v158_v31  ;;  %v172_v62 = vsel %vm171_vm3, %v164_v45, %v168_v59  ;;  %v178_v63 = vsel %vm171_vm3, %v168_v59, %v156_v32  ;;  %v4607_v32 = vld [vmem:[%s10631_s1 + $0x190] sm:$0xff] }
  0xa2   :  { %v193_v10 = vmul.f32 %v4601_v52, %v179_v61  ;;  %v196_v11 = vmul.f32 %v4604_v53, %v173_v60  ;;  %v189_v12 = vmul.f32 %v4597_v54, %v178_v63  ;;  %v192_v13 = vmul.f32 %v4600_v55, %v172_v62  ;;  %v4613_v60 = vld [vmem:[%s10631_s1 + $0x200] sm:$0xff] }
  0xa3   :  { %v255_v58 = vpack.c.bf16 %v5343_v3, %v5329_v1  ;;  %v4618_v3 = vld [vmem:[%s10631_s1 + $0x228] sm:$0xff] }
  0xa4   :  { %v208_v14 = vpop.permute.xlu1 %207  ;;  %v206_v15 = vpop.permute.xlu0 %205  ;;  %v197_v16 = vpack.c.bf16 %v193_v10, %v189_v12  ;;  %v200_v17 = vpack.c.bf16 %v196_v11, %v192_v13 }
  0xa6   :  { %557 = vmatpush1.bf16.msra.mxu0 %v197_v16  ;;  %609 = vmatprep.subr.bf16.mxu1 %v200_v17  ;;  %v4615_v16 = vld [vmem:[%s10631_s1 + $0x210] sm:$0xff]  ;;  %v4616_v17 = vld [vmem:[%s10631_s1 + $0x218] sm:$0xff] }
  0xa7   :  { %610 = vmatpush1.bf16.msra.mxu1 %v199_v18 }
  0xa8   :  { %v212_v21 = vpop.permute.xlu1 %211  ;;  %v210_v22 = vpop.permute.xlu0 %209 }
  0xa9   :  { %v227_v23 = vsel %vm221_vm4, %v208_v14, %v212_v21  ;;  %v226_v24 = vsel %vm221_vm4, %v206_v15, %v210_v22 }
  0xaa   :  { %v244_v25 = vmul.f32 %v4610_v19, %v227_v23  ;;  %v240_v26 = vmul.f32 %v4606_v20, %v226_v24 }
  0xac   :  { %v216_v27 = vpop.permute.xlu1 %215  ;;  %v214_v28 = vpop.permute.xlu0 %213  ;;  %v248_v29 = vpack.c.bf16 %v244_v25, %v240_v26 }
  0xad   :  { %v225_v31 = vsel %vm221_vm4, %v212_v21, %v216_v27  ;;  %v224_v33 = vsel %vm221_vm4, %v210_v22, %v214_v28 }
  0xae   :  { %558 = vmatprep.subr.bf16.mxu0 %v248_v29  ;;  %v245_v38 = vmul.f32 %v4611_v30, %v225_v31  ;;  %v241_v39 = vmul.f32 %v4607_v32, %v224_v33 }
  0xb0   :  { %v220_v40 = vpop.permute.xlu1 %219  ;;  %v218_v41 = vpop.permute.xlu0 %217  ;;  %v249_v57 = vpack.c.bf16 %v245_v38, %v241_v39  ;;  %v4621_v38 = vld [vmem:[%s10631_s1 + $0x280] sm:$0xff] }
  0xb1   :  { %v223_v42 = vsel %vm221_vm4, %v216_v27, %v220_v40  ;;  %v229_v43 = vsel %vm221_vm4, %v220_v40, %v208_v14  ;;  %v222_v44 = vsel %vm221_vm4, %v214_v28, %v218_v41  ;;  %v228_v45 = vsel %vm221_vm4, %v218_v41, %v206_v15  ;;  %v4619_v14 = vld [vmem:[%s10631_s1 + $0x230] sm:$0xff]  ;;  %v4620_v15 = vld [vmem:[%s10631_s1 + $0x238] sm:$0xff]  ;;  %v4626_v40 = vld [vmem:[%s10631_s1 + $0x2a8] sm:$0xff] }
  0xb2   :  { %v243_v46 = vmul.f32 %v4609_v34, %v229_v43  ;;  %v246_v47 = vmul.f32 %v4612_v35, %v223_v42  ;;  %v239_v48 = vmul.f32 %v4605_v36, %v228_v45  ;;  %v242_v49 = vmul.f32 %v4608_v37, %v222_v44  ;;  %v4625_v36 = vld [vmem:[%s10631_s1 + $0x2a0] sm:$0xff]  ;;  %v4622_v41 = vld [vmem:[%s10631_s1 + $0x288] sm:$0xff] }
  0xb4   :  { %v266_v52 = vpop.permute.xlu1 %265  ;;  %v264_v53 = vpop.permute.xlu0 %263  ;;  %v247_v54 = vpack.c.bf16 %v243_v46, %v239_v48  ;;  %v250_v55 = vpack.c.bf16 %v246_v47, %v242_v49 }
  0xb6   :  { %559 = vmatpush1.bf16.msra.mxu0 %v247_v54  ;;  %611 = vmatprep.subr.bf16.mxu1 %v250_v55  ;;  %v4624_v54 = vld [vmem:[%s10631_s1 + $0x298] sm:$0xff] }
  0xb7   :  { %612 = vmatpush1.bf16.msra.mxu1 %v249_v57  ;;  %560 = vmatprep.subr.bf16.mxu0 %v256_v51  ;;  %v4627_v51 = vld [vmem:[%s10631_s1 + $0x2b0] sm:$0xff] }
  0xb8   :  { %v270_v2 = vpop.permute.xlu1 %269  ;;  %v268_v59 = vpop.permute.xlu0 %267  ;;  %613 = vmatprep.subr.bf16.mxu1 %v258_v56 }
  0xb9   :  { %v285_v7 = vsel %vm279_vm5, %v266_v52, %v270_v2  ;;  %v284_v1 = vsel %vm279_vm5, %v264_v53, %v268_v59 }
  0xba   :  { %561 = vmatpush1.bf16.msra.mxu0 %v255_v58  ;;  %v301_v5 = vmul.f32 %v4617_v6, %v285_v7  ;;  %v297_v61 = vmul.f32 %v4613_v60, %v284_v1 }
  0xbb   :  { %614 = vmatpush1.bf16.msra.mxu1 %v257_v0 }
  0xbc   :  { %v274_v62 = vpop.permute.xlu1 %273  ;;  %v272_v63 = vpop.permute.xlu0 %271  ;;  %v305_v21 = vpack.c.bf16 %v301_v5, %v297_v61 }
  0xbd   :  { %v283_v10 = vsel %vm279_vm5, %v270_v2, %v274_v62  ;;  %v282_v11 = vsel %vm279_vm5, %v268_v59, %v272_v63 }
  0xbe   :  { %v302_v12 = vmul.f32 %v4618_v3, %v283_v10  ;;  %v298_v13 = vmul.f32 %v4614_v4, %v282_v11  ;;  %v4633_v11 = vld [vmem:[%s10631_s1 + $0x320] sm:$0xff] }
  0xc0   :  { %v278_v18 = vpop.permute.xlu1 %277  ;;  %v276_v19 = vpop.permute.xlu0 %275  ;;  %v306_v20 = vpack.c.bf16 %v302_v12, %v298_v13  ;;  %v4629_v13 = vld [vmem:[%s10631_s1 + $0x300] sm:$0xff] }
  0xc1   :  { %v281_v22 = vsel %vm279_vm5, %v274_v62, %v278_v18  ;;  %v287_v23 = vsel %vm279_vm5, %v278_v18, %v266_v52  ;;  %v280_v24 = vsel %vm279_vm5, %v272_v63, %v276_v19  ;;  %v286_v25 = vsel %vm279_vm5, %v276_v19, %v264_v53  ;;  %v4628_v52 = vld [vmem:[%s10631_s1 + $0x2b8] sm:$0xff]  ;;  %v4623_v53 = vld [vmem:[%s10631_s1 + $0x290] sm:$0xff] }
  0xc2   :  { %v303_v26 = vmul.f32 %v4619_v14, %v281_v22  ;;  %v304_v27 = vmul.f32 %v4620_v15, %v287_v23  ;;  %v299_v28 = vmul.f32 %v4615_v16, %v280_v24  ;;  %v300_v29 = vmul.f32 %v4616_v17, %v286_v25  ;;  %562 = vmatprep.subr.bf16.mxu0 %v306_v20  ;;  %v4634_v15 = vld [vmem:[%s10631_s1 + $0x328] sm:$0xff]  ;;  %v4635_v25 = vld [vmem:[%s10631_s1 + $0x330] sm:$0xff] }
  0xc3   :  { %563 = vmatpush1.bf16.msra.mxu0 %v305_v21  ;;  %v4630_v16 = vld [vmem:[%s10631_s1 + $0x308] sm:$0xff] }
  0xc4   :  { %v316_v30 = vpop.permute.xlu1 %315  ;;  %v314_v31 = vpop.permute.xlu0 %313  ;;  %v308_v32 = vpack.c.bf16 %v304_v27, %v300_v29  ;;  %v307_v33 = vpack.c.bf16 %v303_v26, %v299_v28  ;;  %v4636_v26 = vld [vmem:[%s10631_s1 + $0x338] sm:$0xff]  ;;  %v4631_v27 = vld [vmem:[%s10631_s1 + $0x310] sm:$0xff] }
  0xc5   :  { %v4632_v28 = vld [vmem:[%s10631_s1 + $0x318] sm:$0xff] }
  0xc6   :  { %615 = vmatprep.subr.bf16.mxu1 %v308_v32 }
  0xc7   :  { %616 = vmatpush1.bf16.msra.mxu1 %v307_v33 }
  0xc8   :  { %v320_v34 = vpop.permute.xlu1 %319  ;;  %v318_v35 = vpop.permute.xlu0 %317 }
  0xc9   :  { %v335_v37 = vsel %vm329_vm6, %v316_v30, %v320_v34  ;;  %v334_v39 = vsel %vm329_vm6, %v314_v31, %v318_v35 }
  0xca   :  { %v351_v42 = vmul.f32 %v4625_v36, %v335_v37  ;;  %v347_v43 = vmul.f32 %v4621_v38, %v334_v39 }
  0xcc   :  { %v324_v44 = vpop.permute.xlu1 %323  ;;  %v322_v45 = vpop.permute.xlu0 %321  ;;  %v355_v58 = vpack.c.bf16 %v351_v42, %v347_v43 }
  0xcd   :  { %v333_v46 = vsel %vm329_vm6, %v320_v34, %v324_v44  ;;  %v332_v47 = vsel %vm329_vm6, %v318_v35, %v322_v45 }
  0xce   :  { %v352_v48 = vmul.f32 %v4626_v40, %v333_v46  ;;  %v348_v49 = vmul.f32 %v4622_v41, %v332_v47  ;;  %v4641_v47 = vld [vmem:[%s10631_s1 + $0x3a0] sm:$0xff] }
  0xd0   :  { %v328_v55 = vpop.permute.xlu1 %327  ;;  %v326_v56 = vpop.permute.xlu0 %325  ;;  %v356_v57 = vpack.c.bf16 %v352_v48, %v348_v49  ;;  %v4637_v49 = vld [vmem:[%s10631_s1 + $0x380] sm:$0xff] }
  0xd1   :  { %v331_v0 = vsel %vm329_vm6, %v324_v44, %v328_v55  ;;  %v337_v2 = vsel %vm329_vm6, %v328_v55, %v316_v30  ;;  %v330_v59 = vsel %vm329_vm6, %v322_v45, %v326_v56  ;;  %v336_v6 = vsel %vm329_vm6, %v326_v56, %v314_v31 }
  0xd2   :  { %v353_v7 = vmul.f32 %v4627_v51, %v331_v0  ;;  %v354_v60 = vmul.f32 %v4628_v52, %v337_v2  ;;  %v349_v1 = vmul.f32 %v4623_v53, %v330_v59  ;;  %v350_v3 = vmul.f32 %v4624_v54, %v336_v6  ;;  %564 = vmatprep.subr.bf16.mxu0 %v356_v57  ;;  %v4642_v52 = vld [vmem:[%s10631_s1 + $0x3a8] sm:$0xff]  ;;  %v4643_v6 = vld [vmem:[%s10631_s1 + $0x3b0] sm:$0xff] }
  0xd3   :  { %565 = vmatpush1.bf16.msra.mxu0 %v355_v58  ;;  %v4638_v53 = vld [vmem:[%s10631_s1 + $0x388] sm:$0xff] }
  0xd4   :  { %v366_v4 = vpop.permute.xlu1 %365  ;;  %v364_v5 = vpop.permute.xlu0 %363  ;;  %v358_v61 = vpack.c.bf16 %v354_v60, %v350_v3  ;;  %v357_v62 = vpack.c.bf16 %v353_v7, %v349_v1  ;;  %v4644_v7 = vld [vmem:[%s10631_s1 + $0x3b8] sm:$0xff]  ;;  %v4639_v60 = vld [vmem:[%s10631_s1 + $0x390] sm:$0xff] }
  0xd5   :  { %v4640_v1 = vld [vmem:[%s10631_s1 + $0x398] sm:$0xff] }
  0xd6   :  { %617 = vmatprep.subr.bf16.mxu1 %v358_v61 }
  0xd7   :  { %618 = vmatpush1.bf16.msra.mxu1 %v357_v62 }
  0xd8   :  { %v370_v63 = vpop.permute.xlu1 %369  ;;  %v368_v10 = vpop.permute.xlu0 %367 }
  0xd9   :  { %v385_v12 = vsel %vm379_vm7, %v366_v4, %v370_v63  ;;  %v384_v14 = vsel %vm379_vm7, %v364_v5, %v368_v10 }
  0xda   :  { %v401_v17 = vmul.f32 %v4633_v11, %v385_v12  ;;  %v397_v18 = vmul.f32 %v4629_v13, %v384_v14 }
  0xdc   :  { %v374_v19 = vpop.permute.xlu1 %373  ;;  %v372_v20 = vpop.permute.xlu0 %371  ;;  %v405_v32 = vpack.c.bf16 %v401_v17, %v397_v18  ;;  %v5157_v17 = vld [vmem:[%s10633_s3 + $0x14] ss:$8 sps:$4 sm:$0xff]  }
  0xdd   :  { %v383_v21 = vsel %vm379_vm7, %v370_v63, %v374_v19  ;;  %v382_v22 = vsel %vm379_vm7, %v368_v10, %v372_v20 }
  0xde   :  { %v402_v23 = vmul.f32 %v4634_v15, %v383_v21  ;;  %v398_v24 = vmul.f32 %v4630_v16, %v382_v22  ;;  %v5154_v16 = vld [vmem:[%s10633_s3] ss:$8 sps:$4 sm:$0xff]  }
  0xe0   :  { %v378_v29 = vpop.permute.xlu1 %377  ;;  %v376_v30 = vpop.permute.xlu0 %375  ;;  %v406_v31 = vpack.c.bf16 %v402_v23, %v398_v24 }
  0xe1   :  { %v381_v33 = vsel %vm379_vm7, %v374_v19, %v378_v29  ;;  %v387_v34 = vsel %vm379_vm7, %v378_v29, %v366_v4  ;;  %v380_v35 = vsel %vm379_vm7, %v372_v20, %v376_v30  ;;  %v386_v36 = vsel %vm379_vm7, %v376_v30, %v364_v5  ;;  %v5159_v20 = vld [vmem:[%s10633_s3 + $0x10] ss:$8 sps:$4 sm:$0xff]  }
  0xe2   :  { %v403_v37 = vmul.f32 %v4635_v25, %v381_v33  ;;  %v404_v38 = vmul.f32 %v4636_v26, %v387_v34  ;;  %v399_v39 = vmul.f32 %v4631_v27, %v380_v35  ;;  %v400_v40 = vmul.f32 %v4632_v28, %v386_v36  ;;  %566 = vmatprep.subr.bf16.mxu0 %v406_v31 }
  0xe3   :  { %567 = vmatpush1.bf16.msra.mxu0 %v405_v32 }
  0xe4   :  { %v416_v41 = vpop.permute.xlu1 %415  ;;  %v414_v42 = vpop.permute.xlu0 %413  ;;  %v408_v43 = vpack.c.bf16 %v404_v38, %v400_v40  ;;  %v407_v44 = vpack.c.bf16 %v403_v37, %v399_v39 }
  0xe6   :  { %619 = vmatprep.subr.bf16.mxu1 %v408_v43 }
  0xe7   :  { %620 = vmatpush1.bf16.msra.mxu1 %v407_v44 }
  0xe8   :  { %v420_v45 = vpop.permute.xlu1 %419  ;;  %v418_v46 = vpop.permute.xlu0 %417 }
  0xe9   :  { %v435_v48 = vsel %vm429_vm8, %v416_v41, %v420_v45  ;;  %v434_v51 = vsel %vm429_vm8, %v414_v42, %v418_v46 }
  0xea   :  { %v451_v54 = vmul.f32 %v4641_v47, %v435_v48  ;;  %v447_v55 = vmul.f32 %v4637_v49, %v434_v51 }
  0xec   :  { %v424_v56 = vpop.permute.xlu1 %423  ;;  %v422_v57 = vpop.permute.xlu0 %421  ;;  %v455_v61 = vpack.c.bf16 %v451_v54, %v447_v55 }
  0xed   :  { %v433_v58 = vsel %vm429_vm8, %v420_v45, %v424_v56  ;;  %v432_v0 = vsel %vm429_vm8, %v418_v46, %v422_v57 }
  0xee   :  { %v452_v2 = vmul.f32 %v4642_v52, %v433_v58  ;;  %v448_v59 = vmul.f32 %v4638_v53, %v432_v0 }
  0xf0   :  { %v428_v3 = vpop.permute.xlu1 %427  ;;  %v426_v4 = vpop.permute.xlu0 %425  ;;  %v456_v5 = vpack.c.bf16 %v452_v2, %v448_v59 }
  0xf1   :  { %v431_v62 = vsel %vm429_vm8, %v424_v56, %v428_v3  ;;  %v437_v63 = vsel %vm429_vm8, %v428_v3, %v416_v41  ;;  %v430_v10 = vsel %vm429_vm8, %v422_v57, %v426_v4  ;;  %v436_v11 = vsel %vm429_vm8, %v426_v4, %v414_v42 }
  0xf2   :  { %v453_v12 = vmul.f32 %v4643_v6, %v431_v62  ;;  %v454_v13 = vmul.f32 %v4644_v7, %v437_v63  ;;  %v449_v14 = vmul.f32 %v4639_v60, %v430_v10  ;;  %v450_v15 = vmul.f32 %v4640_v1, %v436_v11  ;;  %568 = vmatprep.subr.bf16.mxu0 %v456_v5 }
  0xf3   :  { %569 = vmatpush1.bf16.msra.mxu0 %v455_v61 }
  0xf4   :  { %v458_v18 = vpack.c.bf16 %v454_v13, %v450_v15  ;;  %v457_v19 = vpack.c.bf16 %v453_v12, %v449_v14 }
  0xf6   :  { %585 = vmatmul.mubr.bf16.vlgmr.msra.gmra.mrb[0].mxu0 %v5154_v16  ;;  %621 = vmatprep.subr.bf16.mxu1 %v458_v18 }
  0xf7   :  { %622 = vmatpush1.bf16.msra.mxu1 %v457_v19  ;;  %4650 = vmatprep.mubr.msk.bf16.mxu0 %vm545_vm0, %v5157_v17 }
  0xfa   :  { %638 = vmatmul.mubr.bf16.vlgmr.msra.gmra.mrb[0].mxu1 %v5154_v16 }
  0xfb   :  { %4652 = vmatprep.mubr.msk.bf16.mxu1 %vm545_vm0, %v5157_v17 }
  0xfe   :  { %595 = vmatmul.mubr.bf16.gmra.mrb[4].mxu0 %v5159_v20 }
 0x101   :  { %v515_v25 = vpop.permute.xlu1 %514 }
 0x102   :  { %648 = vmatmul.mubr.bf16.gmra.mrb[4].mxu1 %v5159_v20  ;;  %v510_v21 = vpop.permute.xlu0 %509 }
 0x106   :  { %v6000_v56 = vpop.permute.xlu1 %519 }
 0x107   :  { %v6004_v57 = vpop.permute.xlu0 %524 }
 0x1c9   :  { %v586_v22 = vpop.f32.mrb[0].mxu0 }
 0x1ca   :  { %v587_v23 = vadd.f32 %v586_v22, %v510_v21  ;;  %v588_v24 = vpop.f32.mrb[1].mxu0 }
 0x1cb   :  { %v590_v26 = vpop.f32.mrb[2].mxu0  ;;  %v589_v47 = vadd.f32 %v588_v24, %v510_v21 }
 0x1cc   :  { %v5858_v27 = vmax.f32 %v587_v23, 0.0  ;;  %v591_v28 = vadd.f32 %v590_v26, %v515_v25  ;;  %v592_v29 = vpop.f32.mrb[3].mxu0 }
 0x1cd   :  { %v639_v30 = vpop.f32.mrb[0].mxu1  ;;  %v593_v48 = vadd.f32 %v592_v29, %v515_v25  ;;  %v5940_v49 = vmax.f32 %v589_v47, 0.0  ;;  %v759_v47 = vld [vmem:[%s10631_s1 + $0x28] sm:$0xff] }
 0x1ce   :  { %10857 = vst [vmem:[#allocation8_spill] sm:$0xff] %v5858_v27  ;;  %v5860_v31 = vmax.f32 %v591_v28, 0.0  ;;  %v640_v32 = vadd.f32 %v639_v30, %v510_v21  ;;  %v641_v33 = vpop.f32.mrb[1].mxu1  ;;  %706 = vrot.lane.b32.xlu1 %v5858_v27, %s5238_s29 }
 0x1cf   :  { %v643_v34 = vpop.f32.mrb[2].mxu1  ;;  %10861 = vst [vmem:[#allocation12_spill] sm:$0xff] %v5940_v49  ;;  %v642_v51 = vadd.f32 %v641_v33, %v510_v21  ;;  %v5944_v52 = vmax.f32 %v593_v48, 0.0 }
 0x1d0   :  { %10858 = vst [vmem:[#allocation9_spill] sm:$0xff] %v5860_v31  ;;  %v5864_v35 = vmax.f32 %v640_v32, 0.0  ;;  %v644_v36 = vadd.f32 %v643_v34, %v515_v25  ;;  %v645_v37 = vpop.f32.mrb[3].mxu1  ;;  %708 = vrot.lane.b32.xlu0 %v5860_v31, %s5238_s29 }
 0x1d1   :  { %v5868_v38 = vpop.f32.mrb[4].mxu0  ;;  %10862 = vst [vmem:[#allocation13_spill] sm:$0xff] %v5944_v52  ;;  %v646_v53 = vadd.f32 %v645_v37, %v515_v25  ;;  %v5948_v54 = vmax.f32 %v642_v51, 0.0 }
 0x1d2   :  { %10859 = vst [vmem:[#allocation10_spill] sm:$0xff] %v5864_v35  ;;  %v5870_v39 = vmax.f32 %v644_v36, 0.0  ;;  %v5872_v40 = vpop.f32.mrb[5].mxu0  ;;  %722 = vrot.lane.b32.xlu1 %v5864_v35, %s5238_s29  ;;  %v597_v58 = vadd.f32 %v5868_v38, %v6000_v56 }
 0x1d3   :  { %v5876_v41 = vpop.f32.mrb[6].mxu0  ;;  %10863 = vst [vmem:[#allocation14_spill] sm:$0xff] %v5948_v54  ;;  %v5952_v55 = vmax.f32 %v646_v53, 0.0  ;;  %v599_v34 = vadd.f32 %v5872_v40, %v6000_v56 }
 0x1d4   :  { %10860 = vst [vmem:[#allocation11_spill] sm:$0xff] %v5870_v39  ;;  %v5878_v42 = vpop.f32.mrb[7].mxu0  ;;  %724 = vrot.lane.b32.xlu0 %v5870_v39, %s5238_s29  ;;  %v601_v2 = vadd.f32 %v5876_v41, %v6004_v57  ;;  %v6020_v6 = vmax.f32 %v597_v58, 0.0 }
 0x1d5   :  { %v5882_v43 = vpop.f32.mrb[4].mxu1  ;;  %10864 = vst [vmem:[#allocation15_spill] sm:$0xff] %v5952_v55  ;;  %v603_v37 = vadd.f32 %v5878_v42, %v6004_v57  ;;  %v6148_v41 = vmax.f32 %v599_v34, 0.0 }
 0x1d6   :  { %v5884_v44 = vpop.f32.mrb[5].mxu1  ;;  %802 = vrot.lane.b32.xlu1 %v5858_v27, %s5239_s25  ;;  %10865 = vst [vmem:[#allocation16_spill] sm:$0xff] %v6020_v6  ;;  %v650_v7 = vadd.f32 %v5882_v43, %v6000_v56  ;;  %v6028_v1 = vmax.f32 %v601_v2, 0.0 }
 0x1d7   :  { %v5888_v45 = vpop.f32.mrb[6].mxu1  ;;  %10882 = vst [vmem:[#allocation33_spill] sm:$0xff] %v6148_v41  ;;  %v652_v43 = vadd.f32 %v5884_v44, %v6000_v56  ;;  %v6163_v48 = vmax.f32 %v603_v37, 0.0 }
 0x1d8   :  { %v5890_v46 = vpop.f32.mrb[7].mxu1  ;;  %804 = vrot.lane.b32.xlu0 %v5860_v31, %s5239_s25  ;;  %10866 = vst [vmem:[#allocation17_spill] sm:$0xff] %v6028_v1  ;;  %v654_v3 = vadd.f32 %v5888_v45, %v6004_v57  ;;  %v6036_v5 = vmax.f32 %v650_v7, 0.0  ;;  %v755_v45 = vld [vmem:[%s10631_s1 + $0x8] sm:$0xff] }
 0x1d9   :  { %10883 = vst [vmem:[#allocation34_spill] sm:$0xff] %v6163_v48  ;;  %v656_v44 = vadd.f32 %v5890_v46, %v6004_v57  ;;  %v6172_v56 = vmax.f32 %v652_v43, 0.0  ;;  %v754_v46 = vld [vmem:[%s10631_s1] sm:$0xff] }
 0x1da   :  { %818 = vrot.lane.b32.xlu1 %v5864_v35, %s5239_s25  ;;  %10867 = vst [vmem:[#allocation18_spill] sm:$0xff] %v6036_v5  ;;  %v6042_v62 = vmax.f32 %v654_v3, 0.0  ;;  %v757_v3 = vld [vmem:[%s10631_s1 + $0x18] sm:$0xff]  ;;  %v758_v43 = vld [vmem:[%s10631_s1 + $0x20] sm:$0xff] }
 0x1db   :  { %10884 = vst [vmem:[#allocation35_spill] sm:$0xff] %v6172_v56 }
 0x1dc   :  { %820 = vrot.lane.b32.xlu0 %v5870_v39, %s5239_s25  ;;  %10868 = vst [vmem:[#allocation19_spill] sm:$0xff] %v6042_v62 }
 0x1de   :  { %898 = vrot.lane.b32.xlu1 %v5858_v27, %s5240_s0 }
 0x1e0   :  { %900 = vrot.lane.b32.xlu0 %v5860_v31, %s5240_s0 }
 0x1e2   :  { %914 = vrot.lane.b32.xlu1 %v5864_v35, %s5240_s0 }
 0x1e4   :  { %916 = vrot.lane.b32.xlu0 %v5870_v39, %s5240_s0 }
 0x1e6   :  { %994 = vrot.lane.b32.xlu1 %v5858_v27, %s5241_s26 }
 0x1e8   :  { %996 = vrot.lane.b32.xlu0 %v5860_v31, %s5241_s26 }
 0x1ea   :  { %1010 = vrot.lane.b32.xlu1 %v5864_v35, %s5241_s26 }
 0x1ec   :  { %1012 = vrot.lane.b32.xlu0 %v5870_v39, %s5241_s26 }
 0x1ee   :  { %1106 = vrot.lane.b32.xlu1 %v5858_v27, %s5242_s27 }
 0x1f0   :  { %1108 = vrot.lane.b32.xlu0 %v5860_v31, %s5242_s27 }
 0x1f2   :  { %1122 = vrot.lane.b32.xlu1 %v5864_v35, %s5242_s27 }
 0x1f4   :  { %1124 = vrot.lane.b32.xlu0 %v5870_v39, %s5242_s27 }
 0x1f6   :  { %1202 = vrot.lane.b32.xlu1 %v5858_v27, %s5243_s28 }
 0x1f8   :  { %1204 = vrot.lane.b32.xlu0 %v5860_v31, %s5243_s28 }
 0x1fa   :  { %1218 = vrot.lane.b32.xlu1 %v5864_v35, %s5243_s28 }
 0x1fc   :  { %1220 = vrot.lane.b32.xlu0 %v5870_v39, %s5243_s28 }
 0x1fe   :  { %1298 = vrot.lane.b32.xlu1 %v5858_v27, %s5244_s30 }
 0x200   :  { %1300 = vrot.lane.b32.xlu0 %v5860_v31, %s5244_s30 }
 0x202   :  { %1314 = vrot.lane.b32.xlu1 %v5864_v35, %s5244_s30 }
 0x204   :  { %1316 = vrot.lane.b32.xlu0 %v5870_v39, %s5244_s30 }
 0x206   :  { %1394 = vrot.lane.b32.xlu1 %v5858_v27, %s5245_s14  ;;  %v4675_v27 = vld [vmem:[%s10631_s1 + $0x130] sm:$0xff] }
 0x208   :  { %1396 = vrot.lane.b32.xlu0 %v5860_v31, %s5245_s14 }
 0x20a   :  { %714 = vrot.lane.b32.xlu1 %v5940_v49, %s5238_s29 }
 0x20c   :  { %716 = vrot.lane.b32.xlu0 %v5944_v52, %s5238_s29 }
 0x20e   :  { %730 = vrot.lane.b32.xlu1 %v5948_v54, %s5238_s29 }
 0x210   :  { %732 = vrot.lane.b32.xlu0 %v5952_v55, %s5238_s29 }
 0x212   :  { %810 = vrot.lane.b32.xlu1 %v5940_v49, %s5239_s25 }
 0x214   :  { %812 = vrot.lane.b32.xlu0 %v5944_v52, %s5239_s25 }
 0x216   :  { %826 = vrot.lane.b32.xlu1 %v5948_v54, %s5239_s25 }
 0x218   :  { %828 = vrot.lane.b32.xlu0 %v5952_v55, %s5239_s25 }
 0x21a   :  { %906 = vrot.lane.b32.xlu1 %v5940_v49, %s5240_s0 }
 0x21c   :  { %908 = vrot.lane.b32.xlu0 %v5944_v52, %s5240_s0 }
 0x21e   :  { %922 = vrot.lane.b32.xlu1 %v5948_v54, %s5240_s0 }
 0x220   :  { %924 = vrot.lane.b32.xlu0 %v5952_v55, %s5240_s0 }
 0x222   :  { %1002 = vrot.lane.b32.xlu1 %v5940_v49, %s5241_s26 }
 0x224   :  { %1004 = vrot.lane.b32.xlu0 %v5944_v52, %s5241_s26 }
 0x226   :  { %1018 = vrot.lane.b32.xlu1 %v5948_v54, %s5241_s26 }
 0x228   :  { %1020 = vrot.lane.b32.xlu0 %v5952_v55, %s5241_s26 }
 0x22a   :  { %1114 = vrot.lane.b32.xlu1 %v5940_v49, %s5242_s27 }
 0x22c   :  { %1116 = vrot.lane.b32.xlu0 %v5944_v52, %s5242_s27 }
 0x22e   :  { %1130 = vrot.lane.b32.xlu1 %v5948_v54, %s5242_s27 }
 0x230   :  { %1132 = vrot.lane.b32.xlu0 %v5952_v55, %s5242_s27 }
 0x232   :  { %1210 = vrot.lane.b32.xlu1 %v5940_v49, %s5243_s28 }
 0x234   :  { %1212 = vrot.lane.b32.xlu0 %v5944_v52, %s5243_s28 }
 0x236   :  { %1226 = vrot.lane.b32.xlu1 %v5948_v54, %s5243_s28 }
 0x238   :  { %1228 = vrot.lane.b32.xlu0 %v5952_v55, %s5243_s28 }
 0x23a   :  { %1306 = vrot.lane.b32.xlu1 %v5940_v49, %s5244_s30 }
 0x23c   :  { %1308 = vrot.lane.b32.xlu0 %v5944_v52, %s5244_s30 }
 0x23e   :  { %1322 = vrot.lane.b32.xlu1 %v5948_v54, %s5244_s30 }
 0x240   :  { %1324 = vrot.lane.b32.xlu0 %v5952_v55, %s5244_s30  ;;  %v6012_v0 = vpop.permute.xlu1 %706 }
 0x242   :  { %v6016_v59 = vpop.permute.xlu0 %708  ;;  %1402 = vrot.lane.b32.xlu1 %v5940_v49, %s5245_s14 }
 0x244   :  { %1404 = vrot.lane.b32.xlu0 %v5944_v52, %s5245_s14  ;;  %v6026_v60 = vpop.permute.xlu1 %722 }
 0x246   :  { %v6032_v4 = vpop.permute.xlu0 %724  ;;  %710 = vrot.lane.b32.xlu1 %v6020_v6, %s5238_s29 }
 0x248   :  { %712 = vrot.lane.b32.xlu0 %v6028_v1, %s5238_s29  ;;  %v6040_v61 = vpop.permute.xlu1 %802 }
 0x24a   :  { %v6044_v63 = vpop.permute.xlu0 %804  ;;  %726 = vrot.lane.b32.xlu1 %v6036_v5, %s5238_s29 }
 0x24c   :  { %728 = vrot.lane.b32.xlu0 %v6042_v62, %s5238_s29  ;;  %v6050_v10 = vpop.permute.xlu1 %818 }
 0x24e   :  { %v6052_v11 = vpop.permute.xlu0 %820  ;;  %806 = vrot.lane.b32.xlu1 %v6020_v6, %s5239_s25 }
 0x250   :  { %808 = vrot.lane.b32.xlu0 %v6028_v1, %s5239_s25  ;;  %v6058_v12 = vpop.permute.xlu1 %898 }
 0x252   :  { %v6060_v13 = vpop.permute.xlu0 %900  ;;  %822 = vrot.lane.b32.xlu1 %v6036_v5, %s5239_s25 }
 0x254   :  { %824 = vrot.lane.b32.xlu0 %v6042_v62, %s5239_s25  ;;  %v6066_v14 = vpop.permute.xlu1 %914 }
 0x256   :  { %v6068_v15 = vpop.permute.xlu0 %916  ;;  %902 = vrot.lane.b32.xlu1 %v6020_v6, %s5240_s0 }
 0x258   :  { %904 = vrot.lane.b32.xlu0 %v6028_v1, %s5240_s0  ;;  %v6074_v16 = vpop.permute.xlu1 %994 }
 0x25a   :  { %v6076_v17 = vpop.permute.xlu0 %996  ;;  %918 = vrot.lane.b32.xlu1 %v6036_v5, %s5240_s0 }
 0x25c   :  { %920 = vrot.lane.b32.xlu0 %v6042_v62, %s5240_s0  ;;  %v6082_v18 = vpop.permute.xlu1 %1010 }
 0x25e   :  { %v6084_v19 = vpop.permute.xlu0 %1012  ;;  %998 = vrot.lane.b32.xlu1 %v6020_v6, %s5241_s26 }
 0x260   :  { %1000 = vrot.lane.b32.xlu0 %v6028_v1, %s5241_s26  ;;  %v6090_v20 = vpop.permute.xlu1 %1106 }
 0x261   :  { %10869 = vst [vmem:[#allocation20_spill] sm:$0xff] %v6090_v20 }
 0x262   :  { %v6092_v21 = vpop.permute.xlu0 %1108  ;;  %1014 = vrot.lane.b32.xlu1 %v6036_v5, %s5241_s26 }
 0x263   :  { %10870 = vst [vmem:[#allocation21_spill] sm:$0xff] %v6092_v21 }
 0x264   :  { %1016 = vrot.lane.b32.xlu0 %v6042_v62, %s5241_s26  ;;  %v6098_v22 = vpop.permute.xlu1 %1122 }
 0x266   :  { %v6100_v23 = vpop.permute.xlu0 %1124  ;;  %1110 = vrot.lane.b32.xlu1 %v6020_v6, %s5242_s27 }
 0x267   :  { %10871 = vst [vmem:[#allocation22_spill] sm:$0xff] %v6100_v23 }
 0x268   :  { %1112 = vrot.lane.b32.xlu0 %v6028_v1, %s5242_s27  ;;  %v6106_v24 = vpop.permute.xlu1 %1202 }
 0x269   :  { %10872 = vst [vmem:[#allocation23_spill] sm:$0xff] %v6106_v24 }
 0x26a   :  { %v6108_v25 = vpop.permute.xlu0 %1204  ;;  %1126 = vrot.lane.b32.xlu1 %v6036_v5, %s5242_s27 }
 0x26b   :  { %10873 = vst [vmem:[#allocation24_spill] sm:$0xff] %v6108_v25 }
 0x26c   :  { %1128 = vrot.lane.b32.xlu0 %v6042_v62, %s5242_s27  ;;  %v6114_v26 = vpop.permute.xlu1 %1218 }
 0x26d   :  { %10874 = vst [vmem:[#allocation25_spill] sm:$0xff] %v6114_v26  ;;  %v1570_v26 = vld [vmem:[%s10636_s6] sm:$0xff] }
 0x26e   :  { %v6116_v28 = vpop.permute.xlu0 %1220  ;;  %1206 = vrot.lane.b32.xlu1 %v6020_v6, %s5243_s28 }
 0x26f   :  { %10875 = vst [vmem:[#allocation26_spill] sm:$0xff] %v6116_v28  ;;  %v1571_v28 = vld [vmem:[%s10636_s6 + $0x8] sm:$0xff] }
 0x270   :  { %1208 = vrot.lane.b32.xlu0 %v6028_v1, %s5243_s28  ;;  %v6122_v29 = vpop.permute.xlu1 %1298 }
 0x271   :  { %10876 = vst [vmem:[#allocation27_spill] sm:$0xff] %v6122_v29 }
 0x272   :  { %v6124_v30 = vpop.permute.xlu0 %1300  ;;  %1222 = vrot.lane.b32.xlu1 %v6036_v5, %s5243_s28 }
 0x273   :  { %10877 = vst [vmem:[#allocation28_spill] sm:$0xff] %v6124_v30 }
 0x274   :  { %1224 = vrot.lane.b32.xlu0 %v6042_v62, %s5243_s28  ;;  %v6130_v32 = vpop.permute.xlu1 %1314 }
 0x275   :  { %10878 = vst [vmem:[#allocation29_spill] sm:$0xff] %v6130_v32 }
 0x276   :  { %v6132_v33 = vpop.permute.xlu0 %1316  ;;  %1302 = vrot.lane.b32.xlu1 %v6020_v6, %s5244_s30 }
 0x277   :  { %10879 = vst [vmem:[#allocation30_spill] sm:$0xff] %v6132_v33 }
 0x278   :  { %1304 = vrot.lane.b32.xlu0 %v6028_v1, %s5244_s30  ;;  %v6140_v36 = vpop.permute.xlu1 %1394 }
 0x279   :  { %10880 = vst [vmem:[#allocation31_spill] sm:$0xff] %v6140_v36 }
 0x27a   :  { %v6144_v38 = vpop.permute.xlu0 %1396  ;;  %1318 = vrot.lane.b32.xlu1 %v6036_v5, %s5244_s30 }
 0x27b   :  { %10881 = vst [vmem:[#allocation32_spill] sm:$0xff] %v6144_v38 }
 0x27c   :  { %1320 = vrot.lane.b32.xlu0 %v6042_v62, %s5244_s30  ;;  %v715_v40 = vpop.permute.xlu1 %714 }
 0x27d   :  { %v746_v42 = vsel %vm72_vm1, %v6012_v0, %v715_v40 }
 0x27e   :  { %v717_v51 = vpop.permute.xlu0 %716  ;;  %718 = vrot.lane.b32.xlu1 %v6148_v41, %s5238_s29  ;;  %v771_v58 = vmul.f32 %v755_v45, %v746_v42  ;;  %v761_v45 = vld [vmem:[%s10631_s1 + $0x38] sm:$0xff]  ;;  %v6197_v42 = vmax.f32 %v656_v44, 0.0 }
 0x27f   :  { %v747_v53 = vsel %vm72_vm1, %v6016_v59, %v717_v51  ;;  %v743_v2 = vsel %vm72_vm1, %v717_v51, %v6032_v4 }
 0x280   :  { %v775_v7 = vmul.f32 %v759_v47, %v747_v53  ;;  %720 = vrot.lane.b32.xlu0 %v6163_v48, %s5238_s29  ;;  %v731_v57 = vpop.permute.xlu1 %730  ;;  %10885 = vst [vmem:[#allocation36_spill] sm:$0xff] %v6197_v42  ;;  %v742_v47 = vsel %vm72_vm1, %v715_v40, %v6026_v60 }
 0x281   :  { %v738_v34 = vsel %vm72_vm1, %v6026_v60, %v731_v57  ;;  %v750_v37 = vsel %vm72_vm1, %v731_v57, %v6012_v0  ;;  %v5184_v0 = vld [vmem:[%s10631_s1 + $0x30] sm:$0xff] }
 0x282   :  { %v733_v51 = vpop.permute.xlu0 %732  ;;  %734 = vrot.lane.b32.xlu1 %v6172_v56, %s5238_s29  ;;  %v787_v53 = vpack.c.bf16 %v775_v7, %v771_v58  ;;  %v776_v57 = vmul.f32 %v5184_v0, %v743_v2  ;;  %v770_v8 = vmul.f32 %v754_v46, %v750_v37  ;;  %v773_v60 = vmul.f32 %v757_v3, %v738_v34  ;;  %v5185_v2 = vld [vmem:[%s10631_s1 + $0x10] sm:$0xff] }
 0x283   :  { %v739_v44 = vsel %vm72_vm1, %v6032_v4, %v733_v51  ;;  %v751_v50 = vsel %vm72_vm1, %v733_v51, %v6016_v59  ;;  %v772_v7 = vmul.f32 %v5185_v2, %v742_v47 }
 0x284   :  { %v774_v40 = vmul.f32 %v758_v43, %v751_v50  ;;  %v777_v38 = vmul.f32 %v761_v45, %v739_v44  ;;  %736 = vrot.lane.b32.xlu0 %v6197_v42, %s5238_s29  ;;  %1631 = vmatprep.subr.bf16.mxu0 %v787_v53  ;;  %v6215_v58 = vpop.permute.xlu1 %810 }
 0x285   :  { %v788_v50 = vpack.c.bf16 %v776_v57, %v772_v7 }
 0x286   :  { %v786_v46 = vpack.c.bf16 %v774_v40, %v770_v8  ;;  %v6220_v4 = vpop.permute.xlu0 %812  ;;  %814 = vrot.lane.b32.xlu1 %v6148_v41, %s5239_s25  ;;  %v789_v59 = vpack.c.bf16 %v777_v38, %v773_v60 }
 0x288   :  { %816 = vrot.lane.b32.xlu0 %v6163_v48, %s5239_s25  ;;  %1632 = vmatpush1.bf16.msra.mxu0 %v786_v46  ;;  %v6226_v3 = vpop.permute.xlu1 %826 }
 0x289   :  { %1737 = vmatprep.subr.bf16.mxu1 %v789_v59 }
 0x28a   :  { %1738 = vmatpush1.bf16.msra.mxu1 %v788_v50  ;;  %v6228_v34 = vpop.permute.xlu0 %828  ;;  %830 = vrot.lane.b32.xlu1 %v6172_v56, %s5239_s25 }
 0x28c   :  { %832 = vrot.lane.b32.xlu0 %v6197_v42, %s5239_s25  ;;  %v6234_v8 = vpop.permute.xlu1 %906 }
 0x28e   :  { %v6236_v38 = vpop.permute.xlu0 %908  ;;  %910 = vrot.lane.b32.xlu1 %v6148_v41, %s5240_s0 }
 0x290   :  { %912 = vrot.lane.b32.xlu0 %v6163_v48, %s5240_s0  ;;  %v6242_v37 = vpop.permute.xlu1 %922 }
 0x292   :  { %v6244_v43 = vpop.permute.xlu0 %924  ;;  %926 = vrot.lane.b32.xlu1 %v6172_v56, %s5240_s0 }
 0x294   :  { %928 = vrot.lane.b32.xlu0 %v6197_v42, %s5240_s0  ;;  %v6250_v45 = vpop.permute.xlu1 %1002 }
 0x296   :  { %v6252_v47 = vpop.permute.xlu0 %1004  ;;  %1006 = vrot.lane.b32.xlu1 %v6148_v41, %s5241_s26 }
 0x298   :  { %1008 = vrot.lane.b32.xlu0 %v6163_v48, %s5241_s26  ;;  %v6258_v51 = vpop.permute.xlu1 %1018 }
 0x29a   :  { %v6260_v53 = vpop.permute.xlu0 %1020  ;;  %1022 = vrot.lane.b32.xlu1 %v6172_v56, %s5241_s26 }
 0x29c   :  { %1024 = vrot.lane.b32.xlu0 %v6197_v42, %s5241_s26  ;;  %v6266_v0 = vpop.permute.xlu1 %1114 }
 0x29e   :  { %v6268_v57 = vpop.permute.xlu0 %1116  ;;  %1410 = vrot.lane.b32.xlu1 %v5864_v35, %s5245_s14  ;;  %v4657_v35 = vld [vmem:[%s10631_s1 + $0xa0] sm:$0xff] }
 0x29f   :  { %10886 = vst [vmem:[#allocation37_spill] sm:$0xff] %v6268_v57 }
 0x2a0   :  { %1412 = vrot.lane.b32.xlu0 %v5870_v39, %s5245_s14  ;;  %v6274_v44 = vpop.permute.xlu1 %1130 }
 0x2a1   :  { %10887 = vst [vmem:[#allocation38_spill] sm:$0xff] %v6274_v44  ;;  %v1573_v44 = vld [vmem:[%s10636_s6 + $0x18] sm:$0xff] }
 0x2a2   :  { %v6276_v60 = vpop.permute.xlu0 %1132  ;;  %1118 = vrot.lane.b32.xlu1 %v6148_v41, %s5242_s27 }
 0x2a3   :  { %10888 = vst [vmem:[#allocation39_spill] sm:$0xff] %v6276_v60 }
 0x2a4   :  { %1420 = vrot.lane.b32.xlu0 %v5952_v55, %s5245_s14  ;;  %v6282_v40 = vpop.permute.xlu1 %1210 }
 0x2a5   :  { %10889 = vst [vmem:[#allocation40_spill] sm:$0xff] %v6282_v40 }
 0x2a6   :  { %v6284_v2 = vpop.permute.xlu0 %1212  ;;  %1134 = vrot.lane.b32.xlu1 %v6172_v56, %s5242_s27 }
 0x2a7   :  { %10890 = vst [vmem:[#allocation41_spill] sm:$0xff] %v6284_v2  ;;  %v1572_v2 = vld [vmem:[%s10636_s6 + $0x10] sm:$0xff] }
 0x2a8   :  { %1120 = vrot.lane.b32.xlu0 %v6163_v48, %s5242_s27  ;;  %v6290_v7 = vpop.permute.xlu1 %1226 }
 0x2a9   :  { %10891 = vst [vmem:[#allocation42_spill] sm:$0xff] %v6290_v7 }
 0x2aa   :  { %v6292_v46 = vpop.permute.xlu0 %1228  ;;  %1214 = vrot.lane.b32.xlu1 %v6148_v41, %s5243_s28 }
 0x2ab   :  { %10892 = vst [vmem:[#allocation43_spill] sm:$0xff] %v6292_v46 }
 0x2ac   :  { %1136 = vrot.lane.b32.xlu0 %v6197_v42, %s5242_s27  ;;  %v6298_v59 = vpop.permute.xlu1 %1306 }
 0x2ad   :  { %10893 = vst [vmem:[#allocation44_spill] sm:$0xff] %v6298_v59 }
 0x2ae   :  { %v6300_v50 = vpop.permute.xlu0 %1308  ;;  %1230 = vrot.lane.b32.xlu1 %v6172_v56, %s5243_s28 }
 0x2af   :  { %10894 = vst [vmem:[#allocation45_spill] sm:$0xff] %v6300_v50  ;;  %v5162_v50 = vld [vmem:[%s10635_s5 + $0x4] ss:$12 sps:$4 sm:$0xff]  }
 0x2b0   :  { %1216 = vrot.lane.b32.xlu0 %v6163_v48, %s5243_s28  ;;  %v6306_v36 = vpop.permute.xlu1 %1322  ;;  %1663 = vmatprep.mubr.bf16.mxu0 %v5162_v50 }
 0x2b1   :  { %10895 = vst [vmem:[#allocation46_spill] sm:$0xff] %v6306_v36  ;;  %1769 = vmatprep.mubr.bf16.mxu1 %v5162_v50 }
 0x2b2   :  { %v6308_v33 = vpop.permute.xlu0 %1324  ;;  %1310 = vrot.lane.b32.xlu1 %v6148_v41, %s5244_s30 }
 0x2b3   :  { %10896 = vst [vmem:[#allocation47_spill] sm:$0xff] %v6308_v33 }
 0x2b4   :  { %1232 = vrot.lane.b32.xlu0 %v6197_v42, %s5243_s28  ;;  %v6314_v30 = vpop.permute.xlu1 %1402 }
 0x2b5   :  { %10897 = vst [vmem:[#allocation48_spill] sm:$0xff] %v6314_v30 }
 0x2b6   :  { %v6319_v32 = vpop.permute.xlu0 %1404  ;;  %1326 = vrot.lane.b32.xlu1 %v6172_v56, %s5244_s30 }
 0x2b7   :  { %10898 = vst [vmem:[#allocation49_spill] sm:$0xff] %v6319_v32 }
 0x2b8   :  { %1312 = vrot.lane.b32.xlu0 %v6163_v48, %s5244_s30  ;;  %v6325_v33 = vpop.permute.xlu1 %710 }
 0x2ba   :  { %v6327_v36 = vpop.permute.xlu0 %712  ;;  %1418 = vrot.lane.b32.xlu1 %v5948_v54, %s5245_s14 }
 0x2bc   :  { %1328 = vrot.lane.b32.xlu0 %v6197_v42, %s5244_s30  ;;  %v6333_v30 = vpop.permute.xlu1 %726 }
 0x2be   :  { %v6335_v32 = vpop.permute.xlu0 %728  ;;  %1398 = vrot.lane.b32.xlu1 %v6020_v6, %s5245_s14  ;;  %v5187_v6 = vld [vmem:[%s10631_s1 + $0x188] sm:$0xff] }
 0x2c0   :  { %1400 = vrot.lane.b32.xlu0 %v6028_v1, %s5245_s14  ;;  %v6341_v50 = vpop.permute.xlu1 %806 }
 0x2c2   :  { %v6343_v29 = vpop.permute.xlu0 %808  ;;  %1406 = vrot.lane.b32.xlu1 %v6148_v41, %s5245_s14 }
 0x2c4   :  { %1408 = vrot.lane.b32.xlu0 %v6163_v48, %s5245_s14  ;;  %v6349_v59 = vpop.permute.xlu1 %822 }
 0x2c6   :  { %v6351_v7 = vpop.permute.xlu0 %824  ;;  %1414 = vrot.lane.b32.xlu1 %v6036_v5, %s5245_s14  ;;  %v938_v5 = vsel %vm171_vm3, %v6058_v12, %v6234_v8 }
 0x2c8   :  { %1416 = vrot.lane.b32.xlu0 %v6042_v62, %s5245_s14  ;;  %v6357_v24 = vpop.permute.xlu1 %902 }
 0x2ca   :  { %v6359_v40 = vpop.permute.xlu0 %904  ;;  %1422 = vrot.lane.b32.xlu1 %v6172_v56, %s5245_s14  ;;  %v1035_v56 = vsel %vm221_vm4, %v6076_v17, %v6252_v47 }
 0x2cb   :  { %10899 = vst [vmem:[#allocation50_spill] sm:$0xff] %v6359_v40 }
 0x2cc   :  { %1424 = vrot.lane.b32.xlu0 %v6197_v42, %s5245_s14  ;;  %v6368_v46 = vpop.permute.xlu1 %918 }
 0x2cd   :  { %10900 = vst [vmem:[#allocation51_spill] sm:$0xff] %v6368_v46 }
 0x2ce   :  { %v6373_v25 = vpop.permute.xlu0 %920  ;;  %1576 = vperm.xlu1 %5153, %v1570_v26  }
 0x2cf   :  { %10901 = vst [vmem:[#allocation52_spill] sm:$0xff] %v6373_v25 }
 0x2d0   :  { %1581 = vperm.xlu0 %5152, %v1571_v28   ;;  %v6378_v60 = vpop.permute.xlu1 %998 }
 0x2d1   :  { %10902 = vst [vmem:[#allocation53_spill] sm:$0xff] %v6378_v60 }
 0x2d2   :  { %v6383_v21 = vpop.permute.xlu0 %1000  ;;  %1586 = vperm.xlu1 %5153, %v1572_v2   ;;  %v839_v2 = vsel %vm121_vm2, %v6220_v4, %v6052_v11 }
 0x2d4   :  { %1591 = vperm.xlu0 %5152, %v1573_v44   ;;  %v6385_v57 = vpop.permute.xlu1 %1014  ;;  %v4659_v44 = vld [vmem:[%s10631_s1 + $0xb0] sm:$0xff] }
 0x2d5   :  { %10903 = vst [vmem:[#allocation54_spill] sm:$0xff] %v6385_v57  ;;  %v842_v57 = vsel %vm121_vm2, %v6040_v61, %v6215_v58 }
 0x2d6   :  { %v6387_v23 = vpop.permute.xlu0 %1016 }
 0x2d8   :  { %v6389_v26 = vpop.permute.xlu1 %1110 }
 0x2d9   :  { %10904 = vst [vmem:[#allocation55_spill] sm:$0xff] %v6389_v26 }
 0x2da   :  { %v6391_v46 = vpop.permute.xlu0 %1112 }
 0x2db   :  { %10905 = vst [vmem:[#allocation56_spill] sm:$0xff] %v6391_v46  ;;  %v4655_v46 = vld [vmem:[%s10631_s1 + $0x90] sm:$0xff] }
 0x2dc   :  { %v6393_v25 = vpop.permute.xlu1 %1126 }
 0x2dd   :  { %10906 = vst [vmem:[#allocation57_spill] sm:$0xff] %v6393_v25  ;;  %v4654_v25 = vld [vmem:[%s10631_s1 + $0x88] sm:$0xff] }
 0x2de   :  { %v6395_v28 = vpop.permute.xlu0 %1128 }
 0x2df   :  { %10907 = vst [vmem:[#allocation58_spill] sm:$0xff] %v6395_v28  ;;  %v843_v28 = vsel %vm121_vm2, %v6044_v63, %v6220_v4 }
 0x2e0   :  { %v6397_v60 = vpop.permute.xlu1 %1206 }
 0x2e1   :  { %10908 = vst [vmem:[#allocation59_spill] sm:$0xff] %v6397_v60 }
 0x2e2   :  { %v6399_v40 = vpop.permute.xlu0 %1208 }
 0x2e3   :  { %10909 = vst [vmem:[#allocation60_spill] sm:$0xff] %v6399_v40  ;;  %v838_v40 = vsel %vm121_vm2, %v6215_v58, %v6050_v10  ;;  %v847_v58 = vsel %vm121_vm2, %v6228_v34, %v6044_v63  ;;  %v835_v63 = vsel %vm121_vm2, %v6052_v11, %v6228_v34  ;;  %v4653_v11 = vld [vmem:[%s10631_s1 + $0x80] sm:$0xff]  ;;  %v846_v34 = vsel %vm121_vm2, %v6226_v3, %v6040_v61 }
 0x2e4   :  { %v6401_v20 = vpop.permute.xlu1 %1222  ;;  %v834_v61 = vsel %vm121_vm2, %v6050_v10, %v6226_v3  ;;  %v943_v10 = vsel %vm171_vm3, %v6244_v43, %v6060_v13 }
 0x2e5   :  { %10910 = vst [vmem:[#allocation61_spill] sm:$0xff] %v6401_v20  ;;  %v6441_v20 = vmul.f32 %v4659_v44, %v839_v2  ;;  %v6460_v2 = vmul.f32 %v4655_v46, %v838_v40  ;;  %v935_v44 = vsel %vm171_vm3, %v6236_v38, %v6068_v15  ;;  %v6478_v46 = vmul.f32 %v4654_v25, %v842_v57 }
 0x2e6   :  { %v6410_v26 = vpop.permute.xlu0 %1224  ;;  %v939_v25 = vsel %vm171_vm3, %v6060_v13, %v6236_v38  ;;  %v6507_v40 = vmul.f32 %v4657_v35, %v847_v58  ;;  %v934_v38 = vsel %vm171_vm3, %v6234_v8, %v6066_v14  ;;  %v6522_v62 = vmul.f32 %v4675_v27, %v935_v44  ;;  %v4673_v35 = vld [vmem:[%s10631_s1 + $0x120] sm:$0xff]  ;;  %v4672_v8 = vld [vmem:[%s10631_s1 + $0x118] sm:$0xff] }
 0x2e7   :  { %10911 = vst [vmem:[#allocation62_spill] sm:$0xff] %v6410_v26  ;;  %v4660_v26 = vld [vmem:[%s10631_s1 + $0xb8] sm:$0xff]  ;;  %v4669_v27 = vld [vmem:[%s10631_s1 + $0x100] sm:$0xff]  ;;  %v930_v44 = vsel %vm171_vm3, %v6066_v14, %v6242_v37  ;;  %v942_v13 = vsel %vm171_vm3, %v6242_v37, %v6058_v12  ;;  %v931_v14 = vsel %vm171_vm3, %v6068_v15, %v6244_v43  ;;  %v767_v15 = vld [vmem:[%s10631_s1 + $0x68] sm:$0xff]  ;;  %v1034_v12 = vsel %vm221_vm4, %v6074_v16, %v6250_v45 }
 0x2e8   :  { %v6419_v60 = vpop.permute.xlu1 %1302  ;;  %v6584_v37 = vmul.f32 %v4669_v27, %v942_v13  ;;  %v762_v27 = vld [vmem:[%s10631_s1 + $0x40] sm:$0xff]  ;;  %v6641_v1 = vmul.f32 %v5187_v6, %v1034_v12  ;;  %v4690_v6 = vld [vmem:[%s10631_s1 + $0x1a8] sm:$0xff] }
 0x2e9   :  { %10912 = vst [vmem:[#allocation63_spill] sm:$0xff] %v6419_v60  ;;  %v4658_v60 = vld [vmem:[%s10631_s1 + $0xa8] sm:$0xff] }
 0x2ea   :  { %v6452_v39 = vpop.permute.xlu0 %1304  ;;  %v6480_v4 = vmul.f32 %v4658_v60, %v843_v28  ;;  %v4656_v28 = vld [vmem:[%s10631_s1 + $0x98] sm:$0xff]  ;;  %v4670_v60 = vld [vmem:[%s10631_s1 + $0x108] sm:$0xff] }
 0x2eb   :  { %10913 = vst [vmem:[#allocation64_spill] sm:$0xff] %v6452_v39  ;;  %v4674_v39 = vld [vmem:[%s10631_s1 + $0x128] sm:$0xff] }
 0x2ec   :  { %v6496_v57 = vpop.permute.xlu1 %1318  ;;  %v6535_v58 = vmul.f32 %v4674_v39, %v939_v25  ;;  %v6551_v39 = vmul.f32 %v4656_v28, %v834_v61  ;;  %v6569_v28 = vmul.f32 %v4670_v60, %v938_v5  ;;  %v6571_v61 = vmul.f32 %v4673_v35, %v943_v10 }
 0x2ed   :  { %10914 = vst [vmem:[#allocation65_spill] sm:$0xff] %v6496_v57  ;;  %v6513_v57 = vmul.f32 %v4660_v26, %v835_v63  ;;  %v6533_v26 = vmul.f32 %v4653_v11, %v846_v34  ;;  %v5186_v63 = vld [vmem:[%s10631_s1 + $0x110] sm:$0xff]  ;;  %v4676_v34 = vld [vmem:[%s10631_s1 + $0x138] sm:$0xff]  ;;  %v6586_v5 = vmul.f32 %v4672_v8, %v930_v44  ;;  %v1031_v44 = vsel %vm221_vm4, %v6252_v47, %v6084_v19 }
 0x2ee   :  { %v6531_v3 = vpop.permute.xlu0 %1320  ;;  %v6556_v11 = vmul.f32 %v5186_v63, %v934_v38  ;;  %v763_v38 = vld [vmem:[%s10631_s1 + $0x48] sm:$0xff]  ;;  %v6590_v10 = vmul.f32 %v4676_v34, %v931_v14  ;;  %v4691_v8 = vld [vmem:[%s10631_s1 + $0x1b0] sm:$0xff] }
 0x2ef   :  { %10915 = vst [vmem:[#allocation66_spill] sm:$0xff] %v6531_v3  ;;  %v768_v34 = vld [vmem:[%s10631_s1 + $0x70] sm:$0xff]  ;;  %v6656_v12 = vmul.f32 %v4691_v8, %v1031_v44 }
 0x2f0   :  { %v719_v25 = vpop.permute.xlu1 %718  ;;  %v5188_v8 = vld [vmem:[%s10631_s1 + $0x190] sm:$0xff] }
 0x2f1   :  { %v748_v63 = vsel %vm72_vm1, %v6325_v33, %v719_v25 }
 0x2f2   :  { %v721_v60 = vpop.permute.xlu0 %720  ;;  %v779_v13 = vmul.f32 %v763_v38, %v748_v63  ;;  %v1030_v38 = vsel %vm221_vm4, %v6250_v45, %v6082_v18  ;;  %v765_v63 = vld [vmem:[%s10631_s1 + $0x58] sm:$0xff] }
 0x2f3   :  { %v749_v3 = vsel %vm72_vm1, %v6327_v36, %v721_v60  ;;  %v745_v14 = vsel %vm72_vm1, %v721_v60, %v6335_v32  ;;  %v766_v60 = vld [vmem:[%s10631_s1 + $0x60] sm:$0xff]  ;;  %v769_v45 = vld [vmem:[%s10631_s1 + $0x78] sm:$0xff]  ;;  %v6667_v44 = vmul.f32 %v5188_v8, %v1030_v38 }
 0x2f4   :  { %v783_v43 = vmul.f32 %v767_v15, %v749_v3  ;;  %v735_v35 = vpop.permute.xlu1 %734  ;;  %v784_v48 = vmul.f32 %v768_v34, %v745_v14  ;;  %v5190_v8 = vld [vmem:[%s10631_s1 + $0x198] sm:$0xff] }
 0x2f5   :  { %v740_v3 = vsel %vm72_vm1, %v6333_v30, %v735_v35  ;;  %v752_v15 = vsel %vm72_vm1, %v735_v35, %v6325_v33  ;;  %v764_v33 = vld [vmem:[%s10631_s1 + $0x50] sm:$0xff]  ;;  %v744_v35 = vsel %vm72_vm1, %v719_v25, %v6333_v30 }
 0x2f6   :  { %v737_v42 = vpop.permute.xlu0 %736  ;;  %v791_v41 = vpack.c.bf16 %v783_v43, %v779_v13  ;;  %v778_v54 = vmul.f32 %v762_v27, %v752_v15  ;;  %v781_v55 = vmul.f32 %v765_v63, %v740_v3  ;;  %v780_v13 = vmul.f32 %v764_v33, %v744_v35  ;;  %v4664_v33 = vld [vmem:[%s10631_s1 + $0xd8] sm:$0xff] }
 0x2f7   :  { %v741_v47 = vsel %vm72_vm1, %v6335_v32, %v737_v42  ;;  %v753_v31 = vsel %vm72_vm1, %v737_v42, %v6327_v36  ;;  %v4662_v32 = vld [vmem:[%s10631_s1 + $0xc8] sm:$0xff]  ;;  %v6680_v42 = vmul.f32 %v4690_v6, %v1035_v56  ;;  %v1038_v27 = vsel %vm221_vm4, %v6258_v51, %v6074_v16 }
 0x2f8   :  { %v782_v30 = vmul.f32 %v766_v60, %v753_v31  ;;  %v785_v25 = vmul.f32 %v769_v45, %v741_v47  ;;  %1633 = vmatprep.subr.bf16.mxu0 %v791_v41  ;;  %v815_v43 = vpop.permute.xlu1 %814  ;;  %v4666_v31 = vld [vmem:[%s10631_s1 + $0xe8] sm:$0xff]  ;;  %v981_v41 = vpack.c.bf16 %v6590_v10, %v6586_v5  ;;  %v1076_v63 = vpack.c.bf16 %v6656_v12, %v6667_v44  ;;  %v10937_v12 = vld [vmem:[#allocation43_spill] sm:$0xff] }
 0x2f9   :  { %v844_v36 = vsel %vm121_vm2, %v6341_v50, %v815_v43  ;;  %v1026_v3 = vsel %vm221_vm4, %v6082_v18, %v6258_v51  ;;  %v792_v15 = vpack.c.bf16 %v784_v48, %v780_v13  ;;  %v4661_v18 = vld [vmem:[%s10631_s1 + $0xc0] sm:$0xff]  ;;  %v10916_v47 = vpack.c.bf16 %v6480_v4, %v6478_v46  ;;  %v4663_v46 = vld [vmem:[%s10631_s1 + $0xd0] sm:$0xff] }
 0x2fa   :  { %v790_v34 = vpack.c.bf16 %v782_v30, %v778_v54  ;;  %v817_v14 = vpop.permute.xlu0 %816  ;;  %v793_v38 = vpack.c.bf16 %v785_v25, %v781_v55  ;;  %v875_v60 = vmul.f32 %v4662_v32, %v844_v36  ;;  %v4667_v54 = vld [vmem:[%s10631_s1 + $0xf0] sm:$0xff]  ;;  %v5189_v51 = vld [vmem:[%s10631_s1 + $0x180] sm:$0xff]  ;;  %v4668_v25 = vld [vmem:[%s10631_s1 + $0xf8] sm:$0xff]  ;;  %v6730_v13 = vmul.f32 %v5190_v8, %v1026_v3 }
 0x2fb   :  { %v845_v56 = vsel %vm121_vm2, %v6343_v29, %v817_v14  ;;  %v841_v55 = vsel %vm121_vm2, %v817_v14, %v6351_v7  ;;  %v6707_v45 = vmul.f32 %v5189_v51, %v1038_v27  ;;  %v4665_v30 = vld [vmem:[%s10631_s1 + $0xe0] sm:$0xff]  ;;  %v1039_v4 = vsel %vm221_vm4, %v6260_v53, %v6076_v17 }
 0x2fc   :  { %v879_v16 = vmul.f32 %v4666_v31, %v845_v56  ;;  %1634 = vmatpush1.bf16.msra.mxu0 %v790_v34  ;;  %1739 = vmatprep.subr.bf16.mxu1 %v793_v38  ;;  %v831_v48 = vpop.permute.xlu1 %830  ;;  %v840_v32 = vsel %vm121_vm2, %v815_v43, %v6349_v59  ;;  %v10917_v31 = vpack.c.bf16 %v6513_v57, %v6551_v39  ;;  %v4692_v34 = vld [vmem:[%s10631_s1 + $0x1b8] sm:$0xff] }
 0x2fd   :  { %v836_v35 = vsel %vm121_vm2, %v6349_v59, %v831_v48  ;;  %v848_v6 = vsel %vm121_vm2, %v831_v48, %v6341_v50  ;;  %1635 = vmatprep.subr.bf16.mxu0 %v10916_v47  ;;  %1740 = vmatpush1.bf16.msra.mxu1 %v792_v15  ;;  %v4689_v50 = vld [vmem:[%s10631_s1 + $0x1a0] sm:$0xff]  ;;  %v1027_v17 = vsel %vm221_vm4, %v6084_v19, %v6260_v53  ;;  %v4678_v53 = vld [vmem:[%s10631_s1 + $0x148] sm:$0xff]  ;;  %v4683_v47 = vld [vmem:[%s10631_s1 + $0x170] sm:$0xff] }
 0x2fe   :  { %v833_v36 = vpop.permute.xlu0 %832  ;;  %1741 = vmatprep.subr.bf16.mxu1 %v10917_v31  ;;  %v887_v27 = vpack.c.bf16 %v879_v16, %v875_v60  ;;  %v880_v14 = vmul.f32 %v4667_v54, %v841_v55  ;;  %v874_v39 = vmul.f32 %v4661_v18, %v848_v6  ;;  %v877_v43 = vmul.f32 %v4664_v33, %v836_v35  ;;  %v10921_v33 = vld [vmem:[#allocation50_spill] sm:$0xff] }
 0x2ff   :  { %v837_v59 = vsel %vm121_vm2, %v6351_v7, %v833_v36  ;;  %v849_v57 = vsel %vm121_vm2, %v833_v36, %v6343_v29  ;;  %v10918_v15 = vpack.c.bf16 %v6507_v40, %v6533_v26  ;;  %v6764_v60 = vmul.f32 %v4689_v50, %v1039_v4  ;;  %v4682_v40 = vld [vmem:[%s10631_s1 + $0x168] sm:$0xff] }
 0x300   :  { %v878_v38 = vmul.f32 %v4665_v30, %v849_v57  ;;  %v881_v3 = vmul.f32 %v4668_v25, %v837_v59  ;;  %v911_v56 = vpop.permute.xlu1 %910  ;;  %v876_v19 = vmul.f32 %v4663_v46, %v840_v32  ;;  %v10919_v7 = vpack.c.bf16 %v6441_v20, %v6460_v2  ;;  %v10920_v20 = vld [vmem:[#allocation20_spill] sm:$0xff]  ;;  %v4680_v46 = vld [vmem:[%s10631_s1 + $0x158] sm:$0xff]  ;;  %v10926_v57 = vld [vmem:[#allocation37_spill] sm:$0xff] }
 0x301   :  { %1636 = vmatpush1.bf16.msra.mxu0 %v10918_v15  ;;  %v940_v29 = vsel %vm171_vm3, %v6357_v24, %v911_v56  ;;  %v6778_v26 = vmul.f32 %v4692_v34, %v1027_v17  ;;  %v1075_v18 = vpack.c.bf16 %v6680_v42, %v6641_v1  ;;  %v1142_v48 = vsel %vm279_vm5, %v6266_v0, %v6098_v22  ;;  %v10922_v30 = vld [vmem:[#allocation52_spill] sm:$0xff]  ;;  %v10923_v32 = vld [vmem:[#allocation51_spill] sm:$0xff]  ;;  %v10927_v15 = vld [vmem:[#allocation21_spill] sm:$0xff] }
 0x302   :  { %1637 = vmatprep.subr.bf16.mxu0 %v887_v27  ;;  %1742 = vmatpush1.bf16.msra.mxu1 %v10919_v7  ;;  %v886_v54 = vpack.c.bf16 %v878_v38, %v874_v39  ;;  %v913_v55 = vpop.permute.xlu0 %912  ;;  %v889_v16 = vpack.c.bf16 %v881_v3, %v877_v43  ;;  %v1146_v2 = vsel %vm279_vm5, %v10920_v20, %v6266_v0  ;;  %v4677_v0 = vld [vmem:[%s10631_s1 + $0x140] sm:$0xff]  ;;  %v4684_v17 = vld [vmem:[%s10631_s1 + $0x178] sm:$0xff]  ;;  %v4695_v1 = vld [vmem:[%s10631_s1 + $0x1d0] sm:$0xff] }
 0x303   :  { %v888_v51 = vpack.c.bf16 %v880_v14, %v876_v19  ;;  %v941_v35 = vsel %vm171_vm3, %v10921_v33, %v913_v55  ;;  %v971_v6 = vmul.f32 %v4678_v53, %v940_v29  ;;  %v937_v25 = vsel %vm171_vm3, %v913_v55, %v10922_v30  ;;  %v4681_v34 = vld [vmem:[%s10631_s1 + $0x160] sm:$0xff]  ;;  %v5192_v55 = vld [vmem:[%s10631_s1 + $0x208] sm:$0xff] }
 0x304   :  { %v975_v8 = vmul.f32 %v4682_v40, %v941_v35  ;;  %1743 = vmatprep.subr.bf16.mxu1 %v889_v16  ;;  %v927_v50 = vpop.permute.xlu1 %926  ;;  %v1074_v4 = vpack.c.bf16 %v6764_v60, %v6707_v45  ;;  %v10924_v27 = vpack.c.bf16 %v6535_v58, %v6569_v28  ;;  %v5191_v14 = vld [vmem:[%s10631_s1 + $0x200] sm:$0xff]  ;;  %v4679_v28 = vld [vmem:[%s10631_s1 + $0x150] sm:$0xff]  ;;  %v936_v39 = vsel %vm171_vm3, %v911_v56, %v10923_v32 }
 0x305   :  { %1638 = vmatpush1.bf16.msra.mxu0 %v886_v54  ;;  %v932_v36 = vsel %vm171_vm3, %v10923_v32, %v927_v50  ;;  %v944_v31 = vsel %vm171_vm3, %v927_v50, %v6357_v24  ;;  %v6825_v59 = vmul.f32 %v5191_v14, %v1146_v2  ;;  %v10925_v24 = vld [vmem:[#allocation22_spill] sm:$0xff]  ;;  %v4705_v3 = vld [vmem:[%s10631_s1 + $0x220] sm:$0xff]  ;;  %v1147_v19 = vsel %vm279_vm5, %v10927_v15, %v10926_v57  ;;  %v10934_v60 = vld [vmem:[#allocation41_spill] sm:$0xff] }
 0x306   :  { %1639 = vmatprep.subr.bf16.mxu0 %v10924_v27  ;;  %1744 = vmatpush1.bf16.msra.mxu1 %v888_v51  ;;  %v1143_v58 = vsel %vm279_vm5, %v10926_v57, %v10925_v24  ;;  %v929_v43 = vpop.permute.xlu0 %928  ;;  %v983_v38 = vpack.c.bf16 %v975_v8, %v971_v6  ;;  %v976_v53 = vmul.f32 %v4683_v47, %v937_v25  ;;  %v4694_v51 = vld [vmem:[%s10631_s1 + $0x1c8] sm:$0xff] }
 0x307   :  { %1745 = vmatprep.subr.bf16.mxu1 %v981_v41  ;;  %v933_v56 = vsel %vm171_vm3, %v10922_v30, %v929_v43  ;;  %v945_v5 = vsel %vm171_vm3, %v929_v43, %v10921_v33  ;;  %v970_v10 = vmul.f32 %v4677_v0, %v944_v31  ;;  %v973_v41 = vmul.f32 %v4680_v46, %v932_v36  ;;  %v10929_v33 = vld [vmem:[#allocation53_spill] sm:$0xff] }
 0x308   :  { %v974_v29 = vmul.f32 %v4681_v34, %v945_v5  ;;  %v977_v7 = vmul.f32 %v4684_v17, %v933_v56  ;;  %v10928_v40 = vpack.c.bf16 %v6571_v61, %v6584_v37  ;;  %v1007_v54 = vpop.permute.xlu1 %1006  ;;  %v6859_v16 = vmul.f32 %v5192_v55, %v1142_v48  ;;  %v4698_v61 = vld [vmem:[%s10631_s1 + $0x1e8] sm:$0xff]  ;;  %v4696_v34 = vld [vmem:[%s10631_s1 + $0x1d8] sm:$0xff] }
 0x309   :  { %v972_v2 = vmul.f32 %v4679_v28, %v936_v39  ;;  %v1036_v35 = vsel %vm221_vm4, %v10929_v33, %v1007_v54  ;;  %v10930_v37 = vpack.c.bf16 %v6522_v62, %v6556_v11  ;;  %v6873_v48 = vmul.f32 %v4705_v3, %v1147_v19  ;;  %v5193_v8 = vld [vmem:[%s10631_s1 + $0x228] sm:$0xff]  ;;  %v10931_v62 = vld [vmem:[#allocation38_spill] sm:$0xff]  ;;  %v10933_v39 = vld [vmem:[#allocation39_spill] sm:$0xff] }
 0x30a   :  { %1640 = vmatpush1.bf16.msra.mxu0 %v10928_v40  ;;  %v982_v6 = vpack.c.bf16 %v974_v29, %v970_v10  ;;  %v1009_v47 = vpop.permute.xlu0 %1008  ;;  %v985_v30 = vpack.c.bf16 %v977_v7, %v973_v41  ;;  %v1077_v25 = vpack.c.bf16 %v6778_v26, %v6730_v13  ;;  %v6880_v0 = vmul.f32 %v5193_v8, %v1143_v58  ;;  %v4699_v13 = vld [vmem:[%s10631_s1 + $0x1f0] sm:$0xff]  ;;  %v4700_v58 = vld [vmem:[%s10631_s1 + $0x1f8] sm:$0xff] }
 0x30b   :  { %1641 = vmatprep.subr.bf16.mxu0 %v983_v38  ;;  %1746 = vmatpush1.bf16.msra.mxu1 %v10930_v37  ;;  %v1138_v11 = vsel %vm279_vm5, %v6098_v22, %v10931_v62  ;;  %v984_v50 = vpack.c.bf16 %v976_v53, %v972_v2  ;;  %v1037_v46 = vsel %vm221_vm4, %v6383_v21, %v1009_v47  ;;  %v4693_v22 = vld [vmem:[%s10631_s1 + $0x1c0] sm:$0xff]  ;;  %v10932_v17 = vld [vmem:[#allocation54_spill] sm:$0xff] }
 0x30c   :  { %v1067_v32 = vmul.f32 %v4694_v51, %v1036_v35  ;;  %v1033_v26 = vsel %vm221_vm4, %v1009_v47, %v6387_v23  ;;  %v1071_v36 = vmul.f32 %v4698_v61, %v1037_v46  ;;  %1747 = vmatprep.subr.bf16.mxu1 %v985_v30  ;;  %v1023_v31 = vpop.permute.xlu1 %1022  ;;  %v1150_v27 = vsel %vm279_vm5, %v10931_v62, %v10920_v20  ;;  %v4697_v20 = vld [vmem:[%s10631_s1 + $0x1e0] sm:$0xff]  ;;  %v4707_v3 = vld [vmem:[%s10631_s1 + $0x230] sm:$0xff]  ;;  %v4708_v5 = vld [vmem:[%s10631_s1 + $0x238] sm:$0xff] }
 0x30d   :  { %v1028_v14 = vsel %vm221_vm4, %v10932_v17, %v1023_v31  ;;  %v1040_v57 = vsel %vm221_vm4, %v1023_v31, %v10929_v33  ;;  %v1139_v43 = vsel %vm279_vm5, %v10925_v24, %v10933_v39  ;;  %v1032_v42 = vsel %vm221_vm4, %v1007_v54, %v10932_v17  ;;  %v10936_v61 = vld [vmem:[#allocation26_spill] sm:$0xff]  ;;  %v10938_v47 = vld [vmem:[#allocation25_spill] sm:$0xff]  ;;  %v10939_v30 = vld [vmem:[#allocation40_spill] sm:$0xff] }
 0x30e   :  { %1642 = vmatpush1.bf16.msra.mxu0 %v982_v6  ;;  %v1079_v38 = vpack.c.bf16 %v1071_v36, %v1067_v32  ;;  %v1151_v24 = vsel %vm279_vm5, %v10933_v39, %v10927_v15  ;;  %v1072_v19 = vmul.f32 %v4699_v13, %v1033_v26  ;;  %v1066_v10 = vmul.f32 %v4693_v22, %v1040_v57  ;;  %v10940_v8 = vld [vmem:[#allocation23_spill] sm:$0xff]  ;;  %v10941_v13 = vld [vmem:[#allocation42_spill] sm:$0xff]  ;;  %v5207_v31 = vld [vmem:[%s10631_s1 + $0x328] sm:$0xff] }
 0x30f   :  { %1643 = vmatprep.subr.bf16.mxu0 %v1075_v18  ;;  %1748 = vmatpush1.bf16.msra.mxu1 %v984_v50  ;;  %v1025_v18 = vpop.permute.xlu0 %1024  ;;  %v1069_v41 = vmul.f32 %v4696_v34, %v1028_v14  ;;  %v1068_v55 = vmul.f32 %v4695_v1, %v1032_v42  ;;  %v6966_v45 = vmul.f32 %v4707_v3, %v1139_v43  ;;  %v5196_v46 = vld [vmem:[%s10631_s1 + $0x2a0] sm:$0xff]  ;;  %v5198_v14 = vld [vmem:[%s10631_s1 + $0x2b0] sm:$0xff] }
 0x310   :  { %1749 = vmatprep.subr.bf16.mxu1 %v1077_v25  ;;  %v1029_v53 = vsel %vm221_vm4, %v6387_v23, %v1025_v18  ;;  %v1041_v56 = vsel %vm221_vm4, %v1025_v18, %v6383_v21  ;;  %v6951_v15 = vpop.permute.xlu1 %1410  ;;  %v5194_v23 = vld [vmem:[%s10631_s1 + $0x210] sm:$0xff]  ;;  %v5195_v21 = vld [vmem:[%s10631_s1 + $0x218] sm:$0xff]  ;;  %v6974_v37 = vmul.f32 %v4708_v5, %v1151_v24  ;;  %v1239_v6 = vsel %vm329_vm6, %v10934_v60, %v10936_v61  ;;  %v5199_v1 = vld [vmem:[%s10631_s1 + $0x280] sm:$0xff] }
 0x311   :  { %v1070_v29 = vmul.f32 %v4697_v20, %v1041_v56  ;;  %v1073_v7 = vmul.f32 %v4700_v58, %v1029_v53  ;;  %v6956_v40 = vmul.f32 %v5194_v23, %v1138_v11  ;;  %v6961_v54 = vmul.f32 %v5195_v21, %v1150_v27  ;;  %v5197_v27 = vld [vmem:[%s10631_s1 + $0x2a8] sm:$0xff]  ;;  %v10943_v58 = vld [vmem:[#allocation15_spill] sm:$0xff]  ;;  %v10944_v39 = vld [vmem:[#allocation14_spill] sm:$0xff] }
 0x312   :  { %1644 = vmatpush1.bf16.msra.mxu0 %v1074_v4  ;;  %v10935_v4 = vld [vmem:[#allocation24_spill] sm:$0xff]  ;;  %v1235_v44 = vsel %vm329_vm6, %v10936_v61, %v10937_v12  ;;  %v1238_v25 = vsel %vm329_vm6, %v10939_v30, %v10938_v47  ;;  %v1242_v62 = vsel %vm329_vm6, %v10940_v8, %v10939_v30  ;;  %v1187_v50 = vpack.c.bf16 %v6880_v0, %v6859_v16  ;;  %v10947_v24 = vld [vmem:[#allocation27_spill] sm:$0xff]  ;;  %v5201_v56 = vld [vmem:[%s10631_s1 + $0x290] sm:$0xff] }
 0x313   :  { %1645 = vmatprep.subr.bf16.mxu0 %v1079_v38  ;;  %1750 = vmatpush1.bf16.msra.mxu1 %v1076_v63  ;;  %v1243_v2 = vsel %vm329_vm6, %v10935_v4, %v10934_v60  ;;  %v1078_v51 = vpack.c.bf16 %v1070_v29, %v1066_v10  ;;  %v6972_v33 = vpop.permute.xlu0 %1412  ;;  %v1081_v35 = vpack.c.bf16 %v1073_v7, %v1069_v41  ;;  %v5200_v18 = vld [vmem:[%s10631_s1 + $0x288] sm:$0xff]  ;;  %v5202_v10 = vld [vmem:[%s10631_s1 + $0x2b8] sm:$0xff] }
 0x314   :  { %v1080_v63 = vpack.c.bf16 %v1072_v19, %v1068_v55  ;;  %v1119_v11 = vpop.permute.xlu1 %1118  ;;  %v6997_v32 = vmul.f32 %v5196_v46, %v1243_v2  ;;  %v1234_v26 = vsel %vm329_vm6, %v10938_v47, %v10941_v13  ;;  %v1247_v36 = vsel %vm329_vm6, %v10937_v12, %v10935_v4  ;;  %v10946_v3 = vld [vmem:[#allocation44_spill] sm:$0xff]  ;;  %v10948_v29 = vld [vmem:[#allocation29_spill] sm:$0xff]  ;;  %v10958_v30 = vld [vmem:[#allocation11_spill] sm:$0xff] }
 0x315   :  { %1751 = vmatprep.subr.bf16.mxu1 %v1081_v35  ;;  %v10942_v22 = vpack.c.bf16 %v5944_v52, %v5940_v49  ;;  %v7015_v34 = vmul.f32 %v5197_v27, %v1239_v6  ;;  %v1246_v17 = vsel %vm329_vm6, %v10941_v13, %v10940_v8  ;;  %v7024_v57 = vmul.f32 %v5198_v14, %v1235_v44  ;;  %v10949_v23 = vld [vmem:[#allocation45_spill] sm:$0xff]  ;;  %v10950_v21 = vld [vmem:[#allocation28_spill] sm:$0xff]  ;;  %v5203_v35 = vld [vmem:[%s10631_s1 + $0x298] sm:$0xff] }
 0x316   :  { %1646 = vmatpush1.bf16.msra.mxu0 %v1078_v51  ;;  %v10945_v43 = vpack.c.bf16 %v10943_v58, %v10944_v39  ;;  %v7034_v42 = vmul.f32 %v5199_v1, %v1242_v62  ;;  %v7039_v38 = vmul.f32 %v5200_v18, %v1238_v25  ;;  %v1338_v19 = vsel %vm379_vm7, %v10947_v24, %v10946_v3  ;;  %v10951_v60 = vld [vmem:[#allocation9_spill] sm:$0xff]  ;;  %v10952_v4 = vld [vmem:[#allocation8_spill] sm:$0xff]  ;;  %v10955_v44 = vld [vmem:[#allocation34_spill] sm:$0xff] }
 0x317   :  { %1647 = vmatprep.subr.bf16.mxu0 %v10942_v22  ;;  %1752 = vmatpush1.bf16.msra.mxu1 %v1080_v63  ;;  %v7026_v20 = vpop.permute.xlu0 %1420  ;;  %v1189_v53 = vpack.c.bf16 %v6974_v37, %v6961_v54  ;;  %v7050_v5 = vmul.f32 %v5201_v56, %v1234_v26  ;;  %v7055_v41 = vmul.f32 %v5202_v10, %v1247_v36  ;;  %v4710_v61 = vld [vmem:[%s10631_s1 + $0x248] sm:$0xff]  ;;  %v10959_v25 = vld [vmem:[#allocation10_spill] sm:$0xff]  ;;  %v5204_v13 = vld [vmem:[%s10631_s1 + $0x300] sm:$0xff] }
 0x318   :  { %1753 = vmatprep.subr.bf16.mxu1 %v10945_v43  ;;  %v1334_v7 = vsel %vm379_vm7, %v10946_v3, %v10948_v29  ;;  %v1339_v54 = vsel %vm379_vm7, %v10950_v21, %v10949_v23  ;;  %v1135_v55 = vpop.permute.xlu1 %1134  ;;  %v10953_v2 = vpack.c.bf16 %v10951_v60, %v10952_v4  ;;  %v7073_v37 = vmul.f32 %v5203_v35, %v1246_v17  ;;  %v10954_v6 = vld [vmem:[#allocation57_spill] sm:$0xff]  ;;  %v10961_v36 = vld [vmem:[#allocation30_spill] sm:$0xff]  ;;  %v10962_v17 = vld [vmem:[#allocation36_spill] sm:$0xff] }
 0x319   :  { %v1144_v12 = vsel %vm279_vm5, %v1119_v11, %v10954_v6  ;;  %v10956_v63 = vld [vmem:[#allocation33_spill] sm:$0xff]  ;;  %v10960_v8 = vpack.c.bf16 %v10958_v30, %v10959_v25  ;;  %v7095_v26 = vmul.f32 %v5204_v13, %v1338_v19  ;;  %v1335_v22 = vsel %vm379_vm7, %v10949_v23, %v10961_v36  ;;  %v10963_v14 = vld [vmem:[#allocation35_spill] sm:$0xff]  ;;  %v10965_v23 = vld [vmem:[#allocation58_spill] sm:$0xff] }
 0x31a   :  { %1648 = vmatpush1.bf16.msra.mxu0 %v10953_v2  ;;  %v10957_v47 = vpack.c.bf16 %v10955_v44, %v10956_v63  ;;  %v4714_v62 = vld [vmem:[%s10631_s1 + $0x268] sm:$0xff]  ;;  %v10964_v43 = vpack.c.bf16 %v10962_v17, %v10963_v14  ;;  %v5206_v19 = vld [vmem:[%s10631_s1 + $0x320] sm:$0xff]  ;;  %v1179_v13 = vmul.f32 %v4710_v61, %v1144_v12  ;;  %v7142_v28 = vmul.f32 %v5207_v31, %v1335_v22  ;;  %v4715_v22 = vld [vmem:[%s10631_s1 + $0x270] sm:$0xff] }
 0x31b   :  { %1754 = vmatpush1.bf16.msra.mxu1 %v10960_v8  ;;  %v1121_v27 = vpop.permute.xlu0 %1120  ;;  %v5205_v18 = vld [vmem:[%s10631_s1 + $0x308] sm:$0xff]  ;;  %v7114_v56 = vmul.f32 %v5206_v19, %v1339_v54  ;;  %v4713_v10 = vld [vmem:[%s10631_s1 + $0x260] sm:$0xff]  ;;  %v1140_v61 = vsel %vm279_vm5, %v10954_v6, %v1135_v55  ;;  %v4716_v6 = vld [vmem:[%s10631_s1 + $0x278] sm:$0xff] }
 0x31c   :  { %1649 = vmatprep.subr.bf16.mxu0 %v10957_v47  ;;  %1755 = vmatprep.subr.bf16.mxu1 %v10964_v43  ;;  %v7109_v3 = vmul.f32 %v5205_v18, %v1334_v7  ;;  %v1145_v2 = vsel %vm279_vm5, %v1121_v27, %v10965_v23  ;;  %v10966_v35 = vld [vmem:[#allocation56_spill] sm:$0xff]  ;;  %v10967_v8 = vld [vmem:[#allocation55_spill] sm:$0xff]  ;;  %v4711_v43 = vld [vmem:[%s10631_s1 + $0x250] sm:$0xff]  ;;  %v1215_v19 = vpop.permute.xlu1 %1214 }
 0x31d   :  { %v1149_v47 = vsel %vm279_vm5, %v10966_v35, %v1121_v27  ;;  %v4709_v7 = vld [vmem:[%s10631_s1 + $0x240] sm:$0xff]  ;;  %v1148_v54 = vsel %vm279_vm5, %v10967_v8, %v1119_v11  ;;  %v1183_v18 = vmul.f32 %v4714_v62, %v1145_v2  ;;  %v10968_v46 = vld [vmem:[#allocation17_spill] sm:$0xff]  ;;  %v4712_v11 = vld [vmem:[%s10631_s1 + $0x258] sm:$0xff]  ;;  %v1152_v12 = vsel %vm279_vm5, %v1135_v55, %v10967_v8 }
 0x31e   :  { %v10969_v51 = vld [vmem:[#allocation16_spill] sm:$0xff]  ;;  %v10971_v62 = vld [vmem:[#allocation19_spill] sm:$0xff]  ;;  %v10974_v2 = vld [vmem:[#allocation46_spill] sm:$0xff]  ;;  %v1182_v0 = vmul.f32 %v4713_v10, %v1149_v47  ;;  %v1178_v27 = vmul.f32 %v4709_v7, %v1148_v54  ;;  %v1180_v14 = vmul.f32 %v4711_v43, %v1140_v61  ;;  %v1181_v44 = vmul.f32 %v4712_v11, %v1152_v12 }
 0x31f   :  { %v10970_v1 = vpack.c.bf16 %v10968_v46, %v10969_v51  ;;  %v1330_v55 = vsel %vm379_vm7, %v10948_v29, %v10974_v2  ;;  %v1342_v16 = vsel %vm379_vm7, %v10974_v2, %v10947_v24  ;;  %v1191_v8 = vpack.c.bf16 %v1183_v18, %v1179_v13  ;;  %v5208_v47 = vld [vmem:[%s10631_s1 + $0x310] sm:$0xff]  ;;  %v4730_v13 = vld [vmem:[%s10631_s1 + $0x2e8] sm:$0xff]  ;;  %v5209_v12 = vld [vmem:[%s10631_s1 + $0x318] sm:$0xff] }
 0x320   :  { %v1231_v10 = vpop.permute.xlu1 %1230  ;;  %v7187_v7 = vmul.f32 %v5208_v47, %v1330_v55  ;;  %v10977_v54 = vld [vmem:[#allocation61_spill] sm:$0xff]  ;;  %v1190_v43 = vpack.c.bf16 %v1182_v0, %v1178_v27  ;;  %v10980_v2 = vld [vmem:[#allocation62_spill] sm:$0xff] }
 0x321   :  { %1650 = vmatpush1.bf16.msra.mxu0 %v10970_v1  ;;  %v10972_v1 = vld [vmem:[#allocation18_spill] sm:$0xff]  ;;  %v1236_v55 = vsel %vm329_vm6, %v10977_v54, %v1231_v10  ;;  %v1974_v46 = vld [vmem:[%s10631_s1 + $0x8] sm:$0xff] }
 0x322   :  { %1651 = vmatprep.subr.bf16.mxu0 %v1187_v50  ;;  %v10973_v31 = vpack.c.bf16 %v10971_v62, %v10972_v1  ;;  %v1137_v50 = vpop.permute.xlu0 %1136  ;;  %v1979_v49 = vld [vmem:[%s10631_s1 + $0x30] sm:$0xff] }
 0x323   :  { %v1141_v17 = vsel %vm279_vm5, %v10965_v23, %v1137_v50  ;;  %v1153_v29 = vsel %vm279_vm5, %v1137_v50, %v10966_v35  ;;  %v10976_v23 = vld [vmem:[#allocation47_spill] sm:$0xff]  ;;  %v5210_v50 = vld [vmem:[%s10631_s1 + $0x330] sm:$0xff] }
 0x324   :  { %1756 = vmatpush1.bf16.msra.mxu1 %v10973_v31  ;;  %v1378_v31 = vpack.c.bf16 %v7114_v56, %v7095_v26  ;;  %v1184_v63 = vmul.f32 %v4715_v22, %v1141_v17  ;;  %v1185_v24 = vmul.f32 %v4716_v6, %v1153_v29  ;;  %v1331_v35 = vsel %vm379_vm7, %v10961_v36, %v10976_v23  ;;  %v4726_v17 = vld [vmem:[%s10631_s1 + $0x2c8] sm:$0xff]  ;;  %v4729_v6 = vld [vmem:[%s10631_s1 + $0x2e0] sm:$0xff]  ;;  %v1311_v0 = vpop.permute.xlu1 %1310  ;;  %v5211_v29 = vld [vmem:[%s10631_s1 + $0x338] sm:$0xff] }
 0x325   :  { %1757 = vmatprep.subr.bf16.mxu1 %v1189_v53  ;;  %v10975_v53 = vpack.c.bf16 %v6873_v48, %v6825_v59  ;;  %v1240_v59 = vsel %vm329_vm6, %v1215_v19, %v10977_v54  ;;  %v10978_v48 = vpack.c.bf16 %v6966_v45, %v6956_v40  ;;  %v1343_v36 = vsel %vm379_vm7, %v10976_v23, %v10950_v21  ;;  %v10979_v40 = vld [vmem:[#allocation59_spill] sm:$0xff]  ;;  %v10983_v54 = vld [vmem:[#allocation48_spill] sm:$0xff] }
 0x326   :  { %v1192_v18 = vpack.c.bf16 %v1184_v63, %v1180_v14  ;;  %v1217_v11 = vpop.permute.xlu0 %1216  ;;  %v1193_v61 = vpack.c.bf16 %v1185_v24, %v1181_v44  ;;  %v7212_v22 = vmul.f32 %v5209_v12, %v1342_v16  ;;  %v1244_v45 = vsel %vm329_vm6, %v10979_v40, %v1215_v19  ;;  %v10981_v63 = vld [vmem:[#allocation60_spill] sm:$0xff]  ;;  %v4727_v19 = vld [vmem:[%s10631_s1 + $0x2d0] sm:$0xff] }
 0x327   :  { %1652 = vmatpush1.bf16.msra.mxu0 %v10975_v53  ;;  %v1241_v21 = vsel %vm329_vm6, %v1217_v11, %v10980_v2  ;;  %v1245_v44 = vsel %vm329_vm6, %v10981_v63, %v1217_v11  ;;  %v4725_v14 = vld [vmem:[%s10631_s1 + $0x2c0] sm:$0xff]  ;;  %v1275_v27 = vmul.f32 %v4726_v17, %v1240_v59  ;;  %v7243_v24 = vmul.f32 %v5211_v29, %v1343_v36  ;;  %v4728_v53 = vld [vmem:[%s10631_s1 + $0x2d8] sm:$0xff] }
 0x328   :  { %1653 = vmatprep.subr.bf16.mxu0 %v1191_v8  ;;  %1758 = vmatpush1.bf16.msra.mxu1 %v10978_v48  ;;  %v1279_v16 = vmul.f32 %v4730_v13, %v1241_v21  ;;  %v7238_v8 = vmul.f32 %v5210_v50, %v1331_v35  ;;  %v1248_v47 = vsel %vm329_vm6, %v1231_v10, %v10979_v40  ;;  %v4731_v35 = vld [vmem:[%s10631_s1 + $0x2f0] sm:$0xff]  ;;  %v4732_v17 = vld [vmem:[%s10631_s1 + $0x2f8] sm:$0xff]  ;;  %v4745_v29 = vld [vmem:[%s10631_s1 + $0x360] sm:$0xff] }
 0x329   :  { %1759 = vmatprep.subr.bf16.mxu1 %v1193_v61  ;;  %v10982_v23 = vpack.c.bf16 %v7015_v34, %v7039_v38  ;;  %v10984_v59 = vld [vmem:[#allocation31_spill] sm:$0xff]  ;;  %v1278_v10 = vmul.f32 %v4729_v6, %v1245_v44  ;;  %v10985_v34 = vpack.c.bf16 %v7055_v41, %v7073_v37  ;;  %v1379_v36 = vpack.c.bf16 %v7142_v28, %v7109_v3  ;;  %v4742_v41 = vld [vmem:[%s10631_s1 + $0x348] sm:$0xff] }
 0x32a   :  { %v7264_v48 = vsel %vm429_vm8, %v10984_v59, %v10983_v54  ;;  %v1233_v13 = vpop.permute.xlu0 %1232  ;;  %v1287_v38 = vpack.c.bf16 %v1279_v16, %v1275_v27  ;;  %v1277_v12 = vmul.f32 %v4728_v53, %v1248_v47  ;;  %v10986_v37 = vld [vmem:[#allocation65_spill] sm:$0xff]  ;;  %v10987_v6 = vpack.c.bf16 %v6997_v32, %v7034_v42  ;;  %v4741_v16 = vld [vmem:[%s10631_s1 + $0x340] sm:$0xff] }
 0x32b   :  { %1654 = vmatpush1.bf16.msra.mxu0 %v1190_v43  ;;  %v1274_v43 = vmul.f32 %v4725_v14, %v1244_v45  ;;  %v1237_v11 = vsel %vm329_vm6, %v10980_v2, %v1233_v13  ;;  %v1249_v61 = vsel %vm329_vm6, %v1233_v13, %v10981_v63  ;;  %v1336_v40 = vsel %vm379_vm7, %v1311_v0, %v10986_v37  ;;  %v1327_v45 = vpop.permute.xlu1 %1326  ;;  %v10988_v21 = vld [vmem:[#allocation49_spill] sm:$0xff]  ;;  %v10989_v63 = vld [vmem:[#allocation32_spill] sm:$0xff]  ;;  %v10991_v50 = vld [vmem:[#allocation63_spill] sm:$0xff] }
 0x32c   :  { %1655 = vmatprep.subr.bf16.mxu0 %v10982_v23  ;;  %1760 = vmatpush1.bf16.msra.mxu1 %v1192_v18  ;;  %v1276_v18 = vmul.f32 %v4727_v19, %v1236_v55  ;;  %v1280_v28 = vmul.f32 %v4731_v35, %v1237_v11  ;;  %v1281_v3 = vmul.f32 %v4732_v17, %v1249_v61  ;;  %v4746_v27 = vld [vmem:[%s10631_s1 + $0x368] sm:$0xff]  ;;  %v4743_v35 = vld [vmem:[%s10631_s1 + $0x350] sm:$0xff] }
 0x32d   :  { %1761 = vmatprep.subr.bf16.mxu1 %v10985_v34  ;;  %v1380_v2 = vpack.c.bf16 %v7238_v8, %v7187_v7  ;;  %v1435_v44 = vsel %vm429_vm8, %v10989_v63, %v10988_v21  ;;  %v10990_v14 = vpack.c.bf16 %v7024_v57, %v7050_v5  ;;  %v1381_v32 = vpack.c.bf16 %v7243_v24, %v7212_v22  ;;  %v4754_v42 = vld [vmem:[%s10631_s1 + $0x3a8] sm:$0xff]  ;;  %v10992_v24 = vld [vmem:[#allocation66_spill] sm:$0xff] }
 0x32e   :  { %v1431_v7 = vsel %vm429_vm8, %v10988_v21, %v6972_v33  ;;  %v1286_v19 = vpack.c.bf16 %v1278_v10, %v1274_v43  ;;  %v1288_v55 = vpack.c.bf16 %v1280_v28, %v1276_v18  ;;  %v1313_v57 = vpop.permute.xlu0 %1312  ;;  %v1289_v5 = vpack.c.bf16 %v1281_v3, %v1277_v12  ;;  %v10993_v47 = vld [vmem:[#allocation64_spill] sm:$0xff]  ;;  %v4752_v18 = vld [vmem:[%s10631_s1 + $0x398] sm:$0xff]  ;;  %v4747_v61 = vld [vmem:[%s10631_s1 + $0x370] sm:$0xff] }
 0x32f   :  { %1656 = vmatpush1.bf16.msra.mxu0 %v10987_v6  ;;  %v1340_v22 = vsel %vm379_vm7, %v10991_v50, %v1311_v0  ;;  %v1371_v8 = vmul.f32 %v4742_v41, %v1336_v40  ;;  %v1337_v53 = vsel %vm379_vm7, %v1313_v57, %v10992_v24  ;;  %v1341_v23 = vsel %vm379_vm7, %v10993_v47, %v1313_v57  ;;  %v4744_v0 = vld [vmem:[%s10631_s1 + $0x358] sm:$0xff]  ;;  %v1419_v34 = vpop.permute.xlu1 %1418 }
 0x330   :  { %1657 = vmatprep.subr.bf16.mxu0 %v1287_v38  ;;  %1762 = vmatpush1.bf16.msra.mxu1 %v10990_v14  ;;  %v1332_v17 = vsel %vm379_vm7, %v10986_v37, %v1327_v45  ;;  %v1344_v10 = vsel %vm379_vm7, %v1327_v45, %v10991_v50  ;;  %v1375_v13 = vmul.f32 %v4746_v27, %v1337_v53  ;;  %v4748_v12 = vld [vmem:[%s10631_s1 + $0x378] sm:$0xff] }
 0x331   :  { %1763 = vmatprep.subr.bf16.mxu1 %v1289_v5  ;;  %v1430_v38 = vsel %vm429_vm8, %v10983_v54, %v6951_v15  ;;  %v1463_v43 = vmul.f32 %v4754_v42, %v1431_v7  ;;  %v1438_v11 = vsel %vm429_vm8, %v1419_v34, %v10984_v59  ;;  %v4750_v54 = vld [vmem:[%s10631_s1 + $0x388] sm:$0xff]  ;;  %v1439_v41 = vsel %vm429_vm8, %v7026_v20, %v10989_v63  ;;  %v4756_v28 = vld [vmem:[%s10631_s1 + $0x3b8] sm:$0xff]  ;;  %v4751_v63 = vld [vmem:[%s10631_s1 + $0x390] sm:$0xff] }
 0x332   :  { %v1370_v59 = vmul.f32 %v4741_v16, %v1340_v22  ;;  %v1329_v37 = vpop.permute.xlu0 %1328  ;;  %v1383_v40 = vpack.c.bf16 %v1375_v13, %v1371_v8  ;;  %v1372_v3 = vmul.f32 %v4743_v35, %v1332_v17  ;;  %v1373_v45 = vmul.f32 %v4744_v0, %v1344_v10  ;;  %v5163_v53 = vld [vmem:[%s10635_s5 + $0x1c] ss:$12 sps:$4 sm:$0xff]  }
 0x333   :  { %1658 = vmatpush1.bf16.msra.mxu0 %v1286_v19  ;;  %v1333_v6 = vsel %vm379_vm7, %v10992_v24, %v1329_v37  ;;  %v1345_v21 = vsel %vm379_vm7, %v1329_v37, %v10993_v47  ;;  %v1426_v14 = vsel %vm429_vm8, %v6951_v15, %v1419_v34  ;;  %v1461_v27 = vmul.f32 %v4752_v18, %v1438_v11  ;;  %v1399_v7 = vpop.permute.xlu1 %1398  ;;  %v5212_v19 = vld [vmem:[%s10631_s1 + $0x3a0] sm:$0xff]  ;;  %v4755_v15 = vld [vmem:[%s10631_s1 + $0x3b0] sm:$0xff]  ;;  %v4758_v10 = vld [vmem:[%s10631_s1 + $0x3c8] sm:$0xff] }
 0x334   :  { %1659 = vmatprep.subr.bf16.mxu0 %v1379_v36  ;;  %1764 = vmatpush1.bf16.msra.mxu1 %v1288_v55  ;;  %v1374_v36 = vmul.f32 %v4745_v29, %v1341_v23  ;;  %v1377_v42 = vmul.f32 %v4748_v12, %v1345_v21  ;;  %v1462_v55 = vmul.f32 %v5212_v19, %v1435_v44  ;;  %v5160_v44 = vld [vmem:[%s10635_s5] ss:$12 sps:$4 sm:$0xff]   ;;  %v5165_v12 = vld [vmem:[%s10635_s5 + $0x18] ss:$12 sps:$4 sm:$0xff]  }
 0x335   :  { %1765 = vmatprep.subr.bf16.mxu1 %v1381_v32  ;;  %v1376_v32 = vmul.f32 %v4747_v61, %v1333_v6  ;;  %v1459_v57 = vmul.f32 %v4750_v54, %v1430_v38  ;;  %v1427_v5 = vsel %vm429_vm8, %v6972_v33, %v7026_v20  ;;  %v1465_v16 = vmul.f32 %v4756_v28, %v1439_v41  ;;  %v5213_v33 = vld [vmem:[%s10631_s1 + $0x380] sm:$0xff]  ;;  %v4762_v34 = vld [vmem:[%s10631_s1 + $0x3e8] sm:$0xff]  ;;  %v4764_v6 = vld [vmem:[%s10631_s1 + $0x3f8] sm:$0xff] }
 0x336   :  { %v1382_v26 = vpack.c.bf16 %v1374_v36, %v1370_v59  ;;  %v1385_v50 = vpack.c.bf16 %v1377_v42, %v1373_v45  ;;  %v1460_v22 = vmul.f32 %v4751_v63, %v1426_v14  ;;  %v1458_v20 = vmul.f32 %v5213_v33, %v7264_v48  ;;  %v4761_v48 = vld [vmem:[%s10631_s1 + $0x3e0] sm:$0xff]  ;;  %v4759_v59 = vld [vmem:[%s10631_s1 + $0x3d0] sm:$0xff] }
 0x337   :  { %1660 = vmatpush1.bf16.msra.mxu0 %v1378_v31  ;;  %v1384_v56 = vpack.c.bf16 %v1376_v32, %v1372_v3  ;;  %v1401_v31 = vpop.permute.xlu0 %1400  ;;  %v1475_v8 = vpack.c.bf16 %v1463_v43, %v1459_v57  ;;  %v1477_v29 = vpack.c.bf16 %v1465_v16, %v1461_v27  ;;  %v1464_v24 = vmul.f32 %v4755_v15, %v1427_v5  ;;  %v4757_v38 = vld [vmem:[%s10631_s1 + $0x3c0] sm:$0xff]  ;;  %v4763_v45 = vld [vmem:[%s10631_s1 + $0x3f0] sm:$0xff] }
 0x338   :  { %1661 = vmatprep.subr.bf16.mxu0 %v1383_v40  ;;  %1766 = vmatpush1.bf16.msra.mxu1 %v1380_v2  ;;  %v1407_v2 = vpop.permute.xlu1 %1406  ;;  %v1474_v47 = vpack.c.bf16 %v1462_v55, %v1458_v20  ;;  %v4760_v40 = vld [vmem:[%s10631_s1 + $0x3d8] sm:$0xff]  ;;  %v10994_v57 = vmov 0   ;;  %v5166_v16 = vld [vmem:[%s10635_s5 + $0x8] ss:$12 sps:$4 sm:$0xff]  }
 0x339   :  { %1767 = vmatprep.subr.bf16.mxu1 %v1385_v50  ;;  %v1476_v35 = vpack.c.bf16 %v1464_v24, %v1460_v22  ;;  %v1436_v43 = vsel %vm429_vm8, %v1399_v7, %v1407_v2 }
 0x33a   :  { %v1466_v37 = vmul.f32 %v4757_v38, %v1436_v43 }
 0x33b   :  { %1662 = vmatpush1.bf16.msra.mxu0 %v1382_v26  ;;  %v1409_v23 = vpop.permute.xlu0 %1408  ;;  %v5167_v26 = vld [vmem:[%s10635_s5 + $0x20] ss:$12 sps:$4 sm:$0xff]  }
 0x33c   :  { %1684 = vmatprep.subr.bf16.mxu0 %v1475_v8  ;;  %1768 = vmatpush1.bf16.msra.mxu1 %v1384_v56  ;;  %v1437_v0 = vsel %vm429_vm8, %v1401_v31, %v1409_v23  ;;  %v1415_v17 = vpop.permute.xlu1 %1414 }
 0x33d   :  { %1790 = vmatprep.subr.bf16.mxu1 %v1477_v29  ;;  %v1432_v13 = vsel %vm429_vm8, %v1407_v2, %v1415_v17  ;;  %v1470_v11 = vmul.f32 %v4761_v48, %v1437_v0 }
 0x33e   :  { %1664 = vmatmul.mubr.bf16.vlgmr.msra.gmra.mrb[8].mxu0 %v5160_v44  ;;  %v1467_v54 = vmul.f32 %v4758_v10, %v1432_v13 }
 0x33f   :  { %1770 = vmatmul.mubr.bf16.vlgmr.msra.gmra.mrb[8].mxu1 %v5160_v44  ;;  %1685 = vmatpush1.bf16.msra.mxu0 %v1474_v47  ;;  %v1417_v18 = vpop.permute.xlu0 %1416  ;;  %v1478_v14 = vpack.c.bf16 %v1470_v11, %v1466_v37 }
 0x340   :  { %1791 = vmatpush1.bf16.msra.mxu1 %v1476_v35  ;;  %1673 = vmatprep.mubr.bf16.mxu0 %v5163_v53  ;;  %v1433_v61 = vsel %vm429_vm8, %v1409_v23, %v1417_v18  ;;  %v1423_v36 = vpop.permute.xlu1 %1422 }
 0x341   :  { %1779 = vmatprep.mubr.bf16.mxu1 %v5163_v53  ;;  %v1471_v41 = vmul.f32 %v4762_v34, %v1433_v61  ;;  %v1428_v28 = vsel %vm429_vm8, %v1415_v17, %v1423_v36  ;;  %v1440_v3 = vsel %vm429_vm8, %v1423_v36, %v1399_v7 }
 0x342   :  { %v1468_v27 = vmul.f32 %v4759_v59, %v1428_v28  ;;  %v1469_v7 = vmul.f32 %v4760_v40, %v1440_v3 }
 0x343   :  { %v1425_v21 = vpop.permute.xlu0 %1424  ;;  %v1479_v63 = vpack.c.bf16 %v1471_v41, %v1467_v54 }
 0x344   :  { %v1429_v32 = vsel %vm429_vm8, %v1417_v18, %v1425_v21  ;;  %v1441_v42 = vsel %vm429_vm8, %v1425_v21, %v1401_v31 }
 0x345   :  { %v1472_v19 = vmul.f32 %v4763_v45, %v1429_v32  ;;  %v1473_v55 = vmul.f32 %v4764_v6, %v1441_v42  ;;  %1686 = vmatprep.subr.bf16.mxu0 %v1479_v63 }
 0x346   :  { %1674 = vmatmul.mubr.bf16.gmra.mrb[12].mxu0 %v5165_v12 }
 0x347   :  { %1780 = vmatmul.mubr.bf16.gmra.mrb[12].mxu1 %v5165_v12  ;;  %1687 = vmatpush1.bf16.msra.mxu0 %v1478_v14  ;;  %v1480_v5 = vpack.c.bf16 %v1472_v19, %v1468_v27  ;;  %v1481_v15 = vpack.c.bf16 %v1473_v55, %v1469_v7 }
 0x348   :  { %1716 = vmatprep.mubr.bf16.mxu0 %v10994_v57  ;;  %1822 = vmatprep.mubr.bf16.mxu1 %v10994_v57 }
 0x349   :  { %1792 = vmatprep.subr.bf16.mxu1 %v1481_v15 }
 0x34a   :  { %1793 = vmatpush1.bf16.msra.mxu1 %v1480_v5 }
 0x34d   :  { %v1577_v56 = vpop.permute.xlu1 %1576 }
 0x34e   :  { %4771 = vmatmul.mubr.msk.bf16.vlgmr.msra.gmra.mrb[8].mxu0 %vm1624_vm9, %v5166_v16 }
 0x34f   :  { %4773 = vmatmul.mubr.msk.bf16.vlgmr.msra.gmra.mrb[8].mxu1 %vm1624_vm9, %v5166_v16  ;;  %1726 = vmatprep.mubr.bf16.mxu0 %v10994_v57  ;;  %v1582_v31 = vpop.permute.xlu0 %1581 }
 0x350   :  { %1832 = vmatprep.mubr.bf16.mxu1 %v10994_v57 }
 0x351   :  { %v7594_v3 = vpop.permute.xlu1 %1586 }
 0x353   :  { %v7598_v45 = vpop.permute.xlu0 %1591 }
 0x356   :  { %4772 = vmatmul.mubr.msk.bf16.gmra.mrb[12].mxu0 %vm1624_vm9, %v5167_v26 }
 0x357   :  { %4774 = vmatmul.mubr.msk.bf16.gmra.mrb[12].mxu1 %vm1624_vm9, %v5167_v26 }
 0x421   :  { %v1718_v50 = vpop.f32.mrb[8].mxu0 }
 0x422   :  { %v5043_v22 = vadd.f32 %v1718_v50, %v1577_v56  ;;  %v1720_v8 = vpop.f32.mrb[9].mxu0  ;;  %v1824_v44 = vpop.f32.mrb[8].mxu1 }
 0x423   :  { %v1722_v33 = vpop.f32.mrb[10].mxu0  ;;  %v1826_v20 = vpop.f32.mrb[9].mxu1  ;;  %v5051_v29 = vadd.f32 %v1824_v44, %v1577_v56  ;;  %v5044_v12 = vadd.f32 %v1720_v8, %v1577_v56 }
 0x424   :  { %v7452_v2 = vmax.f32 %v5043_v22, 0.0  ;;  %v5045_v24 = vadd.f32 %v1722_v33, %v1582_v31  ;;  %v1724_v53 = vpop.f32.mrb[11].mxu0  ;;  %v1828_v47 = vpop.f32.mrb[10].mxu1  ;;  %v5052_v59 = vadd.f32 %v1826_v20, %v1577_v56 }
 0x425   :  { %v1830_v23 = vpop.f32.mrb[11].mxu1  ;;  %v5053_v48 = vadd.f32 %v1828_v47, %v1582_v31  ;;  %v7458_v0 = vmax.f32 %v5051_v29, 0.0  ;;  %v5046_v54 = vadd.f32 %v1724_v53, %v1582_v31  ;;  %v7534_v41 = vmax.f32 %v5044_v12, 0.0 }
 0x426   :  { %10995 = vst [vmem:[#allocation20_spill] sm:$0xff] %v7452_v2  ;;  %v7454_v35 = vmax.f32 %v5045_v24, 0.0  ;;  %1925 = vrot.lane.b32.xlu1 %v7452_v2, %s5238_s29  ;;  %v5054_v37 = vadd.f32 %v1830_v23, %v1582_v31  ;;  %v7542_v40 = vmax.f32 %v5052_v59, 0.0 }
 0x427   :  { %10997 = vst [vmem:[#allocation52_spill] sm:$0xff] %v7458_v0  ;;  %v7464_v10 = vmax.f32 %v5053_v48, 0.0  ;;  %10999 = vst [vmem:[#allocation22_spill] sm:$0xff] %v7534_v41  ;;  %v7538_v36 = vmax.f32 %v5046_v54, 0.0 }
 0x428   :  { %10996 = vst [vmem:[#allocation50_spill] sm:$0xff] %v7454_v35  ;;  %1927 = vrot.lane.b32.xlu0 %v7454_v35, %s5238_s29  ;;  %11001 = vst [vmem:[#allocation21_spill] sm:$0xff] %v7542_v40  ;;  %v7546_v28 = vmax.f32 %v5054_v37, 0.0 }
 0x429   :  { %v7462_v17 = vpop.f32.mrb[12].mxu0  ;;  %10998 = vst [vmem:[#allocation51_spill] sm:$0xff] %v7464_v10  ;;  %11000 = vst [vmem:[#allocation37_spill] sm:$0xff] %v7538_v36 }
 0x42a   :  { %v7466_v13 = vpop.f32.mrb[13].mxu0  ;;  %v7468_v34 = vpop.f32.mrb[12].mxu1  ;;  %1941 = vrot.lane.b32.xlu1 %v7458_v0, %s5238_s29  ;;  %11002 = vst [vmem:[#allocation53_spill] sm:$0xff] %v7546_v28  ;;  %v5047_v6 = vadd.f32 %v7462_v17, %v7594_v3 }
 0x42b   :  { %v7472_v38 = vpop.f32.mrb[14].mxu0  ;;  %v7474_v43 = vpop.f32.mrb[13].mxu1  ;;  %v5055_v32 = vadd.f32 %v7468_v34, %v7594_v3 }
 0x42c   :  { %v7476_v18 = vpop.f32.mrb[15].mxu0  ;;  %v7478_v11 = vpop.f32.mrb[14].mxu1  ;;  %1943 = vrot.lane.b32.xlu0 %v7464_v10, %s5238_s29  ;;  %v5049_v63 = vadd.f32 %v7472_v38, %v7598_v45  ;;  %v7614_v27 = vmax.f32 %v5047_v6, 0.0  ;;  %v5048_v6 = vadd.f32 %v7466_v13, %v7594_v3  ;;  %v5056_v1 = vadd.f32 %v7474_v43, %v7594_v3 }
 0x42d   :  { %v7482_v61 = vpop.f32.mrb[15].mxu1  ;;  %v5057_v19 = vadd.f32 %v7478_v11, %v7598_v45  ;;  %v7630_v5 = vmax.f32 %v5055_v32, 0.0  ;;  %v5050_v32 = vadd.f32 %v7476_v18, %v7598_v45 }
 0x42e   :  { %2021 = vrot.lane.b32.xlu1 %v7452_v2, %s5239_s25  ;;  %11003 = vst [vmem:[#allocation38_spill] sm:$0xff] %v7614_v27  ;;  %v7622_v7 = vmax.f32 %v5049_v63, 0.0  ;;  %v7742_v62 = vmax.f32 %v5048_v6, 0.0  ;;  %v1978_v6 = vld [vmem:[%s10631_s1 + $0x28] sm:$0xff]  ;;  %v5058_v43 = vadd.f32 %v7482_v61, %v7598_v45  ;;  %v7766_v39 = vmax.f32 %v5056_v1, 0.0  ;;  %v1973_v45 = vld [vmem:[%s10631_s1] sm:$0xff] }
 0x42f   :  { %11005 = vst [vmem:[#allocation39_spill] sm:$0xff] %v7630_v5  ;;  %v7636_v16 = vmax.f32 %v5057_v19, 0.0  ;;  %v7757_v51 = vmax.f32 %v5050_v32, 0.0 }
 0x430   :  { %2023 = vrot.lane.b32.xlu0 %v7454_v35, %s5239_s25  ;;  %11004 = vst [vmem:[#allocation54_spill] sm:$0xff] %v7622_v7  ;;  %11020 = vst [vmem:[#allocation30_spill] sm:$0xff] %v7742_v62 }
 0x431   :  { %11006 = vst [vmem:[#allocation41_spill] sm:$0xff] %v7636_v16  ;;  %11021 = vst [vmem:[#allocation58_spill] sm:$0xff] %v7757_v51 }
 0x432   :  { %2037 = vrot.lane.b32.xlu1 %v7458_v0, %s5239_s25  ;;  %11022 = vst [vmem:[#allocation56_spill] sm:$0xff] %v7766_v39 }
 0x434   :  { %2039 = vrot.lane.b32.xlu0 %v7464_v10, %s5239_s25 }
 0x436   :  { %2117 = vrot.lane.b32.xlu1 %v7452_v2, %s5240_s0 }
 0x438   :  { %2119 = vrot.lane.b32.xlu0 %v7454_v35, %s5240_s0 }
 0x43a   :  { %2133 = vrot.lane.b32.xlu1 %v7458_v0, %s5240_s0 }
 0x43c   :  { %2135 = vrot.lane.b32.xlu0 %v7464_v10, %s5240_s0 }
 0x43e   :  { %2213 = vrot.lane.b32.xlu1 %v7452_v2, %s5241_s26 }
 0x440   :  { %2215 = vrot.lane.b32.xlu0 %v7454_v35, %s5241_s26 }
 0x442   :  { %2229 = vrot.lane.b32.xlu1 %v7458_v0, %s5241_s26 }
 0x444   :  { %2231 = vrot.lane.b32.xlu0 %v7464_v10, %s5241_s26 }
 0x446   :  { %2325 = vrot.lane.b32.xlu1 %v7452_v2, %s5242_s27 }
 0x448   :  { %2327 = vrot.lane.b32.xlu0 %v7454_v35, %s5242_s27 }
 0x44a   :  { %2341 = vrot.lane.b32.xlu1 %v7458_v0, %s5242_s27 }
 0x44c   :  { %2343 = vrot.lane.b32.xlu0 %v7464_v10, %s5242_s27 }
 0x44e   :  { %2421 = vrot.lane.b32.xlu1 %v7452_v2, %s5243_s28 }
 0x450   :  { %2423 = vrot.lane.b32.xlu0 %v7454_v35, %s5243_s28 }
 0x452   :  { %2437 = vrot.lane.b32.xlu1 %v7458_v0, %s5243_s28 }
 0x454   :  { %2439 = vrot.lane.b32.xlu0 %v7464_v10, %s5243_s28 }
 0x456   :  { %2517 = vrot.lane.b32.xlu1 %v7452_v2, %s5244_s30 }
 0x458   :  { %2519 = vrot.lane.b32.xlu0 %v7454_v35, %s5244_s30 }
 0x45a   :  { %2533 = vrot.lane.b32.xlu1 %v7458_v0, %s5244_s30 }
 0x45c   :  { %2535 = vrot.lane.b32.xlu0 %v7464_v10, %s5244_s30 }
 0x45e   :  { %2613 = vrot.lane.b32.xlu1 %v7452_v2, %s5245_s14  ;;  %v4797_v2 = vld [vmem:[%s10631_s1 + $0x130] sm:$0xff] }
 0x460   :  { %2615 = vrot.lane.b32.xlu0 %v7454_v35, %s5245_s14 }
 0x462   :  { %1933 = vrot.lane.b32.xlu1 %v7534_v41, %s5238_s29 }
 0x464   :  { %1935 = vrot.lane.b32.xlu0 %v7538_v36, %s5238_s29 }
 0x466   :  { %1949 = vrot.lane.b32.xlu1 %v7542_v40, %s5238_s29 }
 0x468   :  { %1951 = vrot.lane.b32.xlu0 %v7546_v28, %s5238_s29 }
 0x46a   :  { %2029 = vrot.lane.b32.xlu1 %v7534_v41, %s5239_s25 }
 0x46c   :  { %2031 = vrot.lane.b32.xlu0 %v7538_v36, %s5239_s25 }
 0x46e   :  { %2045 = vrot.lane.b32.xlu1 %v7542_v40, %s5239_s25 }
 0x470   :  { %2047 = vrot.lane.b32.xlu0 %v7546_v28, %s5239_s25 }
 0x472   :  { %2125 = vrot.lane.b32.xlu1 %v7534_v41, %s5240_s0 }
 0x474   :  { %2127 = vrot.lane.b32.xlu0 %v7538_v36, %s5240_s0 }
 0x476   :  { %2141 = vrot.lane.b32.xlu1 %v7542_v40, %s5240_s0 }
 0x478   :  { %2143 = vrot.lane.b32.xlu0 %v7546_v28, %s5240_s0 }
 0x47a   :  { %2221 = vrot.lane.b32.xlu1 %v7534_v41, %s5241_s26 }
 0x47c   :  { %2223 = vrot.lane.b32.xlu0 %v7538_v36, %s5241_s26 }
 0x47e   :  { %2237 = vrot.lane.b32.xlu1 %v7542_v40, %s5241_s26 }
 0x480   :  { %2239 = vrot.lane.b32.xlu0 %v7546_v28, %s5241_s26 }
 0x482   :  { %2333 = vrot.lane.b32.xlu1 %v7534_v41, %s5242_s27 }
 0x484   :  { %2335 = vrot.lane.b32.xlu0 %v7538_v36, %s5242_s27 }
 0x486   :  { %2349 = vrot.lane.b32.xlu1 %v7542_v40, %s5242_s27 }
 0x488   :  { %2351 = vrot.lane.b32.xlu0 %v7546_v28, %s5242_s27 }
 0x48a   :  { %2429 = vrot.lane.b32.xlu1 %v7534_v41, %s5243_s28 }
 0x48c   :  { %2431 = vrot.lane.b32.xlu0 %v7538_v36, %s5243_s28 }
 0x48e   :  { %2445 = vrot.lane.b32.xlu1 %v7542_v40, %s5243_s28 }
 0x490   :  { %2447 = vrot.lane.b32.xlu0 %v7546_v28, %s5243_s28 }
 0x492   :  { %2525 = vrot.lane.b32.xlu1 %v7534_v41, %s5244_s30 }
 0x494   :  { %2527 = vrot.lane.b32.xlu0 %v7538_v36, %s5244_s30 }
 0x496   :  { %2541 = vrot.lane.b32.xlu1 %v7542_v40, %s5244_s30 }
 0x498   :  { %2543 = vrot.lane.b32.xlu0 %v7546_v28, %s5244_s30  ;;  %v7606_v21 = vpop.permute.xlu1 %1925 }
 0x49a   :  { %v7610_v14 = vpop.permute.xlu0 %1927  ;;  %2621 = vrot.lane.b32.xlu1 %v7534_v41, %s5245_s14 }
 0x49c   :  { %2623 = vrot.lane.b32.xlu0 %v7538_v36, %s5245_s14  ;;  %v7620_v42 = vpop.permute.xlu1 %1941 }
 0x49e   :  { %v7626_v55 = vpop.permute.xlu0 %1943  ;;  %1929 = vrot.lane.b32.xlu1 %v7614_v27, %s5238_s29 }
 0x4a0   :  { %1931 = vrot.lane.b32.xlu0 %v7622_v7, %s5238_s29  ;;  %v7634_v15 = vpop.permute.xlu1 %2021 }
 0x4a2   :  { %v7638_v26 = vpop.permute.xlu0 %2023  ;;  %1945 = vrot.lane.b32.xlu1 %v7630_v5, %s5238_s29 }
 0x4a4   :  { %1947 = vrot.lane.b32.xlu0 %v7636_v16, %s5238_s29  ;;  %v7644_v56 = vpop.permute.xlu1 %2037 }
 0x4a6   :  { %v7646_v31 = vpop.permute.xlu0 %2039  ;;  %2025 = vrot.lane.b32.xlu1 %v7614_v27, %s5239_s25 }
 0x4a8   :  { %2027 = vrot.lane.b32.xlu0 %v7622_v7, %s5239_s25  ;;  %v7652_v50 = vpop.permute.xlu1 %2117 }
 0x4aa   :  { %v7654_v22 = vpop.permute.xlu0 %2119  ;;  %2041 = vrot.lane.b32.xlu1 %v7630_v5, %s5239_s25 }
 0x4ac   :  { %2043 = vrot.lane.b32.xlu0 %v7636_v16, %s5239_s25  ;;  %v7660_v8 = vpop.permute.xlu1 %2133 }
 0x4ae   :  { %v7662_v44 = vpop.permute.xlu0 %2135  ;;  %2121 = vrot.lane.b32.xlu1 %v7614_v27, %s5240_s0 }
 0x4b0   :  { %2123 = vrot.lane.b32.xlu0 %v7622_v7, %s5240_s0  ;;  %v7668_v33 = vpop.permute.xlu1 %2213 }
 0x4b2   :  { %v7670_v20 = vpop.permute.xlu0 %2215  ;;  %2137 = vrot.lane.b32.xlu1 %v7630_v5, %s5240_s0 }
 0x4b4   :  { %2139 = vrot.lane.b32.xlu0 %v7636_v16, %s5240_s0  ;;  %v7676_v29 = vpop.permute.xlu1 %2229 }
 0x4b6   :  { %v7678_v24 = vpop.permute.xlu0 %2231  ;;  %2217 = vrot.lane.b32.xlu1 %v7614_v27, %s5241_s26 }
 0x4b8   :  { %2219 = vrot.lane.b32.xlu0 %v7622_v7, %s5241_s26  ;;  %v7684_v53 = vpop.permute.xlu1 %2325 }
 0x4b9   :  { %11007 = vst [vmem:[#allocation24_spill] sm:$0xff] %v7684_v53 }
 0x4ba   :  { %v7686_v47 = vpop.permute.xlu0 %2327  ;;  %2233 = vrot.lane.b32.xlu1 %v7630_v5, %s5241_s26 }
 0x4bb   :  { %11008 = vst [vmem:[#allocation26_spill] sm:$0xff] %v7686_v47 }
 0x4bc   :  { %2235 = vrot.lane.b32.xlu0 %v7636_v16, %s5241_s26  ;;  %v7692_v23 = vpop.permute.xlu1 %2341 }
 0x4be   :  { %v7694_v48 = vpop.permute.xlu0 %2343  ;;  %2329 = vrot.lane.b32.xlu1 %v7614_v27, %s5242_s27 }
 0x4bf   :  { %11009 = vst [vmem:[#allocation43_spill] sm:$0xff] %v7694_v48 }
 0x4c0   :  { %2331 = vrot.lane.b32.xlu0 %v7622_v7, %s5242_s27  ;;  %v7700_v17 = vpop.permute.xlu1 %2421 }
 0x4c1   :  { %11010 = vst [vmem:[#allocation25_spill] sm:$0xff] %v7700_v17 }
 0x4c2   :  { %v7702_v34 = vpop.permute.xlu0 %2423  ;;  %2345 = vrot.lane.b32.xlu1 %v7630_v5, %s5242_s27 }
 0x4c3   :  { %11011 = vst [vmem:[#allocation40_spill] sm:$0xff] %v7702_v34 }
 0x4c4   :  { %2347 = vrot.lane.b32.xlu0 %v7636_v16, %s5242_s27  ;;  %v7708_v38 = vpop.permute.xlu1 %2437 }
 0x4c5   :  { %11012 = vst [vmem:[#allocation23_spill] sm:$0xff] %v7708_v38  ;;  %v2789_v38 = vld [vmem:[%s10638_s8] sm:$0xff] }
 0x4c6   :  { %v7710_v11 = vpop.permute.xlu0 %2439  ;;  %2425 = vrot.lane.b32.xlu1 %v7614_v27, %s5243_s28 }
 0x4c7   :  { %11013 = vst [vmem:[#allocation42_spill] sm:$0xff] %v7710_v11  ;;  %v2790_v11 = vld [vmem:[%s10638_s8 + $0x8] sm:$0xff] }
 0x4c8   :  { %2427 = vrot.lane.b32.xlu0 %v7622_v7, %s5243_s28  ;;  %v7716_v12 = vpop.permute.xlu1 %2517 }
 0x4c9   :  { %11014 = vst [vmem:[#allocation44_spill] sm:$0xff] %v7716_v12 }
 0x4ca   :  { %v7718_v54 = vpop.permute.xlu0 %2519  ;;  %2441 = vrot.lane.b32.xlu1 %v7630_v5, %s5243_s28 }
 0x4cb   :  { %11015 = vst [vmem:[#allocation27_spill] sm:$0xff] %v7718_v54 }
 0x4cc   :  { %2443 = vrot.lane.b32.xlu0 %v7636_v16, %s5243_s28  ;;  %v7724_v59 = vpop.permute.xlu1 %2533 }
 0x4cd   :  { %11016 = vst [vmem:[#allocation29_spill] sm:$0xff] %v7724_v59 }
 0x4ce   :  { %v7726_v37 = vpop.permute.xlu0 %2535  ;;  %2521 = vrot.lane.b32.xlu1 %v7614_v27, %s5244_s30 }
 0x4cf   :  { %11017 = vst [vmem:[#allocation45_spill] sm:$0xff] %v7726_v37 }
 0x4d0   :  { %2523 = vrot.lane.b32.xlu0 %v7622_v7, %s5244_s30  ;;  %v7734_v63 = vpop.permute.xlu1 %2613 }
 0x4d1   :  { %11018 = vst [vmem:[#allocation28_spill] sm:$0xff] %v7734_v63 }
 0x4d2   :  { %v7738_v19 = vpop.permute.xlu0 %2615  ;;  %2537 = vrot.lane.b32.xlu1 %v7630_v5, %s5244_s30 }
 0x4d3   :  { %11019 = vst [vmem:[#allocation57_spill] sm:$0xff] %v7738_v19 }
 0x4d4   :  { %2539 = vrot.lane.b32.xlu0 %v7636_v16, %s5244_s30  ;;  %v1934_v13 = vpop.permute.xlu1 %1933 }
 0x4d5   :  { %v1965_v18 = vsel %vm72_vm1, %v7606_v21, %v1934_v13  ;;  %v1961_v25 = vsel %vm72_vm1, %v1934_v13, %v7620_v42 }
 0x4d6   :  { %v1936_v3 = vpop.permute.xlu0 %1935  ;;  %1937 = vrot.lane.b32.xlu1 %v7742_v62, %s5238_s29  ;;  %v1990_v52 = vmul.f32 %v1974_v46, %v1965_v18  ;;  %v1976_v46 = vld [vmem:[%s10631_s1 + $0x18] sm:$0xff]  ;;  %v1977_v18 = vld [vmem:[%s10631_s1 + $0x20] sm:$0xff] }
 0x4d7   :  { %v1966_v58 = vsel %vm72_vm1, %v7610_v14, %v1936_v3  ;;  %v1962_v32 = vsel %vm72_vm1, %v1936_v3, %v7626_v55  ;;  %v7794_v3 = vmax.f32 %v5058_v43, 0.0 }
 0x4d8   :  { %v1994_v61 = vmul.f32 %v1978_v6, %v1966_v58  ;;  %1939 = vrot.lane.b32.xlu0 %v7757_v51, %s5238_s29  ;;  %v1950_v30 = vpop.permute.xlu1 %1949  ;;  %v1980_v6 = vld [vmem:[%s10631_s1 + $0x38] sm:$0xff] }
 0x4d9   :  { %v1957_v1 = vsel %vm72_vm1, %v7620_v42, %v1950_v30  ;;  %v1969_v58 = vsel %vm72_vm1, %v1950_v30, %v7606_v21  ;;  %11023 = vst [vmem:[#allocation55_spill] sm:$0xff] %v7794_v3  ;;  %v1975_v30 = vld [vmem:[%s10631_s1 + $0x10] sm:$0xff]  ;;  %v1995_v21 = vmul.f32 %v1979_v49, %v1962_v32 }
 0x4da   :  { %v1952_v60 = vpop.permute.xlu0 %1951  ;;  %1953 = vrot.lane.b32.xlu1 %v7766_v39, %s5238_s29  ;;  %v2006_v4 = vpack.c.bf16 %v1994_v61, %v1990_v52  ;;  %v1989_v57 = vmul.f32 %v1973_v45, %v1969_v58  ;;  %v1992_v42 = vmul.f32 %v1976_v46, %v1957_v1  ;;  %v1991_v61 = vmul.f32 %v1975_v30, %v1961_v25 }
 0x4db   :  { %v1958_v43 = vsel %vm72_vm1, %v7626_v55, %v1952_v60  ;;  %v1970_v19 = vsel %vm72_vm1, %v1952_v60, %v7610_v14 }
 0x4dc   :  { %v1993_v13 = vmul.f32 %v1977_v18, %v1970_v19  ;;  %v1996_v63 = vmul.f32 %v1980_v6, %v1958_v43  ;;  %1955 = vrot.lane.b32.xlu0 %v7794_v3, %s5238_s29  ;;  %2849 = vmatprep.subr.bf16.mxu0 %v2006_v4  ;;  %v7812_v52 = vpop.permute.xlu1 %2029  ;;  %v2007_v45 = vpack.c.bf16 %v1995_v21, %v1991_v61 }
 0x4de   :  { %v2005_v49 = vpack.c.bf16 %v1993_v13, %v1989_v57  ;;  %v7814_v32 = vpop.permute.xlu0 %2031  ;;  %2033 = vrot.lane.b32.xlu1 %v7742_v62, %s5239_s25  ;;  %v2008_v55 = vpack.c.bf16 %v1996_v63, %v1992_v42 }
 0x4e0   :  { %2035 = vrot.lane.b32.xlu0 %v7757_v51, %s5239_s25  ;;  %2850 = vmatpush1.bf16.msra.mxu0 %v2005_v49  ;;  %v7820_v60 = vpop.permute.xlu1 %2045 }
 0x4e1   :  { %2955 = vmatprep.subr.bf16.mxu1 %v2008_v55 }
 0x4e2   :  { %2956 = vmatpush1.bf16.msra.mxu1 %v2007_v45  ;;  %v7822_v4 = vpop.permute.xlu0 %2047  ;;  %2049 = vrot.lane.b32.xlu1 %v7766_v39, %s5239_s25 }
 0x4e4   :  { %2051 = vrot.lane.b32.xlu0 %v7794_v3, %s5239_s25  ;;  %v7828_v25 = vpop.permute.xlu1 %2125 }
 0x4e6   :  { %v7830_v57 = vpop.permute.xlu0 %2127  ;;  %2129 = vrot.lane.b32.xlu1 %v7742_v62, %s5240_s0 }
 0x4e8   :  { %2131 = vrot.lane.b32.xlu0 %v7757_v51, %s5240_s0  ;;  %v7836_v14 = vpop.permute.xlu1 %2141 }
 0x4ea   :  { %v7838_v63 = vpop.permute.xlu0 %2143  ;;  %2145 = vrot.lane.b32.xlu1 %v7766_v39, %s5240_s0 }
 0x4ec   :  { %2147 = vrot.lane.b32.xlu0 %v7794_v3, %s5240_s0  ;;  %v7844_v19 = vpop.permute.xlu1 %2221 }
 0x4ee   :  { %v7846_v46 = vpop.permute.xlu0 %2223  ;;  %2225 = vrot.lane.b32.xlu1 %v7742_v62, %s5241_s26 }
 0x4f0   :  { %2227 = vrot.lane.b32.xlu0 %v7757_v51, %s5241_s26  ;;  %v7852_v1 = vpop.permute.xlu1 %2237 }
 0x4f2   :  { %v7854_v58 = vpop.permute.xlu0 %2239  ;;  %2241 = vrot.lane.b32.xlu1 %v7766_v39, %s5241_s26 }
 0x4f4   :  { %2243 = vrot.lane.b32.xlu0 %v7794_v3, %s5241_s26  ;;  %v7860_v18 = vpop.permute.xlu1 %2333 }
 0x4f6   :  { %v7862_v6 = vpop.permute.xlu0 %2335  ;;  %2629 = vrot.lane.b32.xlu1 %v7458_v0, %s5245_s14  ;;  %v4779_v0 = vld [vmem:[%s10631_s1 + $0xa0] sm:$0xff] }
 0x4f7   :  { %11024 = vst [vmem:[#allocation46_spill] sm:$0xff] %v7862_v6 }
 0x4f8   :  { %2631 = vrot.lane.b32.xlu0 %v7464_v10, %s5245_s14  ;;  %v7868_v30 = vpop.permute.xlu1 %2349 }
 0x4f9   :  { %11025 = vst [vmem:[#allocation47_spill] sm:$0xff] %v7868_v30  ;;  %v2792_v30 = vld [vmem:[%s10638_s8 + $0x18] sm:$0xff] }
 0x4fa   :  { %v7870_v21 = vpop.permute.xlu0 %2351  ;;  %2337 = vrot.lane.b32.xlu1 %v7742_v62, %s5242_s27 }
 0x4fb   :  { %11026 = vst [vmem:[#allocation61_spill] sm:$0xff] %v7870_v21 }
 0x4fc   :  { %2639 = vrot.lane.b32.xlu0 %v7546_v28, %s5245_s14  ;;  %v7876_v43 = vpop.permute.xlu1 %2429 }
 0x4fd   :  { %11027 = vst [vmem:[#allocation59_spill] sm:$0xff] %v7876_v43 }
 0x4fe   :  { %v7878_v42 = vpop.permute.xlu0 %2431  ;;  %2353 = vrot.lane.b32.xlu1 %v7766_v39, %s5242_s27 }
 0x4ff   :  { %11028 = vst [vmem:[#allocation62_spill] sm:$0xff] %v7878_v42  ;;  %v2791_v42 = vld [vmem:[%s10638_s8 + $0x10] sm:$0xff] }
 0x500   :  { %2339 = vrot.lane.b32.xlu0 %v7757_v51, %s5242_s27  ;;  %v7884_v13 = vpop.permute.xlu1 %2445 }
 0x501   :  { %11029 = vst [vmem:[#allocation60_spill] sm:$0xff] %v7884_v13 }
 0x502   :  { %v7886_v61 = vpop.permute.xlu0 %2447  ;;  %2433 = vrot.lane.b32.xlu1 %v7742_v62, %s5243_s28 }
 0x503   :  { %11030 = vst [vmem:[#allocation48_spill] sm:$0xff] %v7886_v61 }
 0x504   :  { %2355 = vrot.lane.b32.xlu0 %v7794_v3, %s5242_s27  ;;  %v7892_v49 = vpop.permute.xlu1 %2525 }
 0x505   :  { %11031 = vst [vmem:[#allocation31_spill] sm:$0xff] %v7892_v49 }
 0x506   :  { %v7894_v55 = vpop.permute.xlu0 %2527  ;;  %2449 = vrot.lane.b32.xlu1 %v7766_v39, %s5243_s28 }
 0x507   :  { %11032 = vst [vmem:[#allocation65_spill] sm:$0xff] %v7894_v55  ;;  %v5170_v55 = vld [vmem:[%s10637_s7 + $0x4] ss:$12 sps:$4 sm:$0xff]  }
 0x508   :  { %2435 = vrot.lane.b32.xlu0 %v7757_v51, %s5243_s28  ;;  %v7900_v45 = vpop.permute.xlu1 %2541  ;;  %2881 = vmatprep.mubr.bf16.mxu0 %v5170_v55 }
 0x509   :  { %11033 = vst [vmem:[#allocation49_spill] sm:$0xff] %v7900_v45  ;;  %2987 = vmatprep.mubr.bf16.mxu1 %v5170_v55 }
 0x50a   :  { %v7902_v37 = vpop.permute.xlu0 %2543  ;;  %2529 = vrot.lane.b32.xlu1 %v7742_v62, %s5244_s30 }
 0x50b   :  { %11034 = vst [vmem:[#allocation32_spill] sm:$0xff] %v7902_v37 }
 0x50c   :  { %2451 = vrot.lane.b32.xlu0 %v7794_v3, %s5243_s28  ;;  %v7908_v54 = vpop.permute.xlu1 %2621 }
 0x50d   :  { %11035 = vst [vmem:[#allocation63_spill] sm:$0xff] %v7908_v54 }
 0x50e   :  { %v7913_v59 = vpop.permute.xlu0 %2623  ;;  %2545 = vrot.lane.b32.xlu1 %v7766_v39, %s5244_s30 }
 0x50f   :  { %11036 = vst [vmem:[#allocation66_spill] sm:$0xff] %v7913_v59 }
 0x510   :  { %2531 = vrot.lane.b32.xlu0 %v7757_v51, %s5244_s30  ;;  %v7919_v37 = vpop.permute.xlu1 %1929 }
 0x512   :  { %v7921_v45 = vpop.permute.xlu0 %1931  ;;  %2637 = vrot.lane.b32.xlu1 %v7542_v40, %s5245_s14 }
 0x514   :  { %2547 = vrot.lane.b32.xlu0 %v7794_v3, %s5244_s30  ;;  %v7927_v54 = vpop.permute.xlu1 %1945 }
 0x516   :  { %v7929_v59 = vpop.permute.xlu0 %1947  ;;  %2617 = vrot.lane.b32.xlu1 %v7614_v27, %s5245_s14 }
 0x518   :  { %2619 = vrot.lane.b32.xlu0 %v7622_v7, %s5245_s14  ;;  %v7935_v55 = vpop.permute.xlu1 %2025  ;;  %v4809_v7 = vld [vmem:[%s10631_s1 + $0x190] sm:$0xff] }
 0x51a   :  { %v7937_v12 = vpop.permute.xlu0 %2027  ;;  %2625 = vrot.lane.b32.xlu1 %v7742_v62, %s5245_s14 }
 0x51c   :  { %2635 = vrot.lane.b32.xlu0 %v7636_v16, %s5245_s14  ;;  %v7943_v49 = vpop.permute.xlu1 %2041 }
 0x51e   :  { %v7945_v13 = vpop.permute.xlu0 %2043  ;;  %2633 = vrot.lane.b32.xlu1 %v7630_v5, %s5245_s14  ;;  %v4792_v5 = vld [vmem:[%s10631_s1 + $0x108] sm:$0xff] }
 0x520   :  { %2627 = vrot.lane.b32.xlu0 %v7757_v51, %s5245_s14  ;;  %v7951_v17 = vpop.permute.xlu1 %2121 }
 0x522   :  { %v7953_v43 = vpop.permute.xlu0 %2123  ;;  %2641 = vrot.lane.b32.xlu1 %v7766_v39, %s5245_s14 }
 0x523   :  { %11037 = vst [vmem:[#allocation64_spill] sm:$0xff] %v7953_v43 }
 0x524   :  { %2643 = vrot.lane.b32.xlu0 %v7794_v3, %s5245_s14  ;;  %v7962_v61 = vpop.permute.xlu1 %2137  ;;  %v2254_v3 = vsel %vm221_vm4, %v7670_v20, %v7846_v46 }
 0x525   :  { %11038 = vst [vmem:[#allocation67_spill] sm:$0xff] %v7962_v61 }
 0x526   :  { %v7967_v34 = vpop.permute.xlu0 %2139  ;;  %2795 = vperm.xlu1 %5153, %v2789_v38  }
 0x527   :  { %11039 = vst [vmem:[#allocation68_spill] sm:$0xff] %v7967_v34 }
 0x528   :  { %2800 = vperm.xlu0 %5152, %v2790_v11   ;;  %v7972_v21 = vpop.permute.xlu1 %2217 }
 0x529   :  { %11040 = vst [vmem:[#allocation69_spill] sm:$0xff] %v7972_v21 }
 0x52a   :  { %v7977_v47 = vpop.permute.xlu0 %2219  ;;  %2805 = vperm.xlu1 %5153, %v2791_v42   ;;  %v2058_v42 = vsel %vm121_vm2, %v7814_v32, %v7646_v31 }
 0x52c   :  { %2810 = vperm.xlu0 %5152, %v2792_v30   ;;  %v7979_v6 = vpop.permute.xlu1 %2233  ;;  %v4781_v30 = vld [vmem:[%s10631_s1 + $0xb0] sm:$0xff] }
 0x52d   :  { %11041 = vst [vmem:[#allocation70_spill] sm:$0xff] %v7979_v6  ;;  %v2061_v6 = vsel %vm121_vm2, %v7634_v15, %v7812_v52 }
 0x52e   :  { %v7981_v48 = vpop.permute.xlu0 %2235 }
 0x530   :  { %v7983_v38 = vpop.permute.xlu1 %2329 }
 0x531   :  { %11042 = vst [vmem:[#allocation71_spill] sm:$0xff] %v7983_v38 }
 0x532   :  { %v7985_v61 = vpop.permute.xlu0 %2331 }
 0x533   :  { %11043 = vst [vmem:[#allocation72_spill] sm:$0xff] %v7985_v61  ;;  %v4777_v61 = vld [vmem:[%s10631_s1 + $0x90] sm:$0xff] }
 0x534   :  { %v7987_v34 = vpop.permute.xlu1 %2345 }
 0x535   :  { %11044 = vst [vmem:[#allocation73_spill] sm:$0xff] %v7987_v34  ;;  %v4776_v34 = vld [vmem:[%s10631_s1 + $0x88] sm:$0xff] }
 0x536   :  { %v7989_v11 = vpop.permute.xlu0 %2347 }
 0x537   :  { %11045 = vst [vmem:[#allocation74_spill] sm:$0xff] %v7989_v11  ;;  %v2062_v11 = vsel %vm121_vm2, %v7638_v26, %v7814_v32 }
 0x538   :  { %v7991_v21 = vpop.permute.xlu1 %2425 }
 0x539   :  { %11046 = vst [vmem:[#allocation75_spill] sm:$0xff] %v7991_v21 }
 0x53a   :  { %v7993_v43 = vpop.permute.xlu0 %2427 }
 0x53b   :  { %11047 = vst [vmem:[#allocation76_spill] sm:$0xff] %v7993_v43  ;;  %v2057_v43 = vsel %vm121_vm2, %v7812_v52, %v7644_v56  ;;  %v2066_v52 = vsel %vm121_vm2, %v7822_v4, %v7638_v26  ;;  %v2054_v26 = vsel %vm121_vm2, %v7646_v31, %v7822_v4  ;;  %v4775_v31 = vld [vmem:[%s10631_s1 + $0x80] sm:$0xff]  ;;  %v2065_v4 = vsel %vm121_vm2, %v7820_v60, %v7634_v15 }
 0x53c   :  { %v7995_v53 = vpop.permute.xlu1 %2441  ;;  %v2053_v15 = vsel %vm121_vm2, %v7644_v56, %v7820_v60  ;;  %v4795_v60 = vld [vmem:[%s10631_s1 + $0x120] sm:$0xff] }
 0x53d   :  { %11048 = vst [vmem:[#allocation77_spill] sm:$0xff] %v7995_v53  ;;  %v8035_v53 = vmul.f32 %v4781_v30, %v2058_v42  ;;  %v8054_v42 = vmul.f32 %v4777_v61, %v2057_v43  ;;  %v2154_v30 = vsel %vm171_vm3, %v7830_v57, %v7662_v44  ;;  %v8072_v61 = vmul.f32 %v4776_v34, %v2061_v6 }
 0x53e   :  { %v8004_v38 = vpop.permute.xlu0 %2443  ;;  %v2158_v34 = vsel %vm171_vm3, %v7654_v22, %v7830_v57  ;;  %v8101_v43 = vmul.f32 %v4779_v0, %v2066_v52  ;;  %v4793_v57 = vld [vmem:[%s10631_s1 + $0x110] sm:$0xff]  ;;  %v2157_v0 = vsel %vm171_vm3, %v7652_v50, %v7828_v25  ;;  %v8119_v56 = vmul.f32 %v4797_v2, %v2154_v30  ;;  %v4791_v2 = vld [vmem:[%s10631_s1 + $0x100] sm:$0xff] }
 0x53f   :  { %11049 = vst [vmem:[#allocation78_spill] sm:$0xff] %v8004_v38  ;;  %v4782_v38 = vld [vmem:[%s10631_s1 + $0xb8] sm:$0xff]  ;;  %v2149_v30 = vsel %vm171_vm3, %v7660_v8, %v7836_v14 }
 0x540   :  { %v8013_v21 = vpop.permute.xlu1 %2521 }
 0x541   :  { %11050 = vst [vmem:[#allocation79_spill] sm:$0xff] %v8013_v21  ;;  %v4780_v21 = vld [vmem:[%s10631_s1 + $0xa8] sm:$0xff] }
 0x542   :  { %v8046_v10 = vpop.permute.xlu0 %2523  ;;  %v8074_v32 = vmul.f32 %v4780_v21, %v2062_v11  ;;  %v4778_v11 = vld [vmem:[%s10631_s1 + $0x98] sm:$0xff]  ;;  %v2153_v21 = vsel %vm171_vm3, %v7828_v25, %v7660_v8  ;;  %v2253_v8 = vsel %vm221_vm4, %v7668_v33, %v7844_v19 }
 0x543   :  { %11051 = vst [vmem:[#allocation80_spill] sm:$0xff] %v8046_v10  ;;  %v4796_v10 = vld [vmem:[%s10631_s1 + $0x128] sm:$0xff]  ;;  %v4794_v25 = vld [vmem:[%s10631_s1 + $0x118] sm:$0xff] }
 0x544   :  { %v8090_v6 = vpop.permute.xlu1 %2537  ;;  %v8132_v16 = vmul.f32 %v4796_v10, %v2158_v34  ;;  %v8148_v10 = vmul.f32 %v4778_v11, %v2053_v15  ;;  %v2150_v34 = vsel %vm171_vm3, %v7662_v44, %v7838_v63  ;;  %v1982_v11 = vld [vmem:[%s10631_s1 + $0x48] sm:$0xff] }
 0x545   :  { %11052 = vst [vmem:[#allocation81_spill] sm:$0xff] %v8090_v6  ;;  %v8110_v6 = vmul.f32 %v4782_v38, %v2054_v26  ;;  %v2162_v38 = vsel %vm171_vm3, %v7838_v63, %v7654_v22  ;;  %v8130_v26 = vmul.f32 %v4775_v31, %v2065_v4  ;;  %v2161_v22 = vsel %vm171_vm3, %v7836_v14, %v7652_v50  ;;  %v4798_v4 = vld [vmem:[%s10631_s1 + $0x138] sm:$0xff]  ;;  %v1986_v44 = vld [vmem:[%s10631_s1 + $0x68] sm:$0xff] }
 0x546   :  { %v8128_v52 = vpop.permute.xlu0 %2539  ;;  %v8150_v31 = vmul.f32 %v4793_v57, %v2153_v21  ;;  %v8163_v14 = vmul.f32 %v4792_v5, %v2157_v0  ;;  %v8165_v21 = vmul.f32 %v4795_v60, %v2162_v38  ;;  %v8178_v57 = vmul.f32 %v4791_v2, %v2161_v22  ;;  %v4808_v50 = vld [vmem:[%s10631_s1 + $0x188] sm:$0xff] }
 0x547   :  { %11053 = vst [vmem:[#allocation82_spill] sm:$0xff] %v8128_v52  ;;  %v8180_v5 = vmul.f32 %v4794_v25, %v2149_v30  ;;  %v8184_v38 = vmul.f32 %v4798_v4, %v2150_v34  ;;  %v4813_v30 = vld [vmem:[%s10631_s1 + $0x1b0] sm:$0xff]  ;;  %v2250_v22 = vsel %vm221_vm4, %v7846_v46, %v7678_v24  ;;  %v1981_v25 = vld [vmem:[%s10631_s1 + $0x40] sm:$0xff]  ;;  %v8238_v39 = vmul.f32 %v4808_v50, %v2253_v8  ;;  %v4812_v8 = vld [vmem:[%s10631_s1 + $0x1a8] sm:$0xff] }
 0x548   :  { %v1938_v52 = vpop.permute.xlu1 %1937  ;;  %v1987_v34 = vld [vmem:[%s10631_s1 + $0x70] sm:$0xff]  ;;  %v8253_v50 = vmul.f32 %v4813_v30, %v2250_v22 }
 0x549   :  { %v1967_v15 = vsel %vm72_vm1, %v7919_v37, %v1938_v52 }
 0x54a   :  { %v1940_v0 = vpop.permute.xlu0 %1939  ;;  %v1998_v4 = vmul.f32 %v1982_v11, %v1967_v15  ;;  %v2249_v11 = vsel %vm221_vm4, %v7844_v19, %v7676_v29  ;;  %v1984_v15 = vld [vmem:[%s10631_s1 + $0x58] sm:$0xff] }
 0x54b   :  { %v1968_v2 = vsel %vm72_vm1, %v7921_v45, %v1940_v0  ;;  %v1964_v63 = vsel %vm72_vm1, %v1940_v0, %v7929_v59  ;;  %v1988_v19 = vld [vmem:[%s10631_s1 + $0x78] sm:$0xff] }
 0x54c   :  { %v2002_v60 = vmul.f32 %v1986_v44, %v1968_v2  ;;  %v1954_v27 = vpop.permute.xlu1 %1953  ;;  %v1985_v2 = vld [vmem:[%s10631_s1 + $0x60] sm:$0xff]  ;;  %v2003_v35 = vmul.f32 %v1987_v34, %v1964_v63  ;;  %v4784_v63 = vld [vmem:[%s10631_s1 + $0xc8] sm:$0xff] }
 0x54d   :  { %v1959_v44 = vsel %vm72_vm1, %v7927_v54, %v1954_v27  ;;  %v1971_v0 = vsel %vm72_vm1, %v1954_v27, %v7919_v37  ;;  %v1983_v27 = vld [vmem:[%s10631_s1 + $0x50] sm:$0xff]  ;;  %v1963_v37 = vsel %vm72_vm1, %v1938_v52, %v7927_v54 }
 0x54e   :  { %v1956_v62 = vpop.permute.xlu0 %1955  ;;  %v2010_v51 = vpack.c.bf16 %v2002_v60, %v1998_v4  ;;  %v1997_v28 = vmul.f32 %v1981_v25, %v1971_v0  ;;  %v2000_v41 = vmul.f32 %v1984_v15, %v1959_v44  ;;  %v8261_v4 = vmul.f32 %v4809_v7, %v2249_v11  ;;  %v4807_v7 = vld [vmem:[%s10631_s1 + $0x180] sm:$0xff] }
 0x54f   :  { %v1960_v46 = vsel %vm72_vm1, %v7929_v59, %v1956_v62  ;;  %v1972_v40 = vsel %vm72_vm1, %v1956_v62, %v7921_v45  ;;  %v1999_v36 = vmul.f32 %v1983_v27, %v1963_v37  ;;  %v4788_v62 = vld [vmem:[%s10631_s1 + $0xe8] sm:$0xff]  ;;  %v2257_v45 = vsel %vm221_vm4, %v7852_v1, %v7668_v33  ;;  %v4787_v37 = vld [vmem:[%s10631_s1 + $0xe0] sm:$0xff] }
 0x550   :  { %v2001_v54 = vmul.f32 %v1985_v2, %v1972_v40  ;;  %v2004_v52 = vmul.f32 %v1988_v19, %v1960_v46  ;;  %2851 = vmatprep.subr.bf16.mxu0 %v2010_v51  ;;  %v2034_v60 = vpop.permute.xlu1 %2033  ;;  %v2200_v40 = vpack.c.bf16 %v8184_v38, %v8180_v5  ;;  %v8274_v51 = vmul.f32 %v4812_v8, %v2254_v3  ;;  %v4810_v3 = vld [vmem:[%s10631_s1 + $0x198] sm:$0xff]  ;;  %v4828_v38 = vld [vmem:[%s10631_s1 + $0x228] sm:$0xff] }
 0x551   :  { %v2063_v59 = vsel %vm121_vm2, %v7935_v55, %v2034_v60  ;;  %v2295_v34 = vpack.c.bf16 %v8253_v50, %v8261_v4  ;;  %v2245_v11 = vsel %vm221_vm4, %v7676_v29, %v7852_v1  ;;  %v2011_v15 = vpack.c.bf16 %v2003_v35, %v1999_v36  ;;  %v4783_v35 = vld [vmem:[%s10631_s1 + $0xc0] sm:$0xff]  ;;  %v4786_v1 = vld [vmem:[%s10631_s1 + $0xd8] sm:$0xff]  ;;  %v4844_v50 = vld [vmem:[%s10631_s1 + $0x2a8] sm:$0xff] }
 0x552   :  { %v2009_v25 = vpack.c.bf16 %v2001_v54, %v1997_v28  ;;  %v2036_v30 = vpop.permute.xlu0 %2035  ;;  %v2012_v22 = vpack.c.bf16 %v2004_v52, %v2000_v41  ;;  %v2094_v28 = vmul.f32 %v4784_v63, %v2063_v59  ;;  %v4789_v41 = vld [vmem:[%s10631_s1 + $0xf0] sm:$0xff]  ;;  %v8304_v29 = vmul.f32 %v4807_v7, %v2257_v45  ;;  %v4790_v8 = vld [vmem:[%s10631_s1 + $0xf8] sm:$0xff]  ;;  %v4811_v54 = vld [vmem:[%s10631_s1 + $0x1a0] sm:$0xff] }
 0x553   :  { %v2064_v33 = vsel %vm121_vm2, %v7937_v12, %v2036_v30  ;;  %v2060_v44 = vsel %vm121_vm2, %v2036_v30, %v7945_v13  ;;  %v11054_v27 = vpack.c.bf16 %v8074_v32, %v8072_v61  ;;  %v8324_v46 = vmul.f32 %v4810_v3, %v2245_v11  ;;  %v4785_v32 = vld [vmem:[%s10631_s1 + $0xd0] sm:$0xff] }
 0x554   :  { %v2098_v0 = vmul.f32 %v4788_v62, %v2064_v33  ;;  %2852 = vmatpush1.bf16.msra.mxu0 %v2009_v25  ;;  %2957 = vmatprep.subr.bf16.mxu1 %v2012_v22  ;;  %v2050_v36 = vpop.permute.xlu1 %2049  ;;  %v2059_v61 = vsel %vm121_vm2, %v2034_v60, %v7943_v49  ;;  %v11055_v63 = vpack.c.bf16 %v8110_v6, %v8148_v10  ;;  %v4814_v62 = vld [vmem:[%s10631_s1 + $0x1b8] sm:$0xff] }
 0x555   :  { %v2055_v2 = vsel %vm121_vm2, %v7943_v49, %v2050_v36  ;;  %v2067_v19 = vsel %vm121_vm2, %v2050_v36, %v7935_v55  ;;  %2853 = vmatprep.subr.bf16.mxu0 %v11054_v27  ;;  %2958 = vmatpush1.bf16.msra.mxu1 %v2011_v15  ;;  %v2258_v55 = vsel %vm221_vm4, %v7854_v58, %v7670_v20  ;;  %v11074_v4 = vld [vmem:[#allocation42_spill] sm:$0xff] }
 0x556   :  { %v2052_v52 = vpop.permute.xlu0 %2051  ;;  %2959 = vmatprep.subr.bf16.mxu1 %v11055_v63  ;;  %v2106_v59 = vpack.c.bf16 %v2098_v0, %v2094_v28  ;;  %v2246_v20 = vsel %vm221_vm4, %v7678_v24, %v7854_v58  ;;  %v2099_v7 = vmul.f32 %v4789_v41, %v2060_v44  ;;  %v2093_v10 = vmul.f32 %v4783_v35, %v2067_v19  ;;  %v4800_v58 = vld [vmem:[%s10631_s1 + $0x148] sm:$0xff]  ;;  %v4823_v41 = vld [vmem:[%s10631_s1 + $0x200] sm:$0xff] }
 0x557   :  { %v2056_v49 = vsel %vm121_vm2, %v7945_v13, %v2052_v52  ;;  %v2068_v6 = vsel %vm121_vm2, %v2052_v52, %v7937_v12  ;;  %v2096_v60 = vmul.f32 %v4786_v1, %v2055_v2  ;;  %v11056_v30 = vpack.c.bf16 %v8101_v43, %v8130_v26  ;;  %v4804_v43 = vld [vmem:[%s10631_s1 + $0x168] sm:$0xff]  ;;  %v4805_v2 = vld [vmem:[%s10631_s1 + $0x170] sm:$0xff] }
 0x558   :  { %v2097_v45 = vmul.f32 %v4787_v37, %v2068_v6  ;;  %v2100_v25 = vmul.f32 %v4790_v8, %v2056_v49  ;;  %v2130_v22 = vpop.permute.xlu1 %2129  ;;  %v8358_v3 = vmul.f32 %v4811_v54, %v2258_v55  ;;  %v2095_v24 = vmul.f32 %v4785_v32, %v2059_v61  ;;  %v11059_v35 = vld [vmem:[#allocation64_spill] sm:$0xff]  ;;  %v4802_v55 = vld [vmem:[%s10631_s1 + $0x158] sm:$0xff] }
 0x559   :  { %2854 = vmatpush1.bf16.msra.mxu0 %v11056_v30  ;;  %v2159_v12 = vsel %vm171_vm3, %v7951_v17, %v2130_v22  ;;  %v11057_v13 = vpack.c.bf16 %v8035_v53, %v8054_v42  ;;  %v8372_v26 = vmul.f32 %v4814_v62, %v2246_v20  ;;  %v2294_v28 = vpack.c.bf16 %v8274_v51, %v8238_v39  ;;  %v11058_v42 = vld [vmem:[#allocation24_spill] sm:$0xff]  ;;  %v11061_v32 = vld [vmem:[#allocation67_spill] sm:$0xff]  ;;  %v11064_v49 = vld [vmem:[#allocation46_spill] sm:$0xff] }
 0x55a   :  { %2855 = vmatprep.subr.bf16.mxu0 %v2106_v59  ;;  %v2105_v11 = vpack.c.bf16 %v2097_v45, %v2093_v10  ;;  %v2132_v15 = vpop.permute.xlu0 %2131  ;;  %v2108_v33 = vpack.c.bf16 %v2100_v25, %v2096_v60  ;;  %v2361_v53 = vsel %vm279_vm5, %v7860_v18, %v7692_v23  ;;  %v2365_v44 = vsel %vm279_vm5, %v11058_v42, %v7860_v18  ;;  %v11060_v19 = vld [vmem:[#allocation68_spill] sm:$0xff]  ;;  %v4806_v62 = vld [vmem:[%s10631_s1 + $0x178] sm:$0xff]  ;;  %v11071_v51 = vld [vmem:[#allocation61_spill] sm:$0xff] }
 0x55b   :  { %2960 = vmatpush1.bf16.msra.mxu1 %v11057_v13  ;;  %v2107_v0 = vpack.c.bf16 %v2099_v7, %v2095_v24  ;;  %v2160_v36 = vsel %vm171_vm3, %v11059_v35, %v2132_v15  ;;  %v2190_v1 = vmul.f32 %v4800_v58, %v2159_v12  ;;  %v2156_v27 = vsel %vm171_vm3, %v2132_v15, %v11060_v19  ;;  %v4799_v18 = vld [vmem:[%s10631_s1 + $0x140] sm:$0xff]  ;;  %v4824_v20 = vld [vmem:[%s10631_s1 + $0x208] sm:$0xff]  ;;  %v11065_v25 = vld [vmem:[#allocation26_spill] sm:$0xff] }
 0x55c   :  { %v2194_v37 = vmul.f32 %v4804_v43, %v2160_v36  ;;  %2961 = vmatprep.subr.bf16.mxu1 %v2108_v33  ;;  %v2146_v8 = vpop.permute.xlu1 %2145  ;;  %v2293_v54 = vpack.c.bf16 %v8358_v3, %v8304_v29  ;;  %v11062_v63 = vpack.c.bf16 %v8132_v16, %v8163_v14  ;;  %v4803_v59 = vld [vmem:[%s10631_s1 + $0x160] sm:$0xff]  ;;  %v8422_v7 = vmul.f32 %v4823_v41, %v2365_v44  ;;  %v4801_v14 = vld [vmem:[%s10631_s1 + $0x150] sm:$0xff]  ;;  %v4816_v41 = vld [vmem:[%s10631_s1 + $0x1c8] sm:$0xff] }
 0x55d   :  { %2856 = vmatpush1.bf16.msra.mxu0 %v2105_v11  ;;  %v2151_v61 = vsel %vm171_vm3, %v11061_v32, %v2146_v8  ;;  %v2163_v52 = vsel %vm171_vm3, %v2146_v8, %v7951_v17  ;;  %v11063_v17 = vld [vmem:[#allocation43_spill] sm:$0xff]  ;;  %v2155_v6 = vsel %vm171_vm3, %v2130_v22, %v11061_v32  ;;  %v2366_v30 = vsel %vm279_vm5, %v11065_v25, %v11064_v49  ;;  %v11067_v44 = vld [vmem:[#allocation69_spill] sm:$0xff]  ;;  %v11072_v29 = vld [vmem:[#allocation62_spill] sm:$0xff] }
 0x55e   :  { %2857 = vmatprep.subr.bf16.mxu0 %v11062_v63  ;;  %v2362_v16 = vsel %vm279_vm5, %v11064_v49, %v11063_v17  ;;  %v2148_v10 = vpop.permute.xlu0 %2147  ;;  %v2202_v60 = vpack.c.bf16 %v2194_v37, %v2190_v1  ;;  %v4827_v45 = vld [vmem:[%s10631_s1 + $0x220] sm:$0xff]  ;;  %v2195_v24 = vmul.f32 %v4805_v2, %v2156_v27  ;;  %v2192_v58 = vmul.f32 %v4802_v55, %v2151_v61  ;;  %v4821_v8 = vld [vmem:[%s10631_s1 + $0x1f0] sm:$0xff]  ;;  %v4818_v61 = vld [vmem:[%s10631_s1 + $0x1d8] sm:$0xff] }
 0x55f   :  { %2962 = vmatpush1.bf16.msra.mxu1 %v2107_v0  ;;  %v2152_v22 = vsel %vm171_vm3, %v11060_v19, %v2148_v10  ;;  %v2164_v5 = vsel %vm171_vm3, %v2148_v10, %v11059_v35  ;;  %v11066_v43 = vpack.c.bf16 %v8165_v21, %v8178_v57  ;;  %v8456_v15 = vmul.f32 %v4824_v20, %v2361_v53  ;;  %v4820_v21 = vld [vmem:[%s10631_s1 + $0x1e8] sm:$0xff]  ;;  %v11069_v27 = vld [vmem:[#allocation47_spill] sm:$0xff]  ;;  %v4825_v49 = vld [vmem:[%s10631_s1 + $0x210] sm:$0xff] }
 0x560   :  { %2963 = vmatprep.subr.bf16.mxu1 %v2200_v40  ;;  %v2189_v40 = vmul.f32 %v4799_v18, %v2163_v52  ;;  %v2193_v12 = vmul.f32 %v4803_v59, %v2164_v5  ;;  %v2196_v13 = vmul.f32 %v4806_v62, %v2152_v22  ;;  %v2226_v11 = vpop.permute.xlu1 %2225  ;;  %v2191_v33 = vmul.f32 %v4801_v14, %v2155_v6  ;;  %v11070_v52 = vld [vmem:[#allocation70_spill] sm:$0xff]  ;;  %v11073_v3 = vld [vmem:[#allocation40_spill] sm:$0xff] }
 0x561   :  { %2858 = vmatpush1.bf16.msra.mxu0 %v11066_v43  ;;  %v2255_v0 = vsel %vm221_vm4, %v11067_v44, %v2226_v11  ;;  %v11068_v35 = vpack.c.bf16 %v8119_v56, %v8150_v31  ;;  %v8470_v57 = vmul.f32 %v4827_v45, %v2366_v30  ;;  %v2296_v2 = vpack.c.bf16 %v8372_v26, %v8324_v46  ;;  %v4822_v62 = vld [vmem:[%s10631_s1 + $0x1f8] sm:$0xff]  ;;  %v4843_v43 = vld [vmem:[%s10631_s1 + $0x2a0] sm:$0xff] }
 0x562   :  { %2859 = vmatprep.subr.bf16.mxu0 %v2202_v60  ;;  %v2201_v53 = vpack.c.bf16 %v2193_v12, %v2189_v40  ;;  %v2228_v36 = vpop.permute.xlu0 %2227  ;;  %v2204_v1 = vpack.c.bf16 %v2196_v13, %v2192_v58  ;;  %v8474_v19 = vmul.f32 %v4828_v38, %v2362_v16  ;;  %v2357_v56 = vsel %vm279_vm5, %v7692_v23, %v11069_v27  ;;  %v4815_v23 = vld [vmem:[%s10631_s1 + $0x1c0] sm:$0xff]  ;;  %v4826_v39 = vld [vmem:[%s10631_s1 + $0x218] sm:$0xff]  ;;  %v4817_v16 = vld [vmem:[%s10631_s1 + $0x1d0] sm:$0xff] }
 0x563   :  { %2964 = vmatpush1.bf16.msra.mxu1 %v11068_v35  ;;  %v2203_v31 = vpack.c.bf16 %v2195_v24, %v2191_v33  ;;  %v2256_v37 = vsel %vm221_vm4, %v7977_v47, %v2228_v36  ;;  %v2286_v18 = vmul.f32 %v4816_v41, %v2255_v0  ;;  %v2252_v46 = vsel %vm221_vm4, %v2228_v36, %v7981_v48  ;;  %v4829_v60 = vld [vmem:[%s10631_s1 + $0x230] sm:$0xff]  ;;  %v4830_v22 = vld [vmem:[%s10631_s1 + $0x238] sm:$0xff]  ;;  %v11075_v35 = vld [vmem:[#allocation48_spill] sm:$0xff] }
 0x564   :  { %v2290_v26 = vmul.f32 %v4820_v21, %v2256_v37  ;;  %2965 = vmatprep.subr.bf16.mxu1 %v2204_v1  ;;  %v2242_v55 = vpop.permute.xlu1 %2241  ;;  %v2369_v32 = vsel %vm279_vm5, %v11069_v27, %v11058_v42  ;;  %v4819_v42 = vld [vmem:[%s10631_s1 + $0x1e0] sm:$0xff]  ;;  %v2251_v14 = vsel %vm221_vm4, %v2226_v11, %v11070_v52  ;;  %v2291_v45 = vmul.f32 %v4821_v8, %v2252_v46  ;;  %v4845_v0 = vld [vmem:[%s10631_s1 + $0x2b0] sm:$0xff]  ;;  %v4840_v1 = vld [vmem:[%s10631_s1 + $0x288] sm:$0xff] }
 0x565   :  { %2860 = vmatpush1.bf16.msra.mxu0 %v2201_v53  ;;  %v2247_v63 = vsel %vm221_vm4, %v11070_v52, %v2242_v55  ;;  %v2259_v59 = vsel %vm221_vm4, %v2242_v55, %v11067_v44  ;;  %v8553_v12 = vmul.f32 %v4825_v49, %v2357_v56  ;;  %v2287_v13 = vmul.f32 %v4817_v16, %v2251_v14  ;;  %v4839_v36 = vld [vmem:[%s10631_s1 + $0x280] sm:$0xff] }
 0x566   :  { %2861 = vmatprep.subr.bf16.mxu0 %v2294_v28  ;;  %v2358_v28 = vsel %vm279_vm5, %v11063_v17, %v11071_v51  ;;  %v2244_v6 = vpop.permute.xlu0 %2243  ;;  %v2298_v10 = vpack.c.bf16 %v2290_v26, %v2286_v18  ;;  %v2370_v17 = vsel %vm279_vm5, %v11071_v51, %v11065_v25  ;;  %v2285_v5 = vmul.f32 %v4815_v23, %v2259_v59  ;;  %v11077_v27 = vld [vmem:[#allocation59_spill] sm:$0xff]  ;;  %v4841_v26 = vld [vmem:[%s10631_s1 + $0x290] sm:$0xff]  ;;  %v11079_v23 = vld [vmem:[#allocation60_spill] sm:$0xff] }
 0x567   :  { %2966 = vmatpush1.bf16.msra.mxu1 %v2203_v31  ;;  %v2248_v30 = vsel %vm221_vm4, %v7981_v48, %v2244_v6  ;;  %v2260_v24 = vsel %vm221_vm4, %v2244_v6, %v7977_v47  ;;  %v2288_v38 = vmul.f32 %v4818_v61, %v2247_v63  ;;  %v8555_v48 = vmul.f32 %v4826_v39, %v2369_v32  ;;  %v11078_v31 = vld [vmem:[#allocation25_spill] sm:$0xff]  ;;  %v4846_v32 = vld [vmem:[%s10631_s1 + $0x2b8] sm:$0xff] }
 0x568   :  { %2967 = vmatprep.subr.bf16.mxu1 %v2296_v2  ;;  %v2289_v40 = vmul.f32 %v4819_v42, %v2260_v24  ;;  %v2292_v58 = vmul.f32 %v4822_v62, %v2248_v30  ;;  %v8551_v25 = vpop.permute.xlu1 %2629  ;;  %v8560_v47 = vmul.f32 %v4829_v60, %v2358_v28  ;;  %v8571_v44 = vmul.f32 %v4830_v22, %v2370_v17  ;;  %v11076_v2 = vld [vmem:[#allocation23_spill] sm:$0xff]  ;;  %v11081_v61 = vld [vmem:[#allocation22_spill] sm:$0xff]  ;;  %v11083_v51 = vld [vmem:[#allocation53_spill] sm:$0xff] }
 0x569   :  { %2862 = vmatpush1.bf16.msra.mxu0 %v2293_v54  ;;  %v2462_v54 = vsel %vm329_vm6, %v11073_v3, %v11072_v29  ;;  %v2454_v21 = vsel %vm329_vm6, %v11074_v4, %v11075_v35  ;;  %v2299_v53 = vpack.c.bf16 %v2291_v45, %v2287_v13  ;;  %v2457_v56 = vsel %vm329_vm6, %v11077_v27, %v11076_v2  ;;  %v4842_v42 = vld [vmem:[%s10631_s1 + $0x298] sm:$0xff]  ;;  %v11084_v28 = vld [vmem:[#allocation21_spill] sm:$0xff]  ;;  %v11087_v17 = vld [vmem:[#allocation44_spill] sm:$0xff] }
 0x56a   :  { %2863 = vmatprep.subr.bf16.mxu0 %v2298_v10  ;;  %v2297_v11 = vpack.c.bf16 %v2289_v40, %v2285_v5  ;;  %v8569_v33 = vpop.permute.xlu0 %2631  ;;  %v2300_v41 = vpack.c.bf16 %v2292_v58, %v2288_v38  ;;  %v2461_v37 = vsel %vm329_vm6, %v11078_v31, %v11077_v27  ;;  %v2406_v8 = vpack.c.bf16 %v8474_v19, %v8456_v15  ;;  %v11080_v19 = vld [vmem:[#allocation37_spill] sm:$0xff]  ;;  %v4855_v10 = vld [vmem:[%s10631_s1 + $0x300] sm:$0xff]  ;;  %v11109_v27 = vld [vmem:[#allocation38_spill] sm:$0xff] }
 0x56b   :  { %2968 = vmatpush1.bf16.msra.mxu1 %v2295_v34  ;;  %v2458_v34 = vsel %vm329_vm6, %v11072_v29, %v11074_v4  ;;  %v8603_v46 = vmul.f32 %v4843_v43, %v2462_v54  ;;  %v2453_v55 = vsel %vm329_vm6, %v11076_v2, %v11079_v23  ;;  %v2466_v15 = vsel %vm329_vm6, %v11075_v35, %v11073_v3  ;;  %v11086_v60 = vld [vmem:[#allocation31_spill] sm:$0xff]  ;;  %v4856_v5 = vld [vmem:[%s10631_s1 + $0x308] sm:$0xff]  ;;  %v11091_v3 = vld [vmem:[#allocation50_spill] sm:$0xff] }
 0x56c   :  { %2969 = vmatprep.subr.bf16.mxu1 %v2300_v41  ;;  %v2338_v18 = vpop.permute.xlu1 %2337  ;;  %v11082_v52 = vpack.c.bf16 %v11080_v19, %v11081_v61  ;;  %v8624_v59 = vmul.f32 %v4844_v50, %v2458_v34  ;;  %v2465_v62 = vsel %vm329_vm6, %v11079_v23, %v11078_v31  ;;  %v8633_v49 = vmul.f32 %v4845_v0, %v2454_v21  ;;  %v11088_v38 = vld [vmem:[#allocation29_spill] sm:$0xff]  ;;  %v4859_v58 = vld [vmem:[%s10631_s1 + $0x320] sm:$0xff]  ;;  %v11095_v0 = vld [vmem:[#allocation58_spill] sm:$0xff] }
 0x56d   :  { %2864 = vmatpush1.bf16.msra.mxu0 %v2297_v11  ;;  %v11085_v16 = vpack.c.bf16 %v11083_v51, %v11084_v28  ;;  %v8640_v14 = vmul.f32 %v4839_v36, %v2461_v37  ;;  %v8642_v6 = vmul.f32 %v4840_v1, %v2457_v56  ;;  %v2557_v45 = vsel %vm379_vm7, %v11087_v17, %v11086_v60  ;;  %v11089_v13 = vld [vmem:[#allocation65_spill] sm:$0xff]  ;;  %v11090_v43 = vld [vmem:[#allocation27_spill] sm:$0xff]  ;;  %v11092_v54 = vld [vmem:[#allocation20_spill] sm:$0xff] }
 0x56e   :  { %2865 = vmatprep.subr.bf16.mxu0 %v11082_v52  ;;  %v8635_v39 = vpop.permute.xlu0 %2639  ;;  %v2408_v30 = vpack.c.bf16 %v8571_v44, %v8555_v48  ;;  %v8653_v24 = vmul.f32 %v4841_v26, %v2453_v55  ;;  %v8655_v22 = vmul.f32 %v4846_v32, %v2466_v15  ;;  %v2553_v40 = vsel %vm379_vm7, %v11086_v60, %v11088_v38  ;;  %v4832_v50 = vld [vmem:[%s10631_s1 + $0x248] sm:$0xff]  ;;  %v11096_v35 = vld [vmem:[#allocation30_spill] sm:$0xff]  ;;  %v11102_v55 = vld [vmem:[#allocation55_spill] sm:$0xff] }
 0x56f   :  { %2970 = vmatpush1.bf16.msra.mxu1 %v2299_v53  ;;  %v2558_v48 = vsel %vm379_vm7, %v11090_v43, %v11089_v13  ;;  %v11093_v11 = vpack.c.bf16 %v11091_v3, %v11092_v54  ;;  %v8676_v44 = vmul.f32 %v4842_v42, %v2465_v62  ;;  %v11094_v4 = vld [vmem:[#allocation73_spill] sm:$0xff]  ;;  %v11097_v21 = vpack.c.bf16 %v11095_v0, %v11096_v35  ;;  %v11098_v53 = vld [vmem:[#allocation51_spill] sm:$0xff]  ;;  %v11099_v36 = vld [vmem:[#allocation52_spill] sm:$0xff] }
 0x570   :  { %2971 = vmatprep.subr.bf16.mxu1 %v11085_v16  ;;  %v2354_v29 = vpop.permute.xlu1 %2353  ;;  %v2363_v34 = vsel %vm279_vm5, %v2338_v18, %v11094_v4  ;;  %v11100_v1 = vpack.c.bf16 %v11098_v53, %v11099_v36  ;;  %v4836_v2 = vld [vmem:[%s10631_s1 + $0x268] sm:$0xff]  ;;  %v8695_v56 = vmul.f32 %v4855_v10, %v2557_v45  ;;  %v8709_v42 = vmul.f32 %v4856_v5, %v2553_v40  ;;  %v4835_v16 = vld [vmem:[%s10631_s1 + $0x260] sm:$0xff]  ;;  %v11105_v10 = vld [vmem:[#allocation74_spill] sm:$0xff] }
 0x571   :  { %2866 = vmatpush1.bf16.msra.mxu0 %v11093_v11  ;;  %v4860_v31 = vld [vmem:[%s10631_s1 + $0x328] sm:$0xff]  ;;  %v8711_v62 = vmul.f32 %v4859_v58, %v2558_v48  ;;  %v4831_v11 = vld [vmem:[%s10631_s1 + $0x240] sm:$0xff]  ;;  %v2398_v58 = vmul.f32 %v4832_v50, %v2363_v34  ;;  %v4833_v48 = vld [vmem:[%s10631_s1 + $0x250] sm:$0xff]  ;;  %v2359_v50 = vsel %vm279_vm5, %v11094_v4, %v2354_v29 }
 0x572   :  { %2867 = vmatprep.subr.bf16.mxu0 %v11097_v21  ;;  %v11101_v37 = vld [vmem:[#allocation45_spill] sm:$0xff]  ;;  %v2340_v23 = vpop.permute.xlu0 %2339  ;;  %v11103_v32 = vld [vmem:[#allocation56_spill] sm:$0xff]  ;;  %v11107_v5 = vld [vmem:[#allocation71_spill] sm:$0xff] }
 0x573   :  { %2972 = vmatpush1.bf16.msra.mxu1 %v11100_v1  ;;  %v2554_v26 = vsel %vm379_vm7, %v11089_v13, %v11101_v37  ;;  %v11104_v15 = vpack.c.bf16 %v11102_v55, %v11103_v32  ;;  %v2364_v60 = vsel %vm279_vm5, %v2340_v23, %v11105_v10  ;;  %v11106_v45 = vld [vmem:[#allocation72_spill] sm:$0xff]  ;;  %v2367_v40 = vsel %vm279_vm5, %v11107_v5, %v2338_v18  ;;  %v4834_v18 = vld [vmem:[%s10631_s1 + $0x258] sm:$0xff]  ;;  %v4857_v4 = vld [vmem:[%s10631_s1 + $0x310] sm:$0xff] }
 0x574   :  { %v2368_v13 = vsel %vm279_vm5, %v11106_v45, %v2340_v23  ;;  %v2402_v21 = vmul.f32 %v4836_v2, %v2364_v60  ;;  %v2434_v1 = vpop.permute.xlu1 %2433  ;;  %v8736_v52 = vmul.f32 %v4860_v31, %v2554_v26  ;;  %v2371_v34 = vsel %vm279_vm5, %v2354_v29, %v11107_v5  ;;  %v11111_v2 = vld [vmem:[#allocation41_spill] sm:$0xff]  ;;  %v4838_v26 = vld [vmem:[%s10631_s1 + $0x278] sm:$0xff] }
 0x575   :  { %2973 = vmatprep.subr.bf16.mxu1 %v11104_v15  ;;  %v11108_v15 = vld [vmem:[#allocation54_spill] sm:$0xff]  ;;  %v11114_v23 = vld [vmem:[#allocation49_spill] sm:$0xff]  ;;  %v2401_v5 = vmul.f32 %v4835_v16, %v2368_v13  ;;  %v2597_v20 = vpack.c.bf16 %v8711_v62, %v8695_v56  ;;  %v2397_v55 = vmul.f32 %v4831_v11, %v2367_v40  ;;  %v2399_v16 = vmul.f32 %v4833_v48, %v2359_v50  ;;  %v11165_v53 = vld [vmem:[#allocation35_spill] sm:$0xff] }
 0x576   :  { %v11110_v41 = vpack.c.bf16 %v11108_v15, %v11109_v27  ;;  %v4837_v31 = vld [vmem:[%s10631_s1 + $0x270] sm:$0xff]  ;;  %v2561_v29 = vsel %vm379_vm7, %v11114_v23, %v11087_v17  ;;  %v2410_v63 = vpack.c.bf16 %v2402_v21, %v2398_v58  ;;  %v4858_v17 = vld [vmem:[%s10631_s1 + $0x318] sm:$0xff]  ;;  %v2400_v13 = vmul.f32 %v4834_v18, %v2371_v34 }
 0x577   :  { %v11115_v11 = vpack.c.bf16 %v8470_v57, %v8422_v7  ;;  %v11117_v48 = vld [vmem:[#allocation77_spill] sm:$0xff]  ;;  %v11118_v7 = vpack.c.bf16 %v8560_v47, %v8553_v12  ;;  %v4862_v50 = vld [vmem:[%s10631_s1 + $0x338] sm:$0xff]  ;;  %v2409_v34 = vpack.c.bf16 %v2401_v5, %v2397_v55  ;;  %v4847_v55 = vld [vmem:[%s10631_s1 + $0x2c0] sm:$0xff] }
 0x578   :  { %2868 = vmatpush1.bf16.msra.mxu0 %v11110_v41  ;;  %v11112_v41 = vld [vmem:[#allocation39_spill] sm:$0xff]  ;;  %v2450_v21 = vpop.permute.xlu1 %2449  ;;  %v2459_v18 = vsel %vm329_vm6, %v2434_v1, %v11117_v48  ;;  %v4852_v57 = vld [vmem:[%s10631_s1 + $0x2e8] sm:$0xff]  ;;  %v3228_v3 = vld [vmem:[%s10631_s1 + $0x30] sm:$0xff] }
 0x579   :  { %2869 = vmatprep.subr.bf16.mxu0 %v2406_v8  ;;  %v11113_v60 = vpack.c.bf16 %v11111_v2, %v11112_v41  ;;  %v2549_v8 = vsel %vm379_vm7, %v11088_v38, %v11114_v23  ;;  %v4848_v23 = vld [vmem:[%s10631_s1 + $0x2c8] sm:$0xff]  ;;  %v2455_v5 = vsel %vm329_vm6, %v11117_v48, %v2450_v21  ;;  %v4854_v48 = vld [vmem:[%s10631_s1 + $0x2f8] sm:$0xff] }
 0x57a   :  { %v8781_v40 = vmul.f32 %v4857_v4, %v2549_v8  ;;  %v4851_v8 = vld [vmem:[%s10631_s1 + $0x2e0] sm:$0xff] }
 0x57b   :  { %2974 = vmatpush1.bf16.msra.mxu1 %v11113_v60  ;;  %v2356_v60 = vpop.permute.xlu0 %2355 }
 0x57c   :  { %2975 = vmatprep.subr.bf16.mxu1 %v2408_v30  ;;  %v2360_v2 = vsel %vm279_vm5, %v11105_v10, %v2356_v60  ;;  %v2372_v38 = vsel %vm279_vm5, %v2356_v60, %v11106_v45  ;;  %2870 = vmatpush1.bf16.msra.mxu0 %v11115_v11  ;;  %v11116_v10 = vld [vmem:[#allocation32_spill] sm:$0xff]  ;;  %v11120_v60 = vld [vmem:[#allocation78_spill] sm:$0xff] }
 0x57d   :  { %v2403_v30 = vmul.f32 %v4837_v31, %v2360_v2  ;;  %v2404_v58 = vmul.f32 %v4838_v26, %v2372_v38  ;;  %v2550_v45 = vsel %vm379_vm7, %v11101_v37, %v11116_v10  ;;  %2871 = vmatprep.subr.bf16.mxu0 %v2410_v63  ;;  %v4861_v37 = vld [vmem:[%s10631_s1 + $0x330] sm:$0xff]  ;;  %v2562_v63 = vsel %vm379_vm7, %v11116_v10, %v11090_v43  ;;  %v11119_v26 = vld [vmem:[#allocation75_spill] sm:$0xff]  ;;  %v11121_v11 = vld [vmem:[#allocation76_spill] sm:$0xff] }
 0x57e   :  { %v8809_v31 = vmul.f32 %v4858_v17, %v2561_v29  ;;  %v2463_v4 = vsel %vm329_vm6, %v11119_v26, %v2434_v1  ;;  %v2494_v29 = vmul.f32 %v4848_v23, %v2459_v18  ;;  %v4849_v1 = vld [vmem:[%s10631_s1 + $0x2d0] sm:$0xff]  ;;  %v2467_v10 = vsel %vm329_vm6, %v2450_v21, %v11119_v26  ;;  %v11123_v18 = vld [vmem:[#allocation63_spill] sm:$0xff] }
 0x57f   :  { %2976 = vmatpush1.bf16.msra.mxu1 %v11118_v7  ;;  %v2411_v12 = vpack.c.bf16 %v2403_v30, %v2399_v16  ;;  %v2436_v47 = vpop.permute.xlu0 %2435  ;;  %v2412_v2 = vpack.c.bf16 %v2404_v58, %v2400_v13  ;;  %v2530_v16 = vpop.permute.xlu1 %2529  ;;  %v8832_v13 = vmul.f32 %v4861_v37, %v2550_v45  ;;  %v8834_v30 = vmul.f32 %v4862_v50, %v2562_v63  ;;  %v4850_v58 = vld [vmem:[%s10631_s1 + $0x2d8] sm:$0xff]  ;;  %v4853_v45 = vld [vmem:[%s10631_s1 + $0x2f0] sm:$0xff]  ;;  %v11124_v7 = vld [vmem:[#allocation28_spill] sm:$0xff] }
 0x580   :  { %v2460_v38 = vsel %vm329_vm6, %v2436_v47, %v11120_v60  ;;  %v2464_v43 = vsel %vm329_vm6, %v11121_v11, %v2436_v47  ;;  %2872 = vmatpush1.bf16.msra.mxu0 %v2409_v34  ;;  %v11122_v23 = vpack.c.bf16 %v8624_v59, %v8642_v6  ;;  %v11125_v59 = vpack.c.bf16 %v8655_v22, %v8676_v44  ;;  %v4864_v22 = vld [vmem:[%s10631_s1 + $0x348] sm:$0xff] }
 0x581   :  { %v2498_v17 = vmul.f32 %v4852_v57, %v2460_v38  ;;  %2977 = vmatprep.subr.bf16.mxu1 %v2412_v2  ;;  %v8855_v57 = vsel %vm429_vm8, %v11124_v7, %v11123_v18  ;;  %v2497_v21 = vmul.f32 %v4851_v8, %v2464_v43  ;;  %v2598_v50 = vpack.c.bf16 %v8736_v52, %v8709_v42  ;;  %v11126_v44 = vld [vmem:[#allocation81_spill] sm:$0xff]  ;;  %v11128_v38 = vld [vmem:[#allocation66_spill] sm:$0xff] }
 0x582   :  { %2873 = vmatprep.subr.bf16.mxu0 %v11122_v23  ;;  %v2493_v63 = vmul.f32 %v4847_v55, %v2463_v4  ;;  %v2495_v34 = vmul.f32 %v4849_v1, %v2455_v5  ;;  %v2496_v2 = vmul.f32 %v4850_v58, %v2467_v10  ;;  %v2555_v26 = vsel %vm379_vm7, %v2530_v16, %v11126_v44  ;;  %v4867_v58 = vld [vmem:[%s10631_s1 + $0x360] sm:$0xff]  ;;  %v11132_v10 = vld [vmem:[#allocation82_spill] sm:$0xff] }
 0x583   :  { %2978 = vmatpush1.bf16.msra.mxu1 %v2411_v12  ;;  %v2452_v37 = vpop.permute.xlu0 %2451  ;;  %v2506_v6 = vpack.c.bf16 %v2498_v17, %v2494_v29  ;;  %v2546_v4 = vpop.permute.xlu1 %2545  ;;  %v11127_v8 = vpack.c.bf16 %v8603_v46, %v8640_v14  ;;  %v11130_v55 = vpack.c.bf16 %v8633_v49, %v8653_v24  ;;  %v4868_v29 = vld [vmem:[%s10631_s1 + $0x368] sm:$0xff]  ;;  %v2600_v46 = vpack.c.bf16 %v8834_v30, %v8809_v31  ;;  %v4863_v17 = vld [vmem:[%s10631_s1 + $0x340] sm:$0xff] }
 0x584   :  { %2979 = vmatprep.subr.bf16.mxu1 %v11125_v59  ;;  %v2456_v12 = vsel %vm329_vm6, %v11120_v60, %v2452_v37  ;;  %v2468_v47 = vsel %vm329_vm6, %v2452_v37, %v11121_v11  ;;  %v2599_v60 = vpack.c.bf16 %v8832_v13, %v8781_v40  ;;  %v11129_v11 = vld [vmem:[#allocation57_spill] sm:$0xff]  ;;  %v2650_v40 = vsel %vm429_vm8, %v11128_v38, %v8569_v33  ;;  %v11131_v13 = vld [vmem:[#allocation79_spill] sm:$0xff] }
 0x585   :  { %v2499_v52 = vmul.f32 %v4853_v45, %v2456_v12  ;;  %v2500_v42 = vmul.f32 %v4854_v48, %v2468_v47  ;;  %2874 = vmatpush1.bf16.msra.mxu0 %v11127_v8  ;;  %v2654_v43 = vsel %vm429_vm8, %v11129_v11, %v11128_v38  ;;  %v4876_v14 = vld [vmem:[%s10631_s1 + $0x3a8] sm:$0xff]  ;;  %v2505_v1 = vpack.c.bf16 %v2497_v21, %v2493_v63  ;;  %v4865_v21 = vld [vmem:[%s10631_s1 + $0x350] sm:$0xff]  ;;  %v4874_v47 = vld [vmem:[%s10631_s1 + $0x398] sm:$0xff] }
 0x586   :  { %2875 = vmatprep.subr.bf16.mxu0 %v2506_v6  ;;  %v2559_v31 = vsel %vm379_vm7, %v11131_v13, %v2530_v16  ;;  %v2590_v30 = vmul.f32 %v4864_v22, %v2555_v26  ;;  %v11133_v45 = vld [vmem:[#allocation80_spill] sm:$0xff]  ;;  %v4866_v16 = vld [vmem:[%s10631_s1 + $0x358] sm:$0xff]  ;;  %v2551_v37 = vsel %vm379_vm7, %v11126_v44, %v2546_v4  ;;  %v2563_v59 = vsel %vm379_vm7, %v2546_v4, %v11131_v13  ;;  %v4869_v22 = vld [vmem:[%s10631_s1 + $0x370] sm:$0xff] }
 0x587   :  { %2980 = vmatpush1.bf16.msra.mxu1 %v11130_v55  ;;  %v2507_v5 = vpack.c.bf16 %v2499_v52, %v2495_v34  ;;  %v2532_v49 = vpop.permute.xlu0 %2531  ;;  %v2508_v24 = vpack.c.bf16 %v2500_v42, %v2496_v2  ;;  %v2638_v63 = vpop.permute.xlu1 %2637  ;;  %v2649_v34 = vsel %vm429_vm8, %v11123_v18, %v8551_v25  ;;  %v2682_v12 = vmul.f32 %v4876_v14, %v2650_v40  ;;  %v4870_v44 = vld [vmem:[%s10631_s1 + $0x378] sm:$0xff]  ;;  %v4875_v18 = vld [vmem:[%s10631_s1 + $0x3a0] sm:$0xff]  ;;  %v4872_v26 = vld [vmem:[%s10631_s1 + $0x388] sm:$0xff] }
 0x588   :  { %v2556_v23 = vsel %vm379_vm7, %v2532_v49, %v11132_v10  ;;  %v2560_v48 = vsel %vm379_vm7, %v11133_v45, %v2532_v49  ;;  %v2657_v2 = vsel %vm429_vm8, %v2638_v63, %v11124_v7  ;;  %v2658_v7 = vsel %vm429_vm8, %v8635_v39, %v11129_v11  ;;  %v4878_v8 = vld [vmem:[%s10631_s1 + $0x3b8] sm:$0xff]  ;;  %v4873_v11 = vld [vmem:[%s10631_s1 + $0x390] sm:$0xff] }
 0x589   :  { %v2594_v6 = vmul.f32 %v4868_v29, %v2556_v23  ;;  %2981 = vmatprep.subr.bf16.mxu1 %v2508_v24  ;;  %2876 = vmatpush1.bf16.msra.mxu0 %v2505_v1  ;;  %v2593_v52 = vmul.f32 %v4867_v58, %v2560_v48  ;;  %v2591_v38 = vmul.f32 %v4865_v21, %v2551_v37  ;;  %v4871_v24 = vld [vmem:[%s10631_s1 + $0x380] sm:$0xff]  ;;  %v5171_v48 = vld [vmem:[%s10637_s7 + $0x1c] ss:$12 sps:$4 sm:$0xff]  }
 0x58a   :  { %2877 = vmatprep.subr.bf16.mxu0 %v2598_v50  ;;  %v2589_v50 = vmul.f32 %v4863_v17, %v2559_v31  ;;  %v2592_v55 = vmul.f32 %v4866_v16, %v2563_v59  ;;  %v2680_v40 = vmul.f32 %v4874_v47, %v2657_v2  ;;  %v2681_v17 = vmul.f32 %v4875_v18, %v2654_v43  ;;  %v5168_v43 = vld [vmem:[%s10637_s7] ss:$12 sps:$4 sm:$0xff]   ;;  %v5173_v18 = vld [vmem:[%s10637_s7 + $0x18] ss:$12 sps:$4 sm:$0xff]  }
 0x58b   :  { %2982 = vmatpush1.bf16.msra.mxu1 %v2507_v5  ;;  %v2548_v42 = vpop.permute.xlu0 %2547  ;;  %v2602_v4 = vpack.c.bf16 %v2594_v6, %v2590_v30  ;;  %v2618_v49 = vpop.permute.xlu1 %2617  ;;  %v2678_v13 = vmul.f32 %v4872_v26, %v2649_v34  ;;  %v2646_v31 = vsel %vm429_vm8, %v8569_v33, %v8635_v39  ;;  %v2684_v30 = vmul.f32 %v4878_v8, %v2658_v7  ;;  %v4884_v47 = vld [vmem:[%s10631_s1 + $0x3e8] sm:$0xff]  ;;  %v4882_v8 = vld [vmem:[%s10631_s1 + $0x3d8] sm:$0xff] }
 0x58c   :  { %2983 = vmatprep.subr.bf16.mxu1 %v2600_v46  ;;  %v2552_v29 = vsel %vm379_vm7, %v11132_v10, %v2548_v42  ;;  %v2564_v14 = vsel %vm379_vm7, %v2548_v42, %v11133_v45  ;;  %v2645_v46 = vsel %vm429_vm8, %v8551_v25, %v2638_v63  ;;  %v4877_v25 = vld [vmem:[%s10631_s1 + $0x3b0] sm:$0xff]  ;;  %v2601_v56 = vpack.c.bf16 %v2593_v52, %v2589_v50  ;;  %v4880_v63 = vld [vmem:[%s10631_s1 + $0x3c8] sm:$0xff] }
 0x58d   :  { %v2595_v1 = vmul.f32 %v4869_v22, %v2552_v29  ;;  %v2596_v5 = vmul.f32 %v4870_v44, %v2564_v14  ;;  %2878 = vmatpush1.bf16.msra.mxu0 %v2597_v20  ;;  %v2679_v10 = vmul.f32 %v4873_v11, %v2645_v46  ;;  %v2694_v23 = vpack.c.bf16 %v2682_v12, %v2678_v13  ;;  %v4883_v12 = vld [vmem:[%s10631_s1 + $0x3e0] sm:$0xff]  ;;  %v4881_v42 = vld [vmem:[%s10631_s1 + $0x3d0] sm:$0xff]  ;;  %v4886_v14 = vld [vmem:[%s10631_s1 + $0x3f8] sm:$0xff] }
 0x58e   :  { %2879 = vmatprep.subr.bf16.mxu0 %v2602_v4  ;;  %v2677_v45 = vmul.f32 %v4871_v24, %v8855_v57  ;;  %v2696_v39 = vpack.c.bf16 %v2684_v30, %v2680_v40  ;;  %v4879_v57 = vld [vmem:[%s10631_s1 + $0x3c0] sm:$0xff]  ;;  %v4885_v29 = vld [vmem:[%s10631_s1 + $0x3f0] sm:$0xff] }
 0x58f   :  { %2984 = vmatpush1.bf16.msra.mxu1 %v2599_v60  ;;  %v2603_v20 = vpack.c.bf16 %v2595_v1, %v2591_v38  ;;  %v2620_v62 = vpop.permute.xlu0 %2619  ;;  %v2604_v58 = vpack.c.bf16 %v2596_v5, %v2592_v55  ;;  %v2626_v33 = vpop.permute.xlu1 %2625  ;;  %v2683_v60 = vmul.f32 %v4877_v25, %v2646_v31  ;;  %v11134_v31 = vmov 0  }
 0x590   :  { %v2693_v21 = vpack.c.bf16 %v2681_v17, %v2677_v45  ;;  %v2655_v6 = vsel %vm429_vm8, %v2618_v49, %v2626_v33 }
 0x591   :  { %2985 = vmatprep.subr.bf16.mxu1 %v2604_v58  ;;  %2880 = vmatpush1.bf16.msra.mxu0 %v2601_v56  ;;  %v2695_v37 = vpack.c.bf16 %v2683_v60, %v2679_v10  ;;  %v2685_v26 = vmul.f32 %v4879_v57, %v2655_v6  ;;  %v5174_v56 = vld [vmem:[%s10637_s7 + $0x8] ss:$12 sps:$4 sm:$0xff]  }
 0x592   :  { %2902 = vmatprep.subr.bf16.mxu0 %v2694_v23  ;;  %v11135_v6 = vld [vmem:[#allocation8_spill] sm:$0xff] }
 0x593   :  { %2986 = vmatpush1.bf16.msra.mxu1 %v2603_v20  ;;  %v2636_v16 = vpop.permute.xlu0 %2635  ;;  %v2634_v59 = vpop.permute.xlu1 %2633  ;;  %v5175_v20 = vld [vmem:[%s10637_s7 + $0x20] ss:$12 sps:$4 sm:$0xff]  }
 0x594   :  { %3008 = vmatprep.subr.bf16.mxu1 %v2696_v39  ;;  %2882 = vmatmul.mubr.bf16.vlgmr.msra.gmra.mrb[16].mxu0 %v5168_v43  ;;  %v2651_v34 = vsel %vm429_vm8, %v2626_v33, %v2634_v59 }
 0x595   :  { %2903 = vmatpush1.bf16.msra.mxu0 %v2693_v21  ;;  %2891 = vmatprep.mubr.bf16.mxu0 %v5171_v48  ;;  %v2686_v7 = vmul.f32 %v4880_v63, %v2651_v34 }
 0x596   :  { %2988 = vmatmul.mubr.bf16.vlgmr.msra.gmra.mrb[16].mxu1 %v5168_v43 }
 0x597   :  { %3009 = vmatpush1.bf16.msra.mxu1 %v2695_v37  ;;  %v2628_v2 = vpop.permute.xlu0 %2627  ;;  %2997 = vmatprep.mubr.bf16.mxu1 %v5171_v48  ;;  %v2642_v4 = vpop.permute.xlu1 %2641 }
 0x598   :  { %v2652_v22 = vsel %vm429_vm8, %v2628_v2, %v2636_v16  ;;  %v2656_v44 = vsel %vm429_vm8, %v2620_v62, %v2628_v2  ;;  %v2647_v38 = vsel %vm429_vm8, %v2634_v59, %v2642_v4  ;;  %v2659_v55 = vsel %vm429_vm8, %v2642_v4, %v2618_v49 }
 0x599   :  { %v2689_v50 = vmul.f32 %v4883_v12, %v2656_v44  ;;  %v2690_v52 = vmul.f32 %v4884_v47, %v2652_v22  ;;  %v2687_v1 = vmul.f32 %v4881_v42, %v2647_v38  ;;  %v2688_v49 = vmul.f32 %v4882_v8, %v2659_v55  ;;  %v11137_v47 = vld [vmem:[#allocation9_spill] sm:$0xff]  ;;  %v11141_v8 = vld [vmem:[#allocation11_spill] sm:$0xff] }
 0x59b   :  { %v2697_v11 = vpack.c.bf16 %v2689_v50, %v2685_v26  ;;  %v2644_v46 = vpop.permute.xlu0 %2643  ;;  %v2698_v40 = vpack.c.bf16 %v2690_v52, %v2686_v7 }
 0x59c   :  { %v2648_v5 = vsel %vm429_vm8, %v2636_v16, %v2644_v46  ;;  %v2660_v24 = vsel %vm429_vm8, %v2644_v46, %v2620_v62  ;;  %2892 = vmatmul.mubr.bf16.gmra.mrb[20].mxu0 %v5173_v18 }
 0x59d   :  { %v2691_v17 = vmul.f32 %v4885_v29, %v2648_v5  ;;  %v2692_v13 = vmul.f32 %v4886_v14, %v2660_v24  ;;  %2904 = vmatprep.subr.bf16.mxu0 %v2698_v40  ;;  %2934 = vmatprep.mubr.bf16.mxu0 %v11134_v31 }
 0x59e   :  { %2998 = vmatmul.mubr.bf16.gmra.mrb[20].mxu1 %v5173_v18  ;;  %2905 = vmatpush1.bf16.msra.mxu0 %v2697_v11  ;;  %v11139_v18 = vld [vmem:[#allocation10_spill] sm:$0xff] }
 0x59f   :  { %v2699_v25 = vpack.c.bf16 %v2691_v17, %v2687_v1  ;;  %v2700_v30 = vpack.c.bf16 %v2692_v13, %v2688_v49  ;;  %3040 = vmatprep.mubr.bf16.mxu1 %v11134_v31  ;;  %v11143_v49 = vld [vmem:[#allocation12_spill] sm:$0xff] }
 0x5a1   :  { %3010 = vmatprep.subr.bf16.mxu1 %v2700_v30 }
 0x5a2   :  { %3011 = vmatpush1.bf16.msra.mxu1 %v2699_v25  ;;  %v11145_v25 = vld [vmem:[#allocation13_spill] sm:$0xff] }
 0x5a4   :  { %4893 = vmatmul.mubr.msk.bf16.vlgmr.msra.gmra.mrb[16].mxu0 %vm1624_vm9, %v5174_v56 }
 0x5a5   :  { %2944 = vmatprep.mubr.bf16.mxu0 %v11134_v31  ;;  %v2796_v62 = vpop.permute.xlu1 %2795 }
 0x5a6   :  { %4895 = vmatmul.mubr.msk.bf16.vlgmr.msra.gmra.mrb[16].mxu1 %vm1624_vm9, %v5174_v56 }
 0x5a7   :  { %3050 = vmatprep.mubr.bf16.mxu1 %v11134_v31  ;;  %v9043_v58 = vpop.permute.xlu0 %2800 }
 0x5ac   :  { %4894 = vmatmul.mubr.msk.bf16.gmra.mrb[20].mxu0 %vm1624_vm9, %v5175_v20 }
 0x5ae   :  { %4896 = vmatmul.mubr.msk.bf16.gmra.mrb[20].mxu1 %vm1624_vm9, %v5175_v20  ;;  %v11147_v20 = vld [vmem:[#allocation14_spill] sm:$0xff] }
 0x677   :  { %v2936_v10 = vpop.f32.mrb[16].mxu0 }
 0x678   :  { %v5059_v23 = vadd.f32 %v2936_v10, %v2796_v62  ;;  %v2938_v43 = vpop.f32.mrb[17].mxu0 }
 0x679   :  { %v3042_v45 = vpop.f32.mrb[16].mxu1  ;;  %v2940_v39 = vpop.f32.mrb[18].mxu0  ;;  %v5060_v11 = vadd.f32 %v2938_v43, %v2796_v62 }
 0x67a   :  { %v5067_v33 = vadd.f32 %v3042_v45, %v2796_v62  ;;  %v3044_v60 = vpop.f32.mrb[17].mxu1  ;;  %v3061_v48 = vmax.f32 %v5059_v23, 0.0  ;;  %v5061_v21 = vadd.f32 %v2940_v39, %v9043_v58  ;;  %v2942_v16 = vpop.f32.mrb[19].mxu0 }
 0x67b   :  { %v3046_v37 = vpop.f32.mrb[18].mxu1  ;;  %v5062_v46 = vadd.f32 %v2942_v16, %v9043_v58  ;;  %v3062_v40 = vmax.f32 %v5060_v11, 0.0  ;;  %v5068_v1 = vadd.f32 %v3044_v60, %v2796_v62  ;;  %v9201_v23 = vpop.permute.xlu1 %2805 }
 0x67c   :  { %v5069_v57 = vadd.f32 %v3046_v37, %v9043_v58  ;;  %v3048_v59 = vpop.f32.mrb[19].mxu1  ;;  %v9048_v63 = vadd.f32 %v3061_v48, %v11135_v6  ;;  %v3063_v34 = vmax.f32 %v5067_v33, 0.0  ;;  %v3065_v12 = vmax.f32 %v5061_v21, 0.0  ;;  %v9207_v45 = vpop.permute.xlu0 %2810 }
 0x67d   :  { %v3066_v5 = vmax.f32 %v5062_v46, 0.0  ;;  %v5070_v24 = vadd.f32 %v3048_v59, %v9043_v58  ;;  %v9138_v17 = vadd.f32 %v3062_v40, %v11143_v49  ;;  %v3064_v13 = vmax.f32 %v5068_v1, 0.0  ;;  %v11149_v58 = vld [vmem:[#allocation15_spill] sm:$0xff] }
 0x67e   :  { %11136 = vst [vmem:[#allocation24_spill] sm:$0xff] %v9048_v63  ;;  %v9051_v2 = vadd.f32 %v3065_v12, %v11137_v47  ;;  %v3067_v22 = vmax.f32 %v5069_v57, 0.0  ;;  %3174 = vrot.lane.b32.xlu1 %v9048_v63, %s5238_s29  ;;  %v9058_v26 = vadd.f32 %v3063_v34, %v11139_v18  ;;  %v11151_v57 = vld [vmem:[#allocation16_spill] sm:$0xff]  ;;  %v11153_v12 = vld [vmem:[#allocation17_spill] sm:$0xff]  ;;  %v11155_v18 = vld [vmem:[#allocation18_spill] sm:$0xff] }
 0x67f   :  { %v9055_v44 = vpop.f32.mrb[20].mxu0  ;;  %11144 = vst [vmem:[#allocation43_spill] sm:$0xff] %v9138_v17  ;;  %v9143_v30 = vadd.f32 %v3066_v5, %v11145_v25  ;;  %v3068_v56 = vmax.f32 %v5070_v24, 0.0  ;;  %v9148_v62 = vadd.f32 %v3064_v13, %v11147_v20 }
 0x680   :  { %11138 = vst [vmem:[#allocation64_spill] sm:$0xff] %v9051_v2  ;;  %11140 = vst [vmem:[#allocation68_spill] sm:$0xff] %v9058_v26  ;;  %v9060_v7 = vpop.f32.mrb[21].mxu0  ;;  %3176 = vrot.lane.b32.xlu0 %v9051_v2, %s5238_s29  ;;  %v9073_v38 = vadd.f32 %v3067_v22, %v11141_v8  ;;  %v5063_v43 = vadd.f32 %v9055_v44, %v9201_v23  ;;  %v11157_v8 = vld [vmem:[#allocation19_spill] sm:$0xff] }
 0x681   :  { %v9062_v50 = vpop.f32.mrb[20].mxu1  ;;  %v9068_v42 = vpop.f32.mrb[22].mxu0  ;;  %11146 = vst [vmem:[#allocation46_spill] sm:$0xff] %v9143_v30  ;;  %11148 = vst [vmem:[#allocation26_spill] sm:$0xff] %v9148_v62  ;;  %v9153_v10 = vadd.f32 %v3068_v56, %v11149_v58 }
 0x682   :  { %v9070_v4 = vpop.f32.mrb[21].mxu1  ;;  %11142 = vst [vmem:[#allocation67_spill] sm:$0xff] %v9073_v38  ;;  %v9075_v55 = vpop.f32.mrb[23].mxu0  ;;  %3190 = vrot.lane.b32.xlu1 %v9058_v26, %s5238_s29  ;;  %v5065_v33 = vadd.f32 %v9068_v42, %v9207_v45  ;;  %v3069_v39 = vmax.f32 %v5063_v43, 0.0  ;;  %v5071_v60 = vadd.f32 %v9062_v50, %v9201_v23 }
 0x683   :  { %v9077_v29 = vpop.f32.mrb[22].mxu1  ;;  %11150 = vst [vmem:[#allocation69_spill] sm:$0xff] %v9153_v10  ;;  %v5072_v32 = vadd.f32 %v9070_v4, %v9201_v23 }
 0x684   :  { %v9081_v14 = vpop.f32.mrb[23].mxu1  ;;  %3192 = vrot.lane.b32.xlu0 %v9073_v38, %s5238_s29  ;;  %v3073_v21 = vmax.f32 %v5065_v33, 0.0  ;;  %v5073_v16 = vadd.f32 %v9077_v29, %v9207_v45  ;;  %v9226_v59 = vadd.f32 %v3069_v39, %v11151_v57  ;;  %v3071_v6 = vmax.f32 %v5071_v60, 0.0 }
 0x685   :  { %v5074_v41 = vadd.f32 %v9081_v14, %v9207_v45 }
 0x686   :  { %3270 = vrot.lane.b32.xlu1 %v9048_v63, %s5239_s25  ;;  %11152 = vst [vmem:[#allocation47_spill] sm:$0xff] %v9226_v59  ;;  %v9233_v47 = vadd.f32 %v3073_v21, %v11153_v12  ;;  %v3075_v22 = vmax.f32 %v5073_v16, 0.0  ;;  %v9240_v50 = vadd.f32 %v3071_v6, %v11155_v18 }
 0x688   :  { %3272 = vrot.lane.b32.xlu0 %v9051_v2, %s5239_s25  ;;  %11154 = vst [vmem:[#allocation70_spill] sm:$0xff] %v9233_v47  ;;  %11156 = vst [vmem:[#allocation61_spill] sm:$0xff] %v9240_v50  ;;  %v9247_v29 = vadd.f32 %v3075_v22, %v11157_v8  ;;  %v5064_v22 = vadd.f32 %v9060_v7, %v9201_v23  ;;  %v5066_v8 = vadd.f32 %v9075_v55, %v9207_v45  ;;  %v11161_v55 = vld [vmem:[#allocation33_spill] sm:$0xff] }
 0x689   :  { %v3223_v23 = vld [vmem:[%s10631_s1 + $0x8] sm:$0xff] }
 0x68a   :  { %3286 = vrot.lane.b32.xlu1 %v9058_v26, %s5239_s25  ;;  %11158 = vst [vmem:[#allocation62_spill] sm:$0xff] %v9247_v29  ;;  %v3070_v0 = vmax.f32 %v5064_v22, 0.0  ;;  %v3074_v15 = vmax.f32 %v5066_v8, 0.0  ;;  %v3072_v22 = vmax.f32 %v5072_v32, 0.0  ;;  %v3227_v45 = vld [vmem:[%s10631_s1 + $0x28] sm:$0xff]  ;;  %v11163_v8 = vld [vmem:[#allocation34_spill] sm:$0xff] }
 0x68b   :  { %v3076_v32 = vmax.f32 %v5074_v41, 0.0 }
 0x68c   :  { %3288 = vrot.lane.b32.xlu0 %v9073_v38, %s5239_s25  ;;  %v9358_v27 = vadd.f32 %v3070_v0, %v11161_v55  ;;  %v9372_v0 = vadd.f32 %v3074_v15, %v11163_v8  ;;  %v9380_v19 = vadd.f32 %v3072_v22, %v11165_v53  ;;  %v3222_v8 = vld [vmem:[%s10631_s1] sm:$0xff]  ;;  %v3225_v53 = vld [vmem:[%s10631_s1 + $0x18] sm:$0xff] }
 0x68e   :  { %3366 = vrot.lane.b32.xlu1 %v9048_v63, %s5240_s0  ;;  %11162 = vst [vmem:[#allocation48_spill] sm:$0xff] %v9358_v27  ;;  %11164 = vst [vmem:[#allocation23_spill] sm:$0xff] %v9372_v0 }
 0x68f   :  { %11166 = vst [vmem:[#allocation59_spill] sm:$0xff] %v9380_v19 }
 0x690   :  { %3368 = vrot.lane.b32.xlu0 %v9051_v2, %s5240_s0 }
 0x692   :  { %3382 = vrot.lane.b32.xlu1 %v9058_v26, %s5240_s0 }
 0x694   :  { %3384 = vrot.lane.b32.xlu0 %v9073_v38, %s5240_s0 }
 0x696   :  { %3462 = vrot.lane.b32.xlu1 %v9048_v63, %s5241_s26 }
 0x698   :  { %3464 = vrot.lane.b32.xlu0 %v9051_v2, %s5241_s26 }
 0x69a   :  { %3478 = vrot.lane.b32.xlu1 %v9058_v26, %s5241_s26 }
 0x69c   :  { %3480 = vrot.lane.b32.xlu0 %v9073_v38, %s5241_s26 }
 0x69e   :  { %3574 = vrot.lane.b32.xlu1 %v9048_v63, %s5242_s27 }
 0x6a0   :  { %3576 = vrot.lane.b32.xlu0 %v9051_v2, %s5242_s27 }
 0x6a2   :  { %3590 = vrot.lane.b32.xlu1 %v9058_v26, %s5242_s27 }
 0x6a4   :  { %3592 = vrot.lane.b32.xlu0 %v9073_v38, %s5242_s27 }
 0x6a6   :  { %3670 = vrot.lane.b32.xlu1 %v9048_v63, %s5243_s28 }
 0x6a8   :  { %3672 = vrot.lane.b32.xlu0 %v9051_v2, %s5243_s28 }
 0x6aa   :  { %3686 = vrot.lane.b32.xlu1 %v9058_v26, %s5243_s28 }
 0x6ac   :  { %3688 = vrot.lane.b32.xlu0 %v9073_v38, %s5243_s28 }
 0x6ae   :  { %3766 = vrot.lane.b32.xlu1 %v9048_v63, %s5244_s30 }
 0x6b0   :  { %3768 = vrot.lane.b32.xlu0 %v9051_v2, %s5244_s30 }
 0x6b2   :  { %3782 = vrot.lane.b32.xlu1 %v9058_v26, %s5244_s30 }
 0x6b4   :  { %3784 = vrot.lane.b32.xlu0 %v9073_v38, %s5244_s30 }
 0x6b6   :  { %3862 = vrot.lane.b32.xlu1 %v9048_v63, %s5245_s14  ;;  %v4945_v63 = vld [vmem:[%s10631_s1 + $0x200] sm:$0xff] }
 0x6b8   :  { %3864 = vrot.lane.b32.xlu0 %v9051_v2, %s5245_s14 }
 0x6ba   :  { %3182 = vrot.lane.b32.xlu1 %v9138_v17, %s5238_s29 }
 0x6bc   :  { %3184 = vrot.lane.b32.xlu0 %v9143_v30, %s5238_s29 }
 0x6be   :  { %3198 = vrot.lane.b32.xlu1 %v9148_v62, %s5238_s29 }
 0x6c0   :  { %3200 = vrot.lane.b32.xlu0 %v9153_v10, %s5238_s29 }
 0x6c2   :  { %3278 = vrot.lane.b32.xlu1 %v9138_v17, %s5239_s25 }
 0x6c4   :  { %3280 = vrot.lane.b32.xlu0 %v9143_v30, %s5239_s25 }
 0x6c6   :  { %3294 = vrot.lane.b32.xlu1 %v9148_v62, %s5239_s25 }
 0x6c8   :  { %3296 = vrot.lane.b32.xlu0 %v9153_v10, %s5239_s25 }
 0x6ca   :  { %3374 = vrot.lane.b32.xlu1 %v9138_v17, %s5240_s0 }
 0x6cc   :  { %3376 = vrot.lane.b32.xlu0 %v9143_v30, %s5240_s0 }
 0x6ce   :  { %3390 = vrot.lane.b32.xlu1 %v9148_v62, %s5240_s0 }
 0x6d0   :  { %3392 = vrot.lane.b32.xlu0 %v9153_v10, %s5240_s0 }
 0x6d2   :  { %3470 = vrot.lane.b32.xlu1 %v9138_v17, %s5241_s26 }
 0x6d4   :  { %3472 = vrot.lane.b32.xlu0 %v9143_v30, %s5241_s26 }
 0x6d6   :  { %3486 = vrot.lane.b32.xlu1 %v9148_v62, %s5241_s26 }
 0x6d8   :  { %3488 = vrot.lane.b32.xlu0 %v9153_v10, %s5241_s26 }
 0x6da   :  { %3582 = vrot.lane.b32.xlu1 %v9138_v17, %s5242_s27 }
 0x6dc   :  { %3584 = vrot.lane.b32.xlu0 %v9143_v30, %s5242_s27 }
 0x6de   :  { %3598 = vrot.lane.b32.xlu1 %v9148_v62, %s5242_s27 }
 0x6e0   :  { %3600 = vrot.lane.b32.xlu0 %v9153_v10, %s5242_s27 }
 0x6e2   :  { %3678 = vrot.lane.b32.xlu1 %v9138_v17, %s5243_s28 }
 0x6e4   :  { %3680 = vrot.lane.b32.xlu0 %v9143_v30, %s5243_s28 }
 0x6e6   :  { %3694 = vrot.lane.b32.xlu1 %v9148_v62, %s5243_s28 }
 0x6e8   :  { %3696 = vrot.lane.b32.xlu0 %v9153_v10, %s5243_s28 }
 0x6ea   :  { %3774 = vrot.lane.b32.xlu1 %v9138_v17, %s5244_s30 }
 0x6ec   :  { %3776 = vrot.lane.b32.xlu0 %v9143_v30, %s5244_s30 }
 0x6ee   :  { %3790 = vrot.lane.b32.xlu1 %v9148_v62, %s5244_s30 }
 0x6f0   :  { %3792 = vrot.lane.b32.xlu0 %v9153_v10, %s5244_s30  ;;  %v9217_v48 = vpop.permute.xlu1 %3174 }
 0x6f2   :  { %v9221_v37 = vpop.permute.xlu0 %3176  ;;  %3870 = vrot.lane.b32.xlu1 %v9138_v17, %s5245_s14 }
 0x6f4   :  { %3872 = vrot.lane.b32.xlu0 %v9143_v30, %s5245_s14  ;;  %v9230_v34 = vpop.permute.xlu1 %3190 }
 0x6f6   :  { %v9235_v44 = vpop.permute.xlu0 %3192  ;;  %3178 = vrot.lane.b32.xlu1 %v9226_v59, %s5238_s29 }
 0x6f8   :  { %3180 = vrot.lane.b32.xlu0 %v9233_v47, %s5238_s29  ;;  %v9244_v42 = vpop.permute.xlu1 %3270 }
 0x6fa   :  { %v9249_v11 = vpop.permute.xlu0 %3272  ;;  %3194 = vrot.lane.b32.xlu1 %v9240_v50, %s5238_s29 }
 0x6fc   :  { %3196 = vrot.lane.b32.xlu0 %v9247_v29, %s5238_s29  ;;  %v9255_v46 = vpop.permute.xlu1 %3286 }
 0x6fe   :  { %v9257_v40 = vpop.permute.xlu0 %3288  ;;  %3274 = vrot.lane.b32.xlu1 %v9226_v59, %s5239_s25 }
 0x700   :  { %3276 = vrot.lane.b32.xlu0 %v9233_v47, %s5239_s25  ;;  %v9263_v1 = vpop.permute.xlu1 %3366 }
 0x702   :  { %v9265_v5 = vpop.permute.xlu0 %3368  ;;  %3290 = vrot.lane.b32.xlu1 %v9240_v50, %s5239_s25 }
 0x704   :  { %3292 = vrot.lane.b32.xlu0 %v9247_v29, %s5239_s25  ;;  %v9271_v24 = vpop.permute.xlu1 %3382 }
 0x706   :  { %v9273_v49 = vpop.permute.xlu0 %3384  ;;  %3370 = vrot.lane.b32.xlu1 %v9226_v59, %s5240_s0 }
 0x708   :  { %3372 = vrot.lane.b32.xlu0 %v9233_v47, %s5240_s0  ;;  %v9279_v13 = vpop.permute.xlu1 %3462 }
 0x70a   :  { %v9281_v25 = vpop.permute.xlu0 %3464  ;;  %3386 = vrot.lane.b32.xlu1 %v9240_v50, %s5240_s0 }
 0x70c   :  { %3388 = vrot.lane.b32.xlu0 %v9247_v29, %s5240_s0  ;;  %v9287_v56 = vpop.permute.xlu1 %3478 }
 0x70e   :  { %v9289_v20 = vpop.permute.xlu0 %3480  ;;  %3466 = vrot.lane.b32.xlu1 %v9226_v59, %s5241_s26 }
 0x710   :  { %3468 = vrot.lane.b32.xlu0 %v9233_v47, %s5241_s26  ;;  %v9295_v58 = vpop.permute.xlu1 %3574 }
 0x712   :  { %v9297_v43 = vpop.permute.xlu0 %3576  ;;  %3482 = vrot.lane.b32.xlu1 %v9240_v50, %s5241_s26 }
 0x714   :  { %3484 = vrot.lane.b32.xlu0 %v9247_v29, %s5241_s26  ;;  %v9303_v33 = vpop.permute.xlu1 %3590 }
 0x716   :  { %v9305_v39 = vpop.permute.xlu0 %3592  ;;  %3578 = vrot.lane.b32.xlu1 %v9226_v59, %s5242_s27 }
 0x718   :  { %3580 = vrot.lane.b32.xlu0 %v9233_v47, %s5242_s27  ;;  %v9311_v60 = vpop.permute.xlu1 %3670 }
 0x71a   :  { %v9313_v21 = vpop.permute.xlu0 %3672  ;;  %3594 = vrot.lane.b32.xlu1 %v9240_v50, %s5242_s27 }
 0x71c   :  { %3596 = vrot.lane.b32.xlu0 %v9247_v29, %s5242_s27  ;;  %v9319_v16 = vpop.permute.xlu1 %3686 }
 0x71e   :  { %v9321_v57 = vpop.permute.xlu0 %3688  ;;  %3674 = vrot.lane.b32.xlu1 %v9226_v59, %s5243_s28 }
 0x720   :  { %3676 = vrot.lane.b32.xlu0 %v9233_v47, %s5243_s28  ;;  %v9327_v6 = vpop.permute.xlu1 %3766 }
 0x722   :  { %v9329_v12 = vpop.permute.xlu0 %3768  ;;  %3690 = vrot.lane.b32.xlu1 %v9240_v50, %s5243_s28 }
 0x724   :  { %3692 = vrot.lane.b32.xlu0 %v9247_v29, %s5243_s28  ;;  %v9337_v18 = vpop.permute.xlu1 %3782 }
 0x726   :  { %v9341_v52 = vpop.permute.xlu0 %3784  ;;  %3770 = vrot.lane.b32.xlu1 %v9226_v59, %s5244_s30 }
 0x728   :  { %3772 = vrot.lane.b32.xlu0 %v9233_v47, %s5244_s30  ;;  %v9349_v7 = vpop.permute.xlu1 %3862 }
 0x729   :  { %11159 = vst [vmem:[#allocation40_spill] sm:$0xff] %v9349_v7 }
 0x72a   :  { %v9353_v35 = vpop.permute.xlu0 %3864  ;;  %3786 = vrot.lane.b32.xlu1 %v9240_v50, %s5244_s30 }
 0x72b   :  { %11160 = vst [vmem:[#allocation42_spill] sm:$0xff] %v9353_v35 }
 0x72c   :  { %3788 = vrot.lane.b32.xlu0 %v9247_v29, %s5244_s30  ;;  %v3183_v4 = vpop.permute.xlu1 %3182 }
 0x72d   :  { %v3214_v14 = vsel %vm72_vm1, %v9217_v48, %v3183_v4  ;;  %v3210_v61 = vsel %vm72_vm1, %v3183_v4, %v9230_v34 }
 0x72e   :  { %v3185_v55 = vpop.permute.xlu0 %3184  ;;  %3186 = vrot.lane.b32.xlu1 %v9358_v27, %s5238_s29  ;;  %v3239_v28 = vmul.f32 %v3223_v23, %v3214_v14  ;;  %v3226_v23 = vld [vmem:[%s10631_s1 + $0x20] sm:$0xff]  ;;  %v3229_v14 = vld [vmem:[%s10631_s1 + $0x38] sm:$0xff] }
 0x72f   :  { %v3215_v51 = vsel %vm72_vm1, %v9221_v37, %v3185_v55  ;;  %v3211_v15 = vsel %vm72_vm1, %v3185_v55, %v9235_v44 }
 0x730   :  { %v3243_v41 = vmul.f32 %v3227_v45, %v3215_v51  ;;  %3188 = vrot.lane.b32.xlu0 %v9372_v0, %s5238_s29  ;;  %v3199_v36 = vpop.permute.xlu1 %3198  ;;  %v11167_v45 = vld [vmem:[#allocation36_spill] sm:$0xff]  ;;  %v3244_v31 = vmul.f32 %v3228_v3, %v3211_v15 }
 0x731   :  { %v3206_v22 = vsel %vm72_vm1, %v9230_v34, %v3199_v36  ;;  %v3218_v51 = vsel %vm72_vm1, %v3199_v36, %v9217_v48  ;;  %v9409_v55 = vadd.f32 %v3076_v32, %v11167_v45  ;;  %v3224_v48 = vld [vmem:[%s10631_s1 + $0x10] sm:$0xff] }
 0x732   :  { %v3201_v54 = vpop.permute.xlu0 %3200  ;;  %3202 = vrot.lane.b32.xlu1 %v9380_v19, %s5238_s29  ;;  %v3255_v36 = vpack.c.bf16 %v3243_v41, %v3239_v28  ;;  %v3238_v35 = vmul.f32 %v3222_v8, %v3218_v51  ;;  %v3241_v34 = vmul.f32 %v3225_v53, %v3206_v22  ;;  %v3240_v41 = vmul.f32 %v3224_v48, %v3210_v61  ;;  %v4929_v51 = vld [vmem:[%s10631_s1 + $0x180] sm:$0xff] }
 0x733   :  { %11168 = vst [vmem:[#allocation25_spill] sm:$0xff] %v9409_v55  ;;  %v3207_v32 = vsel %vm72_vm1, %v9235_v44, %v3201_v54  ;;  %v3219_v45 = vsel %vm72_vm1, %v3201_v54, %v9221_v37 }
 0x734   :  { %v3242_v4 = vmul.f32 %v3226_v23, %v3219_v45  ;;  %v3245_v7 = vmul.f32 %v3229_v14, %v3207_v32  ;;  %3204 = vrot.lane.b32.xlu0 %v9409_v55, %s5238_s29  ;;  %4098 = vmatprep.subr.bf16.mxu0 %v3255_v36  ;;  %v9427_v28 = vpop.permute.xlu1 %3278  ;;  %v3256_v8 = vpack.c.bf16 %v3244_v31, %v3240_v41  ;;  %v4932_v14 = vld [vmem:[%s10631_s1 + $0x198] sm:$0xff]  ;;  %v4933_v32 = vld [vmem:[%s10631_s1 + $0x1a0] sm:$0xff] }
 0x735   :  { %v4936_v45 = vld [vmem:[%s10631_s1 + $0x1b8] sm:$0xff] }
 0x736   :  { %v3254_v3 = vpack.c.bf16 %v3242_v4, %v3238_v35  ;;  %v9429_v15 = vpop.permute.xlu0 %3280  ;;  %3282 = vrot.lane.b32.xlu1 %v9358_v27, %s5239_s25  ;;  %v3257_v44 = vpack.c.bf16 %v3245_v7, %v3241_v34 }
 0x738   :  { %3284 = vrot.lane.b32.xlu0 %v9372_v0, %s5239_s25  ;;  %4099 = vmatpush1.bf16.msra.mxu0 %v3254_v3  ;;  %v9435_v54 = vpop.permute.xlu1 %3294 }
 0x739   :  { %4204 = vmatprep.subr.bf16.mxu1 %v3257_v44 }
 0x73a   :  { %4205 = vmatpush1.bf16.msra.mxu1 %v3256_v8  ;;  %v9437_v37 = vpop.permute.xlu0 %3296  ;;  %3298 = vrot.lane.b32.xlu1 %v9380_v19, %s5239_s25 }
 0x73c   :  { %3300 = vrot.lane.b32.xlu0 %v9409_v55, %s5239_s25  ;;  %v9443_v61 = vpop.permute.xlu1 %3374 }
 0x73e   :  { %v9445_v35 = vpop.permute.xlu0 %3376  ;;  %3378 = vrot.lane.b32.xlu1 %v9358_v27, %s5240_s0 }
 0x740   :  { %3380 = vrot.lane.b32.xlu0 %v9372_v0, %s5240_s0  ;;  %v9451_v31 = vpop.permute.xlu1 %3390 }
 0x742   :  { %v9453_v7 = vpop.permute.xlu0 %3392  ;;  %3394 = vrot.lane.b32.xlu1 %v9380_v19, %s5240_s0 }
 0x744   :  { %3396 = vrot.lane.b32.xlu0 %v9409_v55, %s5240_s0  ;;  %v9459_v53 = vpop.permute.xlu1 %3470  ;;  %s4581_s0 = sshll.u32 %s5250_s16, 4  ;;  %s4582_s0 = int_to_ptr.vmem [resolvable:$true] %s4581_s0 }
 0x745   :  { %s5214_s17 = scalar_lea.vmem %s4582_s0, 32  ;;  %p5219_p1 = scmp.lt.s32.totalorder %s4582_s0, %s4582_s0 }
 0x746   :  { %v9461_v22 = vpop.permute.xlu0 %3472  ;;  %3474 = vrot.lane.b32.xlu1 %v9358_v27, %s5241_s26  ;;  %p5215_p0 = scmp.ne.s32.totalorder %s4582_s0, %s5214_s17  ;;  %p5220_p2 = scmp.lt.s32.totalorder %s5214_s17, %s5214_s17 }
 0x748   :  { %3476 = vrot.lane.b32.xlu0 %v9372_v0, %s5241_s26  ;;  %v3487_v23 = vpop.permute.xlu1 %3486  ;;  %p5221_p3 = por %p5220_p2, %p5219_p1 }
 0x749   :  { %v3494_v36 = vsel %vm221_vm4, %v9287_v56, %v3487_v23  ;;  %v3506_v48 = vsel %vm221_vm4, %v3487_v23, %v9279_v13 }
 0x74a   :  { %v3489_v34 = vpop.permute.xlu0 %3488  ;;  %3490 = vrot.lane.b32.xlu1 %v9380_v19, %s5241_s26  ;;  %v9493_v3 = vmul.f32 %v4929_v51, %v3506_v48  ;;  %v9495_v44 = vmul.f32 %v4932_v14, %v3494_v36  ;;  %v4949_v36 = vld [vmem:[%s10631_s1 + $0x220] sm:$0xff]  ;;  %v4950_v48 = vld [vmem:[%s10631_s1 + $0x228] sm:$0xff]  ;;  %p5222_p4 = pnand %p5221_p3, %p5215_p0 }
 0x74b   :  { %v3495_v4 = vsel %vm221_vm4, %v9289_v20, %v3489_v34  ;;  %v3507_v41 = vsel %vm221_vm4, %v3489_v34, %v9281_v25  ;;  %v4946_v34 = vld [vmem:[%s10631_s1 + $0x208] sm:$0xff] }
 0x74c   :  { %11169 = vst [vmem:[#allocation60_spill] sm:$0xff] %v9493_v3  ;;  %11170 = vst [vmem:[#allocation31_spill] sm:$0xff] %v9495_v44  ;;  %v9497_v8 = vmul.f32 %v4933_v32, %v3507_v41  ;;  %v9499_v23 = vmul.f32 %v4936_v45, %v3495_v4  ;;  %3492 = vrot.lane.b32.xlu0 %v9409_v55, %s5241_s26  ;;  %v3583_v2 = vpop.permute.xlu1 %3582  ;;  %v4947_v4 = vld [vmem:[%s10631_s1 + $0x210] sm:$0xff] }
 0x74d   :  { %v3610_v51 = vsel %vm279_vm5, %v3583_v2, %v9303_v33  ;;  %v3614_v14 = vsel %vm279_vm5, %v9295_v58, %v3583_v2 }
 0x74e   :  { %11171 = vst [vmem:[#allocation44_spill] sm:$0xff] %v9497_v8  ;;  %11172 = vst [vmem:[#allocation29_spill] sm:$0xff] %v9499_v23  ;;  %v3585_v45 = vpop.permute.xlu0 %3584  ;;  %3878 = vrot.lane.b32.xlu1 %v9058_v26, %s5245_s14  ;;  %v9533_v30 = vmul.f32 %v4945_v63, %v3614_v14  ;;  %v9535_v17 = vmul.f32 %v4946_v34, %v3610_v51  ;;  %v4951_v51 = vld [vmem:[%s10631_s1 + $0x230] sm:$0xff]  ;;  %v4952_v14 = vld [vmem:[%s10631_s1 + $0x238] sm:$0xff] }
 0x74f   :  { %v3611_v2 = vsel %vm279_vm5, %v3585_v45, %v9305_v39  ;;  %v3615_v41 = vsel %vm279_vm5, %v9297_v43, %v3585_v45  ;;  %v4948_v45 = vld [vmem:[%s10631_s1 + $0x218] sm:$0xff] }
 0x750   :  { %11173 = vst [vmem:[#allocation65_spill] sm:$0xff] %v9533_v30  ;;  %11174 = vst [vmem:[#allocation27_spill] sm:$0xff] %v9535_v17  ;;  %v9537_v32 = vmul.f32 %v4949_v36, %v3615_v41  ;;  %v9539_v3 = vmul.f32 %v4950_v48, %v3611_v2  ;;  %3880 = vrot.lane.b32.xlu0 %v9073_v38, %s5245_s14  ;;  %v3599_v26 = vpop.permute.xlu1 %3598 }
 0x751   :  { %v3606_v63 = vsel %vm279_vm5, %v9303_v33, %v3599_v26  ;;  %v3618_v34 = vsel %vm279_vm5, %v3599_v26, %v9295_v58  ;;  %v4961_v33 = vld [vmem:[%s10631_s1 + $0x280] sm:$0xff] }
 0x752   :  { %11175 = vst [vmem:[#allocation73_spill] sm:$0xff] %v9537_v32  ;;  %11176 = vst [vmem:[#allocation45_spill] sm:$0xff] %v9539_v3  ;;  %v3601_v48 = vpop.permute.xlu0 %3600  ;;  %3586 = vrot.lane.b32.xlu1 %v9358_v27, %s5242_s27  ;;  %v9573_v2 = vmul.f32 %v4947_v4, %v3606_v63  ;;  %v9575_v41 = vmul.f32 %v4948_v45, %v3618_v34  ;;  %v4965_v63 = vld [vmem:[%s10631_s1 + $0x2a0] sm:$0xff]  ;;  %v4966_v34 = vld [vmem:[%s10631_s1 + $0x2a8] sm:$0xff] }
 0x753   :  { %v3607_v26 = vsel %vm279_vm5, %v9305_v39, %v3601_v48  ;;  %v3619_v58 = vsel %vm279_vm5, %v3601_v48, %v9297_v43  ;;  %v4962_v43 = vld [vmem:[%s10631_s1 + $0x288] sm:$0xff]  ;;  %v4963_v48 = vld [vmem:[%s10631_s1 + $0x290] sm:$0xff] }
 0x754   :  { %11177 = vst [vmem:[#allocation74_spill] sm:$0xff] %v9573_v2  ;;  %11178 = vst [vmem:[#allocation72_spill] sm:$0xff] %v9575_v41  ;;  %v9577_v36 = vmul.f32 %v4951_v51, %v3607_v26  ;;  %v9579_v30 = vmul.f32 %v4952_v14, %v3619_v58  ;;  %3888 = vrot.lane.b32.xlu0 %v9153_v10, %s5245_s14  ;;  %v3679_v39 = vpop.permute.xlu1 %3678  ;;  %v4903_v3 = vld [vmem:[%s10631_s1 + $0xb0] sm:$0xff] }
 0x755   :  { %v3706_v4 = vsel %vm329_vm6, %v3679_v39, %v9319_v16  ;;  %v3710_v45 = vsel %vm329_vm6, %v9311_v60, %v3679_v39 }
 0x756   :  { %11179 = vst [vmem:[#allocation71_spill] sm:$0xff] %v9577_v36  ;;  %11180 = vst [vmem:[#allocation49_spill] sm:$0xff] %v9579_v30  ;;  %v3681_v14 = vpop.permute.xlu0 %3680  ;;  %3602 = vrot.lane.b32.xlu1 %v9380_v19, %s5242_s27  ;;  %v9613_v39 = vmul.f32 %v4961_v33, %v3710_v45  ;;  %v9615_v32 = vmul.f32 %v4962_v43, %v3706_v4  ;;  %v4967_v4 = vld [vmem:[%s10631_s1 + $0x2b0] sm:$0xff]  ;;  %v4968_v45 = vld [vmem:[%s10631_s1 + $0x2b8] sm:$0xff] }
 0x757   :  { %v3707_v26 = vsel %vm329_vm6, %v3681_v14, %v9321_v57  ;;  %v3711_v58 = vsel %vm329_vm6, %v9313_v21, %v3681_v14  ;;  %v4964_v14 = vld [vmem:[%s10631_s1 + $0x298] sm:$0xff] }
 0x758   :  { %11181 = vst [vmem:[#allocation32_spill] sm:$0xff] %v9613_v39  ;;  %11182 = vst [vmem:[#allocation77_spill] sm:$0xff] %v9615_v32  ;;  %v9617_v51 = vmul.f32 %v4965_v63, %v3711_v58  ;;  %v9619_v2 = vmul.f32 %v4966_v34, %v3707_v26  ;;  %3588 = vrot.lane.b32.xlu0 %v9372_v0, %s5242_s27  ;;  %v3695_v36 = vpop.permute.xlu1 %3694 }
 0x759   :  { %v3702_v33 = vsel %vm329_vm6, %v9319_v16, %v3695_v36  ;;  %v3714_v43 = vsel %vm329_vm6, %v3695_v36, %v9311_v60  ;;  %v4977_v16 = vld [vmem:[%s10631_s1 + $0x300] sm:$0xff] }
 0x75a   :  { %11183 = vst [vmem:[#allocation75_spill] sm:$0xff] %v9617_v51  ;;  %11184 = vst [vmem:[#allocation78_spill] sm:$0xff] %v9619_v2  ;;  %v3697_v34 = vpop.permute.xlu0 %3696  ;;  %3682 = vrot.lane.b32.xlu1 %v9358_v27, %s5243_s28  ;;  %v9653_v26 = vmul.f32 %v4963_v48, %v3702_v33  ;;  %v9655_v58 = vmul.f32 %v4964_v14, %v3714_v43  ;;  %v4981_v33 = vld [vmem:[%s10631_s1 + $0x320] sm:$0xff]  ;;  %v4982_v43 = vld [vmem:[%s10631_s1 + $0x328] sm:$0xff] }
 0x75b   :  { %v3703_v60 = vsel %vm329_vm6, %v9321_v57, %v3697_v34  ;;  %v3715_v36 = vsel %vm329_vm6, %v3697_v34, %v9313_v21  ;;  %v4978_v21 = vld [vmem:[%s10631_s1 + $0x308] sm:$0xff]  ;;  %v4979_v34 = vld [vmem:[%s10631_s1 + $0x310] sm:$0xff] }
 0x75c   :  { %11185 = vst [vmem:[#allocation76_spill] sm:$0xff] %v9653_v26  ;;  %11186 = vst [vmem:[#allocation63_spill] sm:$0xff] %v9655_v58  ;;  %v9657_v63 = vmul.f32 %v4967_v4, %v3703_v60  ;;  %v9659_v39 = vmul.f32 %v4968_v45, %v3715_v36  ;;  %3604 = vrot.lane.b32.xlu0 %v9409_v55, %s5242_s27  ;;  %v3775_v57 = vpop.permute.xlu1 %3774 }
 0x75d   :  { %v3802_v48 = vsel %vm379_vm7, %v3775_v57, %v9337_v18  ;;  %v3806_v14 = vsel %vm379_vm7, %v9327_v6, %v3775_v57 }
 0x75e   :  { %11187 = vst [vmem:[#allocation28_spill] sm:$0xff] %v9657_v63  ;;  %11188 = vst [vmem:[#allocation81_spill] sm:$0xff] %v9659_v39  ;;  %v3777_v45 = vpop.permute.xlu0 %3776  ;;  %3698 = vrot.lane.b32.xlu1 %v9380_v19, %s5243_s28  ;;  %v9693_v57 = vmul.f32 %v4977_v16, %v3806_v14  ;;  %v9695_v51 = vmul.f32 %v4978_v21, %v3802_v48  ;;  %v4983_v48 = vld [vmem:[%s10631_s1 + $0x330] sm:$0xff]  ;;  %v4984_v14 = vld [vmem:[%s10631_s1 + $0x338] sm:$0xff] }
 0x75f   :  { %v3803_v60 = vsel %vm379_vm7, %v3777_v45, %v9341_v52  ;;  %v3807_v36 = vsel %vm379_vm7, %v9329_v12, %v3777_v45  ;;  %v4980_v45 = vld [vmem:[%s10631_s1 + $0x318] sm:$0xff] }
 0x760   :  { %11189 = vst [vmem:[#allocation66_spill] sm:$0xff] %v9693_v57  ;;  %11190 = vst [vmem:[#allocation57_spill] sm:$0xff] %v9695_v51  ;;  %v9697_v4 = vmul.f32 %v4981_v33, %v3807_v36  ;;  %v9699_v26 = vmul.f32 %v4982_v43, %v3803_v60  ;;  %3684 = vrot.lane.b32.xlu0 %v9372_v0, %s5243_s28  ;;  %v3791_v63 = vpop.permute.xlu1 %3790 }
 0x761   :  { %v3798_v16 = vsel %vm379_vm7, %v9337_v18, %v3791_v63  ;;  %v3810_v21 = vsel %vm379_vm7, %v3791_v63, %v9327_v6 }
 0x762   :  { %11191 = vst [vmem:[#allocation79_spill] sm:$0xff] %v9697_v4  ;;  %11192 = vst [vmem:[#allocation82_spill] sm:$0xff] %v9699_v26  ;;  %v3793_v43 = vpop.permute.xlu0 %3792  ;;  %3778 = vrot.lane.b32.xlu1 %v9358_v27, %s5244_s30  ;;  %v9733_v60 = vmul.f32 %v4979_v34, %v3798_v16  ;;  %v9735_v36 = vmul.f32 %v4980_v45, %v3810_v21  ;;  %v4039_v4 = vld [vmem:[%s10640_s10 + $0x8] sm:$0xff]  ;;  %v4041_v26 = vld [vmem:[%s10640_s10 + $0x18] sm:$0xff] }
 0x763   :  { %v3799_v6 = vsel %vm379_vm7, %v9341_v52, %v3793_v43  ;;  %v3811_v63 = vsel %vm379_vm7, %v3793_v43, %v9329_v12  ;;  %v5178_v52 = vld [vmem:[%s10639_s9 + $0x4] ss:$12 sps:$4 sm:$0xff]  }
 0x764   :  { %11193 = vst [vmem:[#allocation80_spill] sm:$0xff] %v9733_v60  ;;  %11194 = vst [vmem:[#allocation8_spill] sm:$0xff] %v9735_v36  ;;  %v9737_v33 = vmul.f32 %v4983_v48, %v3799_v6  ;;  %v9739_v57 = vmul.f32 %v4984_v14, %v3811_v63  ;;  %3700 = vrot.lane.b32.xlu0 %v9409_v55, %s5243_s28  ;;  %v9743_v18 = vpop.permute.xlu1 %3870  ;;  %4130 = vmatprep.mubr.bf16.mxu0 %v5178_v52  ;;  %v4038_v60 = vld [vmem:[%s10640_s10] sm:$0xff] }
 0x765   :  { %11197 = vst [vmem:[#allocation11_spill] sm:$0xff] %v9743_v18  ;;  %4236 = vmatprep.mubr.bf16.mxu1 %v5178_v52 }
 0x766   :  { %11195 = vst [vmem:[#allocation9_spill] sm:$0xff] %v9737_v33  ;;  %11196 = vst [vmem:[#allocation10_spill] sm:$0xff] %v9739_v57  ;;  %v9750_v34 = vpop.permute.xlu0 %3872  ;;  %3794 = vrot.lane.b32.xlu1 %v9380_v19, %s5244_s30  ;;  %v4040_v57 = vld [vmem:[%s10640_s10 + $0x10] sm:$0xff] }
 0x767   :  { %11198 = vst [vmem:[#allocation12_spill] sm:$0xff] %v9750_v34 }
 0x768   :  { %3780 = vrot.lane.b32.xlu0 %v9372_v0, %s5244_s30  ;;  %v9758_v16 = vpop.permute.xlu1 %3178 }
 0x76a   :  { %v9760_v21 = vpop.permute.xlu0 %3180  ;;  %3886 = vrot.lane.b32.xlu1 %v9148_v62, %s5245_s14 }
 0x76c   :  { %3796 = vrot.lane.b32.xlu0 %v9409_v55, %s5244_s30  ;;  %v9766_v48 = vpop.permute.xlu1 %3194 }
 0x76e   :  { %v9768_v14 = vpop.permute.xlu0 %3196  ;;  %3866 = vrot.lane.b32.xlu1 %v9226_v59, %s5245_s14  ;;  %v4915_v59 = vld [vmem:[%s10631_s1 + $0x110] sm:$0xff] }
 0x770   :  { %3868 = vrot.lane.b32.xlu0 %v9233_v47, %s5245_s14  ;;  %v9774_v43 = vpop.permute.xlu1 %3274  ;;  %v4897_v47 = vld [vmem:[%s10631_s1 + $0x80] sm:$0xff] }
 0x772   :  { %v9776_v6 = vpop.permute.xlu0 %3276  ;;  %3874 = vrot.lane.b32.xlu1 %v9358_v27, %s5245_s14 }
 0x774   :  { %3884 = vrot.lane.b32.xlu0 %v9247_v29, %s5245_s14  ;;  %v9782_v63 = vpop.permute.xlu1 %3290 }
 0x776   :  { %v9784_v52 = vpop.permute.xlu0 %3292  ;;  %3882 = vrot.lane.b32.xlu1 %v9240_v50, %s5245_s14  ;;  %v3315_v50 = vsel %vm121_vm2, %v9437_v37, %v9249_v11 }
 0x778   :  { %3876 = vrot.lane.b32.xlu0 %v9372_v0, %s5245_s14  ;;  %v9790_v12 = vpop.permute.xlu1 %3370  ;;  %v3407_v0 = vsel %vm171_vm3, %v9265_v5, %v9445_v35 }
 0x77a   :  { %v9792_v45 = vpop.permute.xlu0 %3372  ;;  %3890 = vrot.lane.b32.xlu1 %v9380_v19, %s5245_s14 }
 0x77c   :  { %3892 = vrot.lane.b32.xlu0 %v9409_v55, %s5245_s14  ;;  %v9801_v33 = vpop.permute.xlu1 %3386 }
 0x77e   :  { %v9806_v36 = vpop.permute.xlu0 %3388  ;;  %4044 = vperm.xlu1 %5153, %v4038_v60  }
 0x780   :  { %4049 = vperm.xlu0 %5152, %v4039_v4   ;;  %v9811_v51 = vpop.permute.xlu1 %3466 }
 0x782   :  { %v9816_v34 = vpop.permute.xlu0 %3468  ;;  %4054 = vperm.xlu1 %5153, %v4040_v57  }
 0x784   :  { %4059 = vperm.xlu0 %5152, %v4041_v26   ;;  %v9818_v18 = vpop.permute.xlu1 %3482 }
 0x786   :  { %v9820_v58 = vpop.permute.xlu0 %3484 }
 0x788   :  { %v9822_v60 = vpop.permute.xlu1 %3578 }
 0x789   :  { %11199 = vst [vmem:[#allocation13_spill] sm:$0xff] %v9822_v60  ;;  %v3307_v60 = vsel %vm121_vm2, %v9429_v15, %v9257_v40 }
 0x78a   :  { %v9824_v39 = vpop.permute.xlu0 %3580  ;;  %v9872_v29 = vmul.f32 %v4903_v3, %v3307_v60  ;;  %v4900_v60 = vld [vmem:[%s10631_s1 + $0x98] sm:$0xff] }
 0x78b   :  { %11200 = vst [vmem:[#allocation14_spill] sm:$0xff] %v9824_v39 }
 0x78c   :  { %v9826_v32 = vpop.permute.xlu1 %3594 }
 0x78d   :  { %11201 = vst [vmem:[#allocation15_spill] sm:$0xff] %v9826_v32 }
 0x78e   :  { %v9828_v4 = vpop.permute.xlu0 %3596 }
 0x78f   :  { %11202 = vst [vmem:[#allocation16_spill] sm:$0xff] %v9828_v4 }
 0x790   :  { %v9830_v2 = vpop.permute.xlu1 %3674 }
 0x791   :  { %11203 = vst [vmem:[#allocation17_spill] sm:$0xff] %v9830_v2  ;;  %v3306_v2 = vsel %vm121_vm2, %v9427_v28, %v9255_v46 }
 0x792   :  { %v9832_v41 = vpop.permute.xlu0 %3676 }
 0x793   :  { %11204 = vst [vmem:[#allocation18_spill] sm:$0xff] %v9832_v41  ;;  %v4902_v41 = vld [vmem:[%s10631_s1 + $0xa8] sm:$0xff] }
 0x794   :  { %v9834_v30 = vpop.permute.xlu1 %3690 }
 0x795   :  { %11205 = vst [vmem:[#allocation19_spill] sm:$0xff] %v9834_v30  ;;  %v4898_v30 = vld [vmem:[%s10631_s1 + $0x88] sm:$0xff] }
 0x796   :  { %v9836_v57 = vpop.permute.xlu0 %3692 }
 0x797   :  { %11206 = vst [vmem:[#allocation33_spill] sm:$0xff] %v9836_v57 }
 0x798   :  { %v9838_v26 = vpop.permute.xlu1 %3770 }
 0x799   :  { %11207 = vst [vmem:[#allocation34_spill] sm:$0xff] %v9838_v26  ;;  %v3311_v26 = vsel %vm121_vm2, %v9249_v11, %v9429_v15  ;;  %v3310_v15 = vsel %vm121_vm2, %v9244_v42, %v9427_v28  ;;  %v3314_v28 = vsel %vm121_vm2, %v9435_v54, %v9244_v42  ;;  %v3302_v11 = vsel %vm121_vm2, %v9255_v46, %v9435_v54  ;;  %v3235_v46 = vld [vmem:[%s10631_s1 + $0x68] sm:$0xff] }
 0x79a   :  { %v9840_v17 = vpop.permute.xlu0 %3772  ;;  %v9883_v4 = vmul.f32 %v4902_v41, %v3311_v26  ;;  %v9901_v26 = vmul.f32 %v4898_v30, %v3310_v15  ;;  %v9923_v15 = vmul.f32 %v4897_v47, %v3314_v28  ;;  %v3402_v47 = vsel %vm171_vm3, %v9443_v61, %v9271_v24 }
 0x79b   :  { %11208 = vst [vmem:[#allocation35_spill] sm:$0xff] %v9840_v17  ;;  %v4899_v17 = vld [vmem:[%s10631_s1 + $0x90] sm:$0xff] }
 0x79c   :  { %v9856_v57 = vpop.permute.xlu1 %3786  ;;  %v9892_v3 = vmul.f32 %v4899_v17, %v3306_v2  ;;  %v3303_v17 = vsel %vm121_vm2, %v9257_v40, %v9437_v37  ;;  %v3231_v2 = vld [vmem:[%s10631_s1 + $0x48] sm:$0xff]  ;;  %v3406_v40 = vsel %vm171_vm3, %v9263_v1, %v9443_v61  ;;  %v3230_v61 = vld [vmem:[%s10631_s1 + $0x40] sm:$0xff] }
 0x79d   :  { %11209 = vst [vmem:[#allocation36_spill] sm:$0xff] %v9856_v57  ;;  %v4901_v57 = vld [vmem:[%s10631_s1 + $0xa0] sm:$0xff] }
 0x79e   :  { %v9881_v39 = vpop.permute.xlu0 %3788  ;;  %v9910_v42 = vmul.f32 %v4901_v57, %v3315_v50  ;;  %v4914_v50 = vld [vmem:[%s10631_s1 + $0x108] sm:$0xff]  ;;  %v9932_v57 = vmul.f32 %v4900_v60, %v3302_v11  ;;  %v3236_v11 = vld [vmem:[%s10631_s1 + $0x70] sm:$0xff] }
 0x79f   :  { %11210 = vst [vmem:[#allocation83_spill] sm:$0xff] %v9881_v39  ;;  %v4904_v39 = vld [vmem:[%s10631_s1 + $0xb8] sm:$0xff] }
 0x7a0   :  { %v3187_v41 = vpop.permute.xlu1 %3186  ;;  %v9946_v32 = vmul.f32 %v4904_v39, %v3303_v17  ;;  %v9959_v39 = vmul.f32 %v4914_v50, %v3406_v40  ;;  %v3233_v17 = vld [vmem:[%s10631_s1 + $0x58] sm:$0xff]  ;;  %v9976_v40 = vmul.f32 %v4915_v59, %v3402_v47  ;;  %v4918_v47 = vld [vmem:[%s10631_s1 + $0x128] sm:$0xff] }
 0x7a1   :  { %v3216_v30 = vsel %vm72_vm1, %v9758_v16, %v3187_v41  ;;  %v3237_v50 = vld [vmem:[%s10631_s1 + $0x78] sm:$0xff] }
 0x7a2   :  { %v3189_v37 = vpop.permute.xlu0 %3188  ;;  %v3247_v60 = vmul.f32 %v3231_v2, %v3216_v30 }
 0x7a3   :  { %v3217_v28 = vsel %vm72_vm1, %v9760_v21, %v3189_v37  ;;  %v3213_v55 = vsel %vm72_vm1, %v3189_v37, %v9768_v14  ;;  %v4919_v37 = vld [vmem:[%s10631_s1 + $0x130] sm:$0xff] }
 0x7a4   :  { %v3251_v19 = vmul.f32 %v3235_v46, %v3217_v28  ;;  %v3203_v38 = vpop.permute.xlu1 %3202  ;;  %v3234_v46 = vld [vmem:[%s10631_s1 + $0x60] sm:$0xff]  ;;  %v3403_v28 = vsel %vm171_vm3, %v9445_v35, %v9273_v49  ;;  %v3252_v27 = vmul.f32 %v3236_v11, %v3213_v55  ;;  %v4906_v55 = vld [vmem:[%s10631_s1 + $0xc8] sm:$0xff] }
 0x7a5   :  { %v3208_v2 = vsel %vm72_vm1, %v9766_v48, %v3203_v38  ;;  %v3220_v30 = vsel %vm72_vm1, %v3203_v38, %v9758_v16  ;;  %v3232_v38 = vld [vmem:[%s10631_s1 + $0x50] sm:$0xff]  ;;  %v3212_v16 = vsel %vm72_vm1, %v3187_v41, %v9766_v48  ;;  %v10004_v44 = vmul.f32 %v4919_v37, %v3403_v28 }
 0x7a6   :  { %v3205_v54 = vpop.permute.xlu0 %3204  ;;  %v3259_v59 = vpack.c.bf16 %v3251_v19, %v3247_v60  ;;  %v3246_v41 = vmul.f32 %v3230_v61, %v3220_v30  ;;  %v3249_v19 = vmul.f32 %v3233_v17, %v3208_v2  ;;  %v3248_v23 = vmul.f32 %v3232_v38, %v3212_v16  ;;  %v4913_v2 = vld [vmem:[%s10631_s1 + $0x100] sm:$0xff] }
 0x7a7   :  { %v3209_v10 = vsel %vm72_vm1, %v9768_v14, %v3205_v54  ;;  %v3221_v48 = vsel %vm72_vm1, %v3205_v54, %v9760_v21  ;;  %v4910_v21 = vld [vmem:[%s10631_s1 + $0xe8] sm:$0xff]  ;;  %v10017_v14 = vmul.f32 %v4918_v47, %v3407_v0  ;;  %v3398_v54 = vsel %vm171_vm3, %v9271_v24, %v9451_v31  ;;  %v4909_v16 = vld [vmem:[%s10631_s1 + $0xe0] sm:$0xff]  ;;  %v4916_v47 = vld [vmem:[%s10631_s1 + $0x118] sm:$0xff] }
 0x7a8   :  { %v3250_v60 = vmul.f32 %v3234_v46, %v3221_v48  ;;  %v3253_v62 = vmul.f32 %v3237_v50, %v3209_v10  ;;  %4100 = vmatprep.subr.bf16.mxu0 %v3259_v59  ;;  %v3283_v8 = vpop.permute.xlu1 %3282  ;;  %v3353_v10 = vpack.c.bf16 %v9946_v32, %v9932_v57  ;;  %v3410_v30 = vsel %vm171_vm3, %v9451_v31, %v9263_v1  ;;  %v4911_v46 = vld [vmem:[%s10631_s1 + $0xf0] sm:$0xff]  ;;  %v4908_v50 = vld [vmem:[%s10631_s1 + $0xd8] sm:$0xff] }
 0x7a9   :  { %v3312_v35 = vsel %vm121_vm2, %v9774_v43, %v3283_v8  ;;  %v3399_v0 = vsel %vm171_vm3, %v9273_v49, %v9453_v7  ;;  %v3260_v32 = vpack.c.bf16 %v3252_v27, %v3248_v23  ;;  %v4905_v27 = vld [vmem:[%s10631_s1 + $0xc0] sm:$0xff]  ;;  %v3448_v23 = vpack.c.bf16 %v10004_v44, %v9976_v40  ;;  %v4912_v59 = vld [vmem:[%s10631_s1 + $0xf8] sm:$0xff] }
 0x7aa   :  { %v3258_v11 = vpack.c.bf16 %v3250_v60, %v3246_v41  ;;  %v3285_v61 = vpop.permute.xlu0 %3284  ;;  %v3261_v17 = vpack.c.bf16 %v3253_v62, %v3249_v19  ;;  %v4920_v62 = vld [vmem:[%s10631_s1 + $0x138] sm:$0xff]  ;;  %v3343_v57 = vmul.f32 %v4906_v55, %v3312_v35  ;;  %v11211_v38 = vpack.c.bf16 %v9883_v4, %v9901_v26  ;;  %v4907_v4 = vld [vmem:[%s10631_s1 + $0xd0] sm:$0xff]  ;;  %v4917_v60 = vld [vmem:[%s10631_s1 + $0x120] sm:$0xff] }
 0x7ab   :  { %v3313_v24 = vsel %vm121_vm2, %v9776_v6, %v3285_v61  ;;  %v3309_v1 = vsel %vm121_vm2, %v3285_v61, %v9784_v52  ;;  %v10072_v48 = vmul.f32 %v4913_v2, %v3410_v30  ;;  %v3308_v26 = vsel %vm121_vm2, %v3283_v8, %v9782_v63  ;;  %v4922_v30 = vld [vmem:[%s10631_s1 + $0x148] sm:$0xff] }
 0x7ac   :  { %v3347_v31 = vmul.f32 %v4910_v21, %v3313_v24  ;;  %4101 = vmatpush1.bf16.msra.mxu0 %v3258_v11  ;;  %4206 = vmatprep.subr.bf16.mxu1 %v3261_v17  ;;  %v3299_v49 = vpop.permute.xlu1 %3298  ;;  %v3437_v55 = vmul.f32 %v4920_v62, %v3399_v0  ;;  %v3348_v35 = vmul.f32 %v4911_v46, %v3309_v1  ;;  %v4934_v46 = vld [vmem:[%s10631_s1 + $0x1a8] sm:$0xff] }
 0x7ad   :  { %v3304_v37 = vsel %vm121_vm2, %v9782_v63, %v3299_v49  ;;  %v3316_v28 = vsel %vm121_vm2, %v3299_v49, %v9774_v43  ;;  %4102 = vmatprep.subr.bf16.mxu0 %v11211_v38  ;;  %4207 = vmatpush1.bf16.msra.mxu1 %v3260_v32  ;;  %v3411_v43 = vsel %vm171_vm3, %v9453_v7, %v9265_v5  ;;  %v4925_v38 = vld [vmem:[%s10631_s1 + $0x160] sm:$0xff] }
 0x7ae   :  { %v3301_v41 = vpop.permute.xlu0 %3300  ;;  %4208 = vmatprep.subr.bf16.mxu1 %v3353_v10  ;;  %v3355_v19 = vpack.c.bf16 %v3347_v31, %v3343_v57  ;;  %v3342_v21 = vmul.f32 %v4905_v27, %v3316_v28  ;;  %v3345_v11 = vmul.f32 %v4908_v50, %v3304_v37  ;;  %v11212_v10 = vpack.c.bf16 %v9910_v42, %v9923_v15  ;;  %v4926_v42 = vld [vmem:[%s10631_s1 + $0x168] sm:$0xff]  ;;  %v4921_v31 = vld [vmem:[%s10631_s1 + $0x140] sm:$0xff]  ;;  %v4924_v50 = vld [vmem:[%s10631_s1 + $0x158] sm:$0xff] }
 0x7af   :  { %v3305_v5 = vsel %vm121_vm2, %v9784_v52, %v3301_v41  ;;  %v3317_v7 = vsel %vm121_vm2, %v3301_v41, %v9776_v6  ;;  %v3433_v17 = vmul.f32 %v4916_v47, %v3398_v54  ;;  %v3344_v2 = vmul.f32 %v4907_v4, %v3308_v26  ;;  %v4923_v47 = vld [vmem:[%s10631_s1 + $0x150] sm:$0xff] }
 0x7b0   :  { %v3346_v8 = vmul.f32 %v4909_v16, %v3317_v7  ;;  %v3349_v63 = vmul.f32 %v4912_v59, %v3305_v5  ;;  %4103 = vmatpush1.bf16.msra.mxu0 %v11212_v10  ;;  %v3379_v61 = vpop.permute.xlu1 %3378  ;;  %v11213_v6 = vpack.c.bf16 %v9872_v29, %v9892_v3  ;;  %v3434_v15 = vmul.f32 %v4917_v60, %v3411_v43  ;;  %v4930_v59 = vld [vmem:[%s10631_s1 + $0x188] sm:$0xff] }
 0x7b1   :  { %v3408_v52 = vsel %vm171_vm3, %v9790_v12, %v3379_v61  ;;  %4104 = vmatprep.subr.bf16.mxu0 %v3355_v19  ;;  %v3447_v24 = vpack.c.bf16 %v10017_v14, %v9959_v39  ;;  %v3503_v62 = vsel %vm221_vm4, %v9281_v25, %v9461_v22  ;;  %v3356_v57 = vpack.c.bf16 %v3348_v35, %v3344_v2  ;;  %v4927_v39 = vld [vmem:[%s10631_s1 + $0x170] sm:$0xff] }
 0x7b2   :  { %4209 = vmatpush1.bf16.msra.mxu1 %v11213_v6  ;;  %v3354_v54 = vpack.c.bf16 %v3346_v8, %v3342_v21  ;;  %v3381_v0 = vpop.permute.xlu0 %3380  ;;  %v3357_v32 = vpack.c.bf16 %v3349_v63, %v3345_v11  ;;  %v3449_v3 = vpack.c.bf16 %v3437_v55, %v3433_v17  ;;  %v3439_v1 = vmul.f32 %v4922_v30, %v3408_v52  ;;  %v4942_v11 = vld [vmem:[%s10631_s1 + $0x1e8] sm:$0xff]  ;;  %v4931_v8 = vld [vmem:[%s10631_s1 + $0x190] sm:$0xff] }
 0x7b3   :  { %v3409_v29 = vsel %vm171_vm3, %v9792_v45, %v3381_v0  ;;  %v3405_v14 = vsel %vm171_vm3, %v3381_v0, %v9806_v36  ;;  %v3502_v49 = vsel %vm221_vm4, %v9279_v13, %v9459_v53  ;;  %v4928_v13 = vld [vmem:[%s10631_s1 + $0x178] sm:$0xff]  ;;  %v3446_v16 = vpack.c.bf16 %v3434_v15, %v10072_v48  ;;  %v4943_v52 = vld [vmem:[%s10631_s1 + $0x1f0] sm:$0xff] }
 0x7b4   :  { %v3443_v25 = vmul.f32 %v4926_v42, %v3409_v29  ;;  %4105 = vmatpush1.bf16.msra.mxu0 %v3354_v54  ;;  %4210 = vmatprep.subr.bf16.mxu1 %v3357_v32  ;;  %v3395_v27 = vpop.permute.xlu1 %3394  ;;  %v3404_v43 = vsel %vm171_vm3, %v3379_v61, %v9801_v33  ;;  %v3531_v26 = vmul.f32 %v4934_v46, %v3503_v62  ;;  %v4940_v54 = vld [vmem:[%s10631_s1 + $0x1d8] sm:$0xff] }
 0x7b5   :  { %v3400_v37 = vsel %vm171_vm3, %v9801_v33, %v3395_v27  ;;  %v3412_v28 = vsel %vm171_vm3, %v3395_v27, %v9790_v12  ;;  %4106 = vmatprep.subr.bf16.mxu0 %v3447_v24  ;;  %v3499_v12 = vsel %vm221_vm4, %v9461_v22, %v9289_v20  ;;  %v3444_v41 = vmul.f32 %v4927_v39, %v3405_v14  ;;  %v4935_v22 = vld [vmem:[%s10631_s1 + $0x1b0] sm:$0xff]  ;;  %v4941_v24 = vld [vmem:[%s10631_s1 + $0x1e0] sm:$0xff]  ;;  %v4944_v62 = vld [vmem:[%s10631_s1 + $0x1f8] sm:$0xff] }
 0x7b6   :  { %4211 = vmatpush1.bf16.msra.mxu1 %v3356_v57  ;;  %v3397_v4 = vpop.permute.xlu0 %3396  ;;  %v3451_v48 = vpack.c.bf16 %v3443_v25, %v3439_v1  ;;  %v3438_v60 = vmul.f32 %v4921_v31, %v3412_v28  ;;  %v3441_v55 = vmul.f32 %v4924_v50, %v3400_v37  ;;  %v3527_v7 = vmul.f32 %v4930_v59, %v3502_v49  ;;  %v4939_v57 = vld [vmem:[%s10631_s1 + $0x1d0] sm:$0xff]  ;;  %v11215_v46 = vld [vmem:[#allocation31_spill] sm:$0xff]  ;;  %v11217_v28 = vld [vmem:[#allocation44_spill] sm:$0xff] }
 0x7b7   :  { %4212 = vmatprep.subr.bf16.mxu1 %v3449_v3  ;;  %v3401_v19 = vsel %vm171_vm3, %v9806_v36, %v3397_v4  ;;  %v3413_v20 = vsel %vm171_vm3, %v3397_v4, %v9792_v45  ;;  %v3440_v21 = vmul.f32 %v4923_v47, %v3404_v43  ;;  %v4938_v36 = vld [vmem:[%s10631_s1 + $0x1c8] sm:$0xff]  ;;  %v3498_v63 = vsel %vm221_vm4, %v9459_v53, %v9287_v56  ;;  %v4937_v53 = vld [vmem:[%s10631_s1 + $0x1c0] sm:$0xff] }
 0x7b8   :  { %v3442_v33 = vmul.f32 %v4925_v38, %v3413_v20  ;;  %v3445_v35 = vmul.f32 %v4928_v13, %v3401_v19  ;;  %4107 = vmatpush1.bf16.msra.mxu0 %v3446_v16  ;;  %v3475_v5 = vpop.permute.xlu1 %3474  ;;  %v3532_v2 = vmul.f32 %v4935_v22, %v3499_v12  ;;  %v3543_v40 = vpack.c.bf16 %v3531_v26, %v3527_v7  ;;  %v11218_v38 = vld [vmem:[#allocation60_spill] sm:$0xff]  ;;  %v11220_v4 = vld [vmem:[#allocation43_spill] sm:$0xff]  ;;  %v11223_v19 = vld [vmem:[#allocation69_spill] sm:$0xff] }
 0x7b9   :  { %v3504_v45 = vsel %vm221_vm4, %v9811_v51, %v3475_v5  ;;  %4108 = vmatprep.subr.bf16.mxu0 %v3451_v48  ;;  %v3452_v30 = vpack.c.bf16 %v3444_v41, %v3440_v21  ;;  %v3528_v15 = vmul.f32 %v4931_v8, %v3498_v63  ;;  %v3500_v29 = vsel %vm221_vm4, %v3475_v5, %v9818_v18  ;;  %v11222_v41 = vld [vmem:[#allocation26_spill] sm:$0xff]  ;;  %v11227_v5 = vld [vmem:[#allocation67_spill] sm:$0xff]  ;;  %v11232_v63 = vld [vmem:[#allocation25_spill] sm:$0xff] }
 0x7ba   :  { %4213 = vmatpush1.bf16.msra.mxu1 %v3448_v23  ;;  %v3450_v10 = vpack.c.bf16 %v3442_v33, %v3438_v60  ;;  %v3477_v61 = vpop.permute.xlu0 %3476  ;;  %v3453_v17 = vpack.c.bf16 %v3445_v35, %v3441_v55  ;;  %v3535_v23 = vmul.f32 %v4938_v36, %v3504_v45  ;;  %v11219_v13 = vpack.c.bf16 %v11217_v28, %v11218_v38  ;;  %v11224_v60 = vld [vmem:[#allocation48_spill] sm:$0xff]  ;;  %v11225_v55 = vld [vmem:[#allocation23_spill] sm:$0xff]  ;;  %v11244_v28 = vld [vmem:[#allocation49_spill] sm:$0xff] }
 0x7bb   :  { %v3505_v44 = vsel %vm221_vm4, %v9816_v34, %v3477_v61  ;;  %v3501_v6 = vsel %vm221_vm4, %v3477_v61, %v9820_v58  ;;  %v3544_v14 = vpack.c.bf16 %v3532_v2, %v3528_v15  ;;  %v3536_v59 = vmul.f32 %v4939_v57, %v3500_v29  ;;  %v11226_v35 = vld [vmem:[#allocation68_spill] sm:$0xff]  ;;  %v11231_v8 = vld [vmem:[#allocation59_spill] sm:$0xff] }
 0x7bc   :  { %v3539_v56 = vmul.f32 %v4942_v11, %v3505_v44  ;;  %4109 = vmatpush1.bf16.msra.mxu0 %v3450_v10  ;;  %4214 = vmatprep.subr.bf16.mxu1 %v3453_v17  ;;  %v3491_v42 = vpop.permute.xlu1 %3490  ;;  %v3540_v25 = vmul.f32 %v4943_v52, %v3501_v6  ;;  %v3561_v20 = vpack.c.bf16 %v11223_v19, %v11222_v41  ;;  %v11228_v36 = vld [vmem:[#allocation64_spill] sm:$0xff]  ;;  %v11233_v17 = vld [vmem:[#allocation15_spill] sm:$0xff]  ;;  %v11247_v19 = vld [vmem:[#allocation73_spill] sm:$0xff] }
 0x7bd   :  { %v3496_v0 = vsel %vm221_vm4, %v9818_v18, %v3491_v42  ;;  %v3508_v32 = vsel %vm221_vm4, %v3491_v42, %v9811_v51  ;;  %4110 = vmatprep.subr.bf16.mxu0 %v3543_v40  ;;  %v11214_v51 = vld [vmem:[#allocation29_spill] sm:$0xff]  ;;  %v3563_v33 = vpack.c.bf16 %v11225_v55, %v11224_v60  ;;  %v3560_v7 = vpack.c.bf16 %v11227_v5, %v11226_v35  ;;  %v11229_v45 = vld [vmem:[#allocation24_spill] sm:$0xff]  ;;  %v11234_v40 = vld [vmem:[#allocation47_spill] sm:$0xff] }
 0x7be   :  { %4215 = vmatpush1.bf16.msra.mxu1 %v3452_v30  ;;  %v3493_v3 = vpop.permute.xlu0 %3492  ;;  %v11216_v1 = vpack.c.bf16 %v11214_v51, %v11215_v46  ;;  %v3547_v39 = vpack.c.bf16 %v3539_v56, %v3535_v23  ;;  %v3534_v49 = vmul.f32 %v4937_v53, %v3508_v32  ;;  %v3537_v50 = vmul.f32 %v4940_v54, %v3496_v0  ;;  %v4954_v61 = vld [vmem:[%s10631_s1 + $0x248] sm:$0xff]  ;;  %v11235_v23 = vld [vmem:[#allocation70_spill] sm:$0xff]  ;;  %v4957_v6 = vld [vmem:[%s10631_s1 + $0x260] sm:$0xff] }
 0x7bf   :  { %v3497_v31 = vsel %vm221_vm4, %v9820_v58, %v3493_v3  ;;  %v3509_v27 = vsel %vm221_vm4, %v3493_v3, %v9816_v34  ;;  %v3548_v43 = vpack.c.bf16 %v3540_v25, %v3536_v59  ;;  %v11221_v34 = vld [vmem:[#allocation46_spill] sm:$0xff]  ;;  %v11230_v11 = vpack.c.bf16 %v11228_v36, %v11229_v45  ;;  %v4958_v30 = vld [vmem:[%s10631_s1 + $0x268] sm:$0xff]  ;;  %v11251_v5 = vld [vmem:[#allocation71_spill] sm:$0xff] }
 0x7c0   :  { %4216 = vmatprep.subr.bf16.mxu1 %v11216_v1  ;;  %v3538_v37 = vmul.f32 %v4941_v24, %v3509_v27  ;;  %v3541_v18 = vmul.f32 %v4944_v62, %v3497_v31  ;;  %4111 = vmatpush1.bf16.msra.mxu0 %v11219_v13  ;;  %v10235_v16 = vpop.permute.xlu1 %3878  ;;  %v3559_v48 = vpack.c.bf16 %v11221_v34, %v11220_v4  ;;  %v11236_v56 = vld [vmem:[#allocation16_spill] sm:$0xff]  ;;  %v11237_v42 = vld [vmem:[#allocation14_spill] sm:$0xff]  ;;  %v11238_v54 = vld [vmem:[#allocation61_spill] sm:$0xff] }
 0x7c1   :  { %4112 = vmatprep.subr.bf16.mxu0 %v3547_v39  ;;  %v3565_v10 = vpack.c.bf16 %v11232_v63, %v11231_v8  ;;  %v3562_v52 = vpack.c.bf16 %v11235_v23, %v11234_v40  ;;  %v11239_v0 = vld [vmem:[#allocation62_spill] sm:$0xff]  ;;  %v4953_v24 = vld [vmem:[%s10631_s1 + $0x240] sm:$0xff]  ;;  %v11240_v62 = vld [vmem:[#allocation13_spill] sm:$0xff] }
 0x7c2   :  { %4217 = vmatpush1.bf16.msra.mxu1 %v3544_v14  ;;  %v3546_v12 = vpack.c.bf16 %v3538_v37, %v3534_v49  ;;  %v10237_v47 = vpop.permute.xlu0 %3880  ;;  %v3549_v58 = vpack.c.bf16 %v3541_v18, %v3537_v50  ;;  %v3564_v32 = vpack.c.bf16 %v11239_v0, %v11238_v54  ;;  %v4955_v3 = vld [vmem:[%s10631_s1 + $0x250] sm:$0xff]  ;;  %v4956_v1 = vld [vmem:[%s10631_s1 + $0x258] sm:$0xff]  ;;  %v11245_v38 = vld [vmem:[#allocation72_spill] sm:$0xff] }
 0x7c3   :  { %v11241_v25 = vld [vmem:[#allocation45_spill] sm:$0xff]  ;;  %v11242_v31 = vld [vmem:[#allocation27_spill] sm:$0xff]  ;;  %v11246_v13 = vpack.c.bf16 %v11244_v28, %v11245_v38  ;;  %v11257_v0 = vld [vmem:[#allocation78_spill] sm:$0xff] }
 0x7c4   :  { %4113 = vmatpush1.bf16.msra.mxu0 %v3546_v12  ;;  %4218 = vmatprep.subr.bf16.mxu1 %v3549_v58  ;;  %v3587_v26 = vpop.permute.xlu1 %3586  ;;  %v11243_v27 = vpack.c.bf16 %v11241_v25, %v11242_v31  ;;  %v4959_v49 = vld [vmem:[%s10631_s1 + $0x270] sm:$0xff]  ;;  %v4960_v50 = vld [vmem:[%s10631_s1 + $0x278] sm:$0xff]  ;;  %v4970_v55 = vld [vmem:[%s10631_s1 + $0x2c8] sm:$0xff] }
 0x7c5   :  { %4114 = vmatprep.subr.bf16.mxu0 %v3559_v48  ;;  %v3612_v2 = vsel %vm279_vm5, %v3587_v26, %v11233_v17  ;;  %v3616_v57 = vsel %vm279_vm5, %v11240_v62, %v3587_v26  ;;  %v4974_v36 = vld [vmem:[%s10631_s1 + $0x2e8] sm:$0xff]  ;;  %v4969_v23 = vld [vmem:[%s10631_s1 + $0x2c0] sm:$0xff] }
 0x7c6   :  { %4219 = vmatpush1.bf16.msra.mxu1 %v3548_v43  ;;  %v10243_v22 = vpop.permute.xlu0 %3888  ;;  %v3647_v29 = vmul.f32 %v4954_v61, %v3612_v2  ;;  %v3646_v12 = vmul.f32 %v4953_v24, %v3616_v57  ;;  %v11255_v2 = vld [vmem:[#allocation33_spill] sm:$0xff]  ;;  %v4976_v57 = vld [vmem:[%s10631_s1 + $0x2f8] sm:$0xff] }
 0x7c7   :  { %4220 = vmatprep.subr.bf16.mxu1 %v3561_v20  ;;  %v11248_v20 = vld [vmem:[#allocation65_spill] sm:$0xff] }
 0x7c8   :  { %v3603_v21 = vpop.permute.xlu1 %3602  ;;  %4115 = vmatpush1.bf16.msra.mxu0 %v11230_v11  ;;  %v11249_v60 = vpack.c.bf16 %v11247_v19, %v11248_v20  ;;  %v11271_v19 = vld [vmem:[#allocation28_spill] sm:$0xff] }
 0x7c9   :  { %4116 = vmatprep.subr.bf16.mxu0 %v3563_v33  ;;  %v3608_v39 = vsel %vm279_vm5, %v11233_v17, %v3603_v21  ;;  %v3620_v14 = vsel %vm279_vm5, %v3603_v21, %v11240_v62  ;;  %v11250_v33 = vld [vmem:[#allocation19_spill] sm:$0xff]  ;;  %v4975_v62 = vld [vmem:[%s10631_s1 + $0x2f0] sm:$0xff]  ;;  %v11272_v20 = vld [vmem:[#allocation76_spill] sm:$0xff] }
 0x7ca   :  { %4221 = vmatpush1.bf16.msra.mxu1 %v3560_v7  ;;  %v3589_v44 = vpop.permute.xlu0 %3588  ;;  %v3648_v4 = vmul.f32 %v4955_v3, %v3608_v39  ;;  %v3649_v34 = vmul.f32 %v4956_v1, %v3620_v14  ;;  %v11252_v7 = vld [vmem:[#allocation74_spill] sm:$0xff]  ;;  %v4973_v17 = vld [vmem:[%s10631_s1 + $0x2e0] sm:$0xff] }
 0x7cb   :  { %4222 = vmatprep.subr.bf16.mxu1 %v3565_v10  ;;  %v3613_v53 = vsel %vm279_vm5, %v3589_v44, %v11236_v56  ;;  %v3617_v15 = vsel %vm279_vm5, %v11237_v42, %v3589_v44  ;;  %v11253_v21 = vpack.c.bf16 %v11251_v5, %v11252_v7  ;;  %v11254_v10 = vld [vmem:[#allocation17_spill] sm:$0xff]  ;;  %v11256_v44 = vld [vmem:[#allocation18_spill] sm:$0xff] }
 0x7cc   :  { %v3651_v51 = vmul.f32 %v4958_v30, %v3613_v53  ;;  %v3683_v46 = vpop.permute.xlu1 %3682  ;;  %4117 = vmatpush1.bf16.msra.mxu0 %v3562_v52  ;;  %v3650_v37 = vmul.f32 %v4957_v6, %v3617_v15  ;;  %v4971_v6 = vld [vmem:[%s10631_s1 + $0x2d0] sm:$0xff]  ;;  %v4972_v15 = vld [vmem:[%s10631_s1 + $0x2d8] sm:$0xff] }
 0x7cd   :  { %4118 = vmatprep.subr.bf16.mxu0 %v11243_v27  ;;  %v3708_v35 = vsel %vm329_vm6, %v3683_v46, %v11250_v33  ;;  %v3712_v61 = vsel %vm329_vm6, %v11254_v10, %v3683_v46  ;;  %v11261_v46 = vld [vmem:[#allocation63_spill] sm:$0xff] }
 0x7ce   :  { %4223 = vmatpush1.bf16.msra.mxu1 %v3564_v32  ;;  %v3605_v18 = vpop.permute.xlu0 %3604  ;;  %v3659_v59 = vpack.c.bf16 %v3651_v51, %v3647_v29  ;;  %v3658_v45 = vpack.c.bf16 %v3650_v37, %v3646_v12  ;;  %v3743_v52 = vmul.f32 %v4970_v55, %v3708_v35  ;;  %v11258_v32 = vld [vmem:[#allocation77_spill] sm:$0xff]  ;;  %v3742_v14 = vmul.f32 %v4969_v23, %v3712_v61  ;;  %v11263_v37 = vld [vmem:[#allocation36_spill] sm:$0xff]  ;;  %v11275_v61 = vld [vmem:[#allocation83_spill] sm:$0xff] }
 0x7cf   :  { %4224 = vmatprep.subr.bf16.mxu1 %v11246_v13  ;;  %v3609_v58 = vsel %vm279_vm5, %v11236_v56, %v3605_v18  ;;  %v3621_v43 = vsel %vm279_vm5, %v3605_v18, %v11237_v42  ;;  %v11259_v24 = vpack.c.bf16 %v11257_v0, %v11258_v32  ;;  %v11260_v51 = vld [vmem:[#allocation81_spill] sm:$0xff]  ;;  %v11265_v12 = vld [vmem:[#allocation32_spill] sm:$0xff]  ;;  %v11277_v0 = vld [vmem:[#allocation82_spill] sm:$0xff] }
 0x7d0   :  { %v3652_v48 = vmul.f32 %v4959_v49, %v3609_v58  ;;  %v3653_v26 = vmul.f32 %v4960_v50, %v3621_v43  ;;  %v3699_v41 = vpop.permute.xlu1 %3698  ;;  %4119 = vmatpush1.bf16.msra.mxu0 %v11249_v60  ;;  %v11262_v1 = vpack.c.bf16 %v11260_v51, %v11261_v46  ;;  %v4986_v50 = vld [vmem:[%s10631_s1 + $0x348] sm:$0xff]  ;;  %v11267_v43 = vld [vmem:[#allocation11_spill] sm:$0xff]  ;;  %v11273_v60 = vpack.c.bf16 %v11271_v19, %v11272_v20 }
 0x7d1   :  { %4120 = vmatprep.subr.bf16.mxu0 %v3659_v59  ;;  %v3704_v56 = vsel %vm329_vm6, %v11250_v33, %v3699_v41  ;;  %v3716_v54 = vsel %vm329_vm6, %v3699_v41, %v11254_v10  ;;  %v11264_v59 = vld [vmem:[#allocation75_spill] sm:$0xff]  ;;  %v4990_v55 = vld [vmem:[%s10631_s1 + $0x368] sm:$0xff] }
 0x7d2   :  { %4225 = vmatpush1.bf16.msra.mxu1 %v11253_v21  ;;  %v3660_v11 = vpack.c.bf16 %v3652_v48, %v3648_v4  ;;  %v3685_v8 = vpop.permute.xlu0 %3684  ;;  %v3661_v63 = vpack.c.bf16 %v3653_v26, %v3649_v34  ;;  %v3744_v25 = vmul.f32 %v4971_v6, %v3704_v56  ;;  %v3745_v49 = vmul.f32 %v4972_v15, %v3716_v54  ;;  %v11268_v4 = vld [vmem:[#allocation40_spill] sm:$0xff]  ;;  %v11270_v26 = vld [vmem:[#allocation42_spill] sm:$0xff]  ;;  %v11278_v32 = vld [vmem:[#allocation57_spill] sm:$0xff] }
 0x7d3   :  { %v3709_v30 = vsel %vm329_vm6, %v3685_v8, %v11255_v2  ;;  %v3713_v40 = vsel %vm329_vm6, %v11256_v44, %v3685_v8  ;;  %v11266_v58 = vpack.c.bf16 %v11264_v59, %v11265_v12  ;;  %v10385_v34 = vsel %vm429_vm8, %v11268_v4, %v11267_v43  ;;  %v11269_v48 = vld [vmem:[#allocation12_spill] sm:$0xff]  ;;  %v4996_v15 = vld [vmem:[%s10631_s1 + $0x398] sm:$0xff] }
 0x7d4   :  { %v3747_v53 = vmul.f32 %v4974_v36, %v3709_v30  ;;  %4226 = vmatprep.subr.bf16.mxu1 %v3661_v63  ;;  %v3779_v42 = vpop.permute.xlu1 %3778  ;;  %4121 = vmatpush1.bf16.msra.mxu0 %v3658_v45  ;;  %v3746_v29 = vmul.f32 %v4973_v17, %v3713_v40  ;;  %v3903_v41 = vsel %vm429_vm8, %v11270_v26, %v11269_v48  ;;  %v4998_v33 = vld [vmem:[%s10631_s1 + $0x3a8] sm:$0xff]  ;;  %v4985_v45 = vld [vmem:[%s10631_s1 + $0x340] sm:$0xff]  ;;  %v4988_v40 = vld [vmem:[%s10631_s1 + $0x358] sm:$0xff] }
 0x7d5   :  { %4122 = vmatprep.subr.bf16.mxu0 %v11259_v24  ;;  %v3804_v18 = vsel %vm379_vm7, %v3779_v42, %v11263_v37  ;;  %v3899_v35 = vsel %vm429_vm8, %v11269_v48, %v10237_v47  ;;  %v4989_v10 = vld [vmem:[%s10631_s1 + $0x360] sm:$0xff]  ;;  %v11279_v24 = vpack.c.bf16 %v11277_v0, %v11278_v32  ;;  %v3907_v51 = vsel %vm429_vm8, %v10243_v22, %v11270_v26  ;;  %v11284_v48 = vld [vmem:[#allocation66_spill] sm:$0xff] }
 0x7d6   :  { %4227 = vmatpush1.bf16.msra.mxu1 %v3660_v11  ;;  %v3701_v3 = vpop.permute.xlu0 %3700  ;;  %v3755_v39 = vpack.c.bf16 %v3747_v53, %v3743_v52  ;;  %v3754_v5 = vpack.c.bf16 %v3746_v29, %v3742_v14  ;;  %v11274_v11 = vld [vmem:[#allocation34_spill] sm:$0xff]  ;;  %v3839_v63 = vmul.f32 %v4986_v50, %v3804_v18  ;;  %v3898_v53 = vsel %vm429_vm8, %v11267_v43, %v10235_v16  ;;  %v4997_v29 = vld [vmem:[%s10631_s1 + $0x3a0] sm:$0xff] }
 0x7d7   :  { %4228 = vmatprep.subr.bf16.mxu1 %v11262_v1  ;;  %v3705_v31 = vsel %vm329_vm6, %v11255_v2, %v3701_v3  ;;  %v3717_v27 = vsel %vm329_vm6, %v3701_v3, %v11256_v44  ;;  %v3808_v8 = vsel %vm379_vm7, %v11274_v11, %v3779_v42  ;;  %v11276_v2 = vld [vmem:[#allocation35_spill] sm:$0xff]  ;;  %v4987_v44 = vld [vmem:[%s10631_s1 + $0x350] sm:$0xff]  ;;  %v3931_v42 = vmul.f32 %v4998_v33, %v3899_v35  ;;  %v4994_v3 = vld [vmem:[%s10631_s1 + $0x388] sm:$0xff] }
 0x7d8   :  { %v3748_v28 = vmul.f32 %v4975_v62, %v3705_v31  ;;  %v3749_v38 = vmul.f32 %v4976_v57, %v3717_v27  ;;  %v3795_v13 = vpop.permute.xlu1 %3794  ;;  %4123 = vmatpush1.bf16.msra.mxu0 %v11266_v58  ;;  %v4991_v62 = vld [vmem:[%s10631_s1 + $0x370] sm:$0xff]  ;;  %v4992_v57 = vld [vmem:[%s10631_s1 + $0x378] sm:$0xff]  ;;  %v3838_v46 = vmul.f32 %v4985_v45, %v3808_v8  ;;  %v4993_v19 = vld [vmem:[%s10631_s1 + $0x380] sm:$0xff]  ;;  %v3930_v20 = vmul.f32 %v4997_v29, %v3903_v41 }
 0x7d9   :  { %4124 = vmatprep.subr.bf16.mxu0 %v3755_v39  ;;  %v3800_v23 = vsel %vm379_vm7, %v11263_v37, %v3795_v13  ;;  %v3812_v52 = vsel %vm379_vm7, %v3795_v13, %v11274_v11  ;;  %v11280_v14 = vld [vmem:[#allocation10_spill] sm:$0xff]  ;;  %v11287_v33 = vld [vmem:[#allocation80_spill] sm:$0xff] }
 0x7da   :  { %4229 = vmatpush1.bf16.msra.mxu1 %v11273_v60  ;;  %v3756_v7 = vpack.c.bf16 %v3748_v28, %v3744_v25  ;;  %v3781_v21 = vpop.permute.xlu0 %3780  ;;  %v3757_v36 = vpack.c.bf16 %v3749_v38, %v3745_v49  ;;  %v11281_v25 = vld [vmem:[#allocation8_spill] sm:$0xff]  ;;  %v5000_v49 = vld [vmem:[%s10631_s1 + $0x3b8] sm:$0xff]  ;;  %v3840_v50 = vmul.f32 %v4987_v44, %v3800_v23  ;;  %v3841_v37 = vmul.f32 %v4988_v40, %v3812_v52  ;;  %v4995_v38 = vld [vmem:[%s10631_s1 + $0x390] sm:$0xff] }
 0x7db   :  { %v3805_v17 = vsel %vm379_vm7, %v3781_v21, %v11275_v61  ;;  %v3809_v30 = vsel %vm379_vm7, %v11276_v2, %v3781_v21  ;;  %v11282_v31 = vpack.c.bf16 %v11280_v14, %v11281_v25  ;;  %v3927_v60 = vmul.f32 %v4994_v3, %v3898_v53  ;;  %v5002_v52 = vld [vmem:[%s10631_s1 + $0x3c8] sm:$0xff]  ;;  %v5181_v0 = vld [vmem:[%s10639_s9 + $0x18] ss:$12 sps:$4 sm:$0xff]   ;;  %v5003_v29 = vld [vmem:[%s10631_s1 + $0x3d0] sm:$0xff] }
 0x7dc   :  { %v3843_v6 = vmul.f32 %v4990_v55, %v3805_v17  ;;  %4230 = vmatprep.subr.bf16.mxu1 %v3757_v36  ;;  %v3887_v56 = vpop.permute.xlu1 %3886  ;;  %4125 = vmatpush1.bf16.msra.mxu0 %v3754_v5  ;;  %v3842_v1 = vmul.f32 %v4989_v10, %v3809_v30  ;;  %v3895_v55 = vsel %vm429_vm8, %v10237_v47, %v10243_v22  ;;  %v4999_v5 = vld [vmem:[%s10631_s1 + $0x3b0] sm:$0xff]  ;;  %v5176_v47 = vld [vmem:[%s10639_s9] ss:$12 sps:$4 sm:$0xff]   ;;  %v5179_v17 = vld [vmem:[%s10639_s9 + $0x1c] ss:$12 sps:$4 sm:$0xff]  }
 0x7dd   :  { %v3906_v54 = vsel %vm429_vm8, %v3887_v56, %v11268_v4  ;;  %4126 = vmatprep.subr.bf16.mxu0 %v11279_v24  ;;  %v3894_v13 = vsel %vm429_vm8, %v10235_v16, %v3887_v56  ;;  %v11283_v4 = vld [vmem:[#allocation79_spill] sm:$0xff]  ;;  %v11286_v16 = vld [vmem:[#allocation9_spill] sm:$0xff]  ;;  %v3943_v8 = vpack.c.bf16 %v3931_v42, %v3927_v60  ;;  %v3926_v22 = vmul.f32 %v4993_v19, %v10385_v34 }
 0x7de   :  { %4231 = vmatpush1.bf16.msra.mxu1 %v3756_v7  ;;  %v3797_v39 = vpop.permute.xlu0 %3796  ;;  %v3851_v27 = vpack.c.bf16 %v3843_v6, %v3839_v63  ;;  %v3929_v59 = vmul.f32 %v4996_v15, %v3906_v54  ;;  %v11285_v26 = vpack.c.bf16 %v11283_v4, %v11284_v48  ;;  %v11288_v35 = vpack.c.bf16 %v11286_v16, %v11287_v33  ;;  %v5001_v34 = vld [vmem:[%s10631_s1 + $0x3c0] sm:$0xff]  ;;  %v5006_v53 = vld [vmem:[%s10631_s1 + $0x3e8] sm:$0xff]  ;;  %v5008_v14 = vld [vmem:[%s10631_s1 + $0x3f8] sm:$0xff] }
 0x7df   :  { %4232 = vmatprep.subr.bf16.mxu1 %v11282_v31  ;;  %v3801_v18 = vsel %vm379_vm7, %v11275_v61, %v3797_v39  ;;  %v3813_v28 = vsel %vm379_vm7, %v3797_v39, %v11276_v2  ;;  %v3933_v7 = vmul.f32 %v5000_v49, %v3907_v51  ;;  %v3850_v21 = vpack.c.bf16 %v3842_v1, %v3838_v46  ;;  %v5005_v56 = vld [vmem:[%s10631_s1 + $0x3e0] sm:$0xff]  ;;  %v5004_v51 = vld [vmem:[%s10631_s1 + $0x3d8] sm:$0xff]  ;;  %v5007_v39 = vld [vmem:[%s10631_s1 + $0x3f0] sm:$0xff] }
 0x7e0   :  { %v3844_v12 = vmul.f32 %v4991_v62, %v3801_v18  ;;  %v3845_v58 = vmul.f32 %v4992_v57, %v3813_v28  ;;  %v3867_v43 = vpop.permute.xlu1 %3866  ;;  %4127 = vmatpush1.bf16.msra.mxu0 %v11285_v26  ;;  %v3928_v11 = vmul.f32 %v4995_v38, %v3894_v13  ;;  %v3932_v61 = vmul.f32 %v4999_v5, %v3895_v55  ;;  %v4390_v26 = vld [vmem:[%s10632_s2] sm:$0xf] }
 0x7e1   :  { %4128 = vmatprep.subr.bf16.mxu0 %v3851_v27  ;;  %v3945_v10 = vpack.c.bf16 %v3933_v7, %v3929_v59  ;;  %v3942_v2 = vpack.c.bf16 %v3930_v20, %v3926_v22  ;;  %v11289_v13 = vmov 0  }
 0x7e2   :  { %4233 = vmatpush1.bf16.msra.mxu1 %v11288_v35  ;;  %v3852_v36 = vpack.c.bf16 %v3844_v12, %v3840_v50  ;;  %v3869_v45 = vpop.permute.xlu0 %3868  ;;  %v3853_v41 = vpack.c.bf16 %v3845_v58, %v3841_v37  ;;  %v3944_v44 = vpack.c.bf16 %v3932_v61, %v3928_v11  ;;  %v5182_v58 = vld [vmem:[%s10639_s9 + $0x8] ss:$12 sps:$4 sm:$0xff]  }
 0x7e4   :  { %4234 = vmatprep.subr.bf16.mxu1 %v3853_v41  ;;  %v3875_v63 = vpop.permute.xlu1 %3874  ;;  %4129 = vmatpush1.bf16.msra.mxu0 %v3850_v21 }
 0x7e5   :  { %4151 = vmatprep.subr.bf16.mxu0 %v3943_v8  ;;  %v3904_v23 = vsel %vm429_vm8, %v3867_v43, %v3875_v63 }
 0x7e6   :  { %4235 = vmatpush1.bf16.msra.mxu1 %v3852_v36  ;;  %v3885_v30 = vpop.permute.xlu0 %3884  ;;  %v3934_v32 = vmul.f32 %v5001_v34, %v3904_v23 }
 0x7e7   :  { %4257 = vmatprep.subr.bf16.mxu1 %v3945_v10  ;;  %4131 = vmatmul.mubr.bf16.vlgmr.msra.gmra.mrb[24].mxu0 %v5176_v47 }
 0x7e8   :  { %v3883_v40 = vpop.permute.xlu1 %3882  ;;  %4152 = vmatpush1.bf16.msra.mxu0 %v3942_v2  ;;  %4140 = vmatprep.mubr.bf16.mxu0 %v5179_v17 }
 0x7e9   :  { %4237 = vmatmul.mubr.bf16.vlgmr.msra.gmra.mrb[24].mxu1 %v5176_v47  ;;  %v3900_v6 = vsel %vm429_vm8, %v3875_v63, %v3883_v40 }
 0x7ea   :  { %4258 = vmatpush1.bf16.msra.mxu1 %v3944_v44  ;;  %v3877_v42 = vpop.permute.xlu0 %3876  ;;  %4246 = vmatprep.mubr.bf16.mxu1 %v5179_v17  ;;  %v3935_v24 = vmul.f32 %v5002_v52, %v3900_v6  ;;  %v11291_v52 = vld [vmem:[#allocation20_spill] sm:$0xff] }
 0x7eb   :  { %v3901_v15 = vsel %vm429_vm8, %v3877_v42, %v3885_v30  ;;  %v3905_v54 = vsel %vm429_vm8, %v3869_v45, %v3877_v42 }
 0x7ec   :  { %v3938_v62 = vmul.f32 %v5005_v56, %v3905_v54  ;;  %v3939_v57 = vmul.f32 %v5006_v53, %v3901_v15  ;;  %v3891_v3 = vpop.permute.xlu1 %3890  ;;  %v11292_v15 = vld [vmem:[#allocation22_spill] sm:$0xff] }
 0x7ed   :  { %v3896_v46 = vsel %vm429_vm8, %v3883_v40, %v3891_v3  ;;  %v3908_v1 = vsel %vm429_vm8, %v3891_v3, %v3867_v43  ;;  %v11290_v43 = vlaneseq  ;;  %v11294_v3 = vld [vmem:[#allocation50_spill] sm:$0xff] }
 0x7ee   :  { %v3946_v25 = vpack.c.bf16 %v3938_v62, %v3934_v32  ;;  %v3893_v31 = vpop.permute.xlu0 %3892  ;;  %v3947_v27 = vpack.c.bf16 %v3939_v57, %v3935_v24  ;;  %v3936_v49 = vmul.f32 %v5003_v29, %v3896_v46  ;;  %v3937_v18 = vmul.f32 %v5004_v51, %v3908_v1  ;;  %v11295_v46 = vld [vmem:[#allocation21_spill] sm:$0xff] }
 0x7ef   :  { %v3897_v50 = vsel %vm429_vm8, %v3885_v30, %v3893_v31  ;;  %v3909_v37 = vsel %vm429_vm8, %v3893_v31, %v3869_v45  ;;  %4141 = vmatmul.mubr.bf16.gmra.mrb[28].mxu0 %v5181_v0  ;;  %v4393_v4 = vshrl.u32 %v11290_v43, 7 }
 0x7f0   :  { %v3940_v28 = vmul.f32 %v5007_v39, %v3897_v50  ;;  %v3941_v38 = vmul.f32 %v5008_v14, %v3909_v37  ;;  %4153 = vmatprep.subr.bf16.mxu0 %v3947_v27  ;;  %4183 = vmatprep.mubr.bf16.mxu0 %v11289_v13  ;;  %v11296_v27 = vld [vmem:[#allocation37_spill] sm:$0xff]  ;;  %v11297_v50 = vld [vmem:[#allocation51_spill] sm:$0xff] }
 0x7f1   :  { %4247 = vmatmul.mubr.bf16.gmra.mrb[28].mxu1 %v5181_v0  ;;  %4154 = vmatpush1.bf16.msra.mxu0 %v3946_v25  ;;  %v4394_v48 = vsub.s32 0, %v4393_v4  ;;  %v4398_v19 = vsub.s32 1, %v4393_v4  ;;  %v4402_v20 = vsub.s32 2, %v4393_v4  ;;  %v4406_v55 = vsub.s32 3, %v4393_v4  ;;  %v11293_v0 = vld [vmem:[#allocation52_spill] sm:$0xff] }
 0x7f2   :  { %v3948_v59 = vpack.c.bf16 %v3940_v28, %v3936_v49  ;;  %v3949_v12 = vpack.c.bf16 %v3941_v38, %v3937_v18  ;;  %4289 = vmatprep.mubr.bf16.mxu1 %v11289_v13 }
 0x7f3   :  { %v10562_v5 = vrot.slane %v4390_v26, %v4394_v48  ;;  %v10564_v45 = vrot.slane %v4390_v26, %v4398_v19  ;;  %v10566_v11 = vrot.slane %v4390_v26, %v4402_v20  ;;  %v10568_v61 = vrot.slane %v4390_v26, %v4406_v55 }
 0x7f4   :  { %4259 = vmatprep.subr.bf16.mxu1 %v3949_v12 }
 0x7f5   :  { %4260 = vmatpush1.bf16.msra.mxu1 %v3948_v59 }
 0x7f7   :  { %5015 = vmatmul.mubr.msk.bf16.vlgmr.msra.gmra.mrb[24].mxu0 %vm1624_vm9, %v5182_v58 }
 0x7f8   :  { %4193 = vmatprep.mubr.bf16.mxu0 %v11289_v13 }
 0x7f9   :  { %5017 = vmatmul.mubr.msk.bf16.vlgmr.msra.gmra.mrb[24].mxu1 %vm1624_vm9, %v5182_v58 }
 0x7fa   :  { %4299 = vmatprep.mubr.bf16.mxu1 %v11289_v13  ;;  %v11298_v13 = vld [vmem:[#allocation53_spill] sm:$0xff] }
 0x7fd   :  { %v4045_v60 = vpop.permute.xlu1 %4044 }
 0x7ff   :  { %5016 = vmatmul.mubr.msk.bf16.gmra.mrb[28].mxu0 %vm1624_vm9, %v5183_v9  ;;  %v4050_v16 = vpop.permute.xlu0 %4049 }
 0x801   :  { %5018 = vmatmul.mubr.msk.bf16.gmra.mrb[28].mxu1 %vm1624_vm9, %v5183_v9  ;;  %v4055_v57 = vpop.permute.xlu1 %4054 }
 0x803   :  { %v4060_v14 = vpop.permute.xlu0 %4059 }
 0x8ca   :  { %v4185_v33 = vpop.f32.mrb[24].mxu0 }
 0x8cb   :  { %v5075_v35 = vadd.f32 %v4185_v33, %v4045_v60  ;;  %v4187_v7 = vpop.f32.mrb[25].mxu0 }
 0x8cc   :  { %v4291_v21 = vpop.f32.mrb[24].mxu1  ;;  %v5076_v36 = vadd.f32 %v4187_v7, %v4045_v60  ;;  %v4189_v8 = vpop.f32.mrb[26].mxu0 }
 0x8cd   :  { %v5083_v41 = vadd.f32 %v4291_v21, %v4045_v60  ;;  %v4293_v47 = vpop.f32.mrb[25].mxu1  ;;  %v4310_v22 = vmax.f32 %v5075_v35, 0.0  ;;  %v5077_v63 = vadd.f32 %v4189_v8, %v4050_v16  ;;  %v4191_v17 = vpop.f32.mrb[27].mxu0 }
 0x8ce   :  { %v5084_v10 = vadd.f32 %v4293_v47, %v4045_v60  ;;  %v4295_v2 = vpop.f32.mrb[26].mxu1  ;;  %v4311_v30 = vmax.f32 %v5076_v36, 0.0  ;;  %v5078_v34 = vadd.f32 %v4191_v17, %v4050_v16 }
 0x8cf   :  { %v4312_v44 = vmax.f32 %v5083_v41, 0.0  ;;  %v5085_v40 = vadd.f32 %v4295_v2, %v4050_v16  ;;  %v4297_v23 = vpop.f32.mrb[27].mxu1  ;;  %v4342_v6 = vadd.f32 %v4310_v22, %v11291_v52  ;;  %v4314_v56 = vmax.f32 %v5077_v63, 0.0  ;;  %v11299_v22 = vld [vmem:[#allocation38_spill] sm:$0xff] }
 0x8d0   :  { %v4313_v53 = vmax.f32 %v5084_v10, 0.0  ;;  %v5086_v42 = vadd.f32 %v4297_v23, %v4050_v16  ;;  %v4343_v54 = vadd.f32 %v4311_v30, %v11292_v15  ;;  %v4315_v24 = vmax.f32 %v5078_v34, 0.0  ;;  %v11300_v30 = vld [vmem:[#allocation30_spill] sm:$0xff]  ;;  %v11301_v34 = vld [vmem:[#allocation39_spill] sm:$0xff] }
 0x8d1   :  { %v4344_v32 = vadd.f32 %v4312_v44, %v11293_v0  ;;  %v4316_v62 = vmax.f32 %v5085_v40, 0.0  ;;  %v4412_v29 = vmul.f32 %v10562_v5, %v4342_v6  ;;  %v4346_v51 = vadd.f32 %v4314_v56, %v11294_v3  ;;  %v11302_v56 = vld [vmem:[#allocation54_spill] sm:$0xff] }
 0x8d2   :  { %v4345_v1 = vadd.f32 %v4313_v53, %v11295_v46  ;;  %v4317_v39 = vmax.f32 %v5086_v42, 0.0  ;;  %v4413_v25 = vmul.f32 %v10564_v45, %v4343_v54  ;;  %v4347_v49 = vadd.f32 %v4315_v24, %v11296_v27  ;;  %v4195_v18 = vpop.f32.mrb[28].mxu0  ;;  %v11303_v42 = vld [vmem:[#allocation56_spill] sm:$0xff]  ;;  %v11304_v24 = vld [vmem:[#allocation58_spill] sm:$0xff] }
 0x8d3   :  { %v4414_v31 = vmul.f32 %v10566_v11, %v4344_v32  ;;  %v4348_v37 = vadd.f32 %v4316_v62, %v11297_v50  ;;  %v4416_v28 = vmul.f32 %v10562_v5, %v4346_v51  ;;  %v5079_v12 = vadd.f32 %v4195_v18, %v4055_v57  ;;  %v4197_v58 = vpop.f32.mrb[29].mxu0 }
 0x8d4   :  { %v4415_v38 = vmul.f32 %v10568_v61, %v4345_v1  ;;  %v4349_v59 = vadd.f32 %v4317_v39, %v11298_v13  ;;  %v4301_v9 = vpop.f32.mrb[28].mxu1  ;;  %v4417_v43 = vmul.f32 %v10564_v45, %v4347_v49  ;;  %v5080_v48 = vadd.f32 %v4197_v58, %v4055_v57  ;;  %v4199_v19 = vpop.f32.mrb[30].mxu0  ;;  %v11306_v1 = vld [vmem:[#allocation55_spill] sm:$0xff] }
 0x8d5   :  { %v4418_v4 = vmul.f32 %v10566_v11, %v4348_v37  ;;  %v5087_v26 = vadd.f32 %v4301_v9, %v4055_v57  ;;  %v4303_v20 = vpop.f32.mrb[29].mxu1  ;;  %v4318_v55 = vmax.f32 %v5079_v12, 0.0  ;;  %v5081_v16 = vadd.f32 %v4199_v19, %v4060_v14  ;;  %v4201_v35 = vpop.f32.mrb[31].mxu0 }
 0x8d6   :  { %v4419_v60 = vmul.f32 %v10568_v61, %v4349_v59  ;;  %v5088_v33 = vadd.f32 %v4303_v20, %v4055_v57  ;;  %v4305_v7 = vpop.f32.mrb[30].mxu1  ;;  %v4319_v21 = vmax.f32 %v5080_v48, 0.0  ;;  %v5082_v41 = vadd.f32 %v4201_v35, %v4060_v14  ;;  %v11305_v57 = vld [vmem:[#allocation41_spill] sm:$0xff] }
 0x8d7   :  { %v4320_v36 = vmax.f32 %v5087_v26, 0.0  ;;  %v5089_v8 = vadd.f32 %v4305_v7, %v4060_v14  ;;  %v4307_v47 = vpop.f32.mrb[31].mxu1  ;;  %v4350_v63 = vadd.f32 %v4318_v55, %v11299_v22  ;;  %v4322_v10 = vmax.f32 %v5081_v16, 0.0 }
 0x8d8   :  { %v4321_v17 = vmax.f32 %v5088_v33, 0.0  ;;  %v5090_v2 = vadd.f32 %v4307_v47, %v4060_v14  ;;  %v4351_v44 = vadd.f32 %v4319_v21, %v11300_v30  ;;  %v4323_v23 = vmax.f32 %v5082_v41, 0.0  ;;  %v5019_v21 = vld [vmem:[%s10642_s12] ss:$0 sm:$0xff] }
 0x8d9   :  { %v4352_v40 = vadd.f32 %v4320_v36, %v11301_v34  ;;  %v4324_v52 = vmax.f32 %v5089_v8, 0.0  ;;  %v4420_v6 = vmul.f32 %v10562_v5, %v4350_v63  ;;  %v4354_v53 = vadd.f32 %v4322_v10, %v11302_v56 }
 0x8da   :  { %v4353_v15 = vadd.f32 %v4321_v17, %v11303_v42  ;;  %v4325_v54 = vmax.f32 %v5090_v2, 0.0  ;;  %v4421_v0 = vmul.f32 %v10564_v45, %v4351_v44  ;;  %v4355_v62 = vadd.f32 %v4323_v23, %v11304_v24 }
 0x8db   :  { %v4422_v32 = vmul.f32 %v10566_v11, %v4352_v40  ;;  %v4356_v3 = vadd.f32 %v4324_v52, %v11305_v57  ;;  %v4424_v51 = vmul.f32 %v10562_v5, %v4354_v53  ;;  %v4428_v14 = vadd.f32 %v4413_v25, %v4412_v29 }
 0x8dc   :  { %v4423_v46 = vmul.f32 %v10568_v61, %v4353_v15  ;;  %v4357_v39 = vadd.f32 %v4325_v54, %v11306_v1  ;;  %v4425_v27 = vmul.f32 %v10564_v45, %v4355_v62  ;;  %v4440_v50 = vadd.f32 %v4415_v38, %v4414_v31  ;;  %v4457_v45 = vld [vmem:[%s10641_s11] sm:$0xff]  ;;  %v4460_v31 = vld [vmem:[%s10641_s11 + $0x18] sm:$0xff] }
 0x8dd   :  { %v4426_v49 = vmul.f32 %v10566_v11, %v4356_v3  ;;  %v4443_v37 = vadd.f32 %v4419_v60, %v4418_v4  ;;  %4429 = vadd.xlane.f32.xlu1 %v4428_v14  ;;  %v4431_v13 = vadd.f32 %v4417_v43, %v4416_v28  ;;  %v4434_v59 = vadd.f32 %v4421_v0, %v4420_v6  ;;  %v4458_v11 = vld [vmem:[%s10641_s11 + $0x8] sm:$0xff] }
 0x8de   :  { %v4427_v18 = vmul.f32 %v10568_v61, %v4357_v39  ;;  %v4446_v12 = vadd.f32 %v4423_v46, %v4422_v32  ;;  %4441 = vadd.xlane.f32.xlu0 %v4440_v50  ;;  %v4437_v58 = vadd.f32 %v4425_v27, %v4424_v51  ;;  %v4459_v61 = vld [vmem:[%s10641_s11 + $0x10] sm:$0xff]  ;;  %v5247_v29 = vmov 0.0|0.0  }
 0x8df   :  { %5037 = vmatprep.subr.bf16.mxu0 %v5247_v29  ;;  %v5038_v25 = vpack.c.bf16 %v4458_v11, %v4457_v45  ;;  %v5249_v28 = vmov 0.0   ;;  %v5041_v38 = vpack.c.bf16 %v4460_v31, %v4459_v61 }
 0x8e0   :  { %v4449_v5 = vadd.f32 %v4427_v18, %v4426_v49  ;;  %5034 = vmatprep.mubr.msk.f32.mxu0 %vm5248_vm10, %v5249_v28 }
 0x8e1   :  { %4444 = vadd.xlane.f32.xlu1 %v4443_v37  ;;  %5039 = vmatpush3.bf16.msra.mxu0 %v5038_v25 }
 0x8e2   :  { %4432 = vadd.xlane.f32.xlu0 %v4431_v13  ;;  %5040 = vmatprep.subr.bf16.mxu0 %v5247_v29 }
 0x8e5   :  { %4447 = vadd.xlane.f32.xlu1 %v4446_v12  ;;  %5042 = vmatpush3.bf16.msra.mxu0 %v5041_v38 }
 0x8e6   :  { %4435 = vadd.xlane.f32.xlu0 %v4434_v59 }
 0x8e9   :  { %4450 = vadd.xlane.f32.xlu1 %v4449_v5 }
 0x8ea   :  { %4438 = vadd.xlane.f32.xlu0 %v4437_v58 }
 0x96a   :  { %v4430_v9 = vpop.xlane.xlu1 %4429 }
 0x96b   :  { %v4442_v43 = vpop.xlane.xlu0 %4441 }
 0x96c   :  { %v4453_v4 = vsel %vm4452_vm11, %v4430_v9, %v4442_v43 }
 0x96d   :  { %4468 = vxpose.xlu0.b32.start [1/4] (short) (narrow) %v4453_v4, 8 }
 0x96e   :  { %v4445_v48 = vpop.xlane.xlu1 %4444 }
 0x96f   :  { %v4433_v26 = vpop.xlane.xlu0 %4432 }
 0x970   :  { %v4454_v19 = vsel %vm4452_vm11, %v4433_v26, %v4445_v48 }
 0x971   :  { %4469 = vxpose.xlu0.b32.cont [2/4] (short) (narrow) %v4454_v19, 8 }
 0x972   :  { %v4448_v20 = vpop.xlane.xlu1 %4447 }
 0x973   :  { %v4436_v60 = vpop.xlane.xlu0 %4435 }
 0x974   :  { %v4455_v55 = vsel %vm4452_vm11, %v4436_v60, %v4448_v20 }
 0x975   :  { %4470 = vxpose.xlu0.b32.cont [3/4] (short) (narrow) %v4455_v55, 8 }
 0x976   :  { %v4451_v16 = vpop.xlane.xlu1 %4450 }
 0x977   :  { %v4439_v33 = vpop.xlane.xlu0 %4438 }
 0x978   :  { %v4456_v35 = vsel %vm4452_vm11, %v4439_v33, %v4451_v16 }
 0x979   :  { %4471 = vxpose.xlu0.b32.end [4/4] (short) (narrow) %v4456_v35, 8 }
 0x9ed   :  { %v4484_v7 = vpop.trf.xlu0 }
 0x9ee   :  { %5035 = vmatmul.mubr.msk.f32.vlgmr.msra.gmra.mrb[32].mxu0 %vm1624_vm9, %v4484_v7 }
 0xac1   :  { %v4569_v36 = vpop.f32.mrb[32].mxu0 }
 0xac2   :  { %v4570_v41 = vadd.f32 %v5019_v21, %v4569_v36  ;;  %v5036_v8 = vpop.f32.mrb[33].mxu0 }
 0xac4   :  { %4574 = vst.msk [vmem:[#allocation5] sm:$0x3] %vm4573_vm12, %v4570_v41 }
 0xac5   :  { %5225 = shalt.err (!%p5222_p4)
}
 0xac6   :  { %s5226_s18 = scalar_lea.hbm %s10643_s13, 32 }
 0xac7   :  { %p5227_p5 = scmp.ne.s32.totalorder %s10643_s13, %s5226_s18  ;;  %p5230_p6 = scmp.lt.u32.totalorder %s5226_s18, %s10643_s13 }
 0xac9   :  { %p5232_p7 = pnand %p5230_p6, %p5227_p5 }
 0xacb   :  { %5235 = shalt.err (!%p5232_p7)
}
 0xacc   :  { %4584 = dma.vmem_to_hbm [thread:$0]  %s4582_s0, 32, %s10643_s13, [#allocation6]  }
 0xacd   :  { %5236 = dma.done.wait [#allocation6], 32  }
 0xace   :  { %5237 = vsyncadd [#allocation6], 4294967264 }
 0xacf   :  { %4588 = vsyncpa [#allocation6], 1 }

</bundles_post_ra>
